<compile_context>
chip_gen: v7x
topology: tpu7x:2x2x1
jax: 0.10.0
libtpu: 0.0.40
codegen_flags: <defaults>
</compile_context>

<pallas_src>
import functools

import numpy as np
import jax
import jax.numpy as jnp
from jax.experimental import pallas as pl
from jax.experimental.pallas import tpu as pltpu


# ------------------------------ Pallas kernel -------------------------------

def _fire_kernel(x_ref, wsq_ref, we1_ref, we3_ref, mask_ref, out_ref,
                 s_pad_ref, *, W, E1, pad, compute_dtype):
    # x_ref:    (tm, Cin)        flattened NHWC pixels of whole images
    # wsq_ref:  (Cin, Sq)        squeeze 1x1 weights
    # we1_ref:  (Sq, E1)         expand1x1 weights
    # we3_ref:  (9, Sq, E3)      expand3x3 weights, tap index = kh*3 + kw
    # mask_ref: (9, tm, 1)       per-tap validity mask (image-border handling)
    # out_ref:  (tm, E1+E3)      fused [expand1x1 | expand3x3] output
    # s_pad_ref:(tm+2*pad, Sq)   VMEM scratch: zero border + squeezed rows
    tm = x_ref.shape[0]
    Sq = wsq_ref.shape[1]
    E3 = we3_ref.shape[2]
    cd = compute_dtype

    # squeeze 1x1 + ReLU (stays in registers / VMEM)
    s = jnp.maximum(
        jnp.dot(x_ref[...].astype(cd), wsq_ref[...].astype(cd),
                preferred_element_type=jnp.float32),
        0.0)

    # expand1x1 + ReLU
    e1 = jnp.maximum(
        jnp.dot(s.astype(cd), we1_ref[...].astype(cd),
                preferred_element_type=jnp.float32),
        0.0)

    # Stage s into a zero-bordered VMEM scratch so each tap of the 3x3 conv is
    # a plain static row-offset slice (no HBM traffic, no im2col buffer).
    s_pad_ref[0:pad, :] = jnp.zeros((pad, Sq), jnp.float32)
    s_pad_ref[pad + tm:pad + tm + pad, :] = jnp.zeros((pad, Sq), jnp.float32)
    s_pad_ref[pad:pad + tm, :] = s

    # expand3x3 (padding=1) + ReLU as 9 shifted & masked matmuls, accumulated
    # in f32 registers. Masks zero taps that fall outside the image (left /
    # right / top / bottom borders and image-to-image boundaries inside tm).
    acc = jnp.zeros((tm, E3), jnp.float32)
    for kh in range(3):
        for kw in range(3):
            k = kh * 3 + kw
            off = (kh - 1) * W + (kw - 1)
            if off == 0:
                a = s                                    # center tap: no shift
            else:
                a = s_pad_ref[pad + off:pad + off + tm, :]
                a = a * mask_ref[k]                      # (tm,Sq) * (tm,1)
            acc = acc + jnp.dot(a.astype(cd), we3_ref[k].astype(cd),
                                preferred_element_type=jnp.float32)
    e3 = jnp.maximum(acc, 0.0)

    # Single full-block store of the fused [e1 | e3] output (in-kernel concat,
    # avoids two masked partial stores at sub-128-lane offsets).
    out_ref[...] = jnp.concatenate([e1, e3], axis=-1).astype(out_ref.dtype)


# -------------------------------- Fire module --------------------------------

def fire_forward(x_nchw, wsq, we1, we3_hwio, *, compute_dtype=jnp.float32):
    """Fire forward pass.

    x_nchw:   (N, Cin, H, W)   float32 (PyTorch NCHW convention)
    wsq:      (Cin, Sq)        squeeze 1x1 weights
    we1:      (Sq, E1)         expand1x1 weights
    we3_hwio: (3, 3, Sq, E3)   expand3x3 weights (HWIO)
    returns:  (N, E1+E3, H, W) float32, matching torch.cat([e1, e3], dim=1)
    """
    N, Cin, H, W = x_nchw.shape
    Sq = wsq.shape[1]
    E1 = we1.shape[1]
    E3 = we3_hwio.shape[3]
    Eo = E1 + E3

    rows_per_img = H * W
    M = N * rows_per_img

    # Tiles are whole images (so 3x3 taps never need data from another tile).
    # Pick the smallest divisor of N giving >= 512 rows per step (amortizes
    # ~0.35us/step overhead and reaches the mem-bound roofline knee); fall
    # back to all images in one step.
    imgs_per_block = N
    for d in range(1, N + 1):
        rows = d * rows_per_img
        if N % d == 0 and rows % 8 == 0 and rows >= 512:
            imgs_per_block = d
            break
    tm = imgs_per_block * rows_per_img
    grid_m = N // imgs_per_block
    pad = W + 1                                   # max |row shift| of a 3x3 tap

    # ---- glue: NCHW -> NHWC -> flat rows (channels last for the MXU) ----
    # TODO(synk): if the producer/consumer can work in NHWC, drop the two
    # transposes below (each is a full extra HBM pass on a memory-bound op).
    x_flat = jnp.transpose(x_nchw, (0, 2, 3, 1)).reshape(M, Cin)
    we3 = we3_hwio.reshape(9, Sq, E3)             # tap order (kh, kw)

    # Per-tap validity masks (compile-time constants; avoid in-kernel div/mod).
    hh, ww = np.meshgrid(np.arange(H), np.arange(W), indexing="ij")
    mask_list = []
    for kh in range(3):
        for kw in range(3):
            dh, dw = kh - 1, kw - 1
            valid = ((hh + dh >= 0) & (hh + dh < H) &
                     (ww + dw >= 0) & (ww + dw < W))
            mask_list.append(np.tile(valid.reshape(rows_per_img).astype(np.float32),
                                     imgs_per_block))
    masks = jnp.asarray(np.stack(mask_list, 0)[:, :, None])   # (9, tm, 1)

    flops = 2 * M * Sq * (Cin + E1 + 9 * E3)
    bytes_accessed = 4 * (M * Cin + M * Eo + 9 * tm
                          + Sq * (Cin + E1 + 9 * E3))

    kernel = functools.partial(_fire_kernel, W=W, E1=E1, pad=pad,
                               compute_dtype=compute_dtype)

    out_flat = pl.pallas_call(
        kernel,
        out_shape=jax.ShapeDtypeStruct((M, Eo), jnp.float32),
        grid=(grid_m,),
        in_specs=[
            pl.BlockSpec((tm, Cin), lambda i: (i, 0)),
            pl.BlockSpec((Cin, Sq), lambda i: (0, 0)),
            pl.BlockSpec((Sq, E1), lambda i: (0, 0)),
            pl.BlockSpec((9, Sq, E3), lambda i: (0, 0, 0)),
            pl.BlockSpec((9, tm, 1), lambda i: (0, 0, 0)),
        ],
        out_specs=pl.BlockSpec((tm, Eo), lambda i: (i, 0)),
        scratch_shapes=[pltpu.VMEM((tm + 2 * pad, Sq), jnp.float32)],
        compiler_params=pltpu.CompilerParams(
            dimension_semantics=("parallel",)),
        cost_estimate=pl.CostEstimate(
            flops=flops, transcendentals=0, bytes_accessed=bytes_accessed),
    )(x_flat, wsq, we1, we3, masks)

    # ---- glue: fused NHWC output back to NCHW (PyTorch semantics) ----
    out_nhwc = out_flat.reshape(N, H, W, Eo)
    return jnp.transpose(out_nhwc, (0, 3, 1, 2))


# ----------------------------------- main ------------------------------------

if __name__ == "__main__":
    # Fire(inplanes=4, squeeze_planes=8, expand1x1_planes=8, expand3x3_planes=8)
    N, Cin, H, W = 2, 4, 16, 16
    Sq, E1, E3 = 8, 8, 8

    key = jax.random.PRNGKey(0)
    k_x, k_sq, k_e1, k_e3 = jax.random.split(key, 4)

    x_nchw = jax.random.normal(k_x, (N, Cin, H, W), dtype=jnp.float32)

    # Parameters in the PyTorch module's OIHW layout (bias-free, like the spec).
    f_sq = jax.random.normal(k_sq, (Sq, Cin, 1, 1), dtype=jnp.float32)
    f_e1 = jax.random.normal(k_e1, (E1, Sq, 1, 1), dtype=jnp.float32)
    f_e3 = jax.random.normal(k_e3, (E3, Sq, 3, 3), dtype=jnp.float32)

    # Kernel layouts: 1x1 OIHW -> (Cin, Cout); 3x3 OIHW -> HWIO.
    wsq = jnp.transpose(f_sq[:, :, 0, 0], (1, 0))            # (Cin, Sq)
    we1 = jnp.transpose(f_e1[:, :, 0, 0], (1, 0))            # (Sq, E1)
    we3_hwio = jnp.transpose(f_e3, (2, 3, 1, 0))             # (3, 3, Sq, E3)

    out = jax.block_until_ready(fire_forward(x_nchw, wsq, we1, we3_hwio))
    assert out.shape == (N, E1 + E3, H, W), out.shape

    # Reference: plain JAX convs (NHWC / HWIO), same math as the PyTorch Fire.
    x_nhwc = jnp.transpose(x_nchw, (0, 2, 3, 1))
    dn = ("NHWC", "HWIO", "NHWC")
    s_ref = jax.nn.relu(jax.lax.conv_general_dilated(
        x_nhwc, wsq[None, None], (1, 1), "VALID", dimension_numbers=dn))
    e1_ref = jax.nn.relu(jax.lax.conv_general_dilated(
        s_ref, we1[None, None], (1, 1), "VALID", dimension_numbers=dn))
    e3_ref = jax.nn.relu(jax.lax.conv_general_dilated(
        s_ref, we3_hwio, (1, 1), ((1, 1), (1, 1)), dimension_numbers=dn))
    ref = jnp.transpose(jnp.concatenate([e1_ref, e3_ref], axis=-1),
                        (0, 3, 1, 2))

    assert jnp.allclose(out, ref, atol=1e-4, rtol=1e-4), "mismatch vs reference"
    print("KERNEL_OK")
</pallas_src>

<mosaic_0001>
module attributes {stable_mosaic.version = 11 : i64} {
  func.func @_fire_kernel(%arg0: i32, %arg1: memref<512x4xf32, #tpu.memory_space<vmem>>, %arg2: memref<4x8xf32, #tpu.memory_space<vmem>>, %arg3: memref<8x8xf32, #tpu.memory_space<vmem>>, %arg4: memref<9x8x8xf32, #tpu.memory_space<vmem>>, %arg5: memref<9x512x1xf32, #tpu.memory_space<vmem>>, %arg6: memref<512x16xf32, #tpu.memory_space<vmem>>, %arg7: memref<546x8xf32, #tpu.memory_space<vmem>>) attributes {dimension_semantics = [#tpu.dimension_semantics<parallel>], iteration_bounds = array<i64: 1>, scalar_prefetch = 0 : i64, scratch_operands = 1 : i64, tpu.core_type = #tpu.core_type<tc>, window_params = [{transform_indices = @transform_0, window_bounds = array<i64: 512, 4>}, {pipeline_mode = #tpu.pipeline_mode<synchronous>, transform_indices = @transform_1, window_bounds = array<i64: 4, 8>}, {pipeline_mode = #tpu.pipeline_mode<synchronous>, transform_indices = @transform_2, window_bounds = array<i64: 8, 8>}, {pipeline_mode = #tpu.pipeline_mode<synchronous>, transform_indices = @transform_3, window_bounds = array<i64: 9, 8, 8>}, {pipeline_mode = #tpu.pipeline_mode<synchronous>, transform_indices = @transform_4, window_bounds = array<i64: 9, 512, 1>}, {transform_indices = @transform_5, window_bounds = array<i64: 512, 16>}]} {
    %c0 = arith.constant 0 : index
    %c0_0 = arith.constant 0 : index
    %0 = vector.load %arg1[%c0, %c0_0] : memref<512x4xf32, #tpu.memory_space<vmem>>, vector<512x4xf32>
    %c0_1 = arith.constant 0 : index
    %c0_2 = arith.constant 0 : index
    %1 = vector.load %arg2[%c0_1, %c0_2] : memref<4x8xf32, #tpu.memory_space<vmem>>, vector<4x8xf32>
    %cst = arith.constant dense<0.000000e+00> : vector<512x8xf32>
    %2 = tpu.matmul %0, %1, %cst {dimension_numbers = #tpu.dot_dimension_numbers<[1], [0], [0], [1], [0, 0, 1, 1], [], []>} : vector<512x4xf32>, vector<4x8xf32>, vector<512x8xf32> -> vector<512x8xf32>
    %cst_3 = arith.constant 0.000000e+00 : f32
    %3 = vector.broadcast %cst_3 : f32 to vector<512x8xf32>
    %4 = arith.maximumf %2, %3 : vector<512x8xf32>
    %c0_4 = arith.constant 0 : index
    %c0_5 = arith.constant 0 : index
    %5 = vector.load %arg3[%c0_4, %c0_5] : memref<8x8xf32, #tpu.memory_space<vmem>>, vector<8x8xf32>
    %cst_6 = arith.constant dense<0.000000e+00> : vector<512x8xf32>
    %6 = tpu.matmul %4, %5, %cst_6 {dimension_numbers = #tpu.dot_dimension_numbers<[1], [0], [0], [1], [0, 0, 1, 1], [], []>} : vector<512x8xf32>, vector<8x8xf32>, vector<512x8xf32> -> vector<512x8xf32>
    %cst_7 = arith.constant 0.000000e+00 : f32
    %7 = vector.broadcast %cst_7 : f32 to vector<512x8xf32>
    %8 = arith.maximumf %6, %7 : vector<512x8xf32>
    %cst_8 = arith.constant 0.000000e+00 : f32
    %9 = vector.broadcast %cst_8 : f32 to vector<17x8xf32>
    %c0_9 = arith.constant 0 : index
    %c0_10 = arith.constant 0 : index
    %10 = vector.load %arg7[%c0_9, %c0_10] : memref<546x8xf32, #tpu.memory_space<vmem>>, vector<17x8xf32>
    tpu.vector_store %arg7[%c0_9, %c0_10], %9 {strides = array<i32>} : memref<546x8xf32, #tpu.memory_space<vmem>>, vector<17x8xf32>,
    %cst_11 = arith.constant 0.000000e+00 : f32
    %11 = vector.broadcast %cst_11 : f32 to vector<17x8xf32>
    %c529 = arith.constant 529 : index
    %c0_12 = arith.constant 0 : index
    %12 = vector.load %arg7[%c529, %c0_12] : memref<546x8xf32, #tpu.memory_space<vmem>>, vector<17x8xf32>
    tpu.vector_store %arg7[%c529, %c0_12], %11 {strides = array<i32>} : memref<546x8xf32, #tpu.memory_space<vmem>>, vector<17x8xf32>,
    %c17 = arith.constant 17 : index
    %c0_13 = arith.constant 0 : index
    %13 = vector.load %arg7[%c17, %c0_13] : memref<546x8xf32, #tpu.memory_space<vmem>>, vector<512x8xf32>
    tpu.vector_store %arg7[%c17, %c0_13], %4 {strides = array<i32>} : memref<546x8xf32, #tpu.memory_space<vmem>>, vector<512x8xf32>,
    %cst_14 = arith.constant 0.000000e+00 : f32
    %14 = vector.broadcast %cst_14 : f32 to vector<512x8xf32>
    %c0_15 = arith.constant 0 : index
    %c0_16 = arith.constant 0 : index
    %15 = vector.load %arg7[%c0_15, %c0_16] : memref<546x8xf32, #tpu.memory_space<vmem>>, vector<512x8xf32>
    %c0_17 = arith.constant 0 : index
    %c0_18 = arith.constant 0 : index
    %c0_19 = arith.constant 0 : index
    %16 = vector.load %arg5[%c0_17, %c0_18, %c0_19] : memref<9x512x1xf32, #tpu.memory_space<vmem>>, vector<1x512x1xf32>
    %17 = vector.shape_cast %16 : vector<1x512x1xf32> to vector<512x1xf32>
    %18 = vector.broadcast %17 : vector<512x1xf32> to vector<512x8xf32>
    %19 = arith.mulf %15, %18 : vector<512x8xf32>
    %c0_20 = arith.constant 0 : index
    %c0_21 = arith.constant 0 : index
    %c0_22 = arith.constant 0 : index
    %20 = vector.load %arg4[%c0_20, %c0_21, %c0_22] : memref<9x8x8xf32, #tpu.memory_space<vmem>>, vector<1x8x8xf32>
    %21 = vector.shape_cast %20 : vector<1x8x8xf32> to vector<8x8xf32>
    %cst_23 = arith.constant dense<0.000000e+00> : vector<512x8xf32>
    %22 = tpu.matmul %19, %21, %cst_23 {dimension_numbers = #tpu.dot_dimension_numbers<[1], [0], [0], [1], [0, 0, 1, 1], [], []>} : vector<512x8xf32>, vector<8x8xf32>, vector<512x8xf32> -> vector<512x8xf32>
    %23 = arith.addf %14, %22 : vector<512x8xf32>
    %c1 = arith.constant 1 : index
    %c0_24 = arith.constant 0 : index
    %24 = vector.load %arg7[%c1, %c0_24] : memref<546x8xf32, #tpu.memory_space<vmem>>, vector<512x8xf32>
    %c1_25 = arith.constant 1 : index
    %c0_26 = arith.constant 0 : index
    %c0_27 = arith.constant 0 : index
    %25 = vector.load %arg5[%c1_25, %c0_26, %c0_27] : memref<9x512x1xf32, #tpu.memory_space<vmem>>, vector<1x512x1xf32>
    %26 = vector.shape_cast %25 : vector<1x512x1xf32> to vector<512x1xf32>
    %27 = vector.broadcast %26 : vector<512x1xf32> to vector<512x8xf32>
    %28 = arith.mulf %24, %27 : vector<512x8xf32>
    %c1_28 = arith.constant 1 : index
    %c0_29 = arith.constant 0 : index
    %c0_30 = arith.constant 0 : index
    %29 = vector.load %arg4[%c1_28, %c0_29, %c0_30] : memref<9x8x8xf32, #tpu.memory_space<vmem>>, vector<1x8x8xf32>
    %30 = vector.shape_cast %29 : vector<1x8x8xf32> to vector<8x8xf32>
    %cst_31 = arith.constant dense<0.000000e+00> : vector<512x8xf32>
    %31 = tpu.matmul %28, %30, %cst_31 {dimension_numbers = #tpu.dot_dimension_numbers<[1], [0], [0], [1], [0, 0, 1, 1], [], []>} : vector<512x8xf32>, vector<8x8xf32>, vector<512x8xf32> -> vector<512x8xf32>
    %32 = arith.addf %23, %31 : vector<512x8xf32>
    %c2 = arith.constant 2 : index
    %c0_32 = arith.constant 0 : index
    %33 = vector.load %arg7[%c2, %c0_32] : memref<546x8xf32, #tpu.memory_space<vmem>>, vector<512x8xf32>
    %c2_33 = arith.constant 2 : index
    %c0_34 = arith.constant 0 : index
    %c0_35 = arith.constant 0 : index
    %34 = vector.load %arg5[%c2_33, %c0_34, %c0_35] : memref<9x512x1xf32, #tpu.memory_space<vmem>>, vector<1x512x1xf32>
    %35 = vector.shape_cast %34 : vector<1x512x1xf32> to vector<512x1xf32>
    %36 = vector.broadcast %35 : vector<512x1xf32> to vector<512x8xf32>
    %37 = arith.mulf %33, %36 : vector<512x8xf32>
    %c2_36 = arith.constant 2 : index
    %c0_37 = arith.constant 0 : index
    %c0_38 = arith.constant 0 : index
    %38 = vector.load %arg4[%c2_36, %c0_37, %c0_38] : memref<9x8x8xf32, #tpu.memory_space<vmem>>, vector<1x8x8xf32>
    %39 = vector.shape_cast %38 : vector<1x8x8xf32> to vector<8x8xf32>
    %cst_39 = arith.constant dense<0.000000e+00> : vector<512x8xf32>
    %40 = tpu.matmul %37, %39, %cst_39 {dimension_numbers = #tpu.dot_dimension_numbers<[1], [0], [0], [1], [0, 0, 1, 1], [], []>} : vector<512x8xf32>, vector<8x8xf32>, vector<512x8xf32> -> vector<512x8xf32>
    %41 = arith.addf %32, %40 : vector<512x8xf32>
    %c16 = arith.constant 16 : index
    %c0_40 = arith.constant 0 : index
    %42 = vector.load %arg7[%c16, %c0_40] : memref<546x8xf32, #tpu.memory_space<vmem>>, vector<512x8xf32>
    %c3 = arith.constant 3 : index
    %c0_41 = arith.constant 0 : index
    %c0_42 = arith.constant 0 : index
    %43 = vector.load %arg5[%c3, %c0_41, %c0_42] : memref<9x512x1xf32, #tpu.memory_space<vmem>>, vector<1x512x1xf32>
    %44 = vector.shape_cast %43 : vector<1x512x1xf32> to vector<512x1xf32>
    %45 = vector.broadcast %44 : vector<512x1xf32> to vector<512x8xf32>
    %46 = arith.mulf %42, %45 : vector<512x8xf32>
    %c3_43 = arith.constant 3 : index
    %c0_44 = arith.constant 0 : index
    %c0_45 = arith.constant 0 : index
    %47 = vector.load %arg4[%c3_43, %c0_44, %c0_45] : memref<9x8x8xf32, #tpu.memory_space<vmem>>, vector<1x8x8xf32>
    %48 = vector.shape_cast %47 : vector<1x8x8xf32> to vector<8x8xf32>
    %cst_46 = arith.constant dense<0.000000e+00> : vector<512x8xf32>
    %49 = tpu.matmul %46, %48, %cst_46 {dimension_numbers = #tpu.dot_dimension_numbers<[1], [0], [0], [1], [0, 0, 1, 1], [], []>} : vector<512x8xf32>, vector<8x8xf32>, vector<512x8xf32> -> vector<512x8xf32>
    %50 = arith.addf %41, %49 : vector<512x8xf32>
    %c4 = arith.constant 4 : index
    %c0_47 = arith.constant 0 : index
    %c0_48 = arith.constant 0 : index
    %51 = vector.load %arg4[%c4, %c0_47, %c0_48] : memref<9x8x8xf32, #tpu.memory_space<vmem>>, vector<1x8x8xf32>
    %52 = vector.shape_cast %51 : vector<1x8x8xf32> to vector<8x8xf32>
    %cst_49 = arith.constant dense<0.000000e+00> : vector<512x8xf32>
    %53 = tpu.matmul %4, %52, %cst_49 {dimension_numbers = #tpu.dot_dimension_numbers<[1], [0], [0], [1], [0, 0, 1, 1], [], []>} : vector<512x8xf32>, vector<8x8xf32>, vector<512x8xf32> -> vector<512x8xf32>
    %54 = arith.addf %50, %53 : vector<512x8xf32>
    %c18 = arith.constant 18 : index
    %c0_50 = arith.constant 0 : index
    %55 = vector.load %arg7[%c18, %c0_50] : memref<546x8xf32, #tpu.memory_space<vmem>>, vector<512x8xf32>
    %c5 = arith.constant 5 : index
    %c0_51 = arith.constant 0 : index
    %c0_52 = arith.constant 0 : index
    %56 = vector.load %arg5[%c5, %c0_51, %c0_52] : memref<9x512x1xf32, #tpu.memory_space<vmem>>, vector<1x512x1xf32>
    %57 = vector.shape_cast %56 : vector<1x512x1xf32> to vector<512x1xf32>
    %58 = vector.broadcast %57 : vector<512x1xf32> to vector<512x8xf32>
    %59 = arith.mulf %55, %58 : vector<512x8xf32>
    %c5_53 = arith.constant 5 : index
    %c0_54 = arith.constant 0 : index
    %c0_55 = arith.constant 0 : index
    %60 = vector.load %arg4[%c5_53, %c0_54, %c0_55] : memref<9x8x8xf32, #tpu.memory_space<vmem>>, vector<1x8x8xf32>
    %61 = vector.shape_cast %60 : vector<1x8x8xf32> to vector<8x8xf32>
    %cst_56 = arith.constant dense<0.000000e+00> : vector<512x8xf32>
    %62 = tpu.matmul %59, %61, %cst_56 {dimension_numbers = #tpu.dot_dimension_numbers<[1], [0], [0], [1], [0, 0, 1, 1], [], []>} : vector<512x8xf32>, vector<8x8xf32>, vector<512x8xf32> -> vector<512x8xf32>
    %63 = arith.addf %54, %62 : vector<512x8xf32>
    %c32 = arith.constant 32 : index
    %c0_57 = arith.constant 0 : index
    %64 = vector.load %arg7[%c32, %c0_57] : memref<546x8xf32, #tpu.memory_space<vmem>>, vector<512x8xf32>
    %c6 = arith.constant 6 : index
    %c0_58 = arith.constant 0 : index
    %c0_59 = arith.constant 0 : index
    %65 = vector.load %arg5[%c6, %c0_58, %c0_59] : memref<9x512x1xf32, #tpu.memory_space<vmem>>, vector<1x512x1xf32>
    %66 = vector.shape_cast %65 : vector<1x512x1xf32> to vector<512x1xf32>
    %67 = vector.broadcast %66 : vector<512x1xf32> to vector<512x8xf32>
    %68 = arith.mulf %64, %67 : vector<512x8xf32>
    %c6_60 = arith.constant 6 : index
    %c0_61 = arith.constant 0 : index
    %c0_62 = arith.constant 0 : index
    %69 = vector.load %arg4[%c6_60, %c0_61, %c0_62] : memref<9x8x8xf32, #tpu.memory_space<vmem>>, vector<1x8x8xf32>
    %70 = vector.shape_cast %69 : vector<1x8x8xf32> to vector<8x8xf32>
    %cst_63 = arith.constant dense<0.000000e+00> : vector<512x8xf32>
    %71 = tpu.matmul %68, %70, %cst_63 {dimension_numbers = #tpu.dot_dimension_numbers<[1], [0], [0], [1], [0, 0, 1, 1], [], []>} : vector<512x8xf32>, vector<8x8xf32>, vector<512x8xf32> -> vector<512x8xf32>
    %72 = arith.addf %63, %71 : vector<512x8xf32>
    %c33 = arith.constant 33 : index
    %c0_64 = arith.constant 0 : index
    %73 = vector.load %arg7[%c33, %c0_64] : memref<546x8xf32, #tpu.memory_space<vmem>>, vector<512x8xf32>
    %c7 = arith.constant 7 : index
    %c0_65 = arith.constant 0 : index
    %c0_66 = arith.constant 0 : index
    %74 = vector.load %arg5[%c7, %c0_65, %c0_66] : memref<9x512x1xf32, #tpu.memory_space<vmem>>, vector<1x512x1xf32>
    %75 = vector.shape_cast %74 : vector<1x512x1xf32> to vector<512x1xf32>
    %76 = vector.broadcast %75 : vector<512x1xf32> to vector<512x8xf32>
    %77 = arith.mulf %73, %76 : vector<512x8xf32>
    %c7_67 = arith.constant 7 : index
    %c0_68 = arith.constant 0 : index
    %c0_69 = arith.constant 0 : index
    %78 = vector.load %arg4[%c7_67, %c0_68, %c0_69] : memref<9x8x8xf32, #tpu.memory_space<vmem>>, vector<1x8x8xf32>
    %79 = vector.shape_cast %78 : vector<1x8x8xf32> to vector<8x8xf32>
    %cst_70 = arith.constant dense<0.000000e+00> : vector<512x8xf32>
    %80 = tpu.matmul %77, %79, %cst_70 {dimension_numbers = #tpu.dot_dimension_numbers<[1], [0], [0], [1], [0, 0, 1, 1], [], []>} : vector<512x8xf32>, vector<8x8xf32>, vector<512x8xf32> -> vector<512x8xf32>
    %81 = arith.addf %72, %80 : vector<512x8xf32>
    %c34 = arith.constant 34 : index
    %c0_71 = arith.constant 0 : index
    %82 = vector.load %arg7[%c34, %c0_71] : memref<546x8xf32, #tpu.memory_space<vmem>>, vector<512x8xf32>
    %c8 = arith.constant 8 : index
    %c0_72 = arith.constant 0 : index
    %c0_73 = arith.constant 0 : index
    %83 = vector.load %arg5[%c8, %c0_72, %c0_73] : memref<9x512x1xf32, #tpu.memory_space<vmem>>, vector<1x512x1xf32>
    %84 = vector.shape_cast %83 : vector<1x512x1xf32> to vector<512x1xf32>
    %85 = vector.broadcast %84 : vector<512x1xf32> to vector<512x8xf32>
    %86 = arith.mulf %82, %85 : vector<512x8xf32>
    %c8_74 = arith.constant 8 : index
    %c0_75 = arith.constant 0 : index
    %c0_76 = arith.constant 0 : index
    %87 = vector.load %arg4[%c8_74, %c0_75, %c0_76] : memref<9x8x8xf32, #tpu.memory_space<vmem>>, vector<1x8x8xf32>
    %88 = vector.shape_cast %87 : vector<1x8x8xf32> to vector<8x8xf32>
    %cst_77 = arith.constant dense<0.000000e+00> : vector<512x8xf32>
    %89 = tpu.matmul %86, %88, %cst_77 {dimension_numbers = #tpu.dot_dimension_numbers<[1], [0], [0], [1], [0, 0, 1, 1], [], []>} : vector<512x8xf32>, vector<8x8xf32>, vector<512x8xf32> -> vector<512x8xf32>
    %90 = arith.addf %81, %89 : vector<512x8xf32>
    %cst_78 = arith.constant 0.000000e+00 : f32
    %91 = vector.broadcast %cst_78 : f32 to vector<512x8xf32>
    %92 = arith.maximumf %90, %91 : vector<512x8xf32>
    %93 = tpu.concatenate %8, %92 in 1 : vector<512x8xf32>, vector<512x8xf32> -> vector<512x16xf32>
    %c0_79 = arith.constant 0 : index
    %c0_80 = arith.constant 0 : index
    %94 = vector.load %arg6[%c0_79, %c0_80] : memref<512x16xf32, #tpu.memory_space<vmem>>, vector<512x16xf32>
    tpu.vector_store %arg6[%c0_79, %c0_80], %93 {strides = array<i32>} : memref<512x16xf32, #tpu.memory_space<vmem>>, vector<512x16xf32>,
    return
  }
  func.func @transform_0(%arg0: i32) -> (i32, i32) {
    %c0_i32 = arith.constant 0 : i32
    %c0_i32_0 = arith.constant 0 : i32
    return %arg0, %c0_i32 : i32, i32
  }
  func.func @transform_1(%arg0: i32) -> (i32, i32) {
    %c0_i32 = arith.constant 0 : i32
    %c0_i32_0 = arith.constant 0 : i32
    %c0_i32_1 = arith.constant 0 : i32
    return %c0_i32, %c0_i32_0 : i32, i32
  }
  func.func @transform_2(%arg0: i32) -> (i32, i32) {
    %c0_i32 = arith.constant 0 : i32
    %c0_i32_0 = arith.constant 0 : i32
    %c0_i32_1 = arith.constant 0 : i32
    return %c0_i32, %c0_i32_0 : i32, i32
  }
  func.func @transform_3(%arg0: i32) -> (i32, i32, i32) {
    %c0_i32 = arith.constant 0 : i32
    %c0_i32_0 = arith.constant 0 : i32
    %c0_i32_1 = arith.constant 0 : i32
    %c0_i32_2 = arith.constant 0 : i32
    return %c0_i32, %c0_i32_0, %c0_i32_1 : i32, i32, i32
  }
  func.func @transform_4(%arg0: i32) -> (i32, i32, i32) {
    %c0_i32 = arith.constant 0 : i32
    %c0_i32_0 = arith.constant 0 : i32
    %c0_i32_1 = arith.constant 0 : i32
    %c0_i32_2 = arith.constant 0 : i32
    return %c0_i32, %c0_i32_0, %c0_i32_1 : i32, i32, i32
  }
  func.func @transform_5(%arg0: i32) -> (i32, i32) {
    %c0_i32 = arith.constant 0 : i32
    %c0_i32_0 = arith.constant 0 : i32
    return %arg0, %c0_i32 : i32, i32
  }
}

</mosaic_0001>

<bundles_post_ra>
// kernel: tpu_custom_call.1
= control target key start
LH: loop header
LB: loop body
LE: loop exit
PB: predicated region body
PF: predicated region fallthrough
CT: control target
= control target key end

     0   :  { %vm278_vm0 = vcmask 1043456   ;;  %vm85_vm1 = vcmask 31744   ;;  %vm732_vm2 = vcmask 64512   ;;  %v14972_v0 = vmov 0   ;;  %s20133_s4 = inlined_call_operand.vmem [shape: f32[9,512,1], index: 4, kind: input, shape index: {}]   ;;  %s20134_s1 = inlined_call_operand.vmem [shape: f32[4,8], index: 1, kind: input, shape index: {}]   ;;  %s20135_s0 = inlined_call_operand.vmem [shape: f32[512,4], index: 0, kind: input, shape index: {}]   ;;  %s20136_s2 = inlined_call_operand.vmem [shape: f32[8,8], index: 2, kind: input, shape index: {}]   ;;  %s20137_s3 = inlined_call_operand.vmem [shape: f32[9,8,8], index: 3, kind: input, shape index: {}]   ;;  %s20138_s5 = inlined_call_operand.vmem [shape: f32[512,16], index: 5, kind: output, shape index: {}]  }
   0x1   :  { %14939 = vset.pattern.permute.xlu1 %v14972_v0  ;;  %14938 = vset.pattern.permute.xlu0 %v14972_v0  ;;  %v1511_v1 = vld [vmem:[%s20133_s4 + $0x10] sm:$0xff]  ;;  %v1509_v2 = vld [vmem:[%s20133_s4] sm:$0xff]  ;;  %v21_v5 = vld [vmem:[%s20135_s0 + $0x8] sm:$0xff]  ;;  %v14973_v6 = vmov 0.0   ;;  %vm1376_vm3 = vcmask 57344   ;;  %vm11398_vm4 = vcmask 130048  }
   0x2   :  { %v84_v3 = vld [vmem:[%s20134_s1] sm:$0xf]  ;;  %1585 = vperm.xlu1 %14939, %v1511_v1   ;;  %1575 = vperm.xlu0 %14938, %v1509_v2   ;;  %1374 = vst.msk [vmem:[#allocation2] sm:$0xff] %vm732_vm2, %v14973_v6  ;;  %1375 = vst.msk [vmem:[#allocation2 + $0x8] sm:$0xff] %vm732_vm2, %v14973_v6  ;;  %v1512_v7 = vld [vmem:[%s20133_s4 + $0x18] sm:$0xff] }
   0x3   :  { %v20_v4 = vld [vmem:[%s20135_s0] sm:$0xff]  ;;  %1378 = vst.msk [vmem:[#allocation2 + $0x211] sm:$0xff] %vm732_vm2, %v14973_v6  ;;  %1379 = vst.msk [vmem:[#allocation2 + $0x219] sm:$0xff] %vm732_vm2, %v14973_v6  ;;  %13343 = vmatprep.subr.msk.mxu1 %vm278_vm0, %v84_v3  ;;  %v1510_v8 = vld [vmem:[%s20133_s4 + $0x8] sm:$0xff] }
   0x4   :  { %13345 = vmatprep.mubr.msk.f32.mxu1 %vm85_vm1, %v20_v4  ;;  %13344 = vmatpush3.msk.msra.mxu1 %vm278_vm0, %v84_v3  ;;  %v22_v9 = vld [vmem:[%s20135_s0 + $0x10] sm:$0xff]  ;;  %v23_v10 = vld [vmem:[%s20135_s0 + $0x18] sm:$0xff]  ;;  %v1514_v11 = vld [vmem:[%s20133_s4 + $0x28] sm:$0xff]  ;;  %1377 = vst.msk [vmem:[#allocation2 + $0x10] sm:$0x1] %vm1376_vm3, %v14973_v6 }
   0x5   :  { %13346 = vmatmul.mubr.msk.f32.vlgmr.msra.gmra.mrb[0].mxu1 %vm85_vm1, %v21_v5  ;;  %v1513_v12 = vld [vmem:[%s20133_s4 + $0x20] sm:$0xff]  ;;  %v25_v14 = vld [vmem:[%s20135_s0 + $0x28] sm:$0xff]  ;;  %v1516_v15 = vld [vmem:[%s20133_s4 + $0x38] sm:$0xff]  ;;  %1380 = vst.msk [vmem:[#allocation2 + $0x221] sm:$0x1] %vm1376_vm3, %v14973_v6 }
   0x6   :  { %1590 = vperm.xlu1 %14939, %v1512_v7   ;;  %1580 = vperm.xlu0 %14938, %v1510_v8   ;;  %v24_v13 = vld [vmem:[%s20135_s0 + $0x20] sm:$0xff]  ;;  %v1515_v16 = vld [vmem:[%s20133_s4 + $0x30] sm:$0xff]  ;;  %v27_v18 = vld [vmem:[%s20135_s0 + $0x38] sm:$0xff] }
   0x7   :  { %13348 = vmatprep.mubr.msk.f32.mxu1 %vm85_vm1, %v22_v9  ;;  %v26_v17 = vld [vmem:[%s20135_s0 + $0x30] sm:$0xff]  ;;  %v1518_v19 = vld [vmem:[%s20133_s4 + $0x48] sm:$0xff]  ;;  %v1517_v20 = vld [vmem:[%s20133_s4 + $0x40] sm:$0xff] }
   0x8   :  { %v28_v21 = vld [vmem:[%s20135_s0 + $0x40] sm:$0xff]  ;;  %v29_v22 = vld [vmem:[%s20135_s0 + $0x48] sm:$0xff]  ;;  %v1520_v23 = vld [vmem:[%s20133_s4 + $0x58] sm:$0xff] }
   0x9   :  { %13349 = vmatmul.mubr.msk.f32.gmra.mrb[2].mxu1 %vm85_vm1, %v23_v10  ;;  %v1519_v24 = vld [vmem:[%s20133_s4 + $0x50] sm:$0xff]  ;;  %v31_v26 = vld [vmem:[%s20135_s0 + $0x58] sm:$0xff]  ;;  %v1522_v27 = vld [vmem:[%s20133_s4 + $0x68] sm:$0xff] }
   0xa   :  { %1600 = vperm.xlu1 %14939, %v1514_v11   ;;  %1595 = vperm.xlu0 %14938, %v1513_v12   ;;  %v30_v25 = vld [vmem:[%s20135_s0 + $0x50] sm:$0xff]  ;;  %v1521_v28 = vld [vmem:[%s20133_s4 + $0x60] sm:$0xff]  ;;  %v33_v30 = vld [vmem:[%s20135_s0 + $0x68] sm:$0xff] }
   0xb   :  { %13351 = vmatprep.mubr.msk.f32.mxu1 %vm85_vm1, %v24_v13  ;;  %v32_v29 = vld [vmem:[%s20135_s0 + $0x60] sm:$0xff]  ;;  %v1524_v31 = vld [vmem:[%s20133_s4 + $0x78] sm:$0xff]  ;;  %v1523_v32 = vld [vmem:[%s20133_s4 + $0x70] sm:$0xff] }
   0xc   :  { %v34_v33 = vld [vmem:[%s20135_s0 + $0x70] sm:$0xff]  ;;  %v35_v34 = vld [vmem:[%s20135_s0 + $0x78] sm:$0xff]  ;;  %v1526_v35 = vld [vmem:[%s20133_s4 + $0x88] sm:$0xff] }
   0xd   :  { %13352 = vmatmul.mubr.msk.f32.gmra.mrb[4].mxu1 %vm85_vm1, %v25_v14  ;;  %v1525_v36 = vld [vmem:[%s20133_s4 + $0x80] sm:$0xff]  ;;  %v37_v38 = vld [vmem:[%s20135_s0 + $0x88] sm:$0xff]  ;;  %v1528_v39 = vld [vmem:[%s20133_s4 + $0x98] sm:$0xff] }
   0xe   :  { %1610 = vperm.xlu1 %14939, %v1516_v15   ;;  %1605 = vperm.xlu0 %14938, %v1515_v16   ;;  %v36_v37 = vld [vmem:[%s20135_s0 + $0x80] sm:$0xff]  ;;  %v1527_v40 = vld [vmem:[%s20133_s4 + $0x90] sm:$0xff]  ;;  %v39_v42 = vld [vmem:[%s20135_s0 + $0x98] sm:$0xff] }
   0xf   :  { %13354 = vmatprep.mubr.msk.f32.mxu1 %vm85_vm1, %v26_v17  ;;  %v38_v41 = vld [vmem:[%s20135_s0 + $0x90] sm:$0xff]  ;;  %v1530_v43 = vld [vmem:[%s20133_s4 + $0xa8] sm:$0xff]  ;;  %v1529_v44 = vld [vmem:[%s20133_s4 + $0xa0] sm:$0xff] }
  0x10   :  { %v40_v45 = vld [vmem:[%s20135_s0 + $0xa0] sm:$0xff]  ;;  %v41_v46 = vld [vmem:[%s20135_s0 + $0xa8] sm:$0xff]  ;;  %v1532_v47 = vld [vmem:[%s20133_s4 + $0xb8] sm:$0xff] }
  0x11   :  { %13355 = vmatmul.mubr.msk.f32.gmra.mrb[6].mxu1 %vm85_vm1, %v27_v18  ;;  %v1531_v48 = vld [vmem:[%s20133_s4 + $0xb0] sm:$0xff]  ;;  %v43_v50 = vld [vmem:[%s20135_s0 + $0xb8] sm:$0xff]  ;;  %v1534_v51 = vld [vmem:[%s20133_s4 + $0xc8] sm:$0xff] }
  0x12   :  { %1620 = vperm.xlu1 %14939, %v1518_v19   ;;  %1615 = vperm.xlu0 %14938, %v1517_v20   ;;  %v42_v49 = vld [vmem:[%s20135_s0 + $0xb0] sm:$0xff]  ;;  %v1533_v52 = vld [vmem:[%s20133_s4 + $0xc0] sm:$0xff]  ;;  %v45_v54 = vld [vmem:[%s20135_s0 + $0xc8] sm:$0xff] }
  0x13   :  { %13357 = vmatprep.mubr.msk.f32.mxu1 %vm85_vm1, %v28_v21  ;;  %v44_v53 = vld [vmem:[%s20135_s0 + $0xc0] sm:$0xff]  ;;  %v1536_v55 = vld [vmem:[%s20133_s4 + $0xd8] sm:$0xff]  ;;  %v1535_v56 = vld [vmem:[%s20133_s4 + $0xd0] sm:$0xff] }
  0x14   :  { %v46_v57 = vld [vmem:[%s20135_s0 + $0xd0] sm:$0xff]  ;;  %v47_v58 = vld [vmem:[%s20135_s0 + $0xd8] sm:$0xff]  ;;  %v1538_v59 = vld [vmem:[%s20133_s4 + $0xe8] sm:$0xff] }
  0x15   :  { %13358 = vmatmul.mubr.msk.f32.gmra.mrb[8].mxu1 %vm85_vm1, %v29_v22  ;;  %v1537_v60 = vld [vmem:[%s20133_s4 + $0xe0] sm:$0xff]  ;;  %v49_v62 = vld [vmem:[%s20135_s0 + $0xe8] sm:$0xff]  ;;  %v1540_v63 = vld [vmem:[%s20133_s4 + $0xf8] sm:$0xff] }
  0x16   :  { %1630 = vperm.xlu1 %14939, %v1520_v23   ;;  %1625 = vperm.xlu0 %14938, %v1519_v24   ;;  %v48_v61 = vld [vmem:[%s20135_s0 + $0xe0] sm:$0xff]  ;;  %v1539_v0 = vld [vmem:[%s20133_s4 + $0xf0] sm:$0xff]  ;;  %v51_v2 = vld [vmem:[%s20135_s0 + $0xf8] sm:$0xff] }
  0x17   :  { %13360 = vmatprep.mubr.msk.f32.mxu1 %vm85_vm1, %v30_v25  ;;  %v50_v1 = vld [vmem:[%s20135_s0 + $0xf0] sm:$0xff]  ;;  %v1542_v3 = vld [vmem:[%s20133_s4 + $0x108] sm:$0xff]  ;;  %v1541_v4 = vld [vmem:[%s20133_s4 + $0x100] sm:$0xff] }
  0x18   :  { %v52_v5 = vld [vmem:[%s20135_s0 + $0x100] sm:$0xff]  ;;  %v53_v7 = vld [vmem:[%s20135_s0 + $0x108] sm:$0xff]  ;;  %v1544_v8 = vld [vmem:[%s20133_s4 + $0x118] sm:$0xff] }
  0x19   :  { %13361 = vmatmul.mubr.msk.f32.gmra.mrb[10].mxu1 %vm85_vm1, %v31_v26  ;;  %v1543_v9 = vld [vmem:[%s20133_s4 + $0x110] sm:$0xff]  ;;  %v55_v11 = vld [vmem:[%s20135_s0 + $0x118] sm:$0xff]  ;;  %v1546_v12 = vld [vmem:[%s20133_s4 + $0x128] sm:$0xff] }
  0x1a   :  { %1640 = vperm.xlu1 %14939, %v1522_v27   ;;  %1635 = vperm.xlu0 %14938, %v1521_v28   ;;  %v54_v10 = vld [vmem:[%s20135_s0 + $0x110] sm:$0xff]  ;;  %v1545_v13 = vld [vmem:[%s20133_s4 + $0x120] sm:$0xff]  ;;  %v57_v15 = vld [vmem:[%s20135_s0 + $0x128] sm:$0xff] }
  0x1b   :  { %13363 = vmatprep.mubr.msk.f32.mxu1 %vm85_vm1, %v32_v29  ;;  %v56_v14 = vld [vmem:[%s20135_s0 + $0x120] sm:$0xff]  ;;  %v1548_v16 = vld [vmem:[%s20133_s4 + $0x138] sm:$0xff]  ;;  %v1547_v17 = vld [vmem:[%s20133_s4 + $0x130] sm:$0xff] }
  0x1c   :  { %v58_v18 = vld [vmem:[%s20135_s0 + $0x130] sm:$0xff]  ;;  %v59_v19 = vld [vmem:[%s20135_s0 + $0x138] sm:$0xff]  ;;  %v1550_v20 = vld [vmem:[%s20133_s4 + $0x148] sm:$0xff] }
  0x1d   :  { %13364 = vmatmul.mubr.msk.f32.gmra.mrb[12].mxu1 %vm85_vm1, %v33_v30  ;;  %v1549_v21 = vld [vmem:[%s20133_s4 + $0x140] sm:$0xff]  ;;  %v61_v23 = vld [vmem:[%s20135_s0 + $0x148] sm:$0xff]  ;;  %v1552_v24 = vld [vmem:[%s20133_s4 + $0x158] sm:$0xff] }
  0x1e   :  { %1650 = vperm.xlu1 %14939, %v1524_v31   ;;  %1645 = vperm.xlu0 %14938, %v1523_v32   ;;  %v60_v22 = vld [vmem:[%s20135_s0 + $0x140] sm:$0xff]  ;;  %v1551_v25 = vld [vmem:[%s20133_s4 + $0x150] sm:$0xff]  ;;  %v63_v27 = vld [vmem:[%s20135_s0 + $0x158] sm:$0xff] }
  0x1f   :  { %13366 = vmatprep.mubr.msk.f32.mxu1 %vm85_vm1, %v34_v33  ;;  %v62_v26 = vld [vmem:[%s20135_s0 + $0x150] sm:$0xff]  ;;  %v1554_v28 = vld [vmem:[%s20133_s4 + $0x168] sm:$0xff]  ;;  %v1553_v29 = vld [vmem:[%s20133_s4 + $0x160] sm:$0xff] }
  0x20   :  { %v64_v30 = vld [vmem:[%s20135_s0 + $0x160] sm:$0xff]  ;;  %v65_v31 = vld [vmem:[%s20135_s0 + $0x168] sm:$0xff]  ;;  %v1556_v33 = vld [vmem:[%s20133_s4 + $0x178] sm:$0xff] }
  0x21   :  { %13367 = vmatmul.mubr.msk.f32.gmra.mrb[14].mxu1 %vm85_vm1, %v35_v34  ;;  %v731_v32 = vld [vmem:[%s20136_s2] sm:$0xff]  ;;  %v1555_v34 = vld [vmem:[%s20133_s4 + $0x170] sm:$0xff] }
  0x22   :  { %1660 = vperm.xlu1 %14939, %v1526_v35   ;;  %1655 = vperm.xlu0 %14938, %v1525_v36   ;;  %v66_v35 = vld [vmem:[%s20135_s0 + $0x170] sm:$0xff]  ;;  %v67_v36 = vld [vmem:[%s20135_s0 + $0x178] sm:$0xff]  ;;  %v68_v6 = vld [vmem:[%s20135_s0 + $0x180] sm:$0xff] }
  0x23   :  { %13369 = vmatprep.mubr.msk.f32.mxu1 %vm85_vm1, %v36_v37  ;;  %13441 = vmatprep.subr.mxu1 %v731_v32  ;;  %v1558_v37 = vld [vmem:[%s20133_s4 + $0x188] sm:$0xff] }
  0x24   :  { %13442 = vmatpush3.msra.mxu1 %v731_v32 }
  0x25   :  { %13370 = vmatmul.mubr.msk.f32.gmra.mrb[16].mxu1 %vm85_vm1, %v37_v38  ;;  %v1557_v38 = vld [vmem:[%s20133_s4 + $0x180] sm:$0xff] }
  0x26   :  { %1670 = vperm.xlu1 %14939, %v1528_v39   ;;  %1665 = vperm.xlu0 %14938, %v1527_v40   ;;  %v69_v39 = vld [vmem:[%s20135_s0 + $0x188] sm:$0xff]  ;;  %v1560_v40 = vld [vmem:[%s20133_s4 + $0x198] sm:$0xff] }
  0x27   :  { %13372 = vmatprep.mubr.msk.f32.mxu1 %vm85_vm1, %v38_v41  ;;  %v1559_v41 = vld [vmem:[%s20133_s4 + $0x190] sm:$0xff] }
  0x29   :  { %13373 = vmatmul.mubr.msk.f32.gmra.mrb[18].mxu1 %vm85_vm1, %v39_v42  ;;  %v70_v42 = vld [vmem:[%s20135_s0 + $0x190] sm:$0xff] }
  0x2a   :  { %1680 = vperm.xlu1 %14939, %v1530_v43   ;;  %1675 = vperm.xlu0 %14938, %v1529_v44   ;;  %v71_v43 = vld [vmem:[%s20135_s0 + $0x198] sm:$0xff]  ;;  %v1562_v44 = vld [vmem:[%s20133_s4 + $0x1a8] sm:$0xff] }
  0x2b   :  { %13375 = vmatprep.mubr.msk.f32.mxu1 %vm85_vm1, %v40_v45  ;;  %v1561_v45 = vld [vmem:[%s20133_s4 + $0x1a0] sm:$0xff] }
  0x2d   :  { %13376 = vmatmul.mubr.msk.f32.gmra.mrb[20].mxu1 %vm85_vm1, %v41_v46  ;;  %v72_v46 = vld [vmem:[%s20135_s0 + $0x1a0] sm:$0xff] }
  0x2e   :  { %1690 = vperm.xlu1 %14939, %v1532_v47   ;;  %1685 = vperm.xlu0 %14938, %v1531_v48   ;;  %v73_v47 = vld [vmem:[%s20135_s0 + $0x1a8] sm:$0xff]  ;;  %v1564_v48 = vld [vmem:[%s20133_s4 + $0x1b8] sm:$0xff] }
  0x2f   :  { %13378 = vmatprep.mubr.msk.f32.mxu1 %vm85_vm1, %v42_v49  ;;  %v1563_v49 = vld [vmem:[%s20133_s4 + $0x1b0] sm:$0xff] }
  0x31   :  { %13379 = vmatmul.mubr.msk.f32.gmra.mrb[22].mxu1 %vm85_vm1, %v43_v50  ;;  %v74_v50 = vld [vmem:[%s20135_s0 + $0x1b0] sm:$0xff] }
  0x32   :  { %1700 = vperm.xlu1 %14939, %v1534_v51   ;;  %1695 = vperm.xlu0 %14938, %v1533_v52   ;;  %v75_v51 = vld [vmem:[%s20135_s0 + $0x1b8] sm:$0xff]  ;;  %v1566_v52 = vld [vmem:[%s20133_s4 + $0x1c8] sm:$0xff] }
  0x33   :  { %13381 = vmatprep.mubr.msk.f32.mxu1 %vm85_vm1, %v44_v53  ;;  %v1565_v53 = vld [vmem:[%s20133_s4 + $0x1c0] sm:$0xff] }
  0x35   :  { %13382 = vmatmul.mubr.msk.f32.gmra.mrb[24].mxu1 %vm85_vm1, %v45_v54  ;;  %v76_v54 = vld [vmem:[%s20135_s0 + $0x1c0] sm:$0xff] }
  0x36   :  { %1710 = vperm.xlu1 %14939, %v1536_v55   ;;  %1705 = vperm.xlu0 %14938, %v1535_v56   ;;  %v77_v55 = vld [vmem:[%s20135_s0 + $0x1c8] sm:$0xff]  ;;  %v1568_v56 = vld [vmem:[%s20133_s4 + $0x1d8] sm:$0xff] }
  0x37   :  { %13384 = vmatprep.mubr.msk.f32.mxu1 %vm85_vm1, %v46_v57  ;;  %v1567_v57 = vld [vmem:[%s20133_s4 + $0x1d0] sm:$0xff] }
  0x39   :  { %13385 = vmatmul.mubr.msk.f32.gmra.mrb[26].mxu1 %vm85_vm1, %v47_v58  ;;  %v78_v58 = vld [vmem:[%s20135_s0 + $0x1d0] sm:$0xff] }
  0x3a   :  { %1720 = vperm.xlu1 %14939, %v1538_v59   ;;  %1715 = vperm.xlu0 %14938, %v1537_v60   ;;  %v79_v59 = vld [vmem:[%s20135_s0 + $0x1d8] sm:$0xff]  ;;  %v1570_v60 = vld [vmem:[%s20133_s4 + $0x1e8] sm:$0xff] }
  0x3b   :  { %13387 = vmatprep.mubr.msk.f32.mxu1 %vm85_vm1, %v48_v61  ;;  %v1569_v61 = vld [vmem:[%s20133_s4 + $0x1e0] sm:$0xff] }
  0x3d   :  { %13388 = vmatmul.mubr.msk.f32.gmra.mrb[28].mxu1 %vm85_vm1, %v49_v62  ;;  %v80_v62 = vld [vmem:[%s20135_s0 + $0x1e0] sm:$0xff] }
  0x3e   :  { %1730 = vperm.xlu1 %14939, %v1540_v63   ;;  %1725 = vperm.xlu0 %14938, %v1539_v0   ;;  %v81_v63 = vld [vmem:[%s20135_s0 + $0x1e8] sm:$0xff]  ;;  %v1572_v0 = vld [vmem:[%s20133_s4 + $0x1f8] sm:$0xff] }
  0x3f   :  { %13390 = vmatprep.mubr.msk.f32.mxu1 %vm85_vm1, %v50_v1  ;;  %v1571_v1 = vld [vmem:[%s20133_s4 + $0x1f0] sm:$0xff] }
  0x41   :  { %13391 = vmatmul.mubr.msk.f32.gmra.mrb[30].mxu1 %vm85_vm1, %v51_v2  ;;  %v82_v2 = vld [vmem:[%s20135_s0 + $0x1f0] sm:$0xff] }
  0x42   :  { %1740 = vperm.xlu1 %14939, %v1542_v3   ;;  %1735 = vperm.xlu0 %14938, %v1541_v4   ;;  %v83_v3 = vld [vmem:[%s20135_s0 + $0x1f8] sm:$0xff]  ;;  %v11597_v4 = vld [vmem:[%s20133_s4 + $0x208] sm:$0xff] }
  0x43   :  { %13393 = vmatprep.mubr.msk.f32.mxu1 %vm85_vm1, %v52_v5  ;;  %v11596_v5 = vld [vmem:[%s20133_s4 + $0x200] sm:$0xff] }
  0x45   :  { %13394 = vmatmul.mubr.msk.f32.gmra.mrb[32].mxu1 %vm85_vm1, %v53_v7 }
  0x46   :  { %1750 = vperm.xlu1 %14939, %v1544_v8   ;;  %1745 = vperm.xlu0 %14938, %v1543_v9   ;;  %v11599_v9 = vld [vmem:[%s20133_s4 + $0x218] sm:$0xff] }
  0x47   :  { %13396 = vmatprep.mubr.msk.f32.mxu1 %vm85_vm1, %v54_v10  ;;  %v11598_v10 = vld [vmem:[%s20133_s4 + $0x210] sm:$0xff] }
  0x49   :  { %13397 = vmatmul.mubr.msk.f32.gmra.mrb[34].mxu1 %vm85_vm1, %v55_v11 }
  0x4a   :  { %1760 = vperm.xlu1 %14939, %v1546_v12   ;;  %1755 = vperm.xlu0 %14938, %v1545_v13   ;;  %v11601_v13 = vld [vmem:[%s20133_s4 + $0x228] sm:$0xff] }
  0x4b   :  { %13399 = vmatprep.mubr.msk.f32.mxu1 %vm85_vm1, %v56_v14  ;;  %v11600_v14 = vld [vmem:[%s20133_s4 + $0x220] sm:$0xff] }
  0x4d   :  { %13400 = vmatmul.mubr.msk.f32.gmra.mrb[36].mxu1 %vm85_vm1, %v57_v15 }
  0x4e   :  { %1770 = vperm.xlu1 %14939, %v1548_v16   ;;  %1765 = vperm.xlu0 %14938, %v1547_v17   ;;  %v11603_v17 = vld [vmem:[%s20133_s4 + $0x238] sm:$0xff] }
  0x4f   :  { %13402 = vmatprep.mubr.msk.f32.mxu1 %vm85_vm1, %v58_v18  ;;  %v11602_v18 = vld [vmem:[%s20133_s4 + $0x230] sm:$0xff] }
  0x51   :  { %13403 = vmatmul.mubr.msk.f32.gmra.mrb[38].mxu1 %vm85_vm1, %v59_v19 }
  0x52   :  { %1780 = vperm.xlu1 %14939, %v1550_v20   ;;  %1775 = vperm.xlu0 %14938, %v1549_v21   ;;  %v11605_v21 = vld [vmem:[%s20133_s4 + $0x248] sm:$0xff] }
  0x53   :  { %13405 = vmatprep.mubr.msk.f32.mxu1 %vm85_vm1, %v60_v22  ;;  %v11604_v22 = vld [vmem:[%s20133_s4 + $0x240] sm:$0xff] }
  0x55   :  { %13406 = vmatmul.mubr.msk.f32.gmra.mrb[40].mxu1 %vm85_vm1, %v61_v23 }
  0x56   :  { %1790 = vperm.xlu1 %14939, %v1552_v24   ;;  %1785 = vperm.xlu0 %14938, %v1551_v25   ;;  %v11607_v25 = vld [vmem:[%s20133_s4 + $0x258] sm:$0xff] }
  0x57   :  { %13408 = vmatprep.mubr.msk.f32.mxu1 %vm85_vm1, %v62_v26  ;;  %v11606_v26 = vld [vmem:[%s20133_s4 + $0x250] sm:$0xff] }
  0x59   :  { %13409 = vmatmul.mubr.msk.f32.gmra.mrb[42].mxu1 %vm85_vm1, %v63_v27 }
  0x5a   :  { %1800 = vperm.xlu1 %14939, %v1554_v28   ;;  %1795 = vperm.xlu0 %14938, %v1553_v29   ;;  %v11609_v29 = vld [vmem:[%s20133_s4 + $0x268] sm:$0xff] }
  0x5b   :  { %13411 = vmatprep.mubr.msk.f32.mxu1 %vm85_vm1, %v64_v30  ;;  %v11608_v30 = vld [vmem:[%s20133_s4 + $0x260] sm:$0xff] }
  0x5d   :  { %13412 = vmatmul.mubr.msk.f32.gmra.mrb[44].mxu1 %vm85_vm1, %v65_v31 }
  0x5e   :  { %1810 = vperm.xlu1 %14939, %v1556_v33   ;;  %1805 = vperm.xlu0 %14938, %v1555_v34   ;;  %v11611_v33 = vld [vmem:[%s20133_s4 + $0x278] sm:$0xff]  ;;  %v11610_v34 = vld [vmem:[%s20133_s4 + $0x270] sm:$0xff] }
  0x5f   :  { %13414 = vmatprep.mubr.msk.f32.mxu1 %vm85_vm1, %v66_v35 }
  0x61   :  { %13415 = vmatmul.mubr.msk.f32.gmra.mrb[46].mxu1 %vm85_vm1, %v67_v36 }
  0x62   :  { %1820 = vperm.xlu1 %14939, %v1558_v37   ;;  %1815 = vperm.xlu0 %14938, %v1557_v38   ;;  %v11613_v37 = vld [vmem:[%s20133_s4 + $0x288] sm:$0xff]  ;;  %v11612_v38 = vld [vmem:[%s20133_s4 + $0x280] sm:$0xff] }
  0x63   :  { %13417 = vmatprep.mubr.msk.f32.mxu1 %vm85_vm1, %v68_v6 }
  0x65   :  { %13418 = vmatmul.mubr.msk.f32.gmra.mrb[48].mxu1 %vm85_vm1, %v69_v39 }
  0x66   :  { %1830 = vperm.xlu1 %14939, %v1560_v40   ;;  %1825 = vperm.xlu0 %14938, %v1559_v41   ;;  %v11615_v40 = vld [vmem:[%s20133_s4 + $0x298] sm:$0xff]  ;;  %v11614_v41 = vld [vmem:[%s20133_s4 + $0x290] sm:$0xff] }
  0x67   :  { %13420 = vmatprep.mubr.msk.f32.mxu1 %vm85_vm1, %v70_v42 }
  0x69   :  { %13421 = vmatmul.mubr.msk.f32.gmra.mrb[50].mxu1 %vm85_vm1, %v71_v43 }
  0x6a   :  { %1840 = vperm.xlu1 %14939, %v1562_v44   ;;  %1835 = vperm.xlu0 %14938, %v1561_v45   ;;  %v11617_v44 = vld [vmem:[%s20133_s4 + $0x2a8] sm:$0xff]  ;;  %v11616_v45 = vld [vmem:[%s20133_s4 + $0x2a0] sm:$0xff] }
  0x6b   :  { %13423 = vmatprep.mubr.msk.f32.mxu1 %vm85_vm1, %v72_v46 }
  0x6d   :  { %13424 = vmatmul.mubr.msk.f32.gmra.mrb[52].mxu1 %vm85_vm1, %v73_v47 }
  0x6e   :  { %1850 = vperm.xlu1 %14939, %v1564_v48   ;;  %1845 = vperm.xlu0 %14938, %v1563_v49   ;;  %v11619_v48 = vld [vmem:[%s20133_s4 + $0x2b8] sm:$0xff]  ;;  %v11618_v49 = vld [vmem:[%s20133_s4 + $0x2b0] sm:$0xff] }
  0x6f   :  { %13426 = vmatprep.mubr.msk.f32.mxu1 %vm85_vm1, %v74_v50 }
  0x71   :  { %13427 = vmatmul.mubr.msk.f32.gmra.mrb[54].mxu1 %vm85_vm1, %v75_v51 }
  0x72   :  { %1860 = vperm.xlu1 %14939, %v1566_v52   ;;  %1855 = vperm.xlu0 %14938, %v1565_v53   ;;  %v11621_v52 = vld [vmem:[%s20133_s4 + $0x2c8] sm:$0xff]  ;;  %v11620_v53 = vld [vmem:[%s20133_s4 + $0x2c0] sm:$0xff] }
  0x73   :  { %13429 = vmatprep.mubr.msk.f32.mxu1 %vm85_vm1, %v76_v54 }
  0x75   :  { %13430 = vmatmul.mubr.msk.f32.gmra.mrb[56].mxu1 %vm85_vm1, %v77_v55 }
  0x76   :  { %1870 = vperm.xlu1 %14939, %v1568_v56   ;;  %1865 = vperm.xlu0 %14938, %v1567_v57   ;;  %v11623_v56 = vld [vmem:[%s20133_s4 + $0x2d8] sm:$0xff]  ;;  %v11622_v57 = vld [vmem:[%s20133_s4 + $0x2d0] sm:$0xff] }
  0x77   :  { %13432 = vmatprep.mubr.msk.f32.mxu1 %vm85_vm1, %v78_v58 }
  0x79   :  { %13433 = vmatmul.mubr.msk.f32.gmra.mrb[58].mxu1 %vm85_vm1, %v79_v59 }
  0x7a   :  { %1880 = vperm.xlu1 %14939, %v1570_v60   ;;  %1875 = vperm.xlu0 %14938, %v1569_v61   ;;  %v11625_v60 = vld [vmem:[%s20133_s4 + $0x2e8] sm:$0xff]  ;;  %v11624_v61 = vld [vmem:[%s20133_s4 + $0x2e0] sm:$0xff] }
  0x7b   :  { %13435 = vmatprep.mubr.msk.f32.mxu1 %vm85_vm1, %v80_v62 }
  0x7d   :  { %13436 = vmatmul.mubr.msk.f32.gmra.mrb[60].mxu1 %vm85_vm1, %v81_v63 }
  0x7e   :  { %1890 = vperm.xlu1 %14939, %v1572_v0   ;;  %1885 = vperm.xlu0 %14938, %v1571_v1   ;;  %v11627_v0 = vld [vmem:[%s20133_s4 + $0x2f8] sm:$0xff]  ;;  %v11626_v1 = vld [vmem:[%s20133_s4 + $0x2f0] sm:$0xff] }
  0x7f   :  { %13438 = vmatprep.mubr.msk.f32.mxu1 %vm85_vm1, %v82_v2 }
  0x81   :  { %13439 = vmatmul.mubr.msk.f32.gmra.mrb[62].mxu1 %vm85_vm1, %v83_v3  ;;  %v15477_v7 = vpop.permute.xlu1 %1585  ;;  %v15479_v8 = vpop.permute.xlu0 %1575 }
  0x82   :  { %2094 = vperm.xlu1 %14939, %v11597_v4   ;;  %2089 = vperm.xlu0 %14938, %v11596_v5   ;;  %v11629_v4 = vld [vmem:[%s20133_s4 + $0x308] sm:$0xff]  ;;  %v11628_v5 = vld [vmem:[%s20133_s4 + $0x300] sm:$0xff] }
  0x85   :  { %v15487_v11 = vpop.permute.xlu1 %1590  ;;  %v15489_v12 = vpop.permute.xlu0 %1580 }
  0x86   :  { %2104 = vperm.xlu1 %14939, %v11599_v9   ;;  %2099 = vperm.xlu0 %14938, %v11598_v10  }
  0x89   :  { %v15497_v15 = vpop.permute.xlu1 %1600  ;;  %v15499_v16 = vpop.permute.xlu0 %1595 }
  0x8a   :  { %2114 = vperm.xlu1 %14939, %v11601_v13   ;;  %2109 = vperm.xlu0 %14938, %v11600_v14   ;;  %v11631_v13 = vld [vmem:[%s20133_s4 + $0x318] sm:$0xff]  ;;  %v11630_v14 = vld [vmem:[%s20133_s4 + $0x310] sm:$0xff] }
  0x8d   :  { %v15507_v19 = vpop.permute.xlu1 %1610  ;;  %v15509_v20 = vpop.permute.xlu0 %1605 }
  0x8e   :  { %20203 = vst [vmem:[#allocation3_spill] sm:$0xff] %v15507_v19  ;;  %2124 = vperm.xlu1 %14939, %v11603_v17   ;;  %2119 = vperm.xlu0 %14938, %v11602_v18  }
  0x91   :  { %v15517_v23 = vpop.permute.xlu1 %1620  ;;  %v15519_v24 = vpop.permute.xlu0 %1615 }
  0x92   :  { %20204 = vst [vmem:[#allocation4_spill] sm:$0xff] %v15517_v23  ;;  %20205 = vst [vmem:[#allocation5_spill] sm:$0xff] %v15519_v24  ;;  %2134 = vperm.xlu1 %14939, %v11605_v21   ;;  %2129 = vperm.xlu0 %14938, %v11604_v22   ;;  %v11633_v21 = vld [vmem:[%s20133_s4 + $0x328] sm:$0xff]  ;;  %v11632_v22 = vld [vmem:[%s20133_s4 + $0x320] sm:$0xff] }
  0x93   :  { %v11835_v24 = vld [vmem:[%s20133_s4 + $0x570] sm:$0xff] }
  0x95   :  { %v15527_v27 = vpop.permute.xlu1 %1630  ;;  %v15529_v28 = vpop.permute.xlu0 %1625 }
  0x96   :  { %20206 = vst [vmem:[#allocation6_spill] sm:$0xff] %v15527_v27  ;;  %20207 = vst [vmem:[#allocation7_spill] sm:$0xff] %v15529_v28  ;;  %2144 = vperm.xlu1 %14939, %v11607_v25   ;;  %2139 = vperm.xlu0 %14938, %v11606_v26  }
  0x99   :  { %v15537_v31 = vpop.permute.xlu1 %1640  ;;  %v15539_v32 = vpop.permute.xlu0 %1635 }
  0x9a   :  { %20208 = vst [vmem:[#allocation8_spill] sm:$0xff] %v15537_v31  ;;  %20209 = vst [vmem:[#allocation9_spill] sm:$0xff] %v15539_v32  ;;  %2154 = vperm.xlu1 %14939, %v11609_v29   ;;  %2149 = vperm.xlu0 %14938, %v11608_v30   ;;  %v11635_v29 = vld [vmem:[%s20133_s4 + $0x338] sm:$0xff]  ;;  %v11634_v30 = vld [vmem:[%s20133_s4 + $0x330] sm:$0xff] }
  0x9d   :  { %v15547_v35 = vpop.permute.xlu1 %1650  ;;  %v15549_v36 = vpop.permute.xlu0 %1645 }
  0x9e   :  { %20210 = vst [vmem:[#allocation10_spill] sm:$0xff] %v15547_v35  ;;  %20211 = vst [vmem:[#allocation11_spill] sm:$0xff] %v15549_v36  ;;  %2164 = vperm.xlu1 %14939, %v11611_v33   ;;  %2159 = vperm.xlu0 %14938, %v11610_v34  }
  0xa1   :  { %v15557_v6 = vpop.permute.xlu1 %1660  ;;  %v15559_v39 = vpop.permute.xlu0 %1655 }
  0xa2   :  { %20212 = vst [vmem:[#allocation12_spill] sm:$0xff] %v15557_v6  ;;  %20213 = vst [vmem:[#allocation13_spill] sm:$0xff] %v15559_v39  ;;  %2174 = vperm.xlu1 %14939, %v11613_v37   ;;  %2169 = vperm.xlu0 %14938, %v11612_v38   ;;  %v11637_v37 = vld [vmem:[%s20133_s4 + $0x348] sm:$0xff]  ;;  %v11636_v38 = vld [vmem:[%s20133_s4 + $0x340] sm:$0xff] }
  0xa5   :  { %v15567_v42 = vpop.permute.xlu1 %1670  ;;  %v15569_v43 = vpop.permute.xlu0 %1665 }
  0xa6   :  { %20214 = vst [vmem:[#allocation14_spill] sm:$0xff] %v15567_v42  ;;  %20215 = vst [vmem:[#allocation15_spill] sm:$0xff] %v15569_v43  ;;  %2184 = vperm.xlu1 %14939, %v11615_v40   ;;  %2179 = vperm.xlu0 %14938, %v11614_v41  }
  0xa9   :  { %v15577_v46 = vpop.permute.xlu1 %1680  ;;  %v15579_v47 = vpop.permute.xlu0 %1675 }
  0xaa   :  { %20216 = vst [vmem:[#allocation16_spill] sm:$0xff] %v15577_v46  ;;  %20217 = vst [vmem:[#allocation17_spill] sm:$0xff] %v15579_v47  ;;  %2194 = vperm.xlu1 %14939, %v11617_v44   ;;  %2189 = vperm.xlu0 %14938, %v11616_v45   ;;  %v11639_v44 = vld [vmem:[%s20133_s4 + $0x358] sm:$0xff]  ;;  %v11638_v45 = vld [vmem:[%s20133_s4 + $0x350] sm:$0xff] }
  0xad   :  { %v15587_v50 = vpop.permute.xlu1 %1690  ;;  %v15589_v51 = vpop.permute.xlu0 %1685 }
  0xae   :  { %20218 = vst [vmem:[#allocation18_spill] sm:$0xff] %v15587_v50  ;;  %20219 = vst [vmem:[#allocation19_spill] sm:$0xff] %v15589_v51  ;;  %2204 = vperm.xlu1 %14939, %v11619_v48   ;;  %2199 = vperm.xlu0 %14938, %v11618_v49  }
  0xb1   :  { %v15597_v54 = vpop.permute.xlu1 %1700  ;;  %v15599_v55 = vpop.permute.xlu0 %1695 }
  0xb2   :  { %20220 = vst [vmem:[#allocation20_spill] sm:$0xff] %v15597_v54  ;;  %20221 = vst [vmem:[#allocation21_spill] sm:$0xff] %v15599_v55  ;;  %2214 = vperm.xlu1 %14939, %v11621_v52   ;;  %2209 = vperm.xlu0 %14938, %v11620_v53   ;;  %v11641_v52 = vld [vmem:[%s20133_s4 + $0x368] sm:$0xff]  ;;  %v11640_v53 = vld [vmem:[%s20133_s4 + $0x360] sm:$0xff] }
  0xb5   :  { %v15607_v58 = vpop.permute.xlu1 %1710  ;;  %v15609_v59 = vpop.permute.xlu0 %1705 }
  0xb6   :  { %20222 = vst [vmem:[#allocation22_spill] sm:$0xff] %v15607_v58  ;;  %20223 = vst [vmem:[#allocation23_spill] sm:$0xff] %v15609_v59  ;;  %2224 = vperm.xlu1 %14939, %v11623_v56   ;;  %2219 = vperm.xlu0 %14938, %v11622_v57  }
  0xb9   :  { %v15617_v62 = vpop.permute.xlu1 %1720  ;;  %v15619_v63 = vpop.permute.xlu0 %1715 }
  0xba   :  { %20224 = vst [vmem:[#allocation24_spill] sm:$0xff] %v15617_v62  ;;  %20225 = vst [vmem:[#allocation25_spill] sm:$0xff] %v15619_v63  ;;  %2234 = vperm.xlu1 %14939, %v11625_v60   ;;  %2229 = vperm.xlu0 %14938, %v11624_v61  }
  0xbd   :  { %v15627_v2 = vpop.permute.xlu1 %1730  ;;  %v15629_v3 = vpop.permute.xlu0 %1725 }
  0xbe   :  { %20226 = vst [vmem:[#allocation26_spill] sm:$0xff] %v15627_v2  ;;  %20227 = vst [vmem:[#allocation27_spill] sm:$0xff] %v15629_v3  ;;  %2244 = vperm.xlu1 %14939, %v11627_v0   ;;  %2239 = vperm.xlu0 %14938, %v11626_v1  }
  0xc1   :  { %v15637_v9 = vpop.permute.xlu1 %1740  ;;  %v15639_v10 = vpop.permute.xlu0 %1735 }
  0xc2   :  { %20228 = vst [vmem:[#allocation28_spill] sm:$0xff] %v15637_v9  ;;  %20229 = vst [vmem:[#allocation29_spill] sm:$0xff] %v15639_v10  ;;  %2254 = vperm.xlu1 %14939, %v11629_v4   ;;  %2249 = vperm.xlu0 %14938, %v11628_v5   ;;  %v11660_v4 = vld [vmem:[%s20137_s3 + $0x8] sm:$0xff]  ;;  %v11643_v5 = vld [vmem:[%s20133_s4 + $0x378] sm:$0xff] }
  0xc3   :  { %13539 = vmatprep.subr.mxu1 %v11660_v4 }
  0xc5   :  { %v15647_v17 = vpop.permute.xlu1 %1750  ;;  %v15649_v18 = vpop.permute.xlu0 %1745 }
  0xc6   :  { %20230 = vst [vmem:[#allocation30_spill] sm:$0xff] %v15647_v17  ;;  %20231 = vst [vmem:[#allocation31_spill] sm:$0xff] %v15649_v18  ;;  %2264 = vperm.xlu1 %14939, %v11631_v13   ;;  %2259 = vperm.xlu0 %14938, %v11630_v14   ;;  %v11642_v13 = vld [vmem:[%s20133_s4 + $0x370] sm:$0xff] }
  0xc9   :  { %v15657_v25 = vpop.permute.xlu1 %1760  ;;  %v15659_v26 = vpop.permute.xlu0 %1755 }
  0xca   :  { %20232 = vst [vmem:[#allocation32_spill] sm:$0xff] %v15657_v25  ;;  %20233 = vst [vmem:[#allocation33_spill] sm:$0xff] %v15659_v26  ;;  %2274 = vperm.xlu1 %14939, %v11633_v21   ;;  %2269 = vperm.xlu0 %14938, %v11632_v22  }
  0xcd   :  { %v15667_v33 = vpop.permute.xlu1 %1770  ;;  %v15669_v34 = vpop.permute.xlu0 %1765 }
  0xce   :  { %20234 = vst [vmem:[#allocation34_spill] sm:$0xff] %v15667_v33  ;;  %20235 = vst [vmem:[#allocation35_spill] sm:$0xff] %v15669_v34  ;;  %2284 = vperm.xlu1 %14939, %v11635_v29   ;;  %2279 = vperm.xlu0 %14938, %v11634_v30  }
  0xd1   :  { %v15677_v40 = vpop.permute.xlu1 %1780  ;;  %v15679_v41 = vpop.permute.xlu0 %1775 }
  0xd2   :  { %20236 = vst [vmem:[#allocation36_spill] sm:$0xff] %v15677_v40  ;;  %20237 = vst [vmem:[#allocation37_spill] sm:$0xff] %v15679_v41  ;;  %2294 = vperm.xlu1 %14939, %v11637_v37   ;;  %2289 = vperm.xlu0 %14938, %v11636_v38   ;;  %v11645_v38 = vld [vmem:[%s20133_s4 + $0x388] sm:$0xff] }
  0xd5   :  { %v15687_v48 = vpop.permute.xlu1 %1790  ;;  %v15689_v49 = vpop.permute.xlu0 %1785 }
  0xd6   :  { %20238 = vst [vmem:[#allocation38_spill] sm:$0xff] %v15687_v48  ;;  %20239 = vst [vmem:[#allocation39_spill] sm:$0xff] %v15689_v49  ;;  %2304 = vperm.xlu1 %14939, %v11639_v44   ;;  %2299 = vperm.xlu0 %14938, %v11638_v45   ;;  %v11644_v44 = vld [vmem:[%s20133_s4 + $0x380] sm:$0xff] }
  0xd8   :  { %v13347_v56 = vpop.f32.mrb[0].mxu1 }
  0xd9   :  { %v15697_v57 = vmax.f32 %v13347_v56, 0.0  ;;  %v348_v60 = vpop.f32.mrb[1].mxu1  ;;  %v15699_v61 = vpop.permute.xlu1 %1800 }
  0xda   :  { %20241 = vst [vmem:[#allocation41_spill] sm:$0xff] %v15699_v61  ;;  %v15701_v0 = vmax.f32 %v348_v60, 0.0  ;;  %v15703_v1 = vpop.permute.xlu0 %1795  ;;  %2314 = vperm.xlu1 %14939, %v11641_v52   ;;  %2309 = vperm.xlu0 %14938, %v11640_v53  }
  0xdb   :  { %20240 = vst [vmem:[#allocation40_spill] sm:$0xff] %v15697_v57  ;;  %20243 = vst [vmem:[#allocation43_spill] sm:$0xff] %v15703_v1 }
  0xdc   :  { %20242 = vst [vmem:[#allocation42_spill] sm:$0xff] %v15701_v0  ;;  %1382 = vst.msk [vmem:[#allocation2 + $0x19] sm:$0xff] %vm732_vm2, %v15697_v57  ;;  %v13350_v14 = vpop.f32.mrb[2].mxu1  ;;  %13443 = vmatprep.mubr.msk.f32.mxu1 %vm732_vm2, %v15701_v0 }
  0xdd   :  { %1381 = vst.msk [vmem:[#allocation2 + $0x11] sm:$0xff] %vm732_vm2, %v15701_v0  ;;  %v15720_v21 = vmax.f32 %v13350_v14, 0.0  ;;  %v358_v22 = vpop.f32.mrb[3].mxu1  ;;  %13444 = vmatmul.mubr.msk.f32.vlgmr.msra.gmra.mrb[64].mxu1 %vm732_vm2, %v15697_v57  ;;  %v15724_v29 = vpop.permute.xlu1 %1810 }
  0xde   :  { %20245 = vst [vmem:[#allocation45_spill] sm:$0xff] %v15724_v29  ;;  %v15726_v30 = vmax.f32 %v358_v22, 0.0  ;;  %v15728_v37 = vpop.permute.xlu0 %1805  ;;  %2324 = vperm.xlu1 %14939, %v11643_v5   ;;  %2319 = vperm.xlu0 %14938, %v11642_v13   ;;  %v11646_v13 = vld [vmem:[%s20133_s4 + $0x390] sm:$0xff] }
  0xdf   :  { %20244 = vst [vmem:[#allocation44_spill] sm:$0xff] %v15720_v21  ;;  %20247 = vst [vmem:[#allocation47_spill] sm:$0xff] %v15728_v37  ;;  %13540 = vmatpush3.msra.mxu1 %v11660_v4  ;;  %v11647_v4 = vld [vmem:[%s20133_s4 + $0x398] sm:$0xff] }
  0xe0   :  { %20246 = vst [vmem:[#allocation46_spill] sm:$0xff] %v15726_v30  ;;  %1384 = vst.msk [vmem:[#allocation2 + $0x29] sm:$0xff] %vm732_vm2, %v15720_v21  ;;  %v13353_v45 = vpop.f32.mrb[4].mxu1  ;;  %13446 = vmatprep.mubr.msk.f32.mxu1 %vm732_vm2, %v15726_v30 }
  0xe1   :  { %1383 = vst.msk [vmem:[#allocation2 + $0x21] sm:$0xff] %vm732_vm2, %v15726_v30  ;;  %v15742_v52 = vmax.f32 %v13353_v45, 0.0  ;;  %v368_v53 = vpop.f32.mrb[5].mxu1  ;;  %13447 = vmatmul.mubr.msk.f32.gmra.mrb[66].mxu1 %vm732_vm2, %v15720_v21  ;;  %v15746_v56 = vpop.permute.xlu1 %1820 }
  0xe2   :  { %20249 = vst [vmem:[#allocation49_spill] sm:$0xff] %v15746_v56  ;;  %v15748_v60 = vmax.f32 %v368_v53, 0.0  ;;  %v15750_v5 = vpop.permute.xlu0 %1815  ;;  %2334 = vperm.xlu1 %14939, %v11645_v38   ;;  %2329 = vperm.xlu0 %14938, %v11644_v44  }
  0xe3   :  { %20248 = vst [vmem:[#allocation48_spill] sm:$0xff] %v15742_v52  ;;  %20251 = vst [vmem:[#allocation51_spill] sm:$0xff] %v15750_v5  ;;  %v1961_v23 = vld [vmem:[#allocation2 + $0x19] sm:$0xff] }
  0xe4   :  { %20250 = vst [vmem:[#allocation50_spill] sm:$0xff] %v15748_v60  ;;  %1386 = vst.msk [vmem:[#allocation2 + $0x39] sm:$0xff] %vm732_vm2, %v15742_v52  ;;  %v13356_v14 = vpop.f32.mrb[6].mxu1  ;;  %13449 = vmatprep.mubr.msk.f32.mxu1 %vm732_vm2, %v15748_v60 }
  0xe5   :  { %1385 = vst.msk [vmem:[#allocation2 + $0x31] sm:$0xff] %vm732_vm2, %v15748_v60  ;;  %v15764_v22 = vmax.f32 %v13356_v14, 0.0  ;;  %v378_v38 = vpop.f32.mrb[7].mxu1  ;;  %13450 = vmatmul.mubr.msk.f32.gmra.mrb[68].mxu1 %vm732_vm2, %v15742_v52  ;;  %v15768_v44 = vpop.permute.xlu1 %1830  ;;  %v11649_v14 = vld [vmem:[%s20133_s4 + $0x3a8] sm:$0xff]  ;;  %v11648_v60 = vld [vmem:[%s20133_s4 + $0x3a0] sm:$0xff] }
  0xe6   :  { %20253 = vst [vmem:[#allocation53_spill] sm:$0xff] %v15768_v44  ;;  %v15770_v45 = vmax.f32 %v378_v38, 0.0  ;;  %v15772_v53 = vpop.permute.xlu0 %1825  ;;  %2344 = vperm.xlu1 %14939, %v11647_v4   ;;  %2339 = vperm.xlu0 %14938, %v11646_v13  }
  0xe7   :  { %20252 = vst [vmem:[#allocation52_spill] sm:$0xff] %v15764_v22  ;;  %20255 = vst [vmem:[#allocation55_spill] sm:$0xff] %v15772_v53 }
  0xe8   :  { %20254 = vst [vmem:[#allocation54_spill] sm:$0xff] %v15770_v45  ;;  %1388 = vst.msk [vmem:[#allocation2 + $0x49] sm:$0xff] %vm732_vm2, %v15764_v22  ;;  %v13359_v38 = vpop.f32.mrb[8].mxu1  ;;  %13452 = vmatprep.mubr.msk.f32.mxu1 %vm732_vm2, %v15770_v45 }
  0xe9   :  { %1387 = vst.msk [vmem:[#allocation2 + $0x41] sm:$0xff] %vm732_vm2, %v15770_v45  ;;  %v15786_v4 = vmax.f32 %v13359_v38, 0.0  ;;  %v388_v13 = vpop.f32.mrb[9].mxu1  ;;  %13453 = vmatmul.mubr.msk.f32.gmra.mrb[70].mxu1 %vm732_vm2, %v15764_v22  ;;  %v15790_v52 = vpop.permute.xlu1 %1840  ;;  %v11651_v38 = vld [vmem:[%s20133_s4 + $0x3b8] sm:$0xff]  ;;  %v11650_v45 = vld [vmem:[%s20133_s4 + $0x3b0] sm:$0xff] }
  0xea   :  { %20257 = vst [vmem:[#allocation57_spill] sm:$0xff] %v15790_v52  ;;  %v15792_v21 = vmax.f32 %v388_v13, 0.0  ;;  %v15794_v30 = vpop.permute.xlu0 %1835  ;;  %2354 = vperm.xlu1 %14939, %v11649_v14   ;;  %2349 = vperm.xlu0 %14938, %v11648_v60  }
  0xeb   :  { %20256 = vst [vmem:[#allocation56_spill] sm:$0xff] %v15786_v4  ;;  %20259 = vst [vmem:[#allocation59_spill] sm:$0xff] %v15794_v30 }
  0xec   :  { %20258 = vst [vmem:[#allocation58_spill] sm:$0xff] %v15792_v21  ;;  %1390 = vst.msk [vmem:[#allocation2 + $0x59] sm:$0xff] %vm732_vm2, %v15786_v4  ;;  %v13362_v13 = vpop.f32.mrb[10].mxu1  ;;  %13455 = vmatprep.mubr.msk.f32.mxu1 %vm732_vm2, %v15792_v21  ;;  %v1964_v19 = vld [vmem:[#allocation2 + $0x31] sm:$0xff] }
  0xed   :  { %1389 = vst.msk [vmem:[#allocation2 + $0x51] sm:$0xff] %vm732_vm2, %v15792_v21  ;;  %v15808_v14 = vmax.f32 %v13362_v13, 0.0  ;;  %v398_v60 = vpop.f32.mrb[11].mxu1  ;;  %13456 = vmatmul.mubr.msk.f32.gmra.mrb[72].mxu1 %vm732_vm2, %v15786_v4  ;;  %v15812_v22 = vpop.permute.xlu1 %1850  ;;  %v11653_v13 = vld [vmem:[%s20133_s4 + $0x3c8] sm:$0xff]  ;;  %v11652_v21 = vld [vmem:[%s20133_s4 + $0x3c0] sm:$0xff] }
  0xee   :  { %20261 = vst [vmem:[#allocation61_spill] sm:$0xff] %v15812_v22  ;;  %v15814_v57 = vmax.f32 %v398_v60, 0.0  ;;  %v15816_v52 = vpop.permute.xlu0 %1845  ;;  %2364 = vperm.xlu1 %14939, %v11651_v38   ;;  %2359 = vperm.xlu0 %14938, %v11650_v45  }
  0xef   :  { %20260 = vst [vmem:[#allocation60_spill] sm:$0xff] %v15808_v14  ;;  %20263 = vst [vmem:[#allocation63_spill] sm:$0xff] %v15816_v52 }
  0xf0   :  { %20262 = vst [vmem:[#allocation62_spill] sm:$0xff] %v15814_v57  ;;  %1392 = vst.msk [vmem:[#allocation2 + $0x69] sm:$0xff] %vm732_vm2, %v15808_v14  ;;  %v13365_v60 = vpop.f32.mrb[12].mxu1  ;;  %13458 = vmatprep.mubr.msk.f32.mxu1 %vm732_vm2, %v15814_v57 }
  0xf1   :  { %1391 = vst.msk [vmem:[#allocation2 + $0x61] sm:$0xff] %vm732_vm2, %v15814_v57  ;;  %v15830_v38 = vmax.f32 %v13365_v60, 0.0  ;;  %v408_v45 = vpop.f32.mrb[13].mxu1  ;;  %13459 = vmatmul.mubr.msk.f32.gmra.mrb[74].mxu1 %vm732_vm2, %v15808_v14  ;;  %v15834_v4 = vpop.permute.xlu1 %1860  ;;  %v11655_v60 = vld [vmem:[%s20133_s4 + $0x3d8] sm:$0xff]  ;;  %v11654_v57 = vld [vmem:[%s20133_s4 + $0x3d0] sm:$0xff] }
  0xf2   :  { %20265 = vst [vmem:[#allocation65_spill] sm:$0xff] %v15834_v4  ;;  %v15836_v22 = vmax.f32 %v408_v45, 0.0  ;;  %v15838_v52 = vpop.permute.xlu0 %1855  ;;  %2374 = vperm.xlu1 %14939, %v11653_v13   ;;  %2369 = vperm.xlu0 %14938, %v11652_v21  }
  0xf3   :  { %20264 = vst [vmem:[#allocation64_spill] sm:$0xff] %v15830_v38  ;;  %20267 = vst [vmem:[#allocation67_spill] sm:$0xff] %v15838_v52 }
  0xf4   :  { %20266 = vst [vmem:[#allocation66_spill] sm:$0xff] %v15836_v22  ;;  %1394 = vst.msk [vmem:[#allocation2 + $0x79] sm:$0xff] %vm732_vm2, %v15830_v38  ;;  %v13368_v45 = vpop.f32.mrb[14].mxu1  ;;  %13461 = vmatprep.mubr.msk.f32.mxu1 %vm732_vm2, %v15836_v22 }
  0xf5   :  { %1393 = vst.msk [vmem:[#allocation2 + $0x71] sm:$0xff] %vm732_vm2, %v15836_v22  ;;  %v15852_v13 = vmax.f32 %v13368_v45, 0.0  ;;  %v418_v21 = vpop.f32.mrb[15].mxu1  ;;  %13462 = vmatmul.mubr.msk.f32.gmra.mrb[76].mxu1 %vm732_vm2, %v15830_v38  ;;  %v15856_v14 = vpop.permute.xlu1 %1870  ;;  %v11657_v45 = vld [vmem:[%s20133_s4 + $0x3e8] sm:$0xff]  ;;  %v11656_v22 = vld [vmem:[%s20133_s4 + $0x3e0] sm:$0xff] }
  0xf6   :  { %20269 = vst [vmem:[#allocation69_spill] sm:$0xff] %v15856_v14  ;;  %v15858_v4 = vmax.f32 %v418_v21, 0.0  ;;  %v15860_v52 = vpop.permute.xlu0 %1865  ;;  %2384 = vperm.xlu1 %14939, %v11655_v60   ;;  %2379 = vperm.xlu0 %14938, %v11654_v57  }
  0xf7   :  { %20268 = vst [vmem:[#allocation68_spill] sm:$0xff] %v15852_v13  ;;  %20271 = vst [vmem:[#allocation71_spill] sm:$0xff] %v15860_v52 }
  0xf8   :  { %20270 = vst [vmem:[#allocation70_spill] sm:$0xff] %v15858_v4  ;;  %1396 = vst.msk [vmem:[#allocation2 + $0x89] sm:$0xff] %vm732_vm2, %v15852_v13  ;;  %v13371_v21 = vpop.f32.mrb[16].mxu1  ;;  %13464 = vmatprep.mubr.msk.f32.mxu1 %vm732_vm2, %v15858_v4 }
  0xf9   :  { %1395 = vst.msk [vmem:[#allocation2 + $0x81] sm:$0xff] %vm732_vm2, %v15858_v4  ;;  %v15874_v60 = vmax.f32 %v13371_v21, 0.0  ;;  %v428_v57 = vpop.f32.mrb[17].mxu1  ;;  %13465 = vmatmul.mubr.msk.f32.gmra.mrb[78].mxu1 %vm732_vm2, %v15852_v13  ;;  %v15878_v38 = vpop.permute.xlu1 %1880  ;;  %v11659_v21 = vld [vmem:[%s20133_s4 + $0x3f8] sm:$0xff]  ;;  %v11658_v4 = vld [vmem:[%s20133_s4 + $0x3f0] sm:$0xff] }
  0xfa   :  { %20273 = vst [vmem:[#allocation73_spill] sm:$0xff] %v15878_v38  ;;  %v15880_v14 = vmax.f32 %v428_v57, 0.0  ;;  %v15882_v52 = vpop.permute.xlu0 %1875  ;;  %2394 = vperm.xlu1 %14939, %v11657_v45   ;;  %2389 = vperm.xlu0 %14938, %v11656_v22  }
  0xfb   :  { %20272 = vst [vmem:[#allocation72_spill] sm:$0xff] %v15874_v60  ;;  %20275 = vst [vmem:[#allocation75_spill] sm:$0xff] %v15882_v52 }
  0xfc   :  { %20274 = vst [vmem:[#allocation74_spill] sm:$0xff] %v15880_v14  ;;  %1398 = vst.msk [vmem:[#allocation2 + $0x99] sm:$0xff] %vm732_vm2, %v15874_v60  ;;  %v13374_v57 = vpop.f32.mrb[18].mxu1  ;;  %13467 = vmatprep.mubr.msk.f32.mxu1 %vm732_vm2, %v15880_v14 }
  0xfd   :  { %1397 = vst.msk [vmem:[#allocation2 + $0x91] sm:$0xff] %vm732_vm2, %v15880_v14  ;;  %v15896_v45 = vmax.f32 %v13374_v57, 0.0  ;;  %v438_v22 = vpop.f32.mrb[19].mxu1  ;;  %13468 = vmatmul.mubr.msk.f32.gmra.mrb[80].mxu1 %vm732_vm2, %v15874_v60  ;;  %v15900_v13 = vpop.permute.xlu1 %1890  ;;  %v11790_v57 = vld [vmem:[%s20133_s4 + $0x408] sm:$0xff]  ;;  %v11789_v14 = vld [vmem:[%s20133_s4 + $0x400] sm:$0xff] }
  0xfe   :  { %20277 = vst [vmem:[#allocation77_spill] sm:$0xff] %v15900_v13  ;;  %v15902_v38 = vmax.f32 %v438_v22, 0.0  ;;  %v15904_v52 = vpop.permute.xlu0 %1885  ;;  %2404 = vperm.xlu1 %14939, %v11659_v21   ;;  %2399 = vperm.xlu0 %14938, %v11658_v4  }
  0xff   :  { %20276 = vst [vmem:[#allocation76_spill] sm:$0xff] %v15896_v45  ;;  %20279 = vst [vmem:[#allocation79_spill] sm:$0xff] %v15904_v52 }
 0x100   :  { %20278 = vst [vmem:[#allocation78_spill] sm:$0xff] %v15902_v38  ;;  %1400 = vst.msk [vmem:[#allocation2 + $0xa9] sm:$0xff] %vm732_vm2, %v15896_v45  ;;  %v13377_v22 = vpop.f32.mrb[20].mxu1  ;;  %13470 = vmatprep.mubr.msk.f32.mxu1 %vm732_vm2, %v15902_v38 }
 0x101   :  { %1399 = vst.msk [vmem:[#allocation2 + $0xa1] sm:$0xff] %vm732_vm2, %v15902_v38  ;;  %v15918_v21 = vmax.f32 %v13377_v22, 0.0  ;;  %v448_v4 = vpop.f32.mrb[21].mxu1  ;;  %13471 = vmatmul.mubr.msk.f32.gmra.mrb[82].mxu1 %vm732_vm2, %v15896_v45  ;;  %v15922_v60 = vpop.permute.xlu1 %2094  ;;  %v11792_v22 = vld [vmem:[%s20133_s4 + $0x418] sm:$0xff]  ;;  %v11791_v38 = vld [vmem:[%s20133_s4 + $0x410] sm:$0xff] }
 0x102   :  { %v15924_v13 = vmax.f32 %v448_v4, 0.0  ;;  %v15926_v52 = vpop.permute.xlu0 %2089  ;;  %3763 = vperm.xlu1 %14939, %v11790_v57   ;;  %3758 = vperm.xlu0 %14938, %v11789_v14  }
 0x103   :  { %20280 = vst [vmem:[#allocation80_spill] sm:$0xff] %v15918_v21  ;;  %1402 = vst.msk [vmem:[#allocation2 + $0xb9] sm:$0xff] %vm732_vm2, %v15918_v21 }
 0x104   :  { %20281 = vst [vmem:[#allocation81_spill] sm:$0xff] %v15924_v13  ;;  %1401 = vst.msk [vmem:[#allocation2 + $0xb1] sm:$0xff] %vm732_vm2, %v15924_v13  ;;  %v13380_v4 = vpop.f32.mrb[22].mxu1  ;;  %13473 = vmatprep.mubr.msk.f32.mxu1 %vm732_vm2, %v15924_v13  ;;  %v11793_v13 = vld [vmem:[%s20133_s4 + $0x420] sm:$0xff] }
 0x105   :  { %v15940_v57 = vmax.f32 %v13380_v4, 0.0  ;;  %v458_v14 = vpop.f32.mrb[23].mxu1  ;;  %13474 = vmatmul.mubr.msk.f32.gmra.mrb[84].mxu1 %vm732_vm2, %v15918_v21  ;;  %v15944_v45 = vpop.permute.xlu1 %2104  ;;  %v11794_v4 = vld [vmem:[%s20133_s4 + $0x428] sm:$0xff] }
 0x106   :  { %v15946_v0 = vmax.f32 %v458_v14, 0.0  ;;  %v15948_v30 = vpop.permute.xlu0 %2099  ;;  %3773 = vperm.xlu1 %14939, %v11792_v22   ;;  %3768 = vperm.xlu0 %14938, %v11791_v38  }
 0x107   :  { %20282 = vst [vmem:[#allocation82_spill] sm:$0xff] %v15940_v57  ;;  %1404 = vst.msk [vmem:[#allocation2 + $0xc9] sm:$0xff] %vm732_vm2, %v15940_v57 }
 0x108   :  { %20283 = vst [vmem:[#allocation83_spill] sm:$0xff] %v15946_v0  ;;  %1403 = vst.msk [vmem:[#allocation2 + $0xc1] sm:$0xff] %vm732_vm2, %v15946_v0  ;;  %v13383_v14 = vpop.f32.mrb[24].mxu1  ;;  %13476 = vmatprep.mubr.msk.f32.mxu1 %vm732_vm2, %v15946_v0  ;;  %v11795_v0 = vld [vmem:[%s20133_s4 + $0x430] sm:$0xff] }
 0x109   :  { %v15962_v22 = vmax.f32 %v13383_v14, 0.0  ;;  %v468_v38 = vpop.f32.mrb[25].mxu1  ;;  %13477 = vmatmul.mubr.msk.f32.gmra.mrb[86].mxu1 %vm732_vm2, %v15940_v57  ;;  %v15966_v21 = vpop.permute.xlu1 %2114  ;;  %v11796_v14 = vld [vmem:[%s20133_s4 + $0x438] sm:$0xff] }
 0x10a   :  { %v15968_v44 = vmax.f32 %v468_v38, 0.0  ;;  %v15970_v53 = vpop.permute.xlu0 %2109  ;;  %3783 = vperm.xlu1 %14939, %v11794_v4   ;;  %3778 = vperm.xlu0 %14938, %v11793_v13  }
 0x10b   :  { %20284 = vst [vmem:[#allocation84_spill] sm:$0xff] %v15962_v22  ;;  %1406 = vst.msk [vmem:[#allocation2 + $0xd9] sm:$0xff] %vm732_vm2, %v15962_v22 }
 0x10c   :  { %20285 = vst [vmem:[#allocation85_spill] sm:$0xff] %v15968_v44  ;;  %1405 = vst.msk [vmem:[#allocation2 + $0xd1] sm:$0xff] %vm732_vm2, %v15968_v44  ;;  %v13386_v38 = vpop.f32.mrb[26].mxu1  ;;  %13479 = vmatprep.mubr.msk.f32.mxu1 %vm732_vm2, %v15968_v44  ;;  %v11797_v44 = vld [vmem:[%s20133_s4 + $0x440] sm:$0xff] }
 0x10d   :  { %v15984_v4 = vmax.f32 %v13386_v38, 0.0  ;;  %v478_v13 = vpop.f32.mrb[27].mxu1  ;;  %13480 = vmatmul.mubr.msk.f32.gmra.mrb[88].mxu1 %vm732_vm2, %v15962_v22  ;;  %v15988_v57 = vpop.permute.xlu1 %2124  ;;  %v11798_v38 = vld [vmem:[%s20133_s4 + $0x448] sm:$0xff] }
 0x10e   :  { %v15990_v56 = vmax.f32 %v478_v13, 0.0  ;;  %v15992_v5 = vpop.permute.xlu0 %2119  ;;  %3793 = vperm.xlu1 %14939, %v11796_v14   ;;  %3788 = vperm.xlu0 %14938, %v11795_v0  }
 0x10f   :  { %20286 = vst [vmem:[#allocation86_spill] sm:$0xff] %v15984_v4  ;;  %1408 = vst.msk [vmem:[#allocation2 + $0xe9] sm:$0xff] %vm732_vm2, %v15984_v4 }
 0x110   :  { %20287 = vst [vmem:[#allocation87_spill] sm:$0xff] %v15990_v56  ;;  %1407 = vst.msk [vmem:[#allocation2 + $0xe1] sm:$0xff] %vm732_vm2, %v15990_v56  ;;  %v13389_v13 = vpop.f32.mrb[28].mxu1  ;;  %13482 = vmatprep.mubr.msk.f32.mxu1 %vm732_vm2, %v15990_v56  ;;  %v11799_v56 = vld [vmem:[%s20133_s4 + $0x450] sm:$0xff] }
 0x111   :  { %v16006_v14 = vmax.f32 %v13389_v13, 0.0  ;;  %v488_v0 = vpop.f32.mrb[29].mxu1  ;;  %13483 = vmatmul.mubr.msk.f32.gmra.mrb[90].mxu1 %vm732_vm2, %v15984_v4  ;;  %v16010_v22 = vpop.permute.xlu1 %2134  ;;  %v11800_v13 = vld [vmem:[%s20133_s4 + $0x458] sm:$0xff] }
 0x112   :  { %v16012_v29 = vmax.f32 %v488_v0, 0.0  ;;  %v16014_v37 = vpop.permute.xlu0 %2129  ;;  %3803 = vperm.xlu1 %14939, %v11798_v38   ;;  %3798 = vperm.xlu0 %14938, %v11797_v44  }
 0x113   :  { %20288 = vst [vmem:[#allocation88_spill] sm:$0xff] %v16006_v14  ;;  %1410 = vst.msk [vmem:[#allocation2 + $0xf9] sm:$0xff] %vm732_vm2, %v16006_v14 }
 0x114   :  { %20289 = vst [vmem:[#allocation89_spill] sm:$0xff] %v16012_v29  ;;  %1409 = vst.msk [vmem:[#allocation2 + $0xf1] sm:$0xff] %vm732_vm2, %v16012_v29  ;;  %v13392_v0 = vpop.f32.mrb[30].mxu1  ;;  %13485 = vmatprep.mubr.msk.f32.mxu1 %vm732_vm2, %v16012_v29  ;;  %v11801_v29 = vld [vmem:[%s20133_s4 + $0x460] sm:$0xff] }
 0x115   :  { %v16028_v38 = vmax.f32 %v13392_v0, 0.0  ;;  %v498_v44 = vpop.f32.mrb[31].mxu1  ;;  %13486 = vmatmul.mubr.msk.f32.gmra.mrb[92].mxu1 %vm732_vm2, %v16006_v14  ;;  %v16032_v4 = vpop.permute.xlu1 %2144  ;;  %v11802_v0 = vld [vmem:[%s20133_s4 + $0x468] sm:$0xff] }
 0x116   :  { %v16034_v61 = vmax.f32 %v498_v44, 0.0  ;;  %v16036_v1 = vpop.permute.xlu0 %2139  ;;  %3813 = vperm.xlu1 %14939, %v11800_v13   ;;  %3808 = vperm.xlu0 %14938, %v11799_v56  }
 0x117   :  { %20290 = vst [vmem:[#allocation90_spill] sm:$0xff] %v16028_v38  ;;  %1412 = vst.msk [vmem:[#allocation2 + $0x109] sm:$0xff] %vm732_vm2, %v16028_v38 }
 0x118   :  { %20291 = vst [vmem:[#allocation91_spill] sm:$0xff] %v16034_v61  ;;  %1411 = vst.msk [vmem:[#allocation2 + $0x101] sm:$0xff] %vm732_vm2, %v16034_v61  ;;  %v13395_v44 = vpop.f32.mrb[32].mxu1  ;;  %13488 = vmatprep.mubr.msk.f32.mxu1 %vm732_vm2, %v16034_v61  ;;  %v11803_v61 = vld [vmem:[%s20133_s4 + $0x470] sm:$0xff] }
 0x119   :  { %v16050_v13 = vmax.f32 %v13395_v44, 0.0  ;;  %v508_v56 = vpop.f32.mrb[33].mxu1  ;;  %13489 = vmatmul.mubr.msk.f32.gmra.mrb[94].mxu1 %vm732_vm2, %v16028_v38  ;;  %v16054_v14 = vpop.permute.xlu1 %2154  ;;  %v11804_v44 = vld [vmem:[%s20133_s4 + $0x478] sm:$0xff] }
 0x11a   :  { %v16056_v48 = vmax.f32 %v508_v56, 0.0  ;;  %v16058_v49 = vpop.permute.xlu0 %2149  ;;  %3823 = vperm.xlu1 %14939, %v11802_v0   ;;  %3818 = vperm.xlu0 %14938, %v11801_v29  }
 0x11b   :  { %20292 = vst [vmem:[#allocation92_spill] sm:$0xff] %v16050_v13  ;;  %1414 = vst.msk [vmem:[#allocation2 + $0x119] sm:$0xff] %vm732_vm2, %v16050_v13 }
 0x11c   :  { %20293 = vst [vmem:[#allocation93_spill] sm:$0xff] %v16056_v48  ;;  %1413 = vst.msk [vmem:[#allocation2 + $0x111] sm:$0xff] %vm732_vm2, %v16056_v48  ;;  %v13398_v56 = vpop.f32.mrb[34].mxu1  ;;  %13491 = vmatprep.mubr.msk.f32.mxu1 %vm732_vm2, %v16056_v48  ;;  %v11805_v48 = vld [vmem:[%s20133_s4 + $0x480] sm:$0xff] }
 0x11d   :  { %v16072_v0 = vmax.f32 %v13398_v56, 0.0  ;;  %v518_v29 = vpop.f32.mrb[35].mxu1  ;;  %13492 = vmatmul.mubr.msk.f32.gmra.mrb[96].mxu1 %vm732_vm2, %v16050_v13  ;;  %v16076_v38 = vpop.permute.xlu1 %2164  ;;  %v11806_v56 = vld [vmem:[%s20133_s4 + $0x488] sm:$0xff] }
 0x11e   :  { %v16078_v40 = vmax.f32 %v518_v29, 0.0  ;;  %v16080_v41 = vpop.permute.xlu0 %2159  ;;  %3833 = vperm.xlu1 %14939, %v11804_v44   ;;  %3828 = vperm.xlu0 %14938, %v11803_v61  }
 0x11f   :  { %20294 = vst [vmem:[#allocation94_spill] sm:$0xff] %v16072_v0  ;;  %1416 = vst.msk [vmem:[#allocation2 + $0x129] sm:$0xff] %vm732_vm2, %v16072_v0 }
 0x120   :  { %20295 = vst [vmem:[#allocation95_spill] sm:$0xff] %v16078_v40  ;;  %1415 = vst.msk [vmem:[#allocation2 + $0x121] sm:$0xff] %vm732_vm2, %v16078_v40  ;;  %v13401_v29 = vpop.f32.mrb[36].mxu1  ;;  %13494 = vmatprep.mubr.msk.f32.mxu1 %vm732_vm2, %v16078_v40  ;;  %v11807_v40 = vld [vmem:[%s20133_s4 + $0x490] sm:$0xff] }
 0x121   :  { %v16094_v44 = vmax.f32 %v13401_v29, 0.0  ;;  %v528_v61 = vpop.f32.mrb[37].mxu1  ;;  %13495 = vmatmul.mubr.msk.f32.gmra.mrb[98].mxu1 %vm732_vm2, %v16072_v0  ;;  %v16098_v13 = vpop.permute.xlu1 %2174  ;;  %v11808_v29 = vld [vmem:[%s20133_s4 + $0x498] sm:$0xff] }
 0x122   :  { %v16100_v33 = vmax.f32 %v528_v61, 0.0  ;;  %v16102_v34 = vpop.permute.xlu0 %2169  ;;  %3843 = vperm.xlu1 %14939, %v11806_v56   ;;  %3838 = vperm.xlu0 %14938, %v11805_v48  }
 0x123   :  { %20296 = vst [vmem:[#allocation96_spill] sm:$0xff] %v16094_v44  ;;  %1418 = vst.msk [vmem:[#allocation2 + $0x139] sm:$0xff] %vm732_vm2, %v16094_v44 }
 0x124   :  { %20297 = vst [vmem:[#allocation97_spill] sm:$0xff] %v16100_v33  ;;  %1417 = vst.msk [vmem:[#allocation2 + $0x131] sm:$0xff] %vm732_vm2, %v16100_v33  ;;  %v13404_v61 = vpop.f32.mrb[38].mxu1  ;;  %13497 = vmatprep.mubr.msk.f32.mxu1 %vm732_vm2, %v16100_v33  ;;  %v11809_v33 = vld [vmem:[%s20133_s4 + $0x4a0] sm:$0xff] }
 0x125   :  { %v16116_v56 = vmax.f32 %v13404_v61, 0.0  ;;  %v538_v48 = vpop.f32.mrb[39].mxu1  ;;  %13498 = vmatmul.mubr.msk.f32.gmra.mrb[100].mxu1 %vm732_vm2, %v16094_v44  ;;  %v16120_v0 = vpop.permute.xlu1 %2184  ;;  %v11810_v61 = vld [vmem:[%s20133_s4 + $0x4a8] sm:$0xff] }
 0x126   :  { %v16122_v25 = vmax.f32 %v538_v48, 0.0  ;;  %v16124_v26 = vpop.permute.xlu0 %2179  ;;  %3853 = vperm.xlu1 %14939, %v11808_v29   ;;  %3848 = vperm.xlu0 %14938, %v11807_v40  }
 0x127   :  { %20298 = vst [vmem:[#allocation98_spill] sm:$0xff] %v16116_v56  ;;  %1420 = vst.msk [vmem:[#allocation2 + $0x149] sm:$0xff] %vm732_vm2, %v16116_v56 }
 0x128   :  { %20299 = vst [vmem:[#allocation99_spill] sm:$0xff] %v16122_v25  ;;  %1419 = vst.msk [vmem:[#allocation2 + $0x141] sm:$0xff] %vm732_vm2, %v16122_v25  ;;  %v13407_v48 = vpop.f32.mrb[40].mxu1  ;;  %13500 = vmatprep.mubr.msk.f32.mxu1 %vm732_vm2, %v16122_v25  ;;  %v11811_v25 = vld [vmem:[%s20133_s4 + $0x4b0] sm:$0xff] }
 0x129   :  { %v16138_v29 = vmax.f32 %v13407_v48, 0.0  ;;  %v548_v40 = vpop.f32.mrb[41].mxu1  ;;  %13501 = vmatmul.mubr.msk.f32.gmra.mrb[102].mxu1 %vm732_vm2, %v16116_v56  ;;  %v16142_v44 = vpop.permute.xlu1 %2194  ;;  %v11812_v48 = vld [vmem:[%s20133_s4 + $0x4b8] sm:$0xff] }
 0x12a   :  { %v16144_v17 = vmax.f32 %v548_v40, 0.0  ;;  %v16146_v18 = vpop.permute.xlu0 %2189  ;;  %3863 = vperm.xlu1 %14939, %v11810_v61   ;;  %3858 = vperm.xlu0 %14938, %v11809_v33  }
 0x12b   :  { %20300 = vst [vmem:[#allocation100_spill] sm:$0xff] %v16138_v29  ;;  %1422 = vst.msk [vmem:[#allocation2 + $0x159] sm:$0xff] %vm732_vm2, %v16138_v29 }
 0x12c   :  { %20301 = vst [vmem:[#allocation101_spill] sm:$0xff] %v16144_v17  ;;  %1421 = vst.msk [vmem:[#allocation2 + $0x151] sm:$0xff] %vm732_vm2, %v16144_v17  ;;  %v13410_v40 = vpop.f32.mrb[42].mxu1  ;;  %13503 = vmatprep.mubr.msk.f32.mxu1 %vm732_vm2, %v16144_v17  ;;  %v11813_v17 = vld [vmem:[%s20133_s4 + $0x4c0] sm:$0xff] }
 0x12d   :  { %v16160_v61 = vmax.f32 %v13410_v40, 0.0  ;;  %v558_v33 = vpop.f32.mrb[43].mxu1  ;;  %13504 = vmatmul.mubr.msk.f32.gmra.mrb[104].mxu1 %vm732_vm2, %v16138_v29  ;;  %v16164_v56 = vpop.permute.xlu1 %2204  ;;  %v11814_v40 = vld [vmem:[%s20133_s4 + $0x4c8] sm:$0xff] }
 0x12e   :  { %v16166_v9 = vmax.f32 %v558_v33, 0.0  ;;  %v16168_v10 = vpop.permute.xlu0 %2199  ;;  %3873 = vperm.xlu1 %14939, %v11812_v48   ;;  %3868 = vperm.xlu0 %14938, %v11811_v25  }
 0x12f   :  { %20302 = vst [vmem:[#allocation102_spill] sm:$0xff] %v16160_v61  ;;  %1424 = vst.msk [vmem:[#allocation2 + $0x169] sm:$0xff] %vm732_vm2, %v16160_v61 }
 0x130   :  { %20303 = vst [vmem:[#allocation103_spill] sm:$0xff] %v16166_v9  ;;  %1423 = vst.msk [vmem:[#allocation2 + $0x161] sm:$0xff] %vm732_vm2, %v16166_v9  ;;  %v13413_v33 = vpop.f32.mrb[44].mxu1  ;;  %13506 = vmatprep.mubr.msk.f32.mxu1 %vm732_vm2, %v16166_v9  ;;  %v11815_v9 = vld [vmem:[%s20133_s4 + $0x4d0] sm:$0xff] }
 0x131   :  { %v16182_v48 = vmax.f32 %v13413_v33, 0.0  ;;  %v568_v25 = vpop.f32.mrb[45].mxu1  ;;  %13507 = vmatmul.mubr.msk.f32.gmra.mrb[106].mxu1 %vm732_vm2, %v16160_v61  ;;  %v16186_v29 = vpop.permute.xlu1 %2214  ;;  %v11816_v33 = vld [vmem:[%s20133_s4 + $0x4d8] sm:$0xff] }
 0x132   :  { %v16188_v2 = vmax.f32 %v568_v25, 0.0  ;;  %v16190_v3 = vpop.permute.xlu0 %2209  ;;  %3883 = vperm.xlu1 %14939, %v11814_v40   ;;  %3878 = vperm.xlu0 %14938, %v11813_v17  }
 0x133   :  { %20304 = vst [vmem:[#allocation104_spill] sm:$0xff] %v16182_v48  ;;  %1426 = vst.msk [vmem:[#allocation2 + $0x179] sm:$0xff] %vm732_vm2, %v16182_v48 }
 0x134   :  { %20305 = vst [vmem:[#allocation105_spill] sm:$0xff] %v16188_v2  ;;  %1425 = vst.msk [vmem:[#allocation2 + $0x171] sm:$0xff] %vm732_vm2, %v16188_v2  ;;  %v13416_v25 = vpop.f32.mrb[46].mxu1  ;;  %13509 = vmatprep.mubr.msk.f32.mxu1 %vm732_vm2, %v16188_v2  ;;  %v11817_v2 = vld [vmem:[%s20133_s4 + $0x4e0] sm:$0xff] }
 0x135   :  { %v16204_v40 = vmax.f32 %v13416_v25, 0.0  ;;  %v578_v17 = vpop.f32.mrb[47].mxu1  ;;  %13510 = vmatmul.mubr.msk.f32.gmra.mrb[108].mxu1 %vm732_vm2, %v16182_v48  ;;  %v16208_v61 = vpop.permute.xlu1 %2224  ;;  %v11818_v25 = vld [vmem:[%s20133_s4 + $0x4e8] sm:$0xff] }
 0x136   :  { %v16210_v62 = vmax.f32 %v578_v17, 0.0  ;;  %v16212_v63 = vpop.permute.xlu0 %2219  ;;  %3893 = vperm.xlu1 %14939, %v11816_v33   ;;  %3888 = vperm.xlu0 %14938, %v11815_v9  }
 0x137   :  { %20306 = vst [vmem:[#allocation106_spill] sm:$0xff] %v16204_v40  ;;  %1428 = vst.msk [vmem:[#allocation2 + $0x189] sm:$0xff] %vm732_vm2, %v16204_v40 }
 0x138   :  { %20307 = vst [vmem:[#allocation107_spill] sm:$0xff] %v16210_v62  ;;  %1427 = vst.msk [vmem:[#allocation2 + $0x181] sm:$0xff] %vm732_vm2, %v16210_v62  ;;  %v13419_v17 = vpop.f32.mrb[48].mxu1  ;;  %13512 = vmatprep.mubr.msk.f32.mxu1 %vm732_vm2, %v16210_v62  ;;  %v11819_v62 = vld [vmem:[%s20133_s4 + $0x4f0] sm:$0xff] }
 0x139   :  { %v16226_v33 = vmax.f32 %v13419_v17, 0.0  ;;  %v588_v9 = vpop.f32.mrb[49].mxu1  ;;  %13513 = vmatmul.mubr.msk.f32.gmra.mrb[110].mxu1 %vm732_vm2, %v16204_v40  ;;  %v16230_v48 = vpop.permute.xlu1 %2234  ;;  %v11820_v17 = vld [vmem:[%s20133_s4 + $0x4f8] sm:$0xff] }
 0x13a   :  { %v16232_v58 = vmax.f32 %v588_v9, 0.0  ;;  %v16234_v59 = vpop.permute.xlu0 %2229  ;;  %3903 = vperm.xlu1 %14939, %v11818_v25   ;;  %3898 = vperm.xlu0 %14938, %v11817_v2  }
 0x13b   :  { %20308 = vst [vmem:[#allocation108_spill] sm:$0xff] %v16226_v33  ;;  %1430 = vst.msk [vmem:[#allocation2 + $0x199] sm:$0xff] %vm732_vm2, %v16226_v33 }
 0x13c   :  { %20309 = vst [vmem:[#allocation109_spill] sm:$0xff] %v16232_v58  ;;  %1429 = vst.msk [vmem:[#allocation2 + $0x191] sm:$0xff] %vm732_vm2, %v16232_v58  ;;  %v13422_v9 = vpop.f32.mrb[50].mxu1  ;;  %13515 = vmatprep.mubr.msk.f32.mxu1 %vm732_vm2, %v16232_v58  ;;  %v11821_v58 = vld [vmem:[%s20133_s4 + $0x500] sm:$0xff] }
 0x13d   :  { %v16248_v25 = vmax.f32 %v13422_v9, 0.0  ;;  %v598_v2 = vpop.f32.mrb[51].mxu1  ;;  %13516 = vmatmul.mubr.msk.f32.gmra.mrb[112].mxu1 %vm732_vm2, %v16226_v33  ;;  %v16252_v40 = vpop.permute.xlu1 %2244  ;;  %v11822_v9 = vld [vmem:[%s20133_s4 + $0x508] sm:$0xff] }
 0x13e   :  { %v16254_v54 = vmax.f32 %v598_v2, 0.0  ;;  %v16256_v55 = vpop.permute.xlu0 %2239  ;;  %3913 = vperm.xlu1 %14939, %v11820_v17   ;;  %3908 = vperm.xlu0 %14938, %v11819_v62  }
 0x13f   :  { %20310 = vst [vmem:[#allocation110_spill] sm:$0xff] %v16248_v25  ;;  %1432 = vst.msk [vmem:[#allocation2 + $0x1a9] sm:$0xff] %vm732_vm2, %v16248_v25 }
 0x140   :  { %20311 = vst [vmem:[#allocation111_spill] sm:$0xff] %v16254_v54  ;;  %1431 = vst.msk [vmem:[#allocation2 + $0x1a1] sm:$0xff] %vm732_vm2, %v16254_v54  ;;  %v13425_v2 = vpop.f32.mrb[52].mxu1  ;;  %13518 = vmatprep.mubr.msk.f32.mxu1 %vm732_vm2, %v16254_v54  ;;  %v11823_v54 = vld [vmem:[%s20133_s4 + $0x510] sm:$0xff] }
 0x141   :  { %v16270_v17 = vmax.f32 %v13425_v2, 0.0  ;;  %v608_v62 = vpop.f32.mrb[53].mxu1  ;;  %13519 = vmatmul.mubr.msk.f32.gmra.mrb[114].mxu1 %vm732_vm2, %v16248_v25  ;;  %v16274_v33 = vpop.permute.xlu1 %2254  ;;  %v11824_v2 = vld [vmem:[%s20133_s4 + $0x518] sm:$0xff] }
 0x142   :  { %v16276_v50 = vmax.f32 %v608_v62, 0.0  ;;  %v16278_v51 = vpop.permute.xlu0 %2249  ;;  %3923 = vperm.xlu1 %14939, %v11822_v9   ;;  %3918 = vperm.xlu0 %14938, %v11821_v58  }
 0x143   :  { %20312 = vst [vmem:[#allocation112_spill] sm:$0xff] %v16270_v17  ;;  %1434 = vst.msk [vmem:[#allocation2 + $0x1b9] sm:$0xff] %vm732_vm2, %v16270_v17 }
 0x144   :  { %20313 = vst [vmem:[#allocation113_spill] sm:$0xff] %v16276_v50  ;;  %1433 = vst.msk [vmem:[#allocation2 + $0x1b1] sm:$0xff] %vm732_vm2, %v16276_v50  ;;  %v13428_v62 = vpop.f32.mrb[54].mxu1  ;;  %13521 = vmatprep.mubr.msk.f32.mxu1 %vm732_vm2, %v16276_v50  ;;  %v11825_v50 = vld [vmem:[%s20133_s4 + $0x520] sm:$0xff] }
 0x145   :  { %v16292_v9 = vmax.f32 %v13428_v62, 0.0  ;;  %v618_v58 = vpop.f32.mrb[55].mxu1  ;;  %13522 = vmatmul.mubr.msk.f32.gmra.mrb[116].mxu1 %vm732_vm2, %v16270_v17  ;;  %v16296_v25 = vpop.permute.xlu1 %2264  ;;  %v11826_v62 = vld [vmem:[%s20133_s4 + $0x528] sm:$0xff] }
 0x146   :  { %v16298_v46 = vmax.f32 %v618_v58, 0.0  ;;  %v16300_v47 = vpop.permute.xlu0 %2259  ;;  %3933 = vperm.xlu1 %14939, %v11824_v2   ;;  %3928 = vperm.xlu0 %14938, %v11823_v54  }
 0x147   :  { %20314 = vst [vmem:[#allocation114_spill] sm:$0xff] %v16292_v9  ;;  %1436 = vst.msk [vmem:[#allocation2 + $0x1c9] sm:$0xff] %vm732_vm2, %v16292_v9 }
 0x148   :  { %20315 = vst [vmem:[#allocation115_spill] sm:$0xff] %v16298_v46  ;;  %1435 = vst.msk [vmem:[#allocation2 + $0x1c1] sm:$0xff] %vm732_vm2, %v16298_v46  ;;  %v13431_v58 = vpop.f32.mrb[56].mxu1  ;;  %13524 = vmatprep.mubr.msk.f32.mxu1 %vm732_vm2, %v16298_v46  ;;  %v11827_v46 = vld [vmem:[%s20133_s4 + $0x530] sm:$0xff] }
 0x149   :  { %v16314_v2 = vmax.f32 %v13431_v58, 0.0  ;;  %v628_v54 = vpop.f32.mrb[57].mxu1  ;;  %13525 = vmatmul.mubr.msk.f32.gmra.mrb[118].mxu1 %vm732_vm2, %v16292_v9  ;;  %v16318_v17 = vpop.permute.xlu1 %2274  ;;  %v11828_v58 = vld [vmem:[%s20133_s4 + $0x538] sm:$0xff] }
 0x14a   :  { %v16320_v42 = vmax.f32 %v628_v54, 0.0  ;;  %v16322_v43 = vpop.permute.xlu0 %2269  ;;  %3943 = vperm.xlu1 %14939, %v11826_v62   ;;  %3938 = vperm.xlu0 %14938, %v11825_v50  }
 0x14b   :  { %20316 = vst [vmem:[#allocation116_spill] sm:$0xff] %v16314_v2  ;;  %1438 = vst.msk [vmem:[#allocation2 + $0x1d9] sm:$0xff] %vm732_vm2, %v16314_v2 }
 0x14c   :  { %20317 = vst [vmem:[#allocation117_spill] sm:$0xff] %v16320_v42  ;;  %1437 = vst.msk [vmem:[#allocation2 + $0x1d1] sm:$0xff] %vm732_vm2, %v16320_v42  ;;  %v13434_v54 = vpop.f32.mrb[58].mxu1  ;;  %13527 = vmatprep.mubr.msk.f32.mxu1 %vm732_vm2, %v16320_v42  ;;  %v11829_v42 = vld [vmem:[%s20133_s4 + $0x540] sm:$0xff] }
 0x14d   :  { %v16336_v62 = vmax.f32 %v13434_v54, 0.0  ;;  %v638_v50 = vpop.f32.mrb[59].mxu1  ;;  %13528 = vmatmul.mubr.msk.f32.gmra.mrb[120].mxu1 %vm732_vm2, %v16314_v2  ;;  %v16340_v9 = vpop.permute.xlu1 %2284  ;;  %v11830_v54 = vld [vmem:[%s20133_s4 + $0x548] sm:$0xff] }
 0x14e   :  { %v16342_v6 = vmax.f32 %v638_v50, 0.0  ;;  %v16344_v39 = vpop.permute.xlu0 %2279  ;;  %3953 = vperm.xlu1 %14939, %v11828_v58   ;;  %3948 = vperm.xlu0 %14938, %v11827_v46  }
 0x14f   :  { %20318 = vst [vmem:[#allocation118_spill] sm:$0xff] %v16336_v62  ;;  %1440 = vst.msk [vmem:[#allocation2 + $0x1e9] sm:$0xff] %vm732_vm2, %v16336_v62 }
 0x150   :  { %20319 = vst [vmem:[#allocation119_spill] sm:$0xff] %v16342_v6  ;;  %1439 = vst.msk [vmem:[#allocation2 + $0x1e1] sm:$0xff] %vm732_vm2, %v16342_v6  ;;  %v13437_v50 = vpop.f32.mrb[60].mxu1  ;;  %13530 = vmatprep.mubr.msk.f32.mxu1 %vm732_vm2, %v16342_v6  ;;  %v11831_v6 = vld [vmem:[%s20133_s4 + $0x550] sm:$0xff] }
 0x151   :  { %v16358_v58 = vmax.f32 %v13437_v50, 0.0  ;;  %v648_v46 = vpop.f32.mrb[61].mxu1  ;;  %13531 = vmatmul.mubr.msk.f32.gmra.mrb[122].mxu1 %vm732_vm2, %v16336_v62  ;;  %v16362_v2 = vpop.permute.xlu1 %2294  ;;  %v11832_v50 = vld [vmem:[%s20133_s4 + $0x558] sm:$0xff] }
 0x152   :  { %v16364_v35 = vmax.f32 %v648_v46, 0.0  ;;  %v16366_v36 = vpop.permute.xlu0 %2289  ;;  %3963 = vperm.xlu1 %14939, %v11830_v54   ;;  %3958 = vperm.xlu0 %14938, %v11829_v42   ;;  %v1958_v54 = vld [vmem:[#allocation2 + $0x1] sm:$0xff] }
 0x153   :  { %20320 = vst [vmem:[#allocation120_spill] sm:$0xff] %v16358_v58  ;;  %1442 = vst.msk [vmem:[#allocation2 + $0x1f9] sm:$0xff] %vm732_vm2, %v16358_v58  ;;  %v2407_v28 = vmul.f32 %v15926_v52, %v1958_v54  ;;  %v11836_v54 = vld [vmem:[%s20133_s4 + $0x578] sm:$0xff] }
 0x154   :  { %20321 = vst [vmem:[#allocation121_spill] sm:$0xff] %v16364_v35  ;;  %1441 = vst.msk [vmem:[#allocation2 + $0x1f1] sm:$0xff] %vm732_vm2, %v16364_v35  ;;  %v13440_v46 = vpop.f32.mrb[62].mxu1  ;;  %13533 = vmatprep.mubr.msk.f32.mxu1 %vm732_vm2, %v16364_v35  ;;  %v1959_v35 = vld [vmem:[#allocation2 + $0x9] sm:$0xff] }
 0x155   :  { %v16380_v42 = vmax.f32 %v13440_v46, 0.0  ;;  %v658_v62 = vpop.f32.mrb[63].mxu1  ;;  %13534 = vmatmul.mubr.msk.f32.gmra.mrb[124].mxu1 %vm732_vm2, %v16358_v58  ;;  %v16384_v31 = vpop.permute.xlu1 %2304  ;;  %v11834_v46 = vld [vmem:[%s20133_s4 + $0x568] sm:$0xff]  ;;  %v2408_v52 = vmul.f32 %v15922_v60, %v1959_v35 }
 0x156   :  { %v16386_v32 = vmax.f32 %v658_v62, 0.0  ;;  %v16388_v27 = vpop.permute.xlu0 %2299  ;;  %3973 = vperm.xlu1 %14939, %v11832_v50   ;;  %3968 = vperm.xlu0 %14938, %v11831_v6   ;;  %v11833_v6 = vld [vmem:[%s20133_s4 + $0x560] sm:$0xff]  ;;  %v1960_v62 = vld [vmem:[#allocation2 + $0x11] sm:$0xff] }
 0x157   :  { %20322 = vst [vmem:[#allocation122_spill] sm:$0xff] %v16380_v42  ;;  %1444 = vst.msk [vmem:[#allocation2 + $0x209] sm:$0xff] %vm732_vm2, %v16380_v42 }
 0x158   :  { %20323 = vst [vmem:[#allocation123_spill] sm:$0xff] %v16386_v32  ;;  %1443 = vst.msk [vmem:[#allocation2 + $0x201] sm:$0xff] %vm732_vm2, %v16386_v32  ;;  %13536 = vmatprep.mubr.msk.f32.mxu1 %vm732_vm2, %v16386_v32  ;;  %v1957_v32 = vld [vmem:[%s20137_s3] sm:$0xff] }
 0x159   :  { %13537 = vmatmul.mubr.msk.f32.gmra.mrb[126].mxu1 %vm732_vm2, %v16380_v42  ;;  %v16405_v50 = vpop.permute.xlu1 %2314  ;;  %v2409_v42 = vmul.f32 %v15948_v30, %v1960_v62  ;;  %13637 = vmatprep.subr.mxu1 %v1957_v32  ;;  %v11838_v30 = vld [vmem:[%s20133_s4 + $0x588] sm:$0xff] }
 0x15a   :  { %v16407_v58 = vpop.permute.xlu0 %2309  ;;  %13541 = vmatprep.mubr.msk.f32.mxu1 %vm732_vm2, %v2407_v28  ;;  %3983 = vperm.xlu1 %14939, %v11834_v46   ;;  %v1962_v28 = vld [vmem:[#allocation2 + $0x21] sm:$0xff]  ;;  %v2410_v46 = vmul.f32 %v15944_v45, %v1961_v23  ;;  %v11839_v45 = vld [vmem:[%s20133_s4 + $0x590] sm:$0xff] }
 0x15b   :  { %3978 = vperm.xlu0 %14938, %v11833_v6   ;;  %v1963_v6 = vld [vmem:[#allocation2 + $0x29] sm:$0xff]  ;;  %v2411_v62 = vmul.f32 %v15970_v53, %v1962_v28  ;;  %v2413_v53 = vmul.f32 %v15992_v5, %v1964_v19  ;;  %v1966_v28 = vld [vmem:[#allocation2 + $0x41] sm:$0xff] }
 0x15c   :  { %v2412_v23 = vmul.f32 %v15966_v21, %v1963_v6  ;;  %v11842_v19 = vld [vmem:[%s20133_s4 + $0x5a8] sm:$0xff]  ;;  %v2415_v6 = vmul.f32 %v16014_v37, %v1966_v28  ;;  %v11844_v37 = vld [vmem:[%s20133_s4 + $0x5b8] sm:$0xff] }
 0x15d   :  { %13542 = vmatmul.mubr.msk.f32.vlgmr.msra.gmra.mrb[128].mxu1 %vm732_vm2, %v2408_v52  ;;  %v16422_v35 = vpop.permute.xlu1 %2324  ;;  %v11837_v52 = vld [vmem:[%s20133_s4 + $0x580] sm:$0xff]  ;;  %v1967_v5 = vld [vmem:[#allocation2 + $0x49] sm:$0xff] }
 0x15e   :  { %v16424_v60 = vpop.permute.xlu0 %2319  ;;  %13544 = vmatprep.mubr.msk.f32.mxu1 %vm732_vm2, %v2409_v42  ;;  %3993 = vperm.xlu1 %14939, %v11836_v54   ;;  %v1970_v28 = vld [vmem:[#allocation2 + $0x61] sm:$0xff] }
 0x15f   :  { %3988 = vperm.xlu0 %14938, %v11835_v24   ;;  %13638 = vmatpush3.msra.mxu1 %v1957_v32  ;;  %v11840_v24 = vld [vmem:[%s20133_s4 + $0x598] sm:$0xff] }
 0x160   :  { %v1965_v32 = vld [vmem:[#allocation2 + $0x39] sm:$0xff] }
 0x161   :  { %13545 = vmatmul.mubr.msk.f32.gmra.mrb[130].mxu1 %vm732_vm2, %v2410_v46  ;;  %v16436_v42 = vpop.permute.xlu1 %2334  ;;  %v2414_v21 = vmul.f32 %v15988_v57, %v1965_v32  ;;  %v2416_v57 = vmul.f32 %v16010_v22, %v1967_v5  ;;  %v1969_v32 = vld [vmem:[#allocation2 + $0x59] sm:$0xff]  ;;  %v1971_v5 = vld [vmem:[#allocation2 + $0x69] sm:$0xff] }
 0x162   :  { %v16438_v54 = vpop.permute.xlu0 %2329  ;;  %13547 = vmatprep.mubr.msk.f32.mxu1 %vm732_vm2, %v2411_v62  ;;  %4003 = vperm.xlu1 %14939, %v11838_v30   ;;  %v11841_v62 = vld [vmem:[%s20133_s4 + $0x5a0] sm:$0xff]  ;;  %v2418_v22 = vmul.f32 %v16032_v4, %v1969_v32  ;;  %v2420_v4 = vmul.f32 %v16054_v14, %v1971_v5  ;;  %v1975_v5 = vld [vmem:[#allocation2 + $0x89] sm:$0xff] }
 0x163   :  { %3998 = vperm.xlu0 %14938, %v11837_v52   ;;  %v1968_v52 = vld [vmem:[#allocation2 + $0x51] sm:$0xff]  ;;  %v1973_v32 = vld [vmem:[#allocation2 + $0x79] sm:$0xff] }
 0x164   :  { %v2422_v14 = vmul.f32 %v16076_v38, %v1973_v32  ;;  %v2424_v38 = vmul.f32 %v16098_v13, %v1975_v5  ;;  %v1977_v32 = vld [vmem:[#allocation2 + $0x99] sm:$0xff]  ;;  %v1979_v5 = vld [vmem:[#allocation2 + $0xa9] sm:$0xff] }
 0x165   :  { %13548 = vmatmul.mubr.msk.f32.gmra.mrb[132].mxu1 %vm732_vm2, %v2412_v23  ;;  %v16450_v46 = vpop.permute.xlu1 %2344  ;;  %v2426_v13 = vmul.f32 %v16120_v0, %v1977_v32  ;;  %v2428_v0 = vmul.f32 %v16142_v44, %v1979_v5  ;;  %v16560_v32 = vld [vmem:[%s20137_s3 + $0x18] sm:$0xff]  ;;  %v1982_v44 = vld [vmem:[#allocation2 + $0xc1] sm:$0xff] }
 0x166   :  { %v16452_v30 = vpop.permute.xlu0 %2339  ;;  %13550 = vmatprep.mubr.msk.f32.mxu1 %vm732_vm2, %v2413_v53  ;;  %4013 = vperm.xlu1 %14939, %v11840_v24   ;;  %v2417_v53 = vmul.f32 %v16036_v1, %v1968_v52  ;;  %v11846_v1 = vld [vmem:[%s20133_s4 + $0x5c8] sm:$0xff]  ;;  %v1972_v52 = vld [vmem:[#allocation2 + $0x71] sm:$0xff] }
 0x167   :  { %4008 = vperm.xlu0 %14938, %v11839_v45   ;;  %v11843_v45 = vld [vmem:[%s20133_s4 + $0x5b0] sm:$0xff]  ;;  %13833 = vmatprep.subr.mxu0 %v16560_v32 }
 0x168   :  { %13834 = vmatpush3.msra.mxu0 %v16560_v32 }
 0x169   :  { %13551 = vmatmul.mubr.msk.f32.gmra.mrb[134].mxu1 %vm732_vm2, %v2414_v21  ;;  %v16464_v23 = vpop.permute.xlu1 %2354 }
 0x16a   :  { %v16466_v24 = vpop.permute.xlu0 %2349  ;;  %13553 = vmatprep.mubr.msk.f32.mxu1 %vm732_vm2, %v2415_v6  ;;  %4023 = vperm.xlu1 %14939, %v11842_v19   ;;  %v2419_v6 = vmul.f32 %v16058_v49, %v1970_v28  ;;  %v11848_v49 = vld [vmem:[%s20133_s4 + $0x5d8] sm:$0xff]  ;;  %v1974_v28 = vld [vmem:[#allocation2 + $0x81] sm:$0xff] }
 0x16b   :  { %4018 = vperm.xlu0 %14938, %v11841_v62   ;;  %v11845_v62 = vld [vmem:[%s20133_s4 + $0x5c0] sm:$0xff] }
 0x16d   :  { %13554 = vmatmul.mubr.msk.f32.gmra.mrb[136].mxu1 %vm732_vm2, %v2416_v57  ;;  %v16478_v21 = vpop.permute.xlu1 %2364 }
 0x16e   :  { %v16480_v19 = vpop.permute.xlu0 %2359  ;;  %13556 = vmatprep.mubr.msk.f32.mxu1 %vm732_vm2, %v2417_v53  ;;  %4033 = vperm.xlu1 %14939, %v11844_v37   ;;  %v2421_v53 = vmul.f32 %v16080_v41, %v1972_v52  ;;  %v11850_v41 = vld [vmem:[%s20133_s4 + $0x5e8] sm:$0xff]  ;;  %v1976_v52 = vld [vmem:[#allocation2 + $0x91] sm:$0xff] }
 0x16f   :  { %4028 = vperm.xlu0 %14938, %v11843_v45   ;;  %v11847_v45 = vld [vmem:[%s20133_s4 + $0x5d0] sm:$0xff] }
 0x171   :  { %13557 = vmatmul.mubr.msk.f32.gmra.mrb[138].mxu1 %vm732_vm2, %v2418_v22  ;;  %v16492_v57 = vpop.permute.xlu1 %2374 }
 0x172   :  { %v16494_v37 = vpop.permute.xlu0 %2369  ;;  %13559 = vmatprep.mubr.msk.f32.mxu1 %vm732_vm2, %v2419_v6  ;;  %4043 = vperm.xlu1 %14939, %v11846_v1   ;;  %v2423_v6 = vmul.f32 %v16102_v34, %v1974_v28  ;;  %v11852_v34 = vld [vmem:[%s20133_s4 + $0x5f8] sm:$0xff]  ;;  %v1978_v28 = vld [vmem:[#allocation2 + $0xa1] sm:$0xff] }
 0x173   :  { %4038 = vperm.xlu0 %14938, %v11845_v62   ;;  %v11849_v62 = vld [vmem:[%s20133_s4 + $0x5e0] sm:$0xff] }
 0x175   :  { %13560 = vmatmul.mubr.msk.f32.gmra.mrb[140].mxu1 %vm732_vm2, %v2420_v4  ;;  %v16506_v22 = vpop.permute.xlu1 %2384 }
 0x176   :  { %v16508_v1 = vpop.permute.xlu0 %2379  ;;  %13562 = vmatprep.mubr.msk.f32.mxu1 %vm732_vm2, %v2421_v53  ;;  %4053 = vperm.xlu1 %14939, %v11848_v49   ;;  %v2425_v53 = vmul.f32 %v16124_v26, %v1976_v52  ;;  %v11919_v26 = vld [vmem:[%s20133_s4 + $0x608] sm:$0xff]  ;;  %v1980_v52 = vld [vmem:[#allocation2 + $0xb1] sm:$0xff] }
 0x177   :  { %4048 = vperm.xlu0 %14938, %v11847_v45   ;;  %v11851_v45 = vld [vmem:[%s20133_s4 + $0x5f0] sm:$0xff] }
 0x179   :  { %13563 = vmatmul.mubr.msk.f32.gmra.mrb[142].mxu1 %vm732_vm2, %v2422_v14  ;;  %v16520_v4 = vpop.permute.xlu1 %2394 }
 0x17a   :  { %v16522_v49 = vpop.permute.xlu0 %2389  ;;  %13565 = vmatprep.mubr.msk.f32.mxu1 %vm732_vm2, %v2423_v6  ;;  %4063 = vperm.xlu1 %14939, %v11850_v41   ;;  %v2427_v6 = vmul.f32 %v16146_v18, %v1978_v28  ;;  %v11921_v18 = vld [vmem:[%s20133_s4 + $0x618] sm:$0xff]  ;;  %v11920_v28 = vld [vmem:[%s20133_s4 + $0x610] sm:$0xff] }
 0x17b   :  { %4058 = vperm.xlu0 %14938, %v11849_v62   ;;  %v11918_v62 = vld [vmem:[%s20133_s4 + $0x600] sm:$0xff] }
 0x17d   :  { %13566 = vmatmul.mubr.msk.f32.gmra.mrb[144].mxu1 %vm732_vm2, %v2424_v38  ;;  %v16534_v14 = vpop.permute.xlu1 %2404 }
 0x17e   :  { %v16536_v41 = vpop.permute.xlu0 %2399  ;;  %13568 = vmatprep.mubr.msk.f32.mxu1 %vm732_vm2, %v2425_v53  ;;  %4073 = vperm.xlu1 %14939, %v11852_v34   ;;  %v1981_v53 = vld [vmem:[#allocation2 + $0xb9] sm:$0xff] }
 0x17f   :  { %4068 = vperm.xlu0 %14938, %v11851_v45   ;;  %v2429_v45 = vmul.f32 %v16168_v10, %v1980_v52  ;;  %v2430_v10 = vmul.f32 %v16164_v56, %v1981_v53  ;;  %v2431_v52 = vmul.f32 %v16190_v3, %v1982_v44  ;;  %v11925_v3 = vld [vmem:[%s20133_s4 + $0x638] sm:$0xff]  ;;  %v11924_v44 = vld [vmem:[%s20133_s4 + $0x630] sm:$0xff] }
 0x181   :  { %13569 = vmatmul.mubr.msk.f32.gmra.mrb[146].mxu1 %vm732_vm2, %v2426_v13  ;;  %v16548_v38 = vpop.permute.xlu1 %3763 }
 0x182   :  { %v16550_v34 = vpop.permute.xlu0 %3758  ;;  %13571 = vmatprep.mubr.msk.f32.mxu1 %vm732_vm2, %v2427_v6  ;;  %4919 = vperm.xlu1 %14939, %v11919_v26   ;;  %v16574_v26 = vld [vmem:[%s20137_s3 + $0x20] sm:$0xff]  ;;  %v11923_v6 = vld [vmem:[%s20133_s4 + $0x628] sm:$0xff] }
 0x183   :  { %4914 = vperm.xlu0 %14938, %v11918_v62   ;;  %13931 = vmatprep.subr.mxu0 %v16574_v26  ;;  %v1983_v62 = vld [vmem:[#allocation2 + $0xc9] sm:$0xff] }
 0x184   :  { %v2432_v53 = vmul.f32 %v16186_v29, %v1983_v62 }
 0x185   :  { %13572 = vmatmul.mubr.msk.f32.gmra.mrb[148].mxu1 %vm732_vm2, %v2428_v0  ;;  %v16568_v13 = vpop.permute.xlu1 %3773  ;;  %v11922_v0 = vld [vmem:[%s20133_s4 + $0x620] sm:$0xff] }
 0x186   :  { %20324 = vst [vmem:[#allocation124_spill] sm:$0xff] %v16568_v13  ;;  %v16576_v5 = vpop.permute.xlu0 %3768  ;;  %13574 = vmatprep.mubr.msk.f32.mxu1 %vm732_vm2, %v2429_v45  ;;  %4929 = vperm.xlu1 %14939, %v11921_v18   ;;  %v1984_v13 = vld [vmem:[#allocation2 + $0xd1] sm:$0xff]  ;;  %v1985_v45 = vld [vmem:[#allocation2 + $0xd9] sm:$0xff] }
 0x187   :  { %4924 = vperm.xlu0 %14938, %v11920_v28   ;;  %v2433_v28 = vmul.f32 %v16212_v63, %v1984_v13  ;;  %v2434_v29 = vmul.f32 %v16208_v61, %v1985_v45  ;;  %v11927_v63 = vld [vmem:[%s20133_s4 + $0x648] sm:$0xff]  ;;  %v1989_v45 = vld [vmem:[#allocation2 + $0xf9] sm:$0xff] }
 0x188   :  { %v1987_v13 = vld [vmem:[#allocation2 + $0xe9] sm:$0xff] }
 0x189   :  { %13575 = vmatmul.mubr.msk.f32.gmra.mrb[150].mxu1 %vm732_vm2, %v2430_v10  ;;  %v16589_v18 = vpop.permute.xlu1 %3783  ;;  %v1986_v10 = vld [vmem:[#allocation2 + $0xe1] sm:$0xff]  ;;  %v2436_v61 = vmul.f32 %v16230_v48, %v1987_v13  ;;  %v2438_v48 = vmul.f32 %v16252_v40, %v1989_v45  ;;  %v1991_v13 = vld [vmem:[#allocation2 + $0x109] sm:$0xff]  ;;  %v1993_v45 = vld [vmem:[#allocation2 + $0x119] sm:$0xff] }
 0x18a   :  { %20325 = vst [vmem:[#allocation125_spill] sm:$0xff] %v16589_v18  ;;  %v16591_v56 = vpop.permute.xlu0 %3778  ;;  %13577 = vmatprep.mubr.msk.f32.mxu1 %vm732_vm2, %v2431_v52  ;;  %4939 = vperm.xlu1 %14939, %v11923_v6   ;;  %v2435_v62 = vmul.f32 %v16234_v59, %v1986_v10  ;;  %v11926_v52 = vld [vmem:[%s20133_s4 + $0x640] sm:$0xff]  ;;  %v11929_v59 = vld [vmem:[%s20133_s4 + $0x658] sm:$0xff]  ;;  %v2440_v40 = vmul.f32 %v16274_v33, %v1991_v13  ;;  %v1995_v13 = vld [vmem:[#allocation2 + $0x129] sm:$0xff] }
 0x18b   :  { %4934 = vperm.xlu0 %14938, %v11922_v0   ;;  %v1988_v0 = vld [vmem:[#allocation2 + $0xf1] sm:$0xff]  ;;  %v1990_v10 = vld [vmem:[#allocation2 + $0x101] sm:$0xff]  ;;  %v2442_v33 = vmul.f32 %v16296_v25, %v1993_v45  ;;  %v2444_v25 = vmul.f32 %v16318_v17, %v1995_v13  ;;  %v1997_v45 = vld [vmem:[#allocation2 + $0x139] sm:$0xff] }
 0x18c   :  { %v2446_v17 = vmul.f32 %v16340_v9, %v1997_v45  ;;  %v1999_v13 = vld [vmem:[#allocation2 + $0x149] sm:$0xff]  ;;  %v2001_v45 = vld [vmem:[#allocation2 + $0x159] sm:$0xff] }
 0x18d   :  { %13578 = vmatmul.mubr.msk.f32.gmra.mrb[152].mxu1 %vm732_vm2, %v2432_v53  ;;  %v16603_v18 = vpop.permute.xlu1 %3793  ;;  %v2448_v9 = vmul.f32 %v16362_v2, %v1999_v13  ;;  %v2450_v2 = vmul.f32 %v16384_v31, %v2001_v45  ;;  %v2003_v13 = vld [vmem:[#allocation2 + $0x169] sm:$0xff]  ;;  %v2005_v45 = vld [vmem:[#allocation2 + $0x179] sm:$0xff] }
 0x18e   :  { %v16605_v6 = vpop.permute.xlu0 %3788  ;;  %13580 = vmatprep.mubr.msk.f32.mxu1 %vm732_vm2, %v2433_v28  ;;  %4949 = vperm.xlu1 %14939, %v11925_v3   ;;  %v2437_v28 = vmul.f32 %v16256_v55, %v1988_v0  ;;  %v11931_v55 = vld [vmem:[%s20133_s4 + $0x668] sm:$0xff]  ;;  %v1992_v0 = vld [vmem:[#allocation2 + $0x111] sm:$0xff]  ;;  %v2452_v31 = vmul.f32 %v16405_v50, %v2003_v13  ;;  %v2454_v50 = vmul.f32 %v16422_v35, %v2005_v45  ;;  %v2009_v45 = vld [vmem:[#allocation2 + $0x199] sm:$0xff] }
 0x18f   :  { %4944 = vperm.xlu0 %14938, %v11924_v44   ;;  %v11928_v44 = vld [vmem:[%s20133_s4 + $0x650] sm:$0xff] }
 0x190   :  { %v2007_v13 = vld [vmem:[#allocation2 + $0x189] sm:$0xff] }
 0x191   :  { %13581 = vmatmul.mubr.msk.f32.gmra.mrb[154].mxu1 %vm732_vm2, %v2434_v29  ;;  %v16617_v53 = vpop.permute.xlu1 %3803  ;;  %v2456_v35 = vmul.f32 %v16436_v42, %v2007_v13  ;;  %v2458_v42 = vmul.f32 %v16450_v46, %v2009_v45  ;;  %v2011_v13 = vld [vmem:[#allocation2 + $0x1a9] sm:$0xff]  ;;  %v2013_v45 = vld [vmem:[#allocation2 + $0x1b9] sm:$0xff] }
 0x192   :  { %v16619_v3 = vpop.permute.xlu0 %3798  ;;  %13583 = vmatprep.mubr.msk.f32.mxu1 %vm732_vm2, %v2435_v62  ;;  %4959 = vperm.xlu1 %14939, %v11927_v63   ;;  %v2439_v62 = vmul.f32 %v16278_v51, %v1990_v10  ;;  %v11933_v51 = vld [vmem:[%s20133_s4 + $0x678] sm:$0xff]  ;;  %v1994_v10 = vld [vmem:[#allocation2 + $0x121] sm:$0xff]  ;;  %v2460_v46 = vmul.f32 %v16464_v23, %v2011_v13  ;;  %v2462_v23 = vmul.f32 %v16478_v21, %v2013_v45  ;;  %v2015_v13 = vld [vmem:[#allocation2 + $0x1c9] sm:$0xff] }
 0x193   :  { %4954 = vperm.xlu0 %14938, %v11926_v52   ;;  %v11930_v52 = vld [vmem:[%s20133_s4 + $0x660] sm:$0xff]  ;;  %v2464_v21 = vmul.f32 %v16492_v57, %v2015_v13  ;;  %v2019_v13 = vld [vmem:[#allocation2 + $0x1e9] sm:$0xff] }
 0x194   :  { %v2017_v45 = vld [vmem:[#allocation2 + $0x1d9] sm:$0xff] }
 0x195   :  { %13584 = vmatmul.mubr.msk.f32.gmra.mrb[156].mxu1 %vm732_vm2, %v2436_v61  ;;  %v16631_v29 = vpop.permute.xlu1 %3813  ;;  %v2466_v57 = vmul.f32 %v16506_v22, %v2017_v45  ;;  %v2468_v22 = vmul.f32 %v16520_v4, %v2019_v13  ;;  %v2021_v45 = vld [vmem:[#allocation2 + $0x1f9] sm:$0xff] }
 0x196   :  { %v16633_v63 = vpop.permute.xlu0 %3808  ;;  %13586 = vmatprep.mubr.msk.f32.mxu1 %vm732_vm2, %v2437_v28  ;;  %4969 = vperm.xlu1 %14939, %v11929_v59   ;;  %v2441_v28 = vmul.f32 %v16300_v47, %v1992_v0  ;;  %v11935_v47 = vld [vmem:[%s20133_s4 + $0x688] sm:$0xff]  ;;  %v1996_v0 = vld [vmem:[#allocation2 + $0x131] sm:$0xff]  ;;  %v2470_v4 = vmul.f32 %v16534_v14, %v2021_v45 }
 0x197   :  { %4964 = vperm.xlu0 %14938, %v11928_v44   ;;  %v11932_v44 = vld [vmem:[%s20133_s4 + $0x670] sm:$0xff] }
 0x198   :  { %v11853_v45 = vld [vmem:[%s20137_s3 + $0x10] sm:$0xff] }
 0x199   :  { %13587 = vmatmul.mubr.msk.f32.gmra.mrb[158].mxu1 %vm732_vm2, %v2438_v48  ;;  %v16645_v61 = vpop.permute.xlu1 %3823  ;;  %13735 = vmatprep.subr.mxu1 %v11853_v45 }
 0x19a   :  { %v16647_v59 = vpop.permute.xlu0 %3818  ;;  %13589 = vmatprep.mubr.msk.f32.mxu1 %vm732_vm2, %v2439_v62  ;;  %4979 = vperm.xlu1 %14939, %v11931_v55   ;;  %v2443_v62 = vmul.f32 %v16322_v43, %v1994_v10  ;;  %v11937_v43 = vld [vmem:[%s20133_s4 + $0x698] sm:$0xff]  ;;  %v1998_v10 = vld [vmem:[#allocation2 + $0x141] sm:$0xff] }
 0x19b   :  { %4974 = vperm.xlu0 %14938, %v11930_v52   ;;  %v11934_v52 = vld [vmem:[%s20133_s4 + $0x680] sm:$0xff] }
 0x19d   :  { %13590 = vmatmul.mubr.msk.f32.gmra.mrb[160].mxu1 %vm732_vm2, %v2440_v40  ;;  %v16659_v48 = vpop.permute.xlu1 %3833 }
 0x19e   :  { %v16661_v55 = vpop.permute.xlu0 %3828  ;;  %13592 = vmatprep.mubr.msk.f32.mxu1 %vm732_vm2, %v2441_v28  ;;  %4989 = vperm.xlu1 %14939, %v11933_v51   ;;  %v2445_v28 = vmul.f32 %v16344_v39, %v1996_v0  ;;  %v11939_v39 = vld [vmem:[%s20133_s4 + $0x6a8] sm:$0xff]  ;;  %v2000_v0 = vld [vmem:[#allocation2 + $0x151] sm:$0xff] }
 0x19f   :  { %4984 = vperm.xlu0 %14938, %v11932_v44   ;;  %v11936_v44 = vld [vmem:[%s20133_s4 + $0x690] sm:$0xff] }
 0x1a1   :  { %13593 = vmatmul.mubr.msk.f32.gmra.mrb[162].mxu1 %vm732_vm2, %v2442_v33  ;;  %v16673_v40 = vpop.permute.xlu1 %3843 }
 0x1a2   :  { %v16675_v51 = vpop.permute.xlu0 %3838  ;;  %13595 = vmatprep.mubr.msk.f32.mxu1 %vm732_vm2, %v2443_v62  ;;  %4999 = vperm.xlu1 %14939, %v11935_v47   ;;  %v2447_v62 = vmul.f32 %v16366_v36, %v1998_v10  ;;  %v11941_v36 = vld [vmem:[%s20133_s4 + $0x6b8] sm:$0xff]  ;;  %v2002_v10 = vld [vmem:[#allocation2 + $0x161] sm:$0xff] }
 0x1a3   :  { %4994 = vperm.xlu0 %14938, %v11934_v52   ;;  %v11938_v52 = vld [vmem:[%s20133_s4 + $0x6a0] sm:$0xff] }
 0x1a5   :  { %13596 = vmatmul.mubr.msk.f32.gmra.mrb[164].mxu1 %vm732_vm2, %v2444_v25  ;;  %v16687_v33 = vpop.permute.xlu1 %3853 }
 0x1a6   :  { %v16689_v47 = vpop.permute.xlu0 %3848  ;;  %13598 = vmatprep.mubr.msk.f32.mxu1 %vm732_vm2, %v2445_v28  ;;  %5009 = vperm.xlu1 %14939, %v11937_v43   ;;  %v2449_v28 = vmul.f32 %v16388_v27, %v2000_v0  ;;  %v11943_v27 = vld [vmem:[%s20133_s4 + $0x6c8] sm:$0xff]  ;;  %v2004_v0 = vld [vmem:[#allocation2 + $0x171] sm:$0xff] }
 0x1a7   :  { %5004 = vperm.xlu0 %14938, %v11936_v44   ;;  %v11940_v44 = vld [vmem:[%s20133_s4 + $0x6b0] sm:$0xff] }
 0x1a9   :  { %13599 = vmatmul.mubr.msk.f32.gmra.mrb[166].mxu1 %vm732_vm2, %v2446_v17  ;;  %v16701_v25 = vpop.permute.xlu1 %3863 }
 0x1aa   :  { %v16703_v43 = vpop.permute.xlu0 %3858  ;;  %13601 = vmatprep.mubr.msk.f32.mxu1 %vm732_vm2, %v2447_v62  ;;  %5019 = vperm.xlu1 %14939, %v11939_v39   ;;  %v2451_v62 = vmul.f32 %v16407_v58, %v2002_v10  ;;  %v11945_v58 = vld [vmem:[%s20133_s4 + $0x6d8] sm:$0xff]  ;;  %v2006_v10 = vld [vmem:[#allocation2 + $0x181] sm:$0xff] }
 0x1ab   :  { %5014 = vperm.xlu0 %14938, %v11938_v52   ;;  %v11942_v52 = vld [vmem:[%s20133_s4 + $0x6c0] sm:$0xff] }
 0x1ad   :  { %13602 = vmatmul.mubr.msk.f32.gmra.mrb[168].mxu1 %vm732_vm2, %v2448_v9  ;;  %v16715_v17 = vpop.permute.xlu1 %3873 }
 0x1ae   :  { %v16717_v39 = vpop.permute.xlu0 %3868  ;;  %13604 = vmatprep.mubr.msk.f32.mxu1 %vm732_vm2, %v2449_v28  ;;  %5029 = vperm.xlu1 %14939, %v11941_v36   ;;  %v2453_v28 = vmul.f32 %v16424_v60, %v2004_v0  ;;  %v11947_v60 = vld [vmem:[%s20133_s4 + $0x6e8] sm:$0xff]  ;;  %v2008_v0 = vld [vmem:[#allocation2 + $0x191] sm:$0xff] }
 0x1af   :  { %5024 = vperm.xlu0 %14938, %v11940_v44   ;;  %v11944_v44 = vld [vmem:[%s20133_s4 + $0x6d0] sm:$0xff] }
 0x1b1   :  { %13605 = vmatmul.mubr.msk.f32.gmra.mrb[170].mxu1 %vm732_vm2, %v2450_v2  ;;  %v16729_v9 = vpop.permute.xlu1 %3883 }
 0x1b2   :  { %v16731_v36 = vpop.permute.xlu0 %3878  ;;  %13607 = vmatprep.mubr.msk.f32.mxu1 %vm732_vm2, %v2451_v62  ;;  %5039 = vperm.xlu1 %14939, %v11943_v27   ;;  %v2455_v62 = vmul.f32 %v16438_v54, %v2006_v10  ;;  %v11949_v54 = vld [vmem:[%s20133_s4 + $0x6f8] sm:$0xff]  ;;  %v2010_v10 = vld [vmem:[#allocation2 + $0x1a1] sm:$0xff] }
 0x1b3   :  { %5034 = vperm.xlu0 %14938, %v11942_v52   ;;  %v11946_v52 = vld [vmem:[%s20133_s4 + $0x6e0] sm:$0xff] }
 0x1b5   :  { %13608 = vmatmul.mubr.msk.f32.gmra.mrb[172].mxu1 %vm732_vm2, %v2452_v31  ;;  %v16743_v2 = vpop.permute.xlu1 %3893 }
 0x1b6   :  { %v16745_v27 = vpop.permute.xlu0 %3888  ;;  %13610 = vmatprep.mubr.msk.f32.mxu1 %vm732_vm2, %v2453_v28  ;;  %5049 = vperm.xlu1 %14939, %v11945_v58   ;;  %v2457_v28 = vmul.f32 %v16452_v30, %v2008_v0  ;;  %v11951_v30 = vld [vmem:[%s20133_s4 + $0x708] sm:$0xff]  ;;  %v2012_v0 = vld [vmem:[#allocation2 + $0x1b1] sm:$0xff] }
 0x1b7   :  { %5044 = vperm.xlu0 %14938, %v11944_v44   ;;  %v11948_v44 = vld [vmem:[%s20133_s4 + $0x6f0] sm:$0xff] }
 0x1b9   :  { %13611 = vmatmul.mubr.msk.f32.gmra.mrb[174].mxu1 %vm732_vm2, %v2454_v50  ;;  %v16757_v31 = vpop.permute.xlu1 %3903 }
 0x1ba   :  { %v16759_v58 = vpop.permute.xlu0 %3898  ;;  %13613 = vmatprep.mubr.msk.f32.mxu1 %vm732_vm2, %v2455_v62  ;;  %5059 = vperm.xlu1 %14939, %v11947_v60   ;;  %v2459_v62 = vmul.f32 %v16466_v24, %v2010_v10  ;;  %v11953_v24 = vld [vmem:[%s20133_s4 + $0x718] sm:$0xff]  ;;  %v2014_v10 = vld [vmem:[#allocation2 + $0x1c1] sm:$0xff] }
 0x1bb   :  { %5054 = vperm.xlu0 %14938, %v11946_v52   ;;  %v11950_v52 = vld [vmem:[%s20133_s4 + $0x700] sm:$0xff] }
 0x1bd   :  { %13614 = vmatmul.mubr.msk.f32.gmra.mrb[176].mxu1 %vm732_vm2, %v2456_v35  ;;  %v16771_v50 = vpop.permute.xlu1 %3913 }
 0x1be   :  { %20326 = vst [vmem:[#allocation126_spill] sm:$0xff] %v16771_v50  ;;  %v16773_v60 = vpop.permute.xlu0 %3908  ;;  %13616 = vmatprep.mubr.msk.f32.mxu1 %vm732_vm2, %v2457_v28  ;;  %5069 = vperm.xlu1 %14939, %v11949_v54   ;;  %v2461_v28 = vmul.f32 %v16480_v19, %v2012_v0  ;;  %v11955_v19 = vld [vmem:[%s20133_s4 + $0x728] sm:$0xff]  ;;  %v2016_v0 = vld [vmem:[#allocation2 + $0x1d1] sm:$0xff] }
 0x1bf   :  { %20327 = vst [vmem:[#allocation127_spill] sm:$0xff] %v16773_v60  ;;  %5064 = vperm.xlu0 %14938, %v11948_v44   ;;  %v11952_v44 = vld [vmem:[%s20133_s4 + $0x710] sm:$0xff]  ;;  %v17084_v50 = vld [vmem:[#allocation2 + $0xb8] sm:$0xff] }
 0x1c0   :  { %v1480_v60 = vld [vmem:[#allocation2 + $0x118] sm:$0xff] }
 0x1c1   :  { %13617 = vmatmul.mubr.msk.f32.gmra.mrb[178].mxu1 %vm732_vm2, %v2458_v42  ;;  %v16785_v35 = vpop.permute.xlu1 %3923 }
 0x1c2   :  { %20328 = vst [vmem:[#allocation128_spill] sm:$0xff] %v16785_v35  ;;  %v16787_v54 = vpop.permute.xlu0 %3918  ;;  %13619 = vmatprep.mubr.msk.f32.mxu1 %vm732_vm2, %v2459_v62  ;;  %5079 = vperm.xlu1 %14939, %v11951_v30   ;;  %v2463_v62 = vmul.f32 %v16494_v37, %v2014_v10  ;;  %v11957_v37 = vld [vmem:[%s20133_s4 + $0x738] sm:$0xff]  ;;  %v2018_v10 = vld [vmem:[#allocation2 + $0x1e1] sm:$0xff] }
 0x1c3   :  { %20329 = vst [vmem:[#allocation129_spill] sm:$0xff] %v16787_v54  ;;  %5074 = vperm.xlu0 %14938, %v11950_v52   ;;  %v11954_v52 = vld [vmem:[%s20133_s4 + $0x720] sm:$0xff]  ;;  %v20375_v35 = vld [vmem:[#allocation19_spill] sm:$0xff] }
 0x1c5   :  { %13620 = vmatmul.mubr.msk.f32.gmra.mrb[180].mxu1 %vm732_vm2, %v2460_v46  ;;  %v16799_v42 = vpop.permute.xlu1 %3933 }
 0x1c6   :  { %20330 = vst [vmem:[#allocation130_spill] sm:$0xff] %v16799_v42  ;;  %v16801_v30 = vpop.permute.xlu0 %3928  ;;  %13622 = vmatprep.mubr.msk.f32.mxu1 %vm732_vm2, %v2461_v28  ;;  %5089 = vperm.xlu1 %14939, %v11953_v24   ;;  %v2465_v28 = vmul.f32 %v16508_v1, %v2016_v0  ;;  %v11959_v1 = vld [vmem:[%s20133_s4 + $0x748] sm:$0xff]  ;;  %v2020_v0 = vld [vmem:[#allocation2 + $0x1f1] sm:$0xff] }
 0x1c7   :  { %20331 = vst [vmem:[#allocation131_spill] sm:$0xff] %v16801_v30  ;;  %5084 = vperm.xlu0 %14938, %v11952_v44   ;;  %v11956_v44 = vld [vmem:[%s20133_s4 + $0x730] sm:$0xff]  ;;  %v17069_v42 = vld [vmem:[#allocation2 + $0xa8] sm:$0xff] }
 0x1c9   :  { %13623 = vmatmul.mubr.msk.f32.gmra.mrb[182].mxu1 %vm732_vm2, %v2462_v23  ;;  %v16813_v46 = vpop.permute.xlu1 %3943 }
 0x1ca   :  { %20332 = vst [vmem:[#allocation132_spill] sm:$0xff] %v16813_v46  ;;  %v16815_v24 = vpop.permute.xlu0 %3938  ;;  %13625 = vmatprep.mubr.msk.f32.mxu1 %vm732_vm2, %v2463_v62  ;;  %5099 = vperm.xlu1 %14939, %v11955_v19   ;;  %v2467_v62 = vmul.f32 %v16522_v49, %v2018_v10  ;;  %v11961_v49 = vld [vmem:[%s20133_s4 + $0x758] sm:$0xff]  ;;  %v1445_v10 = vld [vmem:[#allocation2] sm:$0xff] }
 0x1cb   :  { %20333 = vst [vmem:[#allocation133_spill] sm:$0xff] %v16815_v24  ;;  %5094 = vperm.xlu0 %14938, %v11954_v52   ;;  %v11958_v52 = vld [vmem:[%s20133_s4 + $0x740] sm:$0xff]  ;;  %v1893_v13 = vmul.f32 %v15479_v8, %v1445_v10  ;;  %v11965_v8 = vld [vmem:[%s20133_s4 + $0x778] sm:$0xff] }
 0x1cc   :  { %v16888_v10 = vld [vmem:[#allocation2 + $0x18] sm:$0xff] }
 0x1cd   :  { %13626 = vmatmul.mubr.msk.f32.gmra.mrb[184].mxu1 %vm732_vm2, %v2464_v21  ;;  %v16827_v23 = vpop.permute.xlu1 %3953  ;;  %v17049_v46 = vld [vmem:[#allocation2 + $0x98] sm:$0xff] }
 0x1ce   :  { %20334 = vst [vmem:[#allocation134_spill] sm:$0xff] %v16827_v23  ;;  %v16829_v19 = vpop.permute.xlu0 %3948  ;;  %13628 = vmatprep.mubr.msk.f32.mxu1 %vm732_vm2, %v2465_v28  ;;  %5109 = vperm.xlu1 %14939, %v11957_v37   ;;  %v2469_v28 = vmul.f32 %v16536_v41, %v2020_v0  ;;  %v11963_v41 = vld [vmem:[%s20133_s4 + $0x768] sm:$0xff]  ;;  %v20373_v24 = vld [vmem:[#allocation17_spill] sm:$0xff] }
 0x1cf   :  { %20335 = vst [vmem:[#allocation135_spill] sm:$0xff] %v16829_v19  ;;  %5104 = vperm.xlu0 %14938, %v11956_v44   ;;  %v11960_v44 = vld [vmem:[%s20133_s4 + $0x750] sm:$0xff]  ;;  %v17029_v23 = vld [vmem:[#allocation2 + $0x88] sm:$0xff] }
 0x1d0   :  { %v20369_v19 = vld [vmem:[#allocation15_spill] sm:$0xff] }
 0x1d1   :  { %13629 = vmatmul.mubr.msk.f32.gmra.mrb[186].mxu1 %vm732_vm2, %v2466_v57  ;;  %v16841_v21 = vpop.permute.xlu1 %3963 }
 0x1d2   :  { %20336 = vst [vmem:[#allocation136_spill] sm:$0xff] %v16841_v21  ;;  %v16843_v37 = vpop.permute.xlu0 %3958  ;;  %13631 = vmatprep.mubr.msk.f32.mxu1 %vm732_vm2, %v2467_v62  ;;  %5119 = vperm.xlu1 %14939, %v11959_v1   ;;  %v1446_v62 = vld [vmem:[#allocation2 + $0x8] sm:$0xff]  ;;  %v17009_v21 = vld [vmem:[#allocation2 + $0x78] sm:$0xff] }
 0x1d3   :  { %20337 = vst [vmem:[#allocation137_spill] sm:$0xff] %v16843_v37  ;;  %5114 = vperm.xlu0 %14938, %v11958_v52   ;;  %v11962_v52 = vld [vmem:[%s20133_s4 + $0x760] sm:$0xff]  ;;  %v1894_v14 = vmul.f32 %v15489_v12, %v1446_v62  ;;  %v20365_v37 = vld [vmem:[#allocation13_spill] sm:$0xff] }
 0x1d5   :  { %13632 = vmatmul.mubr.msk.f32.gmra.mrb[188].mxu1 %vm732_vm2, %v2468_v22  ;;  %v16855_v57 = vpop.permute.xlu1 %3973  ;;  %v16871_v22 = vld [vmem:[#allocation2 + $0x10] sm:$0xff] }
 0x1d6   :  { %20338 = vst [vmem:[#allocation138_spill] sm:$0xff] %v16855_v57  ;;  %v16857_v1 = vpop.permute.xlu0 %3968  ;;  %13634 = vmatprep.mubr.msk.f32.mxu1 %vm732_vm2, %v2469_v28  ;;  %5129 = vperm.xlu1 %14939, %v11961_v49   ;;  %v1895_v28 = vmul.f32 %v15477_v7, %v16871_v22  ;;  %v1896_v7 = vmul.f32 %v15487_v11, %v16888_v10  ;;  %v16914_v11 = vld [vmem:[#allocation2 + $0x30] sm:$0xff]  ;;  %v16989_v57 = vld [vmem:[#allocation2 + $0x68] sm:$0xff] }
 0x1d7   :  { %20339 = vst [vmem:[#allocation139_spill] sm:$0xff] %v16857_v1  ;;  %5124 = vperm.xlu0 %14938, %v11960_v44   ;;  %v11964_v44 = vld [vmem:[%s20133_s4 + $0x770] sm:$0xff]  ;;  %v20361_v1 = vld [vmem:[#allocation11_spill] sm:$0xff] }
 0x1d9   :  { %13635 = vmatmul.mubr.msk.f32.gmra.mrb[190].mxu1 %vm732_vm2, %v2470_v4  ;;  %v16869_v0 = vpop.permute.xlu1 %3983  ;;  %v16893_v4 = vld [vmem:[#allocation2 + $0x20] sm:$0xff] }
 0x1da   :  { %20340 = vst [vmem:[#allocation140_spill] sm:$0xff] %v16869_v0  ;;  %v16873_v49 = vpop.permute.xlu0 %3978  ;;  %13639 = vmatprep.mubr.msk.f32.mxu1 %vm732_vm2, %v1893_v13  ;;  %5139 = vperm.xlu1 %14939, %v11963_v41   ;;  %v11967_v13 = vld [vmem:[%s20133_s4 + $0x788] sm:$0xff]  ;;  %v1897_v62 = vmul.f32 %v15499_v16, %v16893_v4  ;;  %v16969_v0 = vld [vmem:[#allocation2 + $0x58] sm:$0xff] }
 0x1db   :  { %20341 = vst [vmem:[#allocation141_spill] sm:$0xff] %v16873_v49  ;;  %5134 = vperm.xlu0 %14938, %v11962_v52   ;;  %v11966_v52 = vld [vmem:[%s20133_s4 + $0x780] sm:$0xff]  ;;  %v20357_v49 = vld [vmem:[#allocation9_spill] sm:$0xff] }
 0x1dd   :  { %13640 = vmatmul.mubr.msk.f32.vlgmr.msra.gmra.mrb[128].mxu1 %vm732_vm2, %v1894_v14  ;;  %v16891_v12 = vpop.permute.xlu1 %3993  ;;  %v16908_v14 = vld [vmem:[#allocation2 + $0x28] sm:$0xff] }
 0x1de   :  { %20342 = vst [vmem:[#allocation142_spill] sm:$0xff] %v16891_v12  ;;  %v16895_v41 = vpop.permute.xlu0 %3988  ;;  %13642 = vmatprep.mubr.msk.f32.mxu1 %vm732_vm2, %v1895_v28  ;;  %5149 = vperm.xlu1 %14939, %v11965_v8   ;;  %v1898_v16 = vmul.f32 %v15497_v15, %v16908_v14  ;;  %v16949_v12 = vld [vmem:[#allocation2 + $0x48] sm:$0xff] }
 0x1df   :  { %20343 = vst [vmem:[#allocation143_spill] sm:$0xff] %v16895_v41  ;;  %5144 = vperm.xlu0 %14938, %v11964_v44   ;;  %13736 = vmatpush3.msra.mxu1 %v11853_v45  ;;  %v11969_v45 = vld [vmem:[%s20133_s4 + $0x798] sm:$0xff]  ;;  %v11968_v44 = vld [vmem:[%s20133_s4 + $0x790] sm:$0xff]  ;;  %v20353_v41 = vld [vmem:[#allocation7_spill] sm:$0xff] }
 0x1e0   :  { %14421 = vmatprep.subr.mxu1 %v16560_v32  ;;  %v1899_v32 = vmul.f32 %v15509_v20, %v16914_v11  ;;  %v20348_v20 = vld [vmem:[#allocation3_spill] sm:$0xff] }
 0x1e1   :  { %13643 = vmatmul.mubr.msk.f32.gmra.mrb[130].mxu1 %vm732_vm2, %v1896_v7  ;;  %v16912_v8 = vpop.permute.xlu1 %4003  ;;  %v16929_v7 = vld [vmem:[#allocation2 + $0x38] sm:$0xff] }
 0x1e2   :  { %20344 = vst [vmem:[#allocation144_spill] sm:$0xff] %v16912_v8  ;;  %v16916_v28 = vpop.permute.xlu0 %3998  ;;  %13645 = vmatprep.mubr.msk.f32.mxu1 %vm732_vm2, %v1897_v62  ;;  %5159 = vperm.xlu1 %14939, %v11967_v13   ;;  %v16934_v62 = vld [vmem:[#allocation2 + $0x40] sm:$0xff]  ;;  %v11971_v8 = vld [vmem:[%s20133_s4 + $0x7a8] sm:$0xff] }
 0x1e3   :  { %20345 = vst [vmem:[#allocation145_spill] sm:$0xff] %v16916_v28  ;;  %5154 = vperm.xlu0 %14938, %v11966_v52   ;;  %v1900_v52 = vmul.f32 %v20348_v20, %v16929_v7  ;;  %v20349_v28 = vld [vmem:[#allocation5_spill] sm:$0xff] }
 0x1e5   :  { %13646 = vmatmul.mubr.msk.f32.gmra.mrb[132].mxu1 %vm732_vm2, %v1898_v16  ;;  %v16932_v13 = vpop.permute.xlu1 %4013  ;;  %v1901_v16 = vmul.f32 %v20349_v28, %v16934_v62  ;;  %v20352_v28 = vld [vmem:[#allocation4_spill] sm:$0xff] }
 0x1e6   :  { %20346 = vst [vmem:[#allocation146_spill] sm:$0xff] %v16932_v13  ;;  %v16936_v15 = vpop.permute.xlu0 %4008  ;;  %13648 = vmatprep.mubr.msk.f32.mxu1 %vm732_vm2, %v1899_v32  ;;  %5169 = vperm.xlu1 %14939, %v11969_v45   ;;  %v11970_v13 = vld [vmem:[%s20133_s4 + $0x7a0] sm:$0xff]  ;;  %v16954_v32 = vld [vmem:[#allocation2 + $0x50] sm:$0xff]  ;;  %v1902_v20 = vmul.f32 %v20352_v28, %v16949_v12 }
 0x1e7   :  { %20347 = vst [vmem:[#allocation147_spill] sm:$0xff] %v16936_v15  ;;  %5164 = vperm.xlu0 %14938, %v11968_v44   ;;  %v11973_v15 = vld [vmem:[%s20133_s4 + $0x7b8] sm:$0xff] }
 0x1e9   :  { %13649 = vmatmul.mubr.msk.f32.gmra.mrb[134].mxu1 %vm732_vm2, %v1900_v52  ;;  %v16952_v45 = vpop.permute.xlu1 %4023  ;;  %v1903_v52 = vmul.f32 %v20353_v41, %v16954_v32  ;;  %v20356_v41 = vld [vmem:[#allocation6_spill] sm:$0xff] }
 0x1ea   :  { %20350 = vst [vmem:[#allocation3_spill] sm:$0xff] %v16952_v45  ;;  %v16956_v44 = vpop.permute.xlu0 %4018  ;;  %13651 = vmatprep.mubr.msk.f32.mxu1 %vm732_vm2, %v1901_v16  ;;  %5179 = vperm.xlu1 %14939, %v11971_v8   ;;  %v11972_v45 = vld [vmem:[%s20133_s4 + $0x7b0] sm:$0xff]  ;;  %v1904_v28 = vmul.f32 %v20356_v41, %v16969_v0 }
 0x1eb   :  { %20351 = vst [vmem:[#allocation5_spill] sm:$0xff] %v16956_v44  ;;  %5174 = vperm.xlu0 %14938, %v11970_v13   ;;  %v16974_v13 = vld [vmem:[#allocation2 + $0x60] sm:$0xff]  ;;  %v11975_v44 = vld [vmem:[%s20133_s4 + $0x7c8] sm:$0xff] }
 0x1ed   :  { %13652 = vmatmul.mubr.msk.f32.gmra.mrb[136].mxu1 %vm732_vm2, %v1902_v20  ;;  %v16972_v8 = vpop.permute.xlu1 %4033  ;;  %v1905_v20 = vmul.f32 %v20357_v49, %v16974_v13  ;;  %v20360_v49 = vld [vmem:[#allocation8_spill] sm:$0xff] }
 0x1ee   :  { %20354 = vst [vmem:[#allocation4_spill] sm:$0xff] %v16972_v8  ;;  %v16976_v16 = vpop.permute.xlu0 %4028  ;;  %13654 = vmatprep.mubr.msk.f32.mxu1 %vm732_vm2, %v1903_v52  ;;  %5189 = vperm.xlu1 %14939, %v11973_v15   ;;  %v11974_v8 = vld [vmem:[%s20133_s4 + $0x7c0] sm:$0xff]  ;;  %v1906_v41 = vmul.f32 %v20360_v49, %v16989_v57 }
 0x1ef   :  { %20355 = vst [vmem:[#allocation7_spill] sm:$0xff] %v16976_v16  ;;  %5184 = vperm.xlu0 %14938, %v11972_v45   ;;  %v16994_v45 = vld [vmem:[#allocation2 + $0x70] sm:$0xff]  ;;  %v11977_v16 = vld [vmem:[%s20133_s4 + $0x7d8] sm:$0xff] }
 0x1f1   :  { %13655 = vmatmul.mubr.msk.f32.gmra.mrb[138].mxu1 %vm732_vm2, %v1904_v28  ;;  %v16992_v15 = vpop.permute.xlu1 %4043  ;;  %v1907_v28 = vmul.f32 %v20361_v1, %v16994_v45  ;;  %v20364_v1 = vld [vmem:[#allocation10_spill] sm:$0xff] }
 0x1f2   :  { %20358 = vst [vmem:[#allocation6_spill] sm:$0xff] %v16992_v15  ;;  %v16996_v52 = vpop.permute.xlu0 %4038  ;;  %13657 = vmatprep.mubr.msk.f32.mxu1 %vm732_vm2, %v1905_v20  ;;  %5199 = vperm.xlu1 %14939, %v11975_v44   ;;  %v11976_v15 = vld [vmem:[%s20133_s4 + $0x7d0] sm:$0xff]  ;;  %v1908_v49 = vmul.f32 %v20364_v1, %v17009_v21 }
 0x1f3   :  { %20359 = vst [vmem:[#allocation9_spill] sm:$0xff] %v16996_v52  ;;  %5194 = vperm.xlu0 %14938, %v11974_v8   ;;  %v17014_v8 = vld [vmem:[#allocation2 + $0x80] sm:$0xff]  ;;  %v11979_v52 = vld [vmem:[%s20133_s4 + $0x7e8] sm:$0xff] }
 0x1f5   :  { %13658 = vmatmul.mubr.msk.f32.gmra.mrb[140].mxu1 %vm732_vm2, %v1906_v41  ;;  %v17012_v44 = vpop.permute.xlu1 %4053  ;;  %v1909_v41 = vmul.f32 %v20365_v37, %v17014_v8  ;;  %v20368_v37 = vld [vmem:[#allocation12_spill] sm:$0xff] }
 0x1f6   :  { %20362 = vst [vmem:[#allocation8_spill] sm:$0xff] %v17012_v44  ;;  %v17016_v20 = vpop.permute.xlu0 %4048  ;;  %13660 = vmatprep.mubr.msk.f32.mxu1 %vm732_vm2, %v1907_v28  ;;  %5209 = vperm.xlu1 %14939, %v11977_v16   ;;  %v11978_v44 = vld [vmem:[%s20133_s4 + $0x7e0] sm:$0xff]  ;;  %v1910_v1 = vmul.f32 %v20368_v37, %v17029_v23 }
 0x1f7   :  { %20363 = vst [vmem:[#allocation11_spill] sm:$0xff] %v17016_v20  ;;  %5204 = vperm.xlu0 %14938, %v11976_v15   ;;  %v17034_v15 = vld [vmem:[#allocation2 + $0x90] sm:$0xff]  ;;  %v11981_v20 = vld [vmem:[%s20133_s4 + $0x7f8] sm:$0xff] }
 0x1f9   :  { %13661 = vmatmul.mubr.msk.f32.gmra.mrb[142].mxu1 %vm732_vm2, %v1908_v49  ;;  %v17032_v16 = vpop.permute.xlu1 %4063  ;;  %v1911_v49 = vmul.f32 %v20369_v19, %v17034_v15  ;;  %v20372_v19 = vld [vmem:[#allocation14_spill] sm:$0xff] }
 0x1fa   :  { %20366 = vst [vmem:[#allocation10_spill] sm:$0xff] %v17032_v16  ;;  %v17036_v28 = vpop.permute.xlu0 %4058  ;;  %13663 = vmatprep.mubr.msk.f32.mxu1 %vm732_vm2, %v1909_v41  ;;  %5219 = vperm.xlu1 %14939, %v11979_v52   ;;  %v11980_v16 = vld [vmem:[%s20133_s4 + $0x7f0] sm:$0xff]  ;;  %v1912_v37 = vmul.f32 %v20372_v19, %v17049_v46 }
 0x1fb   :  { %20367 = vst [vmem:[#allocation13_spill] sm:$0xff] %v17036_v28  ;;  %5214 = vperm.xlu0 %14938, %v11978_v44   ;;  %v17054_v44 = vld [vmem:[#allocation2 + $0xa0] sm:$0xff]  ;;  %v12113_v28 = vld [vmem:[%s20133_s4 + $0xa08] sm:$0xff] }
 0x1fd   :  { %13664 = vmatmul.mubr.msk.f32.gmra.mrb[144].mxu1 %vm732_vm2, %v1910_v1  ;;  %v17052_v52 = vpop.permute.xlu1 %4073  ;;  %v1913_v1 = vmul.f32 %v20373_v24, %v17054_v44  ;;  %v20374_v24 = vld [vmem:[#allocation16_spill] sm:$0xff] }
 0x1fe   :  { %20370 = vst [vmem:[#allocation12_spill] sm:$0xff] %v17052_v52  ;;  %v17056_v41 = vpop.permute.xlu0 %4068  ;;  %13666 = vmatprep.mubr.msk.f32.mxu1 %vm732_vm2, %v1911_v49  ;;  %5229 = vperm.xlu1 %14939, %v11981_v20   ;;  %v12112_v52 = vld [vmem:[%s20133_s4 + $0xa00] sm:$0xff] }
 0x1ff   :  { %20371 = vst [vmem:[#allocation15_spill] sm:$0xff] %v17056_v41  ;;  %5224 = vperm.xlu0 %14938, %v11980_v16   ;;  %v17072_v16 = vld [vmem:[#allocation2 + $0xb0] sm:$0xff]  ;;  %v1914_v41 = vmul.f32 %v20374_v24, %v17069_v42 }
 0x200   :  { %v1915_v54 = vmul.f32 %v20375_v35, %v17072_v16  ;;  %v17096_v35 = vld [vmem:[%s20137_s3 + $0x28] sm:$0xff] }
 0x201   :  { %13667 = vmatmul.mubr.msk.f32.gmra.mrb[146].mxu1 %vm732_vm2, %v1912_v37  ;;  %v4920_v20 = vpop.permute.xlu1 %4919  ;;  %v12115_v37 = vld [vmem:[%s20133_s4 + $0xa18] sm:$0xff] }
 0x202   :  { %v5233_v49 = vmul.f32 %v4920_v20, %v16888_v10  ;;  %v4915_v19 = vpop.permute.xlu0 %4914  ;;  %13669 = vmatprep.mubr.msk.f32.mxu1 %vm732_vm2, %v1913_v1  ;;  %6526 = vperm.xlu1 %14939, %v12113_v28   ;;  %v12114_v28 = vld [vmem:[%s20133_s4 + $0xa10] sm:$0xff] }
 0x203   :  { %6521 = vperm.xlu0 %14938, %v12112_v52   ;;  %v5232_v30 = vmul.f32 %v4915_v19, %v16871_v22  ;;  %v17091_v52 = vld [vmem:[#allocation2 + $0xc0] sm:$0xff]  ;;  %v20377_v19 = vld [vmem:[#allocation21_spill] sm:$0xff] }
 0x204   :  { %v1917_v24 = vmul.f32 %v20377_v19, %v17091_v52  ;;  %v12119_v19 = vld [vmem:[%s20133_s4 + $0xa38] sm:$0xff] }
 0x205   :  { %13670 = vmatmul.mubr.msk.f32.gmra.mrb[148].mxu1 %vm732_vm2, %v1914_v41  ;;  %13835 = vmatprep.mubr.msk.f32.mxu0 %vm732_vm2, %v5232_v30  ;;  %v4930_v10 = vpop.permute.xlu1 %4929  ;;  %v20376_v41 = vld [vmem:[#allocation18_spill] sm:$0xff] }
 0x206   :  { %v5235_v22 = vmul.f32 %v4930_v10, %v16908_v14  ;;  %v4925_v1 = vpop.permute.xlu0 %4924  ;;  %13672 = vmatprep.mubr.msk.f32.mxu1 %vm732_vm2, %v1915_v54  ;;  %13836 = vmatmul.mubr.msk.f32.vlgmr.msra.gmra.mrb[0].mxu0 %vm732_vm2, %v5233_v49  ;;  %v1916_v20 = vmul.f32 %v20376_v41, %v17084_v50  ;;  %v12117_v14 = vld [vmem:[%s20133_s4 + $0xa28] sm:$0xff]  ;;  %v12116_v54 = vld [vmem:[%s20133_s4 + $0xa20] sm:$0xff] }
 0x207   :  { %v5234_v30 = vmul.f32 %v4925_v1, %v16893_v4  ;;  %13932 = vmatpush3.msra.mxu0 %v16574_v26  ;;  %6536 = vperm.xlu1 %14939, %v12115_v37   ;;  %v17110_v10 = vld [vmem:[#allocation2 + $0xc8] sm:$0xff]  ;;  %v17118_v4 = vld [vmem:[#allocation2 + $0xd0] sm:$0xff] }
 0x208   :  { %6531 = vperm.xlu0 %14938, %v12114_v28   ;;  %14029 = vmatprep.subr.mxu0 %v17096_v35  ;;  %v20378_v1 = vld [vmem:[#allocation20_spill] sm:$0xff]  ;;  %v20379_v41 = vld [vmem:[#allocation23_spill] sm:$0xff] }
 0x209   :  { %13673 = vmatmul.mubr.msk.f32.gmra.mrb[150].mxu1 %vm732_vm2, %v1916_v20  ;;  %13838 = vmatprep.mubr.msk.f32.mxu0 %vm732_vm2, %v5234_v30  ;;  %v4940_v26 = vpop.permute.xlu1 %4939  ;;  %v1918_v30 = vmul.f32 %v20378_v1, %v17110_v10  ;;  %v1919_v20 = vmul.f32 %v20379_v41, %v17118_v4  ;;  %v20381_v1 = vld [vmem:[#allocation25_spill] sm:$0xff]  ;;  %v12121_v41 = vld [vmem:[%s20133_s4 + $0xa48] sm:$0xff] }
 0x20a   :  { %v5237_v49 = vmul.f32 %v4940_v26, %v16929_v7  ;;  %v4935_v37 = vpop.permute.xlu0 %4934  ;;  %13675 = vmatprep.mubr.msk.f32.mxu1 %vm732_vm2, %v1917_v24  ;;  %13839 = vmatmul.mubr.msk.f32.gmra.mrb[2].mxu0 %vm732_vm2, %v5235_v22  ;;  %v17131_v7 = vld [vmem:[#allocation2 + $0xd8] sm:$0xff]  ;;  %v17138_v24 = vld [vmem:[#allocation2 + $0xe0] sm:$0xff] }
 0x20b   :  { %v5236_v28 = vmul.f32 %v4935_v37, %v16914_v11  ;;  %6546 = vperm.xlu1 %14939, %v12117_v14   ;;  %v12118_v11 = vld [vmem:[%s20133_s4 + $0xa30] sm:$0xff]  ;;  %v20380_v37 = vld [vmem:[#allocation22_spill] sm:$0xff] }
 0x20c   :  { %6541 = vperm.xlu0 %14938, %v12116_v54  }
 0x20d   :  { %13676 = vmatmul.mubr.msk.f32.gmra.mrb[152].mxu1 %vm732_vm2, %v1918_v30  ;;  %13841 = vmatprep.mubr.msk.f32.mxu0 %vm732_vm2, %v5236_v28  ;;  %v4950_v22 = vpop.permute.xlu1 %4949  ;;  %v1920_v28 = vmul.f32 %v20380_v37, %v17131_v7  ;;  %v1921_v30 = vmul.f32 %v20381_v1, %v17138_v24  ;;  %v20383_v37 = vld [vmem:[#allocation27_spill] sm:$0xff]  ;;  %v12123_v1 = vld [vmem:[%s20133_s4 + $0xa58] sm:$0xff] }
 0x20e   :  { %v5239_v14 = vmul.f32 %v4950_v22, %v16949_v12  ;;  %v4945_v26 = vpop.permute.xlu0 %4944  ;;  %13678 = vmatprep.mubr.msk.f32.mxu1 %vm732_vm2, %v1919_v20  ;;  %13842 = vmatmul.mubr.msk.f32.gmra.mrb[4].mxu0 %vm732_vm2, %v5237_v49  ;;  %v17151_v12 = vld [vmem:[#allocation2 + $0xe8] sm:$0xff]  ;;  %v17158_v20 = vld [vmem:[#allocation2 + $0xf0] sm:$0xff] }
 0x20f   :  { %v5238_v54 = vmul.f32 %v4945_v26, %v16934_v62  ;;  %6556 = vperm.xlu1 %14939, %v12119_v19   ;;  %v12120_v62 = vld [vmem:[%s20133_s4 + $0xa40] sm:$0xff]  ;;  %v20382_v26 = vld [vmem:[#allocation24_spill] sm:$0xff] }
 0x210   :  { %6551 = vperm.xlu0 %14938, %v12118_v11  }
 0x211   :  { %13679 = vmatmul.mubr.msk.f32.gmra.mrb[154].mxu1 %vm732_vm2, %v1920_v28  ;;  %13844 = vmatprep.mubr.msk.f32.mxu0 %vm732_vm2, %v5238_v54  ;;  %v4960_v49 = vpop.permute.xlu1 %4959  ;;  %v1922_v54 = vmul.f32 %v20382_v26, %v17151_v12  ;;  %v1923_v28 = vmul.f32 %v20383_v37, %v17158_v20  ;;  %v20385_v26 = vld [vmem:[#allocation29_spill] sm:$0xff]  ;;  %v12125_v37 = vld [vmem:[%s20133_s4 + $0xa68] sm:$0xff] }
 0x212   :  { %v5241_v19 = vmul.f32 %v4960_v49, %v16969_v0  ;;  %v4955_v22 = vpop.permute.xlu0 %4954  ;;  %13681 = vmatprep.mubr.msk.f32.mxu1 %vm732_vm2, %v1921_v30  ;;  %13845 = vmatmul.mubr.msk.f32.gmra.mrb[6].mxu0 %vm732_vm2, %v5239_v14  ;;  %v17171_v0 = vld [vmem:[#allocation2 + $0xf8] sm:$0xff]  ;;  %v17178_v30 = vld [vmem:[#allocation2 + $0x100] sm:$0xff] }
 0x213   :  { %v5240_v11 = vmul.f32 %v4955_v22, %v16954_v32  ;;  %6566 = vperm.xlu1 %14939, %v12121_v41   ;;  %v12122_v32 = vld [vmem:[%s20133_s4 + $0xa50] sm:$0xff]  ;;  %v20384_v22 = vld [vmem:[#allocation26_spill] sm:$0xff] }
 0x214   :  { %6561 = vperm.xlu0 %14938, %v12120_v62  }
 0x215   :  { %13682 = vmatmul.mubr.msk.f32.gmra.mrb[156].mxu1 %vm732_vm2, %v1922_v54  ;;  %13847 = vmatprep.mubr.msk.f32.mxu0 %vm732_vm2, %v5240_v11  ;;  %v4970_v14 = vpop.permute.xlu1 %4969  ;;  %v1924_v11 = vmul.f32 %v20384_v22, %v17171_v0  ;;  %v1925_v54 = vmul.f32 %v20385_v26, %v17178_v30  ;;  %v12127_v26 = vld [vmem:[%s20133_s4 + $0xa78] sm:$0xff] }
 0x216   :  { %v5243_v41 = vmul.f32 %v4970_v14, %v16989_v57  ;;  %v4965_v49 = vpop.permute.xlu0 %4964  ;;  %13684 = vmatprep.mubr.msk.f32.mxu1 %vm732_vm2, %v1923_v28  ;;  %13848 = vmatmul.mubr.msk.f32.gmra.mrb[8].mxu0 %vm732_vm2, %v5241_v19  ;;  %v17191_v57 = vld [vmem:[#allocation2 + $0x108] sm:$0xff]  ;;  %v1479_v28 = vld [vmem:[#allocation2 + $0x110] sm:$0xff] }
 0x217   :  { %v5242_v62 = vmul.f32 %v4965_v49, %v16974_v13  ;;  %6576 = vperm.xlu1 %14939, %v12123_v1   ;;  %v12124_v13 = vld [vmem:[%s20133_s4 + $0xa60] sm:$0xff]  ;;  %v20386_v49 = vld [vmem:[#allocation28_spill] sm:$0xff] }
 0x218   :  { %6571 = vperm.xlu0 %14938, %v12122_v32   ;;  %v1926_v22 = vmul.f32 %v20386_v49, %v17191_v57  ;;  %v12129_v49 = vld [vmem:[%s20133_s4 + $0xa88] sm:$0xff] }
 0x219   :  { %13685 = vmatmul.mubr.msk.f32.gmra.mrb[158].mxu1 %vm732_vm2, %v1924_v11  ;;  %13850 = vmatprep.mubr.msk.f32.mxu0 %vm732_vm2, %v5242_v62  ;;  %v4980_v19 = vpop.permute.xlu1 %4979  ;;  %v20387_v62 = vld [vmem:[#allocation31_spill] sm:$0xff] }
 0x21a   :  { %v5245_v1 = vmul.f32 %v4980_v19, %v17009_v21  ;;  %v4975_v14 = vpop.permute.xlu0 %4974  ;;  %13687 = vmatprep.mubr.msk.f32.mxu1 %vm732_vm2, %v1925_v54  ;;  %13851 = vmatmul.mubr.msk.f32.gmra.mrb[10].mxu0 %vm732_vm2, %v5243_v41  ;;  %v1927_v11 = vmul.f32 %v20387_v62, %v1479_v28  ;;  %v1481_v41 = vld [vmem:[#allocation2 + $0x120] sm:$0xff] }
 0x21b   :  { %v5244_v32 = vmul.f32 %v4975_v14, %v16994_v45  ;;  %6586 = vperm.xlu1 %14939, %v12125_v37   ;;  %v12126_v45 = vld [vmem:[%s20133_s4 + $0xa70] sm:$0xff]  ;;  %v20389_v14 = vld [vmem:[#allocation33_spill] sm:$0xff] }
 0x21c   :  { %6581 = vperm.xlu0 %14938, %v12124_v13   ;;  %v20388_v13 = vld [vmem:[#allocation30_spill] sm:$0xff] }
 0x21d   :  { %13688 = vmatmul.mubr.msk.f32.gmra.mrb[160].mxu1 %vm732_vm2, %v1926_v22  ;;  %13853 = vmatprep.mubr.msk.f32.mxu0 %vm732_vm2, %v5244_v32  ;;  %v4990_v21 = vpop.permute.xlu1 %4989  ;;  %v1928_v28 = vmul.f32 %v20388_v13, %v1480_v60  ;;  %v1929_v32 = vmul.f32 %v20389_v14, %v1481_v41  ;;  %v1482_v22 = vld [vmem:[#allocation2 + $0x128] sm:$0xff] }
 0x21e   :  { %v5247_v54 = vmul.f32 %v4990_v21, %v17029_v23  ;;  %v4985_v37 = vpop.permute.xlu0 %4984  ;;  %13690 = vmatprep.mubr.msk.f32.mxu1 %vm732_vm2, %v1927_v11  ;;  %13854 = vmatmul.mubr.msk.f32.gmra.mrb[12].mxu0 %vm732_vm2, %v5245_v1  ;;  %v1483_v1 = vld [vmem:[#allocation2 + $0x130] sm:$0xff] }
 0x21f   :  { %v5246_v19 = vmul.f32 %v4985_v37, %v17014_v8  ;;  %6596 = vperm.xlu1 %14939, %v12127_v26   ;;  %v12128_v8 = vld [vmem:[%s20133_s4 + $0xa80] sm:$0xff]  ;;  %v20390_v26 = vld [vmem:[#allocation32_spill] sm:$0xff]  ;;  %v12131_v37 = vld [vmem:[%s20133_s4 + $0xa98] sm:$0xff] }
 0x220   :  { %6591 = vperm.xlu0 %14938, %v12126_v45   ;;  %v1930_v21 = vmul.f32 %v20390_v26, %v1482_v22  ;;  %v20391_v45 = vld [vmem:[#allocation35_spill] sm:$0xff]  ;;  %v20393_v22 = vld [vmem:[#allocation37_spill] sm:$0xff] }
 0x221   :  { %13691 = vmatmul.mubr.msk.f32.gmra.mrb[162].mxu1 %vm732_vm2, %v1928_v28  ;;  %13856 = vmatprep.mubr.msk.f32.mxu0 %vm732_vm2, %v5246_v19  ;;  %v5000_v23 = vpop.permute.xlu1 %4999  ;;  %v1931_v41 = vmul.f32 %v20391_v45, %v1483_v1  ;;  %v1484_v19 = vld [vmem:[#allocation2 + $0x138] sm:$0xff]  ;;  %v1486_v1 = vld [vmem:[#allocation2 + $0x148] sm:$0xff] }
 0x222   :  { %v5249_v60 = vmul.f32 %v5000_v23, %v17049_v46  ;;  %v4995_v62 = vpop.permute.xlu0 %4994  ;;  %13693 = vmatprep.mubr.msk.f32.mxu1 %vm732_vm2, %v1929_v32  ;;  %13857 = vmatmul.mubr.msk.f32.gmra.mrb[14].mxu0 %vm732_vm2, %v5247_v54  ;;  %v1485_v54 = vld [vmem:[#allocation2 + $0x140] sm:$0xff] }
 0x223   :  { %v5248_v11 = vmul.f32 %v4995_v62, %v17034_v15  ;;  %6606 = vperm.xlu1 %14939, %v12129_v49   ;;  %v12130_v15 = vld [vmem:[%s20133_s4 + $0xa90] sm:$0xff]  ;;  %v20392_v32 = vld [vmem:[#allocation34_spill] sm:$0xff]  ;;  %v1933_v23 = vmul.f32 %v20393_v22, %v1485_v54 }
 0x224   :  { %6601 = vperm.xlu0 %14938, %v12128_v8   ;;  %v1932_v49 = vmul.f32 %v20392_v32, %v1484_v19  ;;  %v12133_v8 = vld [vmem:[%s20133_s4 + $0xaa8] sm:$0xff]  ;;  %v12135_v19 = vld [vmem:[%s20133_s4 + $0xab8] sm:$0xff] }
 0x225   :  { %13694 = vmatmul.mubr.msk.f32.gmra.mrb[164].mxu1 %vm732_vm2, %v1930_v21  ;;  %13859 = vmatprep.mubr.msk.f32.mxu0 %vm732_vm2, %v5248_v11  ;;  %v5010_v46 = vpop.permute.xlu1 %5009  ;;  %v20394_v21 = vld [vmem:[#allocation36_spill] sm:$0xff] }
 0x226   :  { %v5251_v13 = vmul.f32 %v5010_v46, %v17069_v42  ;;  %v5005_v28 = vpop.permute.xlu0 %5004  ;;  %13696 = vmatprep.mubr.msk.f32.mxu1 %vm732_vm2, %v1931_v41  ;;  %13860 = vmatmul.mubr.msk.f32.gmra.mrb[16].mxu0 %vm732_vm2, %v5249_v60  ;;  %v1487_v60 = vld [vmem:[#allocation2 + $0x150] sm:$0xff]  ;;  %v1934_v45 = vmul.f32 %v20394_v21, %v1486_v1  ;;  %v20395_v41 = vld [vmem:[#allocation39_spill] sm:$0xff]  ;;  %v1488_v46 = vld [vmem:[#allocation2 + $0x158] sm:$0xff] }
 0x227   :  { %v5250_v14 = vmul.f32 %v5005_v28, %v17054_v44  ;;  %6616 = vperm.xlu1 %14939, %v12131_v37   ;;  %v12132_v44 = vld [vmem:[%s20133_s4 + $0xaa0] sm:$0xff]  ;;  %v1935_v37 = vmul.f32 %v20395_v41, %v1487_v60  ;;  %v1491_v1 = vld [vmem:[#allocation2 + $0x170] sm:$0xff]  ;;  %v1492_v41 = vld [vmem:[#allocation2 + $0x178] sm:$0xff] }
 0x228   :  { %6611 = vperm.xlu0 %14938, %v12130_v15   ;;  %v1489_v15 = vld [vmem:[#allocation2 + $0x160] sm:$0xff] }
 0x229   :  { %13697 = vmatmul.mubr.msk.f32.gmra.mrb[166].mxu1 %vm732_vm2, %v1932_v49  ;;  %13862 = vmatprep.mubr.msk.f32.mxu0 %vm732_vm2, %v5250_v14  ;;  %v5020_v42 = vpop.permute.xlu1 %5019  ;;  %v20396_v14 = vld [vmem:[#allocation38_spill] sm:$0xff]  ;;  %v20397_v49 = vld [vmem:[#allocation43_spill] sm:$0xff] }
 0x22a   :  { %v5253_v62 = vmul.f32 %v5020_v42, %v17084_v50  ;;  %v5015_v11 = vpop.permute.xlu0 %5014  ;;  %13699 = vmatprep.mubr.msk.f32.mxu1 %vm732_vm2, %v1933_v23  ;;  %13863 = vmatmul.mubr.msk.f32.gmra.mrb[18].mxu0 %vm732_vm2, %v5251_v13  ;;  %v1936_v32 = vmul.f32 %v20396_v14, %v1488_v46  ;;  %v1937_v22 = vmul.f32 %v20397_v49, %v1489_v15  ;;  %v12137_v23 = vld [vmem:[%s20133_s4 + $0xac8] sm:$0xff] }
 0x22b   :  { %v5252_v26 = vmul.f32 %v5015_v11, %v17072_v16  ;;  %6626 = vperm.xlu1 %14939, %v12133_v8   ;;  %v12134_v16 = vld [vmem:[%s20133_s4 + $0xab0] sm:$0xff]  ;;  %v1490_v8 = vld [vmem:[#allocation2 + $0x168] sm:$0xff] }
 0x22c   :  { %6621 = vperm.xlu0 %14938, %v12132_v44   ;;  %v1494_v14 = vld [vmem:[#allocation2 + $0x188] sm:$0xff] }
 0x22d   :  { %13700 = vmatmul.mubr.msk.f32.gmra.mrb[168].mxu1 %vm732_vm2, %v1934_v45  ;;  %13865 = vmatprep.mubr.msk.f32.mxu0 %vm732_vm2, %v5252_v26  ;;  %v5030_v50 = vpop.permute.xlu1 %5029  ;;  %v20399_v26 = vld [vmem:[#allocation47_spill] sm:$0xff]  ;;  %v12139_v45 = vld [vmem:[%s20133_s4 + $0xad8] sm:$0xff] }
 0x22e   :  { %v5255_v54 = vmul.f32 %v5030_v50, %v17110_v10  ;;  %v5025_v13 = vpop.permute.xlu0 %5024  ;;  %13702 = vmatprep.mubr.msk.f32.mxu1 %vm732_vm2, %v1935_v37  ;;  %13866 = vmatmul.mubr.msk.f32.gmra.mrb[20].mxu0 %vm732_vm2, %v5253_v62  ;;  %v20398_v62 = vld [vmem:[#allocation41_spill] sm:$0xff]  ;;  %v1939_v21 = vmul.f32 %v20399_v26, %v1491_v1  ;;  %v1493_v37 = vld [vmem:[#allocation2 + $0x180] sm:$0xff] }
 0x22f   :  { %v5254_v28 = vmul.f32 %v5025_v13, %v17091_v52  ;;  %6636 = vperm.xlu1 %14939, %v12135_v19   ;;  %v12136_v52 = vld [vmem:[%s20133_s4 + $0xac0] sm:$0xff]  ;;  %v1938_v11 = vmul.f32 %v20398_v62, %v1490_v8  ;;  %v20402_v8 = vld [vmem:[#allocation49_spill] sm:$0xff] }
 0x230   :  { %6631 = vperm.xlu0 %14938, %v12134_v16   ;;  %v20400_v16 = vld [vmem:[#allocation45_spill] sm:$0xff] }
 0x231   :  { %13703 = vmatmul.mubr.msk.f32.gmra.mrb[170].mxu1 %vm732_vm2, %v1936_v32  ;;  %13868 = vmatprep.mubr.msk.f32.mxu0 %vm732_vm2, %v5254_v28  ;;  %v5040_v10 = vpop.permute.xlu1 %5039  ;;  %v1940_v15 = vmul.f32 %v20400_v16, %v1492_v41  ;;  %v12141_v28 = vld [vmem:[%s20133_s4 + $0xae8] sm:$0xff]  ;;  %v1495_v32 = vld [vmem:[#allocation2 + $0x190] sm:$0xff]  ;;  %v20407_v16 = vld [vmem:[#allocation57_spill] sm:$0xff] }
 0x232   :  { %v5257_v42 = vmul.f32 %v5040_v10, %v17131_v7  ;;  %v5035_v44 = vpop.permute.xlu0 %5034  ;;  %13705 = vmatprep.mubr.msk.f32.mxu1 %vm732_vm2, %v1937_v22  ;;  %13869 = vmatmul.mubr.msk.f32.gmra.mrb[22].mxu0 %vm732_vm2, %v5255_v54  ;;  %v20401_v54 = vld [vmem:[#allocation51_spill] sm:$0xff]  ;;  %v1942_v10 = vmul.f32 %v20402_v8, %v1494_v14  ;;  %v1500_v14 = vld [vmem:[#allocation2 + $0x1b8] sm:$0xff] }
 0x233   :  { %v5256_v60 = vmul.f32 %v5035_v44, %v17118_v4  ;;  %6646 = vperm.xlu1 %14939, %v12137_v23   ;;  %v12138_v4 = vld [vmem:[%s20133_s4 + $0xad0] sm:$0xff]  ;;  %v1941_v13 = vmul.f32 %v20401_v54, %v1493_v37  ;;  %v1496_v44 = vld [vmem:[#allocation2 + $0x198] sm:$0xff]  ;;  %v20405_v41 = vld [vmem:[#allocation59_spill] sm:$0xff] }
 0x234   :  { %6641 = vperm.xlu0 %14938, %v12136_v52   ;;  %v20403_v52 = vld [vmem:[#allocation55_spill] sm:$0xff]  ;;  %v20410_v8 = vld [vmem:[#allocation61_spill] sm:$0xff] }
 0x235   :  { %13706 = vmatmul.mubr.msk.f32.gmra.mrb[172].mxu1 %vm732_vm2, %v1938_v11  ;;  %13871 = vmatprep.mubr.msk.f32.mxu0 %vm732_vm2, %v5256_v60  ;;  %v5050_v7 = vpop.permute.xlu1 %5049  ;;  %v1943_v1 = vmul.f32 %v20403_v52, %v1495_v32  ;;  %v1497_v60 = vld [vmem:[#allocation2 + $0x1a0] sm:$0xff]  ;;  %v1498_v37 = vld [vmem:[#allocation2 + $0x1a8] sm:$0xff] }
 0x236   :  { %v5259_v19 = vmul.f32 %v5050_v7, %v17151_v12  ;;  %v5045_v46 = vpop.permute.xlu0 %5044  ;;  %13708 = vmatprep.mubr.msk.f32.mxu1 %vm732_vm2, %v1939_v21  ;;  %13872 = vmatmul.mubr.msk.f32.gmra.mrb[24].mxu0 %vm732_vm2, %v5257_v42  ;;  %v12143_v42 = vld [vmem:[%s20133_s4 + $0xaf8] sm:$0xff]  ;;  %v1945_v7 = vmul.f32 %v20405_v41, %v1497_v60  ;;  %v20408_v54 = vld [vmem:[#allocation63_spill] sm:$0xff]  ;;  %v1501_v32 = vld [vmem:[#allocation2 + $0x1c0] sm:$0xff] }
 0x237   :  { %v5258_v50 = vmul.f32 %v5045_v46, %v17138_v24  ;;  %6656 = vperm.xlu1 %14939, %v12139_v45   ;;  %v12140_v24 = vld [vmem:[%s20133_s4 + $0xae0] sm:$0xff]  ;;  %v20404_v21 = vld [vmem:[#allocation53_spill] sm:$0xff]  ;;  %v1503_v60 = vld [vmem:[#allocation2 + $0x1d0] sm:$0xff] }
 0x238   :  { %6651 = vperm.xlu0 %14938, %v12138_v4   ;;  %v1944_v45 = vmul.f32 %v20404_v21, %v1496_v44  ;;  %v12145_v4 = vld [vmem:[%s20133_s4 + $0xb08] sm:$0xff]  ;;  %v20411_v52 = vld [vmem:[#allocation46_spill] sm:$0xff]  ;;  %v20415_v21 = vld [vmem:[#allocation65_spill] sm:$0xff] }
 0x239   :  { %13709 = vmatmul.mubr.msk.f32.gmra.mrb[174].mxu1 %vm732_vm2, %v1940_v15  ;;  %13874 = vmatprep.mubr.msk.f32.mxu0 %vm732_vm2, %v5258_v50  ;;  %v5060_v12 = vpop.permute.xlu1 %5059  ;;  %v20406_v50 = vld [vmem:[#allocation42_spill] sm:$0xff]  ;;  %v1946_v15 = vmul.f32 %v20407_v16, %v1498_v37  ;;  %v12149_v44 = vld [vmem:[%s20133_s4 + $0xb28] sm:$0xff]  ;;  %v1504_v37 = vld [vmem:[#allocation2 + $0x1d8] sm:$0xff] }
 0x23a   :  { %v5261_v49 = vmul.f32 %v5060_v12, %v17171_v0  ;;  %v5055_v22 = vpop.permute.xlu0 %5054  ;;  %13711 = vmatprep.mubr.msk.f32.mxu1 %vm732_vm2, %v1941_v13  ;;  %13875 = vmatmul.mubr.msk.f32.gmra.mrb[26].mxu0 %vm732_vm2, %v5259_v19  ;;  %v1499_v19 = vld [vmem:[#allocation2 + $0x1b0] sm:$0xff]  ;;  %v20416_v41 = vld [vmem:[#allocation71_spill] sm:$0xff]  ;;  %v1505_v16 = vld [vmem:[#allocation2 + $0x1e0] sm:$0xff] }
 0x23b   :  { %v5260_v23 = vmul.f32 %v5055_v22, %v17158_v20  ;;  %6666 = vperm.xlu1 %14939, %v12141_v28   ;;  %v12142_v20 = vld [vmem:[%s20133_s4 + $0xaf0] sm:$0xff]  ;;  %v1947_v13 = vmul.f32 %v20408_v54, %v1499_v19  ;;  %v12147_v28 = vld [vmem:[%s20133_s4 + $0xb18] sm:$0xff] }
 0x23c   :  { %6661 = vperm.xlu0 %14938, %v12140_v24   ;;  %v12146_v24 = vld [vmem:[%s20133_s4 + $0xb10] sm:$0xff] }
 0x23d   :  { %13712 = vmatmul.mubr.msk.f32.gmra.mrb[176].mxu1 %vm732_vm2, %v1942_v10  ;;  %13877 = vmatprep.mubr.msk.f32.mxu0 %vm732_vm2, %v5260_v23  ;;  %v5070_v0 = vpop.permute.xlu1 %5069  ;;  %v20409_v22 = vld [vmem:[#allocation40_spill] sm:$0xff]  ;;  %v1948_v10 = vmul.f32 %v20410_v8, %v1500_v14  ;;  %v20421_v14 = vld [vmem:[#allocation69_spill] sm:$0xff]  ;;  %v1506_v8 = vld [vmem:[#allocation2 + $0x1e8] sm:$0xff] }
 0x23e   :  { %v5263_v62 = vmul.f32 %v5070_v0, %v17191_v57  ;;  %v5065_v11 = vpop.permute.xlu0 %5064  ;;  %13714 = vmatprep.mubr.msk.f32.mxu1 %vm732_vm2, %v1943_v1  ;;  %13878 = vmatmul.mubr.msk.f32.gmra.mrb[28].mxu0 %vm732_vm2, %v5261_v49  ;;  %v12305_v23 = vld [vmem:[%s20137_s3 + $0x30] sm:$0xff]  ;;  %v20412_v1 = vld [vmem:[#allocation67_spill] sm:$0xff] }
 0x23f   :  { %v5262_v26 = vmul.f32 %v5065_v11, %v17178_v30  ;;  %6676 = vperm.xlu1 %14939, %v12143_v42   ;;  %v12144_v30 = vld [vmem:[%s20133_s4 + $0xb00] sm:$0xff]  ;;  %v1949_v42 = vmul.f32 %v20412_v1, %v1501_v32  ;;  %v1502_v0 = vld [vmem:[#allocation2 + $0x1c8] sm:$0xff]  ;;  %v20413_v11 = vld [vmem:[#allocation44_spill] sm:$0xff] }
 0x240   :  { %6671 = vperm.xlu0 %14938, %v12142_v20   ;;  %v20422_v32 = vld [vmem:[#allocation75_spill] sm:$0xff]  ;;  %v12152_v1 = vld [vmem:[%s20133_s4 + $0xb40] sm:$0xff] }
 0x241   :  { %13715 = vmatmul.mubr.msk.f32.gmra.mrb[178].mxu1 %vm732_vm2, %v1944_v45  ;;  %13880 = vmatprep.mubr.msk.f32.mxu0 %vm732_vm2, %v5262_v26  ;;  %v17336_v57 = vpop.permute.xlu1 %5079  ;;  %v20414_v26 = vld [vmem:[#allocation50_spill] sm:$0xff]  ;;  %v1950_v45 = vmul.f32 %v20415_v21, %v1502_v0  ;;  %v20428_v21 = vld [vmem:[#allocation79_spill] sm:$0xff] }
 0x242   :  { %v17341_v46 = vpop.permute.xlu0 %5074  ;;  %13717 = vmatprep.mubr.msk.f32.mxu1 %vm732_vm2, %v1945_v7  ;;  %13881 = vmatmul.mubr.msk.f32.gmra.mrb[30].mxu0 %vm732_vm2, %v5263_v62  ;;  %v1951_v7 = vmul.f32 %v20416_v41, %v1503_v60  ;;  %v20426_v60 = vld [vmem:[#allocation58_spill] sm:$0xff]  ;;  %v12155_v41 = vld [vmem:[%s20133_s4 + $0xb58] sm:$0xff] }
 0x243   :  { %6686 = vperm.xlu1 %14939, %v12145_v4   ;;  %13933 = vmatprep.mubr.msk.f32.mxu0 %vm732_vm2, %v20406_v50  ;;  %v12151_v4 = vld [vmem:[%s20133_s4 + $0xb38] sm:$0xff]  ;;  %v12150_v50 = vld [vmem:[%s20133_s4 + $0xb30] sm:$0xff] }
 0x244   :  { %6681 = vperm.xlu0 %14938, %v12144_v30   ;;  %v17392_v30 = vpop.f32.mrb[64].mxu1 }
 0x245   :  { %13718 = vmatmul.mubr.msk.f32.gmra.mrb[180].mxu1 %vm732_vm2, %v1946_v15  ;;  %v17353_v12 = vpop.permute.xlu1 %5089  ;;  %20417 = vst [vmem:[#allocation14_spill] sm:$0xff] %v17392_v30  ;;  %v17400_v15 = vpop.f32.mrb[65].mxu1 }
 0x246   :  { %v17358_v49 = vpop.permute.xlu0 %5084  ;;  %13720 = vmatprep.mubr.msk.f32.mxu1 %vm732_vm2, %v1947_v13  ;;  %13934 = vmatmul.mubr.msk.f32.vlgmr.msra.gmra.mrb[0].mxu0 %vm732_vm2, %v20409_v22  ;;  %20418 = vst [vmem:[#allocation17_spill] sm:$0xff] %v17400_v15  ;;  %v20419_v13 = vld [vmem:[#allocation48_spill] sm:$0xff]  ;;  %v1953_v22 = vmul.f32 %v20422_v32, %v1505_v16  ;;  %v20433_v32 = vld [vmem:[#allocation77_spill] sm:$0xff]  ;;  %v20540_v15 = vld [vmem:[#allocation135_spill] sm:$0xff] }
 0x247   :  { %14030 = vmatpush3.msra.mxu0 %v17096_v35  ;;  %6696 = vperm.xlu1 %14939, %v12147_v28   ;;  %v12148_v35 = vld [vmem:[%s20133_s4 + $0xb20] sm:$0xff]  ;;  %v12154_v16 = vld [vmem:[%s20133_s4 + $0xb50] sm:$0xff] }
 0x248   :  { %6691 = vperm.xlu0 %14938, %v12146_v24   ;;  %13936 = vmatprep.mubr.msk.f32.mxu0 %vm732_vm2, %v20411_v52  ;;  %v20420_v28 = vld [vmem:[#allocation54_spill] sm:$0xff]  ;;  %v1952_v24 = vmul.f32 %v20421_v14, %v1504_v37  ;;  %v20431_v14 = vld [vmem:[#allocation56_spill] sm:$0xff] }
 0x249   :  { %13721 = vmatmul.mubr.msk.f32.gmra.mrb[182].mxu1 %vm732_vm2, %v1948_v10  ;;  %v17375_v20 = vpop.permute.xlu1 %5099  ;;  %14127 = vmatprep.subr.mxu0 %v12305_v23  ;;  %v12153_v23 = vld [vmem:[%s20133_s4 + $0xb48] sm:$0xff]  ;;  %v17414_v10 = vpop.f32.mrb[66].mxu1 }
 0x24a   :  { %v17380_v62 = vpop.permute.xlu0 %5094  ;;  %13723 = vmatprep.mubr.msk.f32.mxu1 %vm732_vm2, %v1949_v42  ;;  %13937 = vmatmul.mubr.msk.f32.gmra.mrb[2].mxu0 %vm732_vm2, %v20413_v11  ;;  %20423 = vst [vmem:[#allocation16_spill] sm:$0xff] %v17414_v10  ;;  %v1507_v42 = vld [vmem:[#allocation2 + $0x1f0] sm:$0xff]  ;;  %v20427_v11 = vld [vmem:[#allocation73_spill] sm:$0xff]  ;;  %v3627_v37 = vld [vmem:[#allocation2 + $0x2] sm:$0xff] }
 0x24b   :  { %6706 = vperm.xlu1 %14939, %v12149_v44   ;;  %13939 = vmatprep.mubr.msk.f32.mxu0 %vm732_vm2, %v20414_v26  ;;  %v17422_v44 = vpop.f32.mrb[67].mxu1  ;;  %v1954_v26 = vmul.f32 %v20427_v11, %v1506_v8  ;;  %v4076_v8 = vmul.f32 %v16550_v34, %v3627_v37  ;;  %v12156_v11 = vld [vmem:[%s20133_s4 + $0xb60] sm:$0xff]  ;;  %v20436_v34 = vld [vmem:[#allocation60_spill] sm:$0xff] }
 0x24c   :  { %6701 = vperm.xlu0 %14938, %v12148_v35   ;;  %20424 = vst [vmem:[#allocation19_spill] sm:$0xff] %v17422_v44  ;;  %v20425_v35 = vld [vmem:[#allocation52_spill] sm:$0xff]  ;;  %v20532_v44 = vld [vmem:[#allocation133_spill] sm:$0xff] }
 0x24d   :  { %13724 = vmatmul.mubr.msk.f32.gmra.mrb[184].mxu1 %vm732_vm2, %v1950_v45  ;;  %v17395_v19 = vpop.permute.xlu1 %5109  ;;  %v1955_v45 = vmul.f32 %v20428_v21, %v1507_v42 }
 0x24e   :  { %v17402_v54 = vpop.permute.xlu0 %5104  ;;  %13726 = vmatprep.mubr.msk.f32.mxu1 %vm732_vm2, %v1951_v7  ;;  %13940 = vmatmul.mubr.msk.f32.gmra.mrb[4].mxu0 %vm732_vm2, %v20419_v13  ;;  %v1508_v7 = vld [vmem:[#allocation2 + $0x1f8] sm:$0xff] }
 0x24f   :  { %6716 = vperm.xlu1 %14939, %v12151_v4   ;;  %13942 = vmatprep.mubr.msk.f32.mxu0 %vm732_vm2, %v20420_v28  ;;  %v17436_v4 = vpop.f32.mrb[68].mxu1 }
 0x250   :  { %6711 = vperm.xlu0 %14938, %v12150_v50   ;;  %20429 = vst [vmem:[#allocation18_spill] sm:$0xff] %v17436_v4  ;;  %v17444_v13 = vpop.f32.mrb[69].mxu1 }
 0x251   :  { %13727 = vmatmul.mubr.msk.f32.gmra.mrb[186].mxu1 %vm732_vm2, %v1952_v24  ;;  %v17417_v52 = vpop.permute.xlu1 %5119  ;;  %20430 = vst [vmem:[#allocation21_spill] sm:$0xff] %v17444_v13  ;;  %v20432_v24 = vld [vmem:[#allocation62_spill] sm:$0xff]  ;;  %v17458_v42 = vpop.f32.mrb[70].mxu1  ;;  %v20524_v13 = vld [vmem:[#allocation131_spill] sm:$0xff] }
 0x252   :  { %v17424_v0 = vpop.permute.xlu0 %5114  ;;  %13729 = vmatprep.mubr.msk.f32.mxu1 %vm732_vm2, %v1953_v22  ;;  %13943 = vmatmul.mubr.msk.f32.gmra.mrb[6].mxu0 %vm732_vm2, %v20425_v35  ;;  %v1956_v22 = vmul.f32 %v20433_v32, %v1508_v7  ;;  %20434 = vst [vmem:[#allocation20_spill] sm:$0xff] %v17458_v42  ;;  %v3629_v35 = vld [vmem:[#allocation2 + $0x12] sm:$0xff]  ;;  %v3630_v7 = vld [vmem:[#allocation2 + $0x1a] sm:$0xff] }
 0x253   :  { %6726 = vperm.xlu1 %14939, %v12153_v23   ;;  %13945 = vmatprep.mubr.msk.f32.mxu0 %vm732_vm2, %v20426_v60  ;;  %v3628_v23 = vld [vmem:[#allocation2 + $0xa] sm:$0xff]  ;;  %v4078_v37 = vmul.f32 %v16576_v5, %v3629_v35  ;;  %v20442_v35 = vld [vmem:[#allocation70_spill] sm:$0xff] }
 0x254   :  { %6721 = vperm.xlu0 %14938, %v12152_v1   ;;  %v12157_v1 = vld [vmem:[%s20133_s4 + $0xb68] sm:$0xff]  ;;  %v20440_v5 = vld [vmem:[#allocation64_spill] sm:$0xff] }
 0x255   :  { %13730 = vmatmul.mubr.msk.f32.gmra.mrb[188].mxu1 %vm732_vm2, %v1954_v26  ;;  %v17439_v50 = vpop.permute.xlu1 %5129  ;;  %v17466_v26 = vpop.f32.mrb[71].mxu1 }
 0x256   :  { %v17446_v28 = vpop.permute.xlu0 %5124  ;;  %13732 = vmatprep.mubr.msk.f32.mxu1 %vm732_vm2, %v1955_v45  ;;  %13946 = vmatmul.mubr.msk.f32.gmra.mrb[8].mxu0 %vm732_vm2, %v20431_v14  ;;  %20435 = vst [vmem:[#allocation23_spill] sm:$0xff] %v17466_v26  ;;  %v4077_v45 = vmul.f32 %v16548_v38, %v3628_v23  ;;  %v17480_v14 = vpop.f32.mrb[72].mxu1  ;;  %v12158_v38 = vld [vmem:[%s20133_s4 + $0xb70] sm:$0xff]  ;;  %v20516_v26 = vld [vmem:[#allocation129_spill] sm:$0xff] }
 0x257   :  { %6736 = vperm.xlu1 %14939, %v12155_v41   ;;  %13948 = vmatprep.mubr.msk.f32.mxu0 %vm732_vm2, %v20432_v24  ;;  %v20437_v41 = vld [vmem:[#allocation66_spill] sm:$0xff]  ;;  %20438 = vst [vmem:[#allocation22_spill] sm:$0xff] %v17480_v14 }
 0x258   :  { %6731 = vperm.xlu0 %14938, %v12154_v16   ;;  %v12159_v16 = vld [vmem:[%s20133_s4 + $0xb78] sm:$0xff]  ;;  %v3631_v24 = vld [vmem:[#allocation2 + $0x22] sm:$0xff] }
 0x259   :  { %13733 = vmatmul.mubr.msk.f32.gmra.mrb[190].mxu1 %vm732_vm2, %v1956_v22  ;;  %v17461_v60 = vpop.permute.xlu1 %5139  ;;  %v17488_v22 = vpop.f32.mrb[73].mxu1 }
 0x25a   :  { %v17468_v21 = vpop.permute.xlu0 %5134  ;;  %13737 = vmatprep.mubr.msk.f32.mxu1 %vm732_vm2, %v4076_v8  ;;  %13949 = vmatmul.mubr.msk.f32.gmra.mrb[10].mxu0 %vm732_vm2, %v20436_v34  ;;  %20439 = vst [vmem:[#allocation25_spill] sm:$0xff] %v17488_v22  ;;  %v20441_v8 = vld [vmem:[#allocation124_spill] sm:$0xff]  ;;  %v4080_v34 = vmul.f32 %v16591_v56, %v3631_v24  ;;  %v12160_v56 = vld [vmem:[%s20133_s4 + $0xb80] sm:$0xff] }
 0x25b   :  { %6746 = vperm.xlu1 %14939, %v12157_v1   ;;  %13951 = vmatprep.mubr.msk.f32.mxu0 %vm732_vm2, %v20437_v41  ;;  %v4079_v1 = vmul.f32 %v20441_v8, %v3630_v7  ;;  %v14940_v41 = vld [vmem:[%s20137_s3 + $0x18] sm:$0xff] }
 0x25c   :  { %6741 = vperm.xlu0 %14938, %v12156_v11   ;;  %v3632_v11 = vld [vmem:[#allocation2 + $0x2a] sm:$0xff]  ;;  %v3633_v7 = vld [vmem:[#allocation2 + $0x32] sm:$0xff] }
 0x25d   :  { %13738 = vmatmul.mubr.msk.f32.vlgmr.msra.gmra.mrb[128].mxu1 %vm732_vm2, %v4077_v45  ;;  %v17483_v32 = vpop.permute.xlu1 %5149  ;;  %v12161_v45 = vld [vmem:[%s20133_s4 + $0xb88] sm:$0xff]  ;;  %v20446_v8 = vld [vmem:[#allocation125_spill] sm:$0xff] }
 0x25e   :  { %v17490_v23 = vpop.permute.xlu0 %5144  ;;  %13740 = vmatprep.mubr.msk.f32.mxu1 %vm732_vm2, %v4078_v37  ;;  %13952 = vmatmul.mubr.msk.f32.gmra.mrb[12].mxu0 %vm732_vm2, %v20440_v5  ;;  %v17505_v37 = vpop.f32.mrb[74].mxu1  ;;  %v20445_v5 = vld [vmem:[#allocation68_spill] sm:$0xff] }
 0x25f   :  { %6756 = vperm.xlu1 %14939, %v12159_v16   ;;  %13954 = vmatprep.mubr.msk.f32.mxu0 %vm732_vm2, %v20442_v35  ;;  %20443 = vst [vmem:[#allocation24_spill] sm:$0xff] %v17505_v37  ;;  %v17513_v24 = vpop.f32.mrb[75].mxu1  ;;  %v4081_v35 = vmul.f32 %v20446_v8, %v3632_v11  ;;  %v4082_v37 = vmul.f32 %v16605_v6, %v3633_v7  ;;  %v12162_v11 = vld [vmem:[%s20133_s4 + $0xb90] sm:$0xff] }
 0x260   :  { %6751 = vperm.xlu0 %14938, %v12158_v38   ;;  %14422 = vmatpush3.msra.mxu1 %v14940_v41  ;;  %20444 = vst [vmem:[#allocation27_spill] sm:$0xff] %v17513_v24  ;;  %v20447_v41 = vld [vmem:[#allocation74_spill] sm:$0xff]  ;;  %v12163_v24 = vld [vmem:[%s20133_s4 + $0xb98] sm:$0xff]  ;;  %v17527_v22 = vpop.f32.mrb[76].mxu1  ;;  %v20451_v6 = vld [vmem:[#allocation72_spill] sm:$0xff] }
 0x261   :  { %13741 = vmatmul.mubr.msk.f32.gmra.mrb[130].mxu1 %vm732_vm2, %v4079_v1  ;;  %v17508_v16 = vpop.permute.xlu1 %5159  ;;  %v3634_v1 = vld [vmem:[#allocation2 + $0x3a] sm:$0xff]  ;;  %20448 = vst [vmem:[#allocation26_spill] sm:$0xff] %v17527_v22 }
 0x262   :  { %v17515_v38 = vpop.permute.xlu0 %5154  ;;  %13743 = vmatprep.mubr.msk.f32.mxu1 %vm732_vm2, %v4080_v34  ;;  %13955 = vmatmul.mubr.msk.f32.gmra.mrb[14].mxu0 %vm732_vm2, %v20445_v5  ;;  %v3635_v34 = vld [vmem:[#allocation2 + $0x42] sm:$0xff]  ;;  %v4083_v7 = vmul.f32 %v16603_v18, %v3634_v1 }
 0x263   :  { %6766 = vperm.xlu1 %14939, %v12161_v45   ;;  %13957 = vmatprep.mubr.msk.f32.mxu0 %vm732_vm2, %v20447_v41  ;;  %v17535_v45 = vpop.f32.mrb[77].mxu1  ;;  %v4084_v41 = vmul.f32 %v16619_v3, %v3635_v34  ;;  %v12164_v18 = vld [vmem:[%s20133_s4 + $0xba0] sm:$0xff]  ;;  %v20457_v3 = vld [vmem:[#allocation76_spill] sm:$0xff] }
 0x264   :  { %6761 = vperm.xlu0 %14938, %v12160_v56   ;;  %20450 = vst [vmem:[#allocation28_spill] sm:$0xff] %v17535_v45  ;;  %v20452_v56 = vld [vmem:[#allocation78_spill] sm:$0xff]  ;;  %v12165_v45 = vld [vmem:[%s20133_s4 + $0xba8] sm:$0xff]  ;;  %v17549_v22 = vpop.f32.mrb[78].mxu1 }
 0x265   :  { %13744 = vmatmul.mubr.msk.f32.gmra.mrb[132].mxu1 %vm732_vm2, %v4081_v35  ;;  %v17530_v5 = vpop.permute.xlu1 %5169  ;;  %v3636_v35 = vld [vmem:[#allocation2 + $0x4a] sm:$0xff]  ;;  %20453 = vst [vmem:[#allocation31_spill] sm:$0xff] %v17549_v22 }
 0x266   :  { %20449 = vst [vmem:[#allocation29_spill] sm:$0xff] %v17530_v5  ;;  %v17537_v8 = vpop.permute.xlu0 %5164  ;;  %13746 = vmatprep.mubr.msk.f32.mxu1 %vm732_vm2, %v4082_v37  ;;  %13958 = vmatmul.mubr.msk.f32.gmra.mrb[16].mxu0 %vm732_vm2, %v20451_v6  ;;  %v3637_v37 = vld [vmem:[#allocation2 + $0x52] sm:$0xff]  ;;  %v4085_v34 = vmul.f32 %v16617_v53, %v3636_v35 }
 0x267   :  { %6776 = vperm.xlu1 %14939, %v12163_v24   ;;  %13960 = vmatprep.mubr.msk.f32.mxu0 %vm732_vm2, %v20452_v56  ;;  %v17557_v24 = vpop.f32.mrb[79].mxu1  ;;  %v4086_v56 = vmul.f32 %v16633_v63, %v3637_v37  ;;  %v12166_v53 = vld [vmem:[%s20133_s4 + $0xbb0] sm:$0xff] }
 0x268   :  { %6771 = vperm.xlu0 %14938, %v12162_v11   ;;  %20455 = vst [vmem:[#allocation33_spill] sm:$0xff] %v17557_v24  ;;  %v20458_v11 = vld [vmem:[#allocation81_spill] sm:$0xff]  ;;  %v17571_v22 = vpop.f32.mrb[80].mxu1  ;;  %v20463_v63 = vld [vmem:[#allocation80_spill] sm:$0xff] }
 0x269   :  { %13747 = vmatmul.mubr.msk.f32.gmra.mrb[134].mxu1 %vm732_vm2, %v4083_v7  ;;  %v17552_v6 = vpop.permute.xlu1 %5179  ;;  %v3638_v7 = vld [vmem:[#allocation2 + $0x5a] sm:$0xff]  ;;  %20459 = vst [vmem:[#allocation35_spill] sm:$0xff] %v17571_v22  ;;  %v6390_v5 = vld [vmem:[#allocation2 + $0x12] sm:$0xff] }
 0x26a   :  { %20454 = vst [vmem:[#allocation30_spill] sm:$0xff] %v17552_v6  ;;  %v17559_v1 = vpop.permute.xlu0 %5174  ;;  %13749 = vmatprep.mubr.msk.f32.mxu1 %vm732_vm2, %v4084_v41  ;;  %13961 = vmatmul.mubr.msk.f32.gmra.mrb[18].mxu0 %vm732_vm2, %v20457_v3  ;;  %v12167_v24 = vld [vmem:[%s20133_s4 + $0xbb8] sm:$0xff]  ;;  %v3639_v41 = vld [vmem:[#allocation2 + $0x62] sm:$0xff]  ;;  %v4087_v37 = vmul.f32 %v16631_v29, %v3638_v7 }
 0x26b   :  { %20456 = vst [vmem:[#allocation32_spill] sm:$0xff] %v17559_v1  ;;  %6786 = vperm.xlu1 %14939, %v12165_v45   ;;  %13963 = vmatprep.mubr.msk.f32.mxu0 %vm732_vm2, %v20458_v11  ;;  %v17579_v45 = vpop.f32.mrb[81].mxu1  ;;  %v4088_v11 = vmul.f32 %v16647_v59, %v3639_v41  ;;  %v12168_v29 = vld [vmem:[%s20133_s4 + $0xbc0] sm:$0xff]  ;;  %v12272_v6 = vld [vmem:[%s20133_s4 + $0xcf8] sm:$0xff] }
 0x26c   :  { %6781 = vperm.xlu0 %14938, %v12164_v18   ;;  %20461 = vst [vmem:[#allocation37_spill] sm:$0xff] %v17579_v45  ;;  %v20464_v18 = vld [vmem:[#allocation83_spill] sm:$0xff]  ;;  %v17593_v22 = vpop.f32.mrb[82].mxu1  ;;  %v20469_v59 = vld [vmem:[#allocation82_spill] sm:$0xff] }
 0x26d   :  { %13750 = vmatmul.mubr.msk.f32.gmra.mrb[136].mxu1 %vm732_vm2, %v4085_v34  ;;  %v17574_v3 = vpop.permute.xlu1 %5189  ;;  %v3640_v34 = vld [vmem:[#allocation2 + $0x6a] sm:$0xff]  ;;  %20465 = vst [vmem:[#allocation39_spill] sm:$0xff] %v17593_v22 }
 0x26e   :  { %20460 = vst [vmem:[#allocation34_spill] sm:$0xff] %v17574_v3  ;;  %v17581_v35 = vpop.permute.xlu0 %5184  ;;  %13752 = vmatprep.mubr.msk.f32.mxu1 %vm732_vm2, %v4086_v56  ;;  %13964 = vmatmul.mubr.msk.f32.gmra.mrb[20].mxu0 %vm732_vm2, %v20463_v63  ;;  %v12169_v45 = vld [vmem:[%s20133_s4 + $0xbc8] sm:$0xff]  ;;  %v3641_v56 = vld [vmem:[#allocation2 + $0x72] sm:$0xff]  ;;  %v4089_v41 = vmul.f32 %v16645_v61, %v3640_v34 }
 0x26f   :  { %20462 = vst [vmem:[#allocation36_spill] sm:$0xff] %v17581_v35  ;;  %6796 = vperm.xlu1 %14939, %v12167_v24   ;;  %13966 = vmatprep.mubr.msk.f32.mxu0 %vm732_vm2, %v20464_v18  ;;  %v17601_v24 = vpop.f32.mrb[83].mxu1  ;;  %v4090_v18 = vmul.f32 %v16661_v55, %v3641_v56  ;;  %v12170_v61 = vld [vmem:[%s20133_s4 + $0xbd0] sm:$0xff]  ;;  %v12270_v3 = vld [vmem:[%s20133_s4 + $0xce8] sm:$0xff] }
 0x270   :  { %6791 = vperm.xlu0 %14938, %v12166_v53   ;;  %20467 = vst [vmem:[#allocation43_spill] sm:$0xff] %v17601_v24  ;;  %v20470_v53 = vld [vmem:[#allocation85_spill] sm:$0xff]  ;;  %v17615_v22 = vpop.f32.mrb[84].mxu1  ;;  %v20475_v55 = vld [vmem:[#allocation84_spill] sm:$0xff] }
 0x271   :  { %13753 = vmatmul.mubr.msk.f32.gmra.mrb[138].mxu1 %vm732_vm2, %v4087_v37  ;;  %v17596_v63 = vpop.permute.xlu1 %5199  ;;  %v3642_v37 = vld [vmem:[#allocation2 + $0x7a] sm:$0xff]  ;;  %20471 = vst [vmem:[#allocation47_spill] sm:$0xff] %v17615_v22 }
 0x272   :  { %20466 = vst [vmem:[#allocation38_spill] sm:$0xff] %v17596_v63  ;;  %v17603_v7 = vpop.permute.xlu0 %5194  ;;  %13755 = vmatprep.mubr.msk.f32.mxu1 %vm732_vm2, %v4088_v11  ;;  %13967 = vmatmul.mubr.msk.f32.gmra.mrb[22].mxu0 %vm732_vm2, %v20469_v59  ;;  %v12171_v24 = vld [vmem:[%s20133_s4 + $0xbd8] sm:$0xff]  ;;  %v3643_v11 = vld [vmem:[#allocation2 + $0x82] sm:$0xff]  ;;  %v4091_v56 = vmul.f32 %v16659_v48, %v3642_v37 }
 0x273   :  { %20468 = vst [vmem:[#allocation41_spill] sm:$0xff] %v17603_v7  ;;  %6806 = vperm.xlu1 %14939, %v12169_v45   ;;  %13969 = vmatprep.mubr.msk.f32.mxu0 %vm732_vm2, %v20470_v53  ;;  %v17623_v45 = vpop.f32.mrb[85].mxu1  ;;  %v4092_v53 = vmul.f32 %v16675_v51, %v3643_v11  ;;  %v12172_v48 = vld [vmem:[%s20133_s4 + $0xbe0] sm:$0xff]  ;;  %v12268_v63 = vld [vmem:[%s20133_s4 + $0xcd8] sm:$0xff] }
 0x274   :  { %6801 = vperm.xlu0 %14938, %v12168_v29   ;;  %20473 = vst [vmem:[#allocation51_spill] sm:$0xff] %v17623_v45  ;;  %v20476_v29 = vld [vmem:[#allocation87_spill] sm:$0xff]  ;;  %v17637_v22 = vpop.f32.mrb[86].mxu1  ;;  %v20481_v51 = vld [vmem:[#allocation86_spill] sm:$0xff] }
 0x275   :  { %13756 = vmatmul.mubr.msk.f32.gmra.mrb[140].mxu1 %vm732_vm2, %v4089_v41  ;;  %v17618_v59 = vpop.permute.xlu1 %5209  ;;  %v3644_v41 = vld [vmem:[#allocation2 + $0x8a] sm:$0xff]  ;;  %20477 = vst [vmem:[#allocation55_spill] sm:$0xff] %v17637_v22 }
 0x276   :  { %20472 = vst [vmem:[#allocation45_spill] sm:$0xff] %v17618_v59  ;;  %v17625_v34 = vpop.permute.xlu0 %5204  ;;  %13758 = vmatprep.mubr.msk.f32.mxu1 %vm732_vm2, %v4090_v18  ;;  %13970 = vmatmul.mubr.msk.f32.gmra.mrb[24].mxu0 %vm732_vm2, %v20475_v55  ;;  %v12173_v45 = vld [vmem:[%s20133_s4 + $0xbe8] sm:$0xff]  ;;  %v3645_v18 = vld [vmem:[#allocation2 + $0x92] sm:$0xff]  ;;  %v4093_v11 = vmul.f32 %v16673_v40, %v3644_v41 }
 0x277   :  { %20474 = vst [vmem:[#allocation49_spill] sm:$0xff] %v17625_v34  ;;  %6816 = vperm.xlu1 %14939, %v12171_v24   ;;  %13972 = vmatprep.mubr.msk.f32.mxu0 %vm732_vm2, %v20476_v29  ;;  %v17645_v24 = vpop.f32.mrb[87].mxu1  ;;  %v4094_v29 = vmul.f32 %v16689_v47, %v3645_v18  ;;  %v12174_v40 = vld [vmem:[%s20133_s4 + $0xbf0] sm:$0xff]  ;;  %v20564_v59 = vld [vmem:[#allocation141_spill] sm:$0xff] }
 0x278   :  { %6811 = vperm.xlu0 %14938, %v12170_v61   ;;  %20479 = vst [vmem:[#allocation59_spill] sm:$0xff] %v17645_v24  ;;  %v20482_v61 = vld [vmem:[#allocation89_spill] sm:$0xff]  ;;  %v17659_v22 = vpop.f32.mrb[88].mxu1  ;;  %v20487_v47 = vld [vmem:[#allocation88_spill] sm:$0xff] }
 0x279   :  { %13759 = vmatmul.mubr.msk.f32.gmra.mrb[142].mxu1 %vm732_vm2, %v4091_v56  ;;  %v17640_v55 = vpop.permute.xlu1 %5219  ;;  %v3646_v56 = vld [vmem:[#allocation2 + $0x9a] sm:$0xff]  ;;  %20483 = vst [vmem:[#allocation57_spill] sm:$0xff] %v17659_v22 }
 0x27a   :  { %20478 = vst [vmem:[#allocation53_spill] sm:$0xff] %v17640_v55  ;;  %v17647_v37 = vpop.permute.xlu0 %5214  ;;  %13761 = vmatprep.mubr.msk.f32.mxu1 %vm732_vm2, %v4092_v53  ;;  %13973 = vmatmul.mubr.msk.f32.gmra.mrb[26].mxu0 %vm732_vm2, %v20481_v51  ;;  %v12175_v24 = vld [vmem:[%s20133_s4 + $0xbf8] sm:$0xff]  ;;  %v3647_v53 = vld [vmem:[#allocation2 + $0xa2] sm:$0xff]  ;;  %v4095_v18 = vmul.f32 %v16687_v33, %v3646_v56 }
 0x27b   :  { %20480 = vst [vmem:[#allocation42_spill] sm:$0xff] %v17647_v37  ;;  %6826 = vperm.xlu1 %14939, %v12173_v45   ;;  %13975 = vmatprep.mubr.msk.f32.mxu0 %vm732_vm2, %v20482_v61  ;;  %v17667_v45 = vpop.f32.mrb[89].mxu1  ;;  %v4096_v61 = vmul.f32 %v16703_v43, %v3647_v53  ;;  %v12241_v33 = vld [vmem:[%s20133_s4 + $0xc00] sm:$0xff]  ;;  %v20556_v55 = vld [vmem:[#allocation139_spill] sm:$0xff] }
 0x27c   :  { %6821 = vperm.xlu0 %14938, %v12172_v48   ;;  %20485 = vst [vmem:[#allocation40_spill] sm:$0xff] %v17667_v45  ;;  %v20488_v48 = vld [vmem:[#allocation91_spill] sm:$0xff]  ;;  %v17681_v22 = vpop.f32.mrb[90].mxu1  ;;  %v20491_v43 = vld [vmem:[#allocation90_spill] sm:$0xff] }
 0x27d   :  { %13762 = vmatmul.mubr.msk.f32.gmra.mrb[144].mxu1 %vm732_vm2, %v4093_v11  ;;  %v17662_v51 = vpop.permute.xlu1 %5229  ;;  %v3648_v11 = vld [vmem:[#allocation2 + $0xaa] sm:$0xff]  ;;  %20489 = vst [vmem:[#allocation46_spill] sm:$0xff] %v17681_v22 }
 0x27e   :  { %20484 = vst [vmem:[#allocation63_spill] sm:$0xff] %v17662_v51  ;;  %v17669_v41 = vpop.permute.xlu0 %5224  ;;  %13764 = vmatprep.mubr.msk.f32.mxu1 %vm732_vm2, %v4094_v29  ;;  %13976 = vmatmul.mubr.msk.f32.gmra.mrb[28].mxu0 %vm732_vm2, %v20487_v47  ;;  %v12242_v45 = vld [vmem:[%s20133_s4 + $0xc08] sm:$0xff]  ;;  %v3649_v29 = vld [vmem:[#allocation2 + $0xb2] sm:$0xff]  ;;  %v4097_v53 = vmul.f32 %v16701_v25, %v3648_v11 }
 0x27f   :  { %20486 = vst [vmem:[#allocation61_spill] sm:$0xff] %v17669_v41  ;;  %6836 = vperm.xlu1 %14939, %v12175_v24   ;;  %13978 = vmatprep.mubr.msk.f32.mxu0 %vm732_vm2, %v20488_v48  ;;  %v17689_v24 = vpop.f32.mrb[91].mxu1  ;;  %v4098_v48 = vmul.f32 %v16717_v39, %v3649_v29  ;;  %v12243_v25 = vld [vmem:[%s20133_s4 + $0xc10] sm:$0xff]  ;;  %v20548_v51 = vld [vmem:[#allocation137_spill] sm:$0xff] }
 0x280   :  { %6831 = vperm.xlu0 %14938, %v12174_v40   ;;  %20490 = vst [vmem:[#allocation67_spill] sm:$0xff] %v17689_v24  ;;  %v20492_v40 = vld [vmem:[#allocation93_spill] sm:$0xff]  ;;  %v17703_v22 = vpop.f32.mrb[92].mxu1  ;;  %v20495_v39 = vld [vmem:[#allocation92_spill] sm:$0xff] }
 0x281   :  { %13765 = vmatmul.mubr.msk.f32.gmra.mrb[146].mxu1 %vm732_vm2, %v4095_v18  ;;  %v17684_v47 = vpop.permute.xlu1 %6526  ;;  %v3650_v18 = vld [vmem:[#allocation2 + $0xba] sm:$0xff]  ;;  %20493 = vst [vmem:[#allocation44_spill] sm:$0xff] %v17703_v22  ;;  %v3653_v22 = vld [vmem:[#allocation2 + $0xd2] sm:$0xff] }
 0x282   :  { %v17691_v56 = vpop.permute.xlu0 %6521  ;;  %13767 = vmatprep.mubr.msk.f32.mxu1 %vm732_vm2, %v4096_v61  ;;  %13979 = vmatmul.mubr.msk.f32.gmra.mrb[30].mxu0 %vm732_vm2, %v20491_v43  ;;  %v12244_v24 = vld [vmem:[%s20133_s4 + $0xc18] sm:$0xff]  ;;  %v3651_v61 = vld [vmem:[#allocation2 + $0xc2] sm:$0xff]  ;;  %v4099_v29 = vmul.f32 %v16715_v17, %v3650_v18 }
 0x283   :  { %7682 = vperm.xlu1 %14939, %v12242_v45   ;;  %13981 = vmatprep.mubr.msk.f32.mxu0 %vm732_vm2, %v20492_v40  ;;  %v17709_v45 = vpop.f32.mrb[93].mxu1  ;;  %v20496_v43 = vld [vmem:[#allocation95_spill] sm:$0xff]  ;;  %v4100_v40 = vmul.f32 %v16731_v36, %v3651_v61  ;;  %v12245_v17 = vld [vmem:[%s20133_s4 + $0xc20] sm:$0xff] }
 0x284   :  { %7677 = vperm.xlu0 %14938, %v12241_v33   ;;  %20494 = vst [vmem:[#allocation50_spill] sm:$0xff] %v17709_v45  ;;  %v12246_v45 = vld [vmem:[%s20133_s4 + $0xc28] sm:$0xff]  ;;  %v20499_v36 = vld [vmem:[#allocation94_spill] sm:$0xff] }
 0x285   :  { %13768 = vmatmul.mubr.msk.f32.gmra.mrb[148].mxu1 %vm732_vm2, %v4097_v53  ;;  %v3652_v53 = vld [vmem:[#allocation2 + $0xca] sm:$0xff] }
 0x286   :  { %v17711_v11 = vpop.permute.xlu1 %6536  ;;  %13770 = vmatprep.mubr.msk.f32.mxu1 %vm732_vm2, %v4098_v48  ;;  %13982 = vmatmul.mubr.msk.f32.gmra.mrb[32].mxu0 %vm732_vm2, %v20495_v39  ;;  %v17725_v48 = vpop.f32.mrb[94].mxu1  ;;  %v4101_v61 = vmul.f32 %v16729_v9, %v3652_v53  ;;  %v20500_v39 = vld [vmem:[#allocation97_spill] sm:$0xff]  ;;  %v12247_v9 = vld [vmem:[%s20133_s4 + $0xc30] sm:$0xff] }
 0x287   :  { %v17717_v33 = vpop.permute.xlu0 %6531  ;;  %7692 = vperm.xlu1 %14939, %v12244_v24   ;;  %13984 = vmatprep.mubr.msk.f32.mxu0 %vm732_vm2, %v20496_v43  ;;  %20497 = vst [vmem:[#allocation65_spill] sm:$0xff] %v17725_v48  ;;  %v17731_v24 = vpop.f32.mrb[95].mxu1  ;;  %v4102_v43 = vmul.f32 %v16745_v27, %v3653_v22  ;;  %v3657_v48 = vld [vmem:[#allocation2 + $0xf2] sm:$0xff] }
 0x288   :  { %7687 = vperm.xlu0 %14938, %v12243_v25   ;;  %20498 = vst [vmem:[#allocation71_spill] sm:$0xff] %v17731_v24  ;;  %v12248_v24 = vld [vmem:[%s20133_s4 + $0xc38] sm:$0xff] }
 0x289   :  { %13771 = vmatmul.mubr.msk.f32.gmra.mrb[150].mxu1 %vm732_vm2, %v4099_v29  ;;  %v3654_v29 = vld [vmem:[#allocation2 + $0xda] sm:$0xff] }
 0x28a   :  { %v17733_v18 = vpop.permute.xlu1 %6546  ;;  %13773 = vmatprep.mubr.msk.f32.mxu1 %vm732_vm2, %v4100_v40  ;;  %13985 = vmatmul.mubr.msk.f32.gmra.mrb[34].mxu0 %vm732_vm2, %v20499_v36  ;;  %v3655_v40 = vld [vmem:[#allocation2 + $0xe2] sm:$0xff]  ;;  %v4103_v27 = vmul.f32 %v16743_v2, %v3654_v29  ;;  %v3656_v36 = vld [vmem:[#allocation2 + $0xea] sm:$0xff] }
 0x28b   :  { %v17739_v25 = vpop.permute.xlu0 %6541  ;;  %7702 = vperm.xlu1 %14939, %v12246_v45   ;;  %13987 = vmatprep.mubr.msk.f32.mxu0 %vm732_vm2, %v20500_v39  ;;  %v20501_v45 = vld [vmem:[#allocation96_spill] sm:$0xff]  ;;  %v12250_v39 = vld [vmem:[%s20133_s4 + $0xc48] sm:$0xff]  ;;  %v12249_v2 = vld [vmem:[%s20133_s4 + $0xc40] sm:$0xff] }
 0x28c   :  { %7697 = vperm.xlu0 %14938, %v12245_v17   ;;  %v20502_v17 = vld [vmem:[#allocation99_spill] sm:$0xff] }
 0x28d   :  { %13774 = vmatmul.mubr.msk.f32.gmra.mrb[152].mxu1 %vm732_vm2, %v4101_v61  ;;  %v4104_v61 = vmul.f32 %v16759_v58, %v3655_v40  ;;  %v20505_v58 = vld [vmem:[#allocation98_spill] sm:$0xff]  ;;  %v4105_v40 = vmul.f32 %v16757_v31, %v3656_v36  ;;  %v12251_v31 = vld [vmem:[%s20133_s4 + $0xc50] sm:$0xff] }
 0x28e   :  { %v17751_v53 = vpop.permute.xlu1 %6556  ;;  %13776 = vmatprep.mubr.msk.f32.mxu1 %vm732_vm2, %v4102_v43  ;;  %13988 = vmatmul.mubr.msk.f32.gmra.mrb[36].mxu0 %vm732_vm2, %v20501_v45  ;;  %v17765_v43 = vpop.f32.mrb[96].mxu1  ;;  %v20506_v45 = vld [vmem:[#allocation101_spill] sm:$0xff] }
 0x28f   :  { %v17757_v22 = vpop.permute.xlu0 %6551  ;;  %7712 = vperm.xlu1 %14939, %v12248_v24   ;;  %13990 = vmatprep.mubr.msk.f32.mxu0 %vm732_vm2, %v20502_v17  ;;  %20503 = vst [vmem:[#allocation48_spill] sm:$0xff] %v17765_v43  ;;  %v17771_v24 = vpop.f32.mrb[97].mxu1  ;;  %v3658_v17 = vld [vmem:[#allocation2 + $0xfa] sm:$0xff]  ;;  %v20508_v43 = vld [vmem:[#allocation127_spill] sm:$0xff] }
 0x290   :  { %7707 = vperm.xlu0 %14938, %v12247_v9   ;;  %20504 = vst [vmem:[#allocation54_spill] sm:$0xff] %v17771_v24  ;;  %v4106_v24 = vmul.f32 %v20508_v43, %v3657_v48  ;;  %v20511_v48 = vld [vmem:[#allocation100_spill] sm:$0xff] }
 0x291   :  { %13777 = vmatmul.mubr.msk.f32.gmra.mrb[154].mxu1 %vm732_vm2, %v4103_v27  ;;  %v17783_v27 = vpop.f32.mrb[98].mxu1 }
 0x292   :  { %v17773_v29 = vpop.permute.xlu1 %6566  ;;  %13779 = vmatprep.mubr.msk.f32.mxu1 %vm732_vm2, %v4104_v61  ;;  %13991 = vmatmul.mubr.msk.f32.gmra.mrb[38].mxu0 %vm732_vm2, %v20505_v58  ;;  %20507 = vst [vmem:[#allocation69_spill] sm:$0xff] %v17783_v27  ;;  %v12252_v61 = vld [vmem:[%s20133_s4 + $0xc58] sm:$0xff]  ;;  %v17789_v14 = vpop.f32.mrb[99].mxu1  ;;  %v3659_v58 = vld [vmem:[#allocation2 + $0x102] sm:$0xff] }
 0x293   :  { %v17779_v9 = vpop.permute.xlu0 %6561  ;;  %7722 = vperm.xlu1 %14939, %v12250_v39   ;;  %13993 = vmatprep.mubr.msk.f32.mxu0 %vm732_vm2, %v20506_v45  ;;  %20509 = vst [vmem:[#allocation75_spill] sm:$0xff] %v17789_v14  ;;  %v17795_v36 = vpop.f32.mrb[100].mxu1  ;;  %v4108_v42 = vmul.f32 %v20516_v26, %v3659_v58  ;;  %v20519_v26 = vld [vmem:[#allocation102_spill] sm:$0xff] }
 0x294   :  { %7717 = vperm.xlu0 %14938, %v12249_v2   ;;  %20510 = vst [vmem:[#allocation52_spill] sm:$0xff] %v17795_v36  ;;  %v17802_v43 = vpop.f32.mrb[101].mxu1  ;;  %v20513_v2 = vld [vmem:[#allocation126_spill] sm:$0xff]  ;;  %v3660_v36 = vld [vmem:[#allocation2 + $0x10a] sm:$0xff] }
 0x295   :  { %13780 = vmatmul.mubr.msk.f32.gmra.mrb[156].mxu1 %vm732_vm2, %v4105_v40  ;;  %20512 = vst [vmem:[#allocation58_spill] sm:$0xff] %v17802_v43  ;;  %v4107_v45 = vmul.f32 %v20513_v2, %v3658_v17  ;;  %v20514_v40 = vld [vmem:[#allocation103_spill] sm:$0xff]  ;;  %v17809_v27 = vpop.f32.mrb[102].mxu1  ;;  %v3661_v43 = vld [vmem:[#allocation2 + $0x112] sm:$0xff]  ;;  %v12253_v17 = vld [vmem:[%s20133_s4 + $0xc60] sm:$0xff] }
 0x296   :  { %v17797_v39 = vpop.permute.xlu1 %6576  ;;  %13782 = vmatprep.mubr.msk.f32.mxu1 %vm732_vm2, %v4106_v24  ;;  %13994 = vmatmul.mubr.msk.f32.gmra.mrb[40].mxu0 %vm732_vm2, %v20511_v48  ;;  %20515 = vst [vmem:[#allocation73_spill] sm:$0xff] %v17809_v27  ;;  %v12254_v24 = vld [vmem:[%s20133_s4 + $0xc68] sm:$0xff]  ;;  %v17815_v48 = vpop.f32.mrb[103].mxu1  ;;  %v4110_v4 = vmul.f32 %v20524_v13, %v3661_v43  ;;  %v20527_v13 = vld [vmem:[#allocation104_spill] sm:$0xff] }
 0x297   :  { %v17805_v14 = vpop.permute.xlu0 %6571  ;;  %7732 = vperm.xlu1 %14939, %v12252_v61   ;;  %13996 = vmatprep.mubr.msk.f32.mxu0 %vm732_vm2, %v20514_v40  ;;  %20517 = vst [vmem:[#allocation79_spill] sm:$0xff] %v17815_v48  ;;  %v17821_v61 = vpop.f32.mrb[104].mxu1 }
 0x298   :  { %7727 = vperm.xlu0 %14938, %v12251_v31   ;;  %20518 = vst [vmem:[#allocation56_spill] sm:$0xff] %v17821_v61  ;;  %v17828_v58 = vpop.f32.mrb[105].mxu1  ;;  %v20521_v31 = vld [vmem:[#allocation128_spill] sm:$0xff]  ;;  %v3662_v61 = vld [vmem:[#allocation2 + $0x11a] sm:$0xff] }
 0x299   :  { %13783 = vmatmul.mubr.msk.f32.gmra.mrb[158].mxu1 %vm732_vm2, %v4107_v45  ;;  %20520 = vst [vmem:[#allocation62_spill] sm:$0xff] %v17828_v58  ;;  %v4109_v40 = vmul.f32 %v20521_v31, %v3660_v36  ;;  %v20522_v45 = vld [vmem:[#allocation105_spill] sm:$0xff]  ;;  %v17835_v27 = vpop.f32.mrb[106].mxu1  ;;  %v3663_v58 = vld [vmem:[#allocation2 + $0x122] sm:$0xff]  ;;  %v12255_v36 = vld [vmem:[%s20133_s4 + $0xc70] sm:$0xff] }
 0x29a   :  { %v17823_v2 = vpop.permute.xlu1 %6586  ;;  %13785 = vmatprep.mubr.msk.f32.mxu1 %vm732_vm2, %v4108_v42  ;;  %13997 = vmatmul.mubr.msk.f32.gmra.mrb[42].mxu0 %vm732_vm2, %v20519_v26  ;;  %20523 = vst [vmem:[#allocation77_spill] sm:$0xff] %v17835_v27  ;;  %v12256_v42 = vld [vmem:[%s20133_s4 + $0xc78] sm:$0xff]  ;;  %v17841_v26 = vpop.f32.mrb[107].mxu1  ;;  %v4112_v10 = vmul.f32 %v20532_v44, %v3663_v58  ;;  %v20535_v44 = vld [vmem:[#allocation106_spill] sm:$0xff] }
 0x29b   :  { %v17831_v48 = vpop.permute.xlu0 %6581  ;;  %7742 = vperm.xlu1 %14939, %v12254_v24   ;;  %13999 = vmatprep.mubr.msk.f32.mxu0 %vm732_vm2, %v20522_v45  ;;  %20525 = vst [vmem:[#allocation60_spill] sm:$0xff] %v17841_v26  ;;  %v17847_v24 = vpop.f32.mrb[108].mxu1 }
 0x29c   :  { %7737 = vperm.xlu0 %14938, %v12253_v17   ;;  %20526 = vst [vmem:[#allocation66_spill] sm:$0xff] %v17847_v24  ;;  %v17854_v43 = vpop.f32.mrb[109].mxu1  ;;  %v20529_v17 = vld [vmem:[#allocation130_spill] sm:$0xff]  ;;  %v3664_v24 = vld [vmem:[#allocation2 + $0x12a] sm:$0xff] }
 0x29d   :  { %13786 = vmatmul.mubr.msk.f32.gmra.mrb[160].mxu1 %vm732_vm2, %v4109_v40  ;;  %20528 = vst [vmem:[#allocation64_spill] sm:$0xff] %v17854_v43  ;;  %v4111_v45 = vmul.f32 %v20529_v17, %v3662_v61  ;;  %v20530_v40 = vld [vmem:[#allocation107_spill] sm:$0xff]  ;;  %v17861_v27 = vpop.f32.mrb[110].mxu1  ;;  %v3665_v43 = vld [vmem:[#allocation2 + $0x132] sm:$0xff]  ;;  %v12257_v61 = vld [vmem:[%s20133_s4 + $0xc80] sm:$0xff] }
 0x29e   :  { %v17849_v31 = vpop.permute.xlu1 %6596  ;;  %13788 = vmatprep.mubr.msk.f32.mxu1 %vm732_vm2, %v4110_v4  ;;  %14000 = vmatmul.mubr.msk.f32.gmra.mrb[44].mxu0 %vm732_vm2, %v20527_v13  ;;  %20531 = vst [vmem:[#allocation124_spill] sm:$0xff] %v17861_v27  ;;  %v12258_v4 = vld [vmem:[%s20133_s4 + $0xc88] sm:$0xff]  ;;  %v17867_v13 = vpop.f32.mrb[111].mxu1  ;;  %v4114_v30 = vmul.f32 %v20540_v15, %v3665_v43  ;;  %v20543_v15 = vld [vmem:[#allocation108_spill] sm:$0xff] }
 0x29f   :  { %v17857_v26 = vpop.permute.xlu0 %6591  ;;  %7752 = vperm.xlu1 %14939, %v12256_v42   ;;  %14002 = vmatprep.mubr.msk.f32.mxu0 %vm732_vm2, %v20530_v40  ;;  %20533 = vst [vmem:[#allocation70_spill] sm:$0xff] %v17867_v13  ;;  %v17873_v42 = vpop.f32.mrb[112].mxu1 }
 0x2a0   :  { %7747 = vperm.xlu0 %14938, %v12255_v36   ;;  %20534 = vst [vmem:[#allocation68_spill] sm:$0xff] %v17873_v42  ;;  %v17880_v58 = vpop.f32.mrb[113].mxu1  ;;  %v20537_v36 = vld [vmem:[#allocation132_spill] sm:$0xff]  ;;  %v3666_v42 = vld [vmem:[#allocation2 + $0x13a] sm:$0xff] }
 0x2a1   :  { %13789 = vmatmul.mubr.msk.f32.gmra.mrb[162].mxu1 %vm732_vm2, %v4111_v45  ;;  %20536 = vst [vmem:[#allocation125_spill] sm:$0xff] %v17880_v58  ;;  %v4113_v40 = vmul.f32 %v20537_v36, %v3664_v24  ;;  %v20538_v45 = vld [vmem:[#allocation109_spill] sm:$0xff]  ;;  %v17887_v27 = vpop.f32.mrb[114].mxu1  ;;  %v3667_v58 = vld [vmem:[#allocation2 + $0x142] sm:$0xff]  ;;  %v12259_v24 = vld [vmem:[%s20133_s4 + $0xc90] sm:$0xff] }
 0x2a2   :  { %v17875_v17 = vpop.permute.xlu1 %6606  ;;  %13791 = vmatprep.mubr.msk.f32.mxu1 %vm732_vm2, %v4112_v10  ;;  %14003 = vmatmul.mubr.msk.f32.gmra.mrb[46].mxu0 %vm732_vm2, %v20535_v44  ;;  %20539 = vst [vmem:[#allocation74_spill] sm:$0xff] %v17887_v27  ;;  %v12260_v10 = vld [vmem:[%s20133_s4 + $0xc98] sm:$0xff]  ;;  %v17893_v44 = vpop.f32.mrb[115].mxu1  ;;  %v4116_v41 = vmul.f32 %v20548_v51, %v3667_v58  ;;  %v20551_v51 = vld [vmem:[#allocation110_spill] sm:$0xff] }
 0x2a3   :  { %v17883_v13 = vpop.permute.xlu0 %6601  ;;  %7762 = vperm.xlu1 %14939, %v12258_v4   ;;  %14005 = vmatprep.mubr.msk.f32.mxu0 %vm732_vm2, %v20538_v45  ;;  %20541 = vst [vmem:[#allocation72_spill] sm:$0xff] %v17893_v44  ;;  %v17899_v4 = vpop.f32.mrb[116].mxu1 }
 0x2a4   :  { %7757 = vperm.xlu0 %14938, %v12257_v61   ;;  %20542 = vst [vmem:[#allocation78_spill] sm:$0xff] %v17899_v4  ;;  %v17906_v43 = vpop.f32.mrb[117].mxu1  ;;  %v20545_v61 = vld [vmem:[#allocation134_spill] sm:$0xff]  ;;  %v3668_v4 = vld [vmem:[#allocation2 + $0x14a] sm:$0xff] }
 0x2a5   :  { %13792 = vmatmul.mubr.msk.f32.gmra.mrb[164].mxu1 %vm732_vm2, %v4113_v40  ;;  %20544 = vst [vmem:[#allocation76_spill] sm:$0xff] %v17906_v43  ;;  %v4115_v45 = vmul.f32 %v20545_v61, %v3666_v42  ;;  %v20546_v40 = vld [vmem:[#allocation111_spill] sm:$0xff]  ;;  %v17913_v27 = vpop.f32.mrb[118].mxu1  ;;  %v3669_v43 = vld [vmem:[#allocation2 + $0x152] sm:$0xff]  ;;  %v12261_v42 = vld [vmem:[%s20133_s4 + $0xca0] sm:$0xff] }
 0x2a6   :  { %v17901_v36 = vpop.permute.xlu1 %6616  ;;  %13794 = vmatprep.mubr.msk.f32.mxu1 %vm732_vm2, %v4114_v30  ;;  %14006 = vmatmul.mubr.msk.f32.gmra.mrb[48].mxu0 %vm732_vm2, %v20543_v15  ;;  %20547 = vst [vmem:[#allocation81_spill] sm:$0xff] %v17913_v27  ;;  %v12262_v30 = vld [vmem:[%s20133_s4 + $0xca8] sm:$0xff]  ;;  %v17919_v15 = vpop.f32.mrb[119].mxu1  ;;  %v4118_v37 = vmul.f32 %v20556_v55, %v3669_v43  ;;  %v20559_v55 = vld [vmem:[#allocation112_spill] sm:$0xff] }
 0x2a7   :  { %v17909_v44 = vpop.permute.xlu0 %6611  ;;  %7772 = vperm.xlu1 %14939, %v12260_v10   ;;  %14008 = vmatprep.mubr.msk.f32.mxu0 %vm732_vm2, %v20546_v40  ;;  %20549 = vst [vmem:[#allocation80_spill] sm:$0xff] %v17919_v15  ;;  %v17925_v10 = vpop.f32.mrb[120].mxu1 }
 0x2a8   :  { %7767 = vperm.xlu0 %14938, %v12259_v24   ;;  %20550 = vst [vmem:[#allocation83_spill] sm:$0xff] %v17925_v10  ;;  %v17932_v58 = vpop.f32.mrb[121].mxu1  ;;  %v20553_v24 = vld [vmem:[#allocation136_spill] sm:$0xff]  ;;  %v3670_v10 = vld [vmem:[#allocation2 + $0x15a] sm:$0xff] }
 0x2a9   :  { %13795 = vmatmul.mubr.msk.f32.gmra.mrb[166].mxu1 %vm732_vm2, %v4115_v45  ;;  %20552 = vst [vmem:[#allocation82_spill] sm:$0xff] %v17932_v58  ;;  %v4117_v40 = vmul.f32 %v20553_v24, %v3668_v4  ;;  %v20554_v45 = vld [vmem:[#allocation113_spill] sm:$0xff]  ;;  %v17939_v27 = vpop.f32.mrb[122].mxu1  ;;  %v3671_v58 = vld [vmem:[#allocation2 + $0x162] sm:$0xff]  ;;  %v12263_v4 = vld [vmem:[%s20133_s4 + $0xcb0] sm:$0xff] }
 0x2aa   :  { %v17927_v61 = vpop.permute.xlu1 %6626  ;;  %13797 = vmatprep.mubr.msk.f32.mxu1 %vm732_vm2, %v4116_v41  ;;  %14009 = vmatmul.mubr.msk.f32.gmra.mrb[50].mxu0 %vm732_vm2, %v20551_v51  ;;  %20555 = vst [vmem:[#allocation85_spill] sm:$0xff] %v17939_v27  ;;  %v12264_v41 = vld [vmem:[%s20133_s4 + $0xcb8] sm:$0xff]  ;;  %v17945_v51 = vpop.f32.mrb[123].mxu1  ;;  %v4120_v34 = vmul.f32 %v20564_v59, %v3671_v58  ;;  %v20567_v59 = vld [vmem:[#allocation140_spill] sm:$0xff] }
 0x2ab   :  { %v17935_v15 = vpop.permute.xlu0 %6621  ;;  %7782 = vperm.xlu1 %14939, %v12262_v30   ;;  %14011 = vmatprep.mubr.msk.f32.mxu0 %vm732_vm2, %v20554_v45  ;;  %20557 = vst [vmem:[#allocation84_spill] sm:$0xff] %v17945_v51  ;;  %v17951_v30 = vpop.f32.mrb[124].mxu1 }
 0x2ac   :  { %7777 = vperm.xlu0 %14938, %v12261_v42   ;;  %20558 = vst [vmem:[#allocation87_spill] sm:$0xff] %v17951_v30  ;;  %v17958_v43 = vpop.f32.mrb[125].mxu1  ;;  %v20561_v42 = vld [vmem:[#allocation138_spill] sm:$0xff]  ;;  %v3672_v30 = vld [vmem:[#allocation2 + $0x16a] sm:$0xff] }
 0x2ad   :  { %13798 = vmatmul.mubr.msk.f32.gmra.mrb[168].mxu1 %vm732_vm2, %v4117_v40  ;;  %20560 = vst [vmem:[#allocation86_spill] sm:$0xff] %v17958_v43  ;;  %v4119_v45 = vmul.f32 %v20561_v42, %v3670_v10  ;;  %v20562_v40 = vld [vmem:[#allocation115_spill] sm:$0xff]  ;;  %v17965_v27 = vpop.f32.mrb[126].mxu1  ;;  %v3673_v43 = vld [vmem:[#allocation2 + $0x172] sm:$0xff]  ;;  %v12265_v10 = vld [vmem:[%s20133_s4 + $0xcc0] sm:$0xff]  ;;  %v4121_v58 = vmul.f32 %v20567_v59, %v3672_v30 }
 0x2ae   :  { %v17953_v24 = vpop.permute.xlu1 %6636  ;;  %13800 = vmatprep.mubr.msk.f32.mxu1 %vm732_vm2, %v4118_v37  ;;  %14012 = vmatmul.mubr.msk.f32.gmra.mrb[52].mxu0 %vm732_vm2, %v20559_v55  ;;  %20563 = vst [vmem:[#allocation89_spill] sm:$0xff] %v17965_v27  ;;  %v12266_v37 = vld [vmem:[%s20133_s4 + $0xcc8] sm:$0xff]  ;;  %v17971_v55 = vpop.f32.mrb[127].mxu1  ;;  %v20566_v42 = vld [vmem:[#allocation114_spill] sm:$0xff]  ;;  %v12267_v30 = vld [vmem:[%s20133_s4 + $0xcd0] sm:$0xff] }
 0x2af   :  { %v17961_v51 = vpop.permute.xlu0 %6631  ;;  %7792 = vperm.xlu1 %14939, %v12264_v41   ;;  %14014 = vmatprep.mubr.msk.f32.mxu0 %vm732_vm2, %v20562_v40  ;;  %20565 = vst [vmem:[#allocation88_spill] sm:$0xff] %v17971_v55  ;;  %v20568_v40 = vld [vmem:[#allocation117_spill] sm:$0xff]  ;;  %v20569_v55 = vld [vmem:[#allocation143_spill] sm:$0xff] }
 0x2b0   :  { %7787 = vperm.xlu0 %14938, %v12263_v4   ;;  %v4122_v27 = vmul.f32 %v20569_v55, %v3673_v43  ;;  %v20571_v43 = vld [vmem:[#allocation142_spill] sm:$0xff]  ;;  %v20572_v59 = vld [vmem:[#allocation119_spill] sm:$0xff] }
 0x2b1   :  { %13801 = vmatmul.mubr.msk.f32.gmra.mrb[170].mxu1 %vm732_vm2, %v4119_v45  ;;  %v3674_v45 = vld [vmem:[#allocation2 + $0x17a] sm:$0xff] }
 0x2b2   :  { %v17977_v41 = vpop.permute.xlu1 %6646  ;;  %13803 = vmatprep.mubr.msk.f32.mxu1 %vm732_vm2, %v4120_v34  ;;  %14015 = vmatmul.mubr.msk.f32.gmra.mrb[54].mxu0 %vm732_vm2, %v20566_v42  ;;  %v3675_v34 = vld [vmem:[#allocation2 + $0x182] sm:$0xff]  ;;  %v4123_v55 = vmul.f32 %v20571_v43, %v3674_v45 }
 0x2b3   :  { %v17983_v4 = vpop.permute.xlu0 %6641  ;;  %7802 = vperm.xlu1 %14939, %v12266_v37   ;;  %14017 = vmatprep.mubr.msk.f32.mxu0 %vm732_vm2, %v20568_v40  ;;  %v20570_v37 = vld [vmem:[#allocation116_spill] sm:$0xff]  ;;  %v20573_v40 = vld [vmem:[#allocation145_spill] sm:$0xff]  ;;  %v12269_v45 = vld [vmem:[%s20133_s4 + $0xce0] sm:$0xff] }
 0x2b4   :  { %7797 = vperm.xlu0 %14938, %v12265_v10   ;;  %v4124_v7 = vmul.f32 %v20573_v40, %v3675_v34  ;;  %v20575_v34 = vld [vmem:[#allocation144_spill] sm:$0xff]  ;;  %v20577_v40 = vld [vmem:[#allocation147_spill] sm:$0xff] }
 0x2b5   :  { %13804 = vmatmul.mubr.msk.f32.gmra.mrb[172].mxu1 %vm732_vm2, %v4121_v58  ;;  %v3676_v58 = vld [vmem:[#allocation2 + $0x18a] sm:$0xff] }
 0x2b6   :  { %v17995_v42 = vpop.permute.xlu1 %6656  ;;  %13806 = vmatprep.mubr.msk.f32.mxu1 %vm732_vm2, %v4122_v27  ;;  %14018 = vmatmul.mubr.msk.f32.gmra.mrb[56].mxu0 %vm732_vm2, %v20570_v37  ;;  %v3677_v27 = vld [vmem:[#allocation2 + $0x192] sm:$0xff] }
 0x2b7   :  { %v18001_v10 = vpop.permute.xlu0 %6651  ;;  %7812 = vperm.xlu1 %14939, %v12268_v63   ;;  %14020 = vmatprep.mubr.msk.f32.mxu0 %vm732_vm2, %v20572_v59  ;;  %v20574_v63 = vld [vmem:[#allocation118_spill] sm:$0xff]  ;;  %v20576_v59 = vld [vmem:[#allocation121_spill] sm:$0xff]  ;;  %v4126_v35 = vmul.f32 %v20577_v40, %v3677_v27 }
 0x2b8   :  { %7807 = vperm.xlu0 %14938, %v12267_v30   ;;  %v4125_v30 = vmul.f32 %v20575_v34, %v3676_v58  ;;  %v12271_v58 = vld [vmem:[%s20133_s4 + $0xcf0] sm:$0xff]  ;;  %v20580_v27 = vld [vmem:[#allocation146_spill] sm:$0xff]  ;;  %v20583_v40 = vld [vmem:[#allocation5_spill] sm:$0xff] }
 0x2b9   :  { %13807 = vmatmul.mubr.msk.f32.gmra.mrb[174].mxu1 %vm732_vm2, %v4123_v55  ;;  %v3678_v55 = vld [vmem:[#allocation2 + $0x19a] sm:$0xff] }
 0x2ba   :  { %v18013_v37 = vpop.permute.xlu1 %6666  ;;  %13809 = vmatprep.mubr.msk.f32.mxu1 %vm732_vm2, %v4124_v7  ;;  %14021 = vmatmul.mubr.msk.f32.gmra.mrb[58].mxu0 %vm732_vm2, %v20574_v63  ;;  %v3679_v7 = vld [vmem:[#allocation2 + $0x1a2] sm:$0xff] }
 0x2bb   :  { %v18019_v43 = vpop.permute.xlu0 %6661  ;;  %7822 = vperm.xlu1 %14939, %v12270_v3   ;;  %14023 = vmatprep.mubr.msk.f32.mxu0 %vm732_vm2, %v20576_v59  ;;  %v20579_v3 = vld [vmem:[#allocation120_spill] sm:$0xff]  ;;  %v20582_v59 = vld [vmem:[#allocation123_spill] sm:$0xff]  ;;  %v4128_v1 = vmul.f32 %v20583_v40, %v3679_v7  ;;  %v20585_v7 = vld [vmem:[#allocation122_spill] sm:$0xff] }
 0x2bc   :  { %7817 = vperm.xlu0 %14938, %v12269_v45   ;;  %v4127_v45 = vmul.f32 %v20580_v27, %v3678_v55 }
 0x2bd   :  { %13810 = vmatmul.mubr.msk.f32.gmra.mrb[176].mxu1 %vm732_vm2, %v4125_v30  ;;  %v3680_v30 = vld [vmem:[#allocation2 + $0x1aa] sm:$0xff] }
 0x2be   :  { %v18031_v63 = vpop.permute.xlu1 %6676  ;;  %13812 = vmatprep.mubr.msk.f32.mxu1 %vm732_vm2, %v4126_v35  ;;  %14024 = vmatmul.mubr.msk.f32.gmra.mrb[60].mxu0 %vm732_vm2, %v20579_v3  ;;  %v12274_v35 = vld [vmem:[%s20133_s4 + $0xd08] sm:$0xff]  ;;  %v6839_v3 = vmul.f32 %v17691_v56, %v6390_v5  ;;  %v3682_v5 = vld [vmem:[#allocation2 + $0x1ba] sm:$0xff] }
 0x2bf   :  { %20578 = vst [vmem:[#allocation91_spill] sm:$0xff] %v18031_v63  ;;  %v18037_v34 = vpop.permute.xlu0 %6671  ;;  %7832 = vperm.xlu1 %14939, %v12272_v6   ;;  %14026 = vmatprep.mubr.msk.f32.mxu0 %vm732_vm2, %v20582_v59  ;;  %v3681_v63 = vld [vmem:[#allocation2 + $0x1b2] sm:$0xff]  ;;  %v12273_v6 = vld [vmem:[%s20133_s4 + $0xd00] sm:$0xff]  ;;  %v20587_v56 = vld [vmem:[#allocation7_spill] sm:$0xff] }
 0x2c0   :  { %20581 = vst [vmem:[#allocation90_spill] sm:$0xff] %v18037_v34  ;;  %7827 = vperm.xlu0 %14938, %v12271_v58   ;;  %v20586_v58 = vld [vmem:[#allocation3_spill] sm:$0xff]  ;;  %v6391_v59 = vld [vmem:[#allocation2 + $0x1a] sm:$0xff] }
 0x2c1   :  { %13813 = vmatmul.mubr.msk.f32.gmra.mrb[178].mxu1 %vm732_vm2, %v4127_v45  ;;  %v4129_v27 = vmul.f32 %v20586_v58, %v3680_v30  ;;  %v4130_v45 = vmul.f32 %v20587_v56, %v3681_v63  ;;  %v6840_v34 = vmul.f32 %v17684_v47, %v6391_v59  ;;  %v12275_v30 = vld [vmem:[%s20133_s4 + $0xd10] sm:$0xff]  ;;  %v18076_v47 = vld [vmem:[%s20137_s3 + $0x38] sm:$0xff] }
 0x2c2   :  { %v18050_v55 = vpop.permute.xlu1 %6686  ;;  %13815 = vmatprep.mubr.msk.f32.mxu1 %vm732_vm2, %v4128_v1  ;;  %14027 = vmatmul.mubr.msk.f32.gmra.mrb[62].mxu0 %vm732_vm2, %v20585_v7  ;;  %v12276_v1 = vld [vmem:[%s20133_s4 + $0xd18] sm:$0xff]  ;;  %v6392_v7 = vld [vmem:[#allocation2 + $0x22] sm:$0xff]  ;;  %v20589_v63 = vld [vmem:[#allocation4_spill] sm:$0xff] }
 0x2c3   :  { %20584 = vst [vmem:[#allocation93_spill] sm:$0xff] %v18050_v55  ;;  %v18056_v40 = vpop.permute.xlu0 %6681  ;;  %7842 = vperm.xlu1 %14939, %v12274_v35   ;;  %14031 = vmatprep.mubr.msk.f32.mxu0 %vm732_vm2, %v6839_v3  ;;  %v3683_v55 = vld [vmem:[#allocation2 + $0x1c2] sm:$0xff]  ;;  %v6841_v35 = vmul.f32 %v17717_v33, %v6392_v7  ;;  %v6393_v58 = vld [vmem:[#allocation2 + $0x2a] sm:$0xff]  ;;  %v20590_v56 = vld [vmem:[#allocation9_spill] sm:$0xff] }
 0x2c4   :  { %7837 = vperm.xlu0 %14938, %v12273_v6   ;;  %v4131_v6 = vmul.f32 %v20589_v63, %v3682_v5  ;;  %v14941_v33 = vld [vmem:[%s20137_s3 + $0x30] sm:$0xff]  ;;  %v12278_v5 = vld [vmem:[%s20133_s4 + $0xd28] sm:$0xff] }
 0x2c5   :  { %13816 = vmatmul.mubr.msk.f32.gmra.mrb[180].mxu1 %vm732_vm2, %v4129_v27  ;;  %v3684_v59 = vld [vmem:[#allocation2 + $0x1ca] sm:$0xff]  ;;  %v6394_v7 = vld [vmem:[#allocation2 + $0x32] sm:$0xff] }
 0x2c6   :  { %v18069_v3 = vpop.permute.xlu1 %6696  ;;  %13818 = vmatprep.mubr.msk.f32.mxu1 %vm732_vm2, %v4130_v45  ;;  %14032 = vmatmul.mubr.msk.f32.vlgmr.msra.gmra.mrb[0].mxu0 %vm732_vm2, %v6840_v34  ;;  %v4132_v45 = vmul.f32 %v20590_v56, %v3683_v55  ;;  %v6842_v34 = vmul.f32 %v17711_v11, %v6393_v58  ;;  %v3685_v63 = vld [vmem:[#allocation2 + $0x1d2] sm:$0xff]  ;;  %v20591_v55 = vld [vmem:[#allocation6_spill] sm:$0xff] }
 0x2c7   :  { %20588 = vst [vmem:[#allocation92_spill] sm:$0xff] %v18069_v3  ;;  %v18079_v27 = vpop.permute.xlu0 %6691  ;;  %14128 = vmatpush3.msra.mxu0 %v14941_v33  ;;  %7852 = vperm.xlu1 %14939, %v12276_v1   ;;  %v6843_v3 = vmul.f32 %v17739_v25, %v6394_v7  ;;  %v12277_v1 = vld [vmem:[%s20133_s4 + $0xd20] sm:$0xff] }
 0x2c8   :  { %7847 = vperm.xlu0 %14938, %v12275_v30   ;;  %14034 = vmatprep.mubr.msk.f32.mxu0 %vm732_vm2, %v6841_v35  ;;  %v4133_v30 = vmul.f32 %v20591_v55, %v3684_v59  ;;  %v6395_v35 = vld [vmem:[#allocation2 + $0x3a] sm:$0xff]  ;;  %v6396_v7 = vld [vmem:[#allocation2 + $0x42] sm:$0xff] }
 0x2c9   :  { %13819 = vmatmul.mubr.msk.f32.gmra.mrb[182].mxu1 %vm732_vm2, %v4131_v6  ;;  %14225 = vmatprep.subr.mxu0 %v18076_v47  ;;  %v3686_v25 = vld [vmem:[#allocation2 + $0x1da] sm:$0xff]  ;;  %v20592_v6 = vld [vmem:[#allocation11_spill] sm:$0xff]  ;;  %v6844_v56 = vmul.f32 %v17733_v18, %v6395_v35  ;;  %v6845_v59 = vmul.f32 %v17757_v22, %v6396_v7  ;;  %v20593_v18 = vld [vmem:[#allocation8_spill] sm:$0xff] }
 0x2ca   :  { %v18096_v11 = vpop.permute.xlu1 %6706  ;;  %13821 = vmatprep.mubr.msk.f32.mxu1 %vm732_vm2, %v4132_v45  ;;  %14035 = vmatmul.mubr.msk.f32.gmra.mrb[2].mxu0 %vm732_vm2, %v6842_v34  ;;  %v4134_v33 = vmul.f32 %v20592_v6, %v3685_v63  ;;  %v12280_v45 = vld [vmem:[%s20133_s4 + $0xd38] sm:$0xff]  ;;  %v3687_v34 = vld [vmem:[#allocation2 + $0x1e2] sm:$0xff]  ;;  %v4135_v63 = vmul.f32 %v20593_v18, %v3686_v25  ;;  %v3688_v22 = vld [vmem:[#allocation2 + $0x1ea] sm:$0xff] }
 0x2cb   :  { %v18101_v58 = vpop.permute.xlu0 %6701  ;;  %7862 = vperm.xlu1 %14939, %v12278_v5   ;;  %14037 = vmatprep.mubr.msk.f32.mxu0 %vm732_vm2, %v6843_v3  ;;  %v12279_v3 = vld [vmem:[%s20133_s4 + $0xd30] sm:$0xff] }
 0x2cc   :  { %7857 = vperm.xlu0 %14938, %v12277_v1   ;;  %v6397_v1 = vld [vmem:[#allocation2 + $0x4a] sm:$0xff]  ;;  %v6398_v7 = vld [vmem:[#allocation2 + $0x52] sm:$0xff] }
 0x2cd   :  { %13822 = vmatmul.mubr.msk.f32.gmra.mrb[184].mxu1 %vm732_vm2, %v4133_v30  ;;  %v20594_v30 = vld [vmem:[#allocation13_spill] sm:$0xff]  ;;  %v6846_v6 = vmul.f32 %v17751_v53, %v6397_v1  ;;  %v6847_v25 = vmul.f32 %v17779_v9, %v6398_v7  ;;  %v20595_v53 = vld [vmem:[#allocation10_spill] sm:$0xff] }
 0x2ce   :  { %v18114_v5 = vpop.permute.xlu1 %6716  ;;  %13824 = vmatprep.mubr.msk.f32.mxu1 %vm732_vm2, %v4134_v33  ;;  %14038 = vmatmul.mubr.msk.f32.gmra.mrb[4].mxu0 %vm732_vm2, %v6844_v56  ;;  %v4136_v35 = vmul.f32 %v20594_v30, %v3687_v34  ;;  %v12282_v33 = vld [vmem:[%s20133_s4 + $0xd48] sm:$0xff]  ;;  %v3689_v56 = vld [vmem:[#allocation2 + $0x1f2] sm:$0xff]  ;;  %v4137_v34 = vmul.f32 %v20595_v53, %v3688_v22  ;;  %v3690_v9 = vld [vmem:[#allocation2 + $0x1fa] sm:$0xff] }
 0x2cf   :  { %v18119_v55 = vpop.permute.xlu0 %6711  ;;  %7872 = vperm.xlu1 %14939, %v12280_v45   ;;  %14040 = vmatprep.mubr.msk.f32.mxu0 %vm732_vm2, %v6845_v59  ;;  %v12281_v45 = vld [vmem:[%s20133_s4 + $0xd40] sm:$0xff]  ;;  %v12283_v22 = vld [vmem:[%s20133_s4 + $0xd50] sm:$0xff] }
 0x2d0   :  { %7867 = vperm.xlu0 %14938, %v12279_v3   ;;  %v6399_v3 = vld [vmem:[#allocation2 + $0x5a] sm:$0xff]  ;;  %v6400_v7 = vld [vmem:[#allocation2 + $0x62] sm:$0xff] }
 0x2d1   :  { %13825 = vmatmul.mubr.msk.f32.gmra.mrb[186].mxu1 %vm732_vm2, %v4135_v63  ;;  %v20596_v63 = vld [vmem:[#allocation15_spill] sm:$0xff]  ;;  %v6848_v30 = vmul.f32 %v17773_v29, %v6399_v3  ;;  %v20597_v29 = vld [vmem:[#allocation12_spill] sm:$0xff] }
 0x2d2   :  { %v18132_v59 = vpop.permute.xlu1 %6726  ;;  %13827 = vmatprep.mubr.msk.f32.mxu1 %vm732_vm2, %v4136_v35  ;;  %14041 = vmatmul.mubr.msk.f32.gmra.mrb[6].mxu0 %vm732_vm2, %v6846_v6  ;;  %v4138_v1 = vmul.f32 %v20596_v63, %v3689_v56  ;;  %v12284_v35 = vld [vmem:[%s20133_s4 + $0xd58] sm:$0xff]  ;;  %v6849_v6 = vmul.f32 %v17805_v14, %v6400_v7  ;;  %v4139_v56 = vmul.f32 %v20597_v29, %v3690_v9  ;;  %v14942_v14 = vld [vmem:[#allocation2 + $0x110] sm:$0xff]  ;;  %v12286_v63 = vld [vmem:[%s20133_s4 + $0xd68] sm:$0xff] }
 0x2d3   :  { %v18137_v18 = vpop.permute.xlu0 %6721  ;;  %7882 = vperm.xlu1 %14939, %v12282_v33   ;;  %14043 = vmatprep.mubr.msk.f32.mxu0 %vm732_vm2, %v6847_v25  ;;  %v6401_v25 = vld [vmem:[#allocation2 + $0x6a] sm:$0xff]  ;;  %v5264_v53 = vmul.f32 %v14942_v14, %v17341_v46  ;;  %v6402_v3 = vld [vmem:[#allocation2 + $0x72] sm:$0xff]  ;;  %v12285_v9 = vld [vmem:[%s20133_s4 + $0xd60] sm:$0xff] }
 0x2d4   :  { %7877 = vperm.xlu0 %14938, %v12281_v45   ;;  %v14943_v46 = vld [vmem:[#allocation2 + $0x118] sm:$0xff]  ;;  %v6404_v29 = vld [vmem:[#allocation2 + $0x82] sm:$0xff] }
 0x2d5   :  { %13828 = vmatmul.mubr.msk.f32.gmra.mrb[188].mxu1 %vm732_vm2, %v4137_v34  ;;  %v6850_v34 = vmul.f32 %v17797_v39, %v6401_v25  ;;  %v5265_v39 = vmul.f32 %v14943_v46, %v17336_v57  ;;  %v6403_v7 = vld [vmem:[#allocation2 + $0x7a] sm:$0xff]  ;;  %v6853_v25 = vmul.f32 %v17857_v26, %v6404_v29  ;;  %v12287_v57 = vld [vmem:[%s20133_s4 + $0xd70] sm:$0xff]  ;;  %v6408_v29 = vld [vmem:[#allocation2 + $0xa2] sm:$0xff] }
 0x2d6   :  { %v18150_v33 = vpop.permute.xlu1 %6736  ;;  %13830 = vmatprep.mubr.msk.f32.mxu1 %vm732_vm2, %v4138_v1  ;;  %14044 = vmatmul.mubr.msk.f32.gmra.mrb[8].mxu0 %vm732_vm2, %v6848_v30  ;;  %v6851_v1 = vmul.f32 %v17831_v48, %v6402_v3  ;;  %v14944_v48 = vld [vmem:[#allocation2 + $0x120] sm:$0xff]  ;;  %v14946_v26 = vld [vmem:[#allocation2 + $0x130] sm:$0xff] }
 0x2d7   :  { %v18155_v45 = vpop.permute.xlu0 %6731  ;;  %7892 = vperm.xlu1 %14939, %v12284_v35   ;;  %14046 = vmatprep.mubr.msk.f32.mxu0 %vm732_vm2, %v6849_v6  ;;  %v5266_v6 = vmul.f32 %v14944_v48, %v17358_v49  ;;  %v14945_v49 = vld [vmem:[#allocation2 + $0x128] sm:$0xff]  ;;  %v5268_v3 = vmul.f32 %v14946_v26, %v17380_v62  ;;  %v14947_v62 = vld [vmem:[#allocation2 + $0x138] sm:$0xff] }
 0x2d8   :  { %7887 = vperm.xlu0 %14938, %v12283_v22   ;;  %v6852_v22 = vmul.f32 %v17823_v2, %v6403_v7  ;;  %v5267_v2 = vmul.f32 %v14945_v49, %v17353_v12  ;;  %v12289_v12 = vld [vmem:[%s20133_s4 + $0xd80] sm:$0xff]  ;;  %v6409_v49 = vld [vmem:[#allocation2 + $0xaa] sm:$0xff] }
 0x2d9   :  { %13831 = vmatmul.mubr.msk.f32.gmra.mrb[190].mxu1 %vm732_vm2, %v4139_v56  ;;  %v12288_v56 = vld [vmem:[%s20133_s4 + $0xd78] sm:$0xff]  ;;  %v6858_v26 = vmul.f32 %v17901_v36, %v6409_v49 }
 0x2da   :  { %v18168_v30 = vpop.permute.xlu1 %6746  ;;  %13883 = vmatprep.mubr.msk.f32.mxu1 %vm732_vm2, %v5264_v53  ;;  %14047 = vmatmul.mubr.msk.f32.gmra.mrb[10].mxu0 %vm732_vm2, %v6850_v34  ;;  %v6405_v53 = vld [vmem:[#allocation2 + $0x8a] sm:$0xff]  ;;  %v6407_v7 = vld [vmem:[#allocation2 + $0x9a] sm:$0xff] }
 0x2db   :  { %v18173_v35 = vpop.permute.xlu0 %6741  ;;  %7902 = vperm.xlu1 %14939, %v12286_v63   ;;  %14049 = vmatprep.mubr.msk.f32.mxu0 %vm732_vm2, %v6851_v1  ;;  %v6854_v63 = vmul.f32 %v17849_v31, %v6405_v53  ;;  %v6406_v1 = vld [vmem:[#allocation2 + $0x92] sm:$0xff]  ;;  %v5269_v31 = vmul.f32 %v14947_v62, %v17375_v20 }
 0x2dc   :  { %7897 = vperm.xlu0 %14938, %v12285_v9   ;;  %v12290_v9 = vld [vmem:[%s20133_s4 + $0xd88] sm:$0xff]  ;;  %v6855_v46 = vmul.f32 %v17883_v13, %v6406_v1  ;;  %v14948_v13 = vld [vmem:[#allocation2 + $0x140] sm:$0xff]  ;;  %v12291_v20 = vld [vmem:[%s20133_s4 + $0xd90] sm:$0xff] }
 0x2dd   :  { %13884 = vmatmul.mubr.msk.f32.vlgmr.msra.gmra.mrb[160].mxu1 %vm732_vm2, %v5265_v39 }
 0x2de   :  { %v18186_v14 = vpop.permute.xlu1 %6756  ;;  %13886 = vmatprep.mubr.msk.f32.mxu1 %vm732_vm2, %v5266_v6  ;;  %14050 = vmatmul.mubr.msk.f32.gmra.mrb[12].mxu0 %vm732_vm2, %v6852_v22  ;;  %v5270_v6 = vmul.f32 %v14948_v13, %v17402_v54  ;;  %v6856_v22 = vmul.f32 %v17875_v17, %v6407_v7  ;;  %v14949_v54 = vld [vmem:[#allocation2 + $0x148] sm:$0xff]  ;;  %v12296_v13 = vld [vmem:[%s20133_s4 + $0xdb8] sm:$0xff] }
 0x2df   :  { %v18191_v34 = vpop.permute.xlu0 %6751  ;;  %7912 = vperm.xlu1 %14939, %v12288_v56   ;;  %14052 = vmatprep.mubr.msk.f32.mxu0 %vm732_vm2, %v6853_v25  ;;  %v12292_v56 = vld [vmem:[%s20133_s4 + $0xd98] sm:$0xff]  ;;  %v6857_v25 = vmul.f32 %v17909_v44, %v6408_v29  ;;  %v5271_v17 = vmul.f32 %v14949_v54, %v17395_v19  ;;  %v14950_v44 = vld [vmem:[#allocation2 + $0x150] sm:$0xff]  ;;  %v12293_v19 = vld [vmem:[%s20133_s4 + $0xda0] sm:$0xff] }
 0x2e0   :  { %7907 = vperm.xlu0 %14938, %v12287_v57   ;;  %v5272_v53 = vmul.f32 %v14950_v44, %v17424_v0  ;;  %v14951_v0 = vld [vmem:[#allocation2 + $0x158] sm:$0xff]  ;;  %v6412_v7 = vld [vmem:[#allocation2 + $0xc2] sm:$0xff]  ;;  %v6413_v29 = vld [vmem:[#allocation2 + $0xca] sm:$0xff] }
 0x2e1   :  { %13887 = vmatmul.mubr.msk.f32.gmra.mrb[162].mxu1 %vm732_vm2, %v5267_v2  ;;  %v5273_v36 = vmul.f32 %v14951_v0, %v17417_v52  ;;  %v12295_v52 = vld [vmem:[%s20133_s4 + $0xdb0] sm:$0xff] }
 0x2e2   :  { %v18204_v39 = vpop.permute.xlu1 %6766  ;;  %13889 = vmatprep.mubr.msk.f32.mxu1 %vm732_vm2, %v5268_v3  ;;  %14053 = vmatmul.mubr.msk.f32.gmra.mrb[14].mxu0 %vm732_vm2, %v6854_v63  ;;  %v6410_v3 = vld [vmem:[#allocation2 + $0xb2] sm:$0xff]  ;;  %v12294_v63 = vld [vmem:[%s20133_s4 + $0xda8] sm:$0xff] }
 0x2e3   :  { %v18209_v48 = vpop.permute.xlu0 %6761  ;;  %7922 = vperm.xlu1 %14939, %v12290_v9   ;;  %14055 = vmatprep.mubr.msk.f32.mxu0 %vm732_vm2, %v6855_v46  ;;  %v6859_v1 = vmul.f32 %v17935_v15, %v6410_v3  ;;  %v6411_v46 = vld [vmem:[#allocation2 + $0xba] sm:$0xff]  ;;  %v6414_v54 = vld [vmem:[#allocation2 + $0xd2] sm:$0xff] }
 0x2e4   :  { %7917 = vperm.xlu0 %14938, %v12289_v12   ;;  %v14952_v15 = vld [vmem:[#allocation2 + $0x160] sm:$0xff]  ;;  %v6863_v49 = vmul.f32 %v17983_v4, %v6414_v54 }
 0x2e5   :  { %13890 = vmatmul.mubr.msk.f32.gmra.mrb[164].mxu1 %vm732_vm2, %v5269_v31  ;;  %v5274_v62 = vmul.f32 %v14952_v15, %v17446_v28  ;;  %v6860_v31 = vmul.f32 %v17927_v61, %v6411_v46  ;;  %v14953_v28 = vld [vmem:[#allocation2 + $0x168] sm:$0xff]  ;;  %v14956_v4 = vld [vmem:[#allocation2 + $0x180] sm:$0xff] }
 0x2e6   :  { %v18222_v57 = vpop.permute.xlu1 %6776  ;;  %13892 = vmatprep.mubr.msk.f32.mxu1 %vm732_vm2, %v5270_v6  ;;  %14056 = vmatmul.mubr.msk.f32.gmra.mrb[16].mxu0 %vm732_vm2, %v6856_v22  ;;  %v6861_v6 = vmul.f32 %v17961_v51, %v6412_v7  ;;  %v5275_v61 = vmul.f32 %v14953_v28, %v17439_v50  ;;  %v14954_v51 = vld [vmem:[#allocation2 + $0x170] sm:$0xff]  ;;  %v12297_v50 = vld [vmem:[%s20133_s4 + $0xdc0] sm:$0xff]  ;;  %v5278_v3 = vmul.f32 %v14956_v4, %v17490_v23  ;;  %v14957_v23 = vld [vmem:[#allocation2 + $0x188] sm:$0xff] }
 0x2e7   :  { %v18227_v2 = vpop.permute.xlu0 %6771  ;;  %7932 = vperm.xlu1 %14939, %v12292_v56   ;;  %14058 = vmatprep.mubr.msk.f32.mxu0 %vm732_vm2, %v6857_v25  ;;  %v5276_v25 = vmul.f32 %v14954_v51, %v17468_v21  ;;  %v14955_v21 = vld [vmem:[#allocation2 + $0x178] sm:$0xff]  ;;  %v6417_v46 = vld [vmem:[#allocation2 + $0xea] sm:$0xff]  ;;  %v20598_v54 = vld [vmem:[#allocation90_spill] sm:$0xff] }
 0x2e8   :  { %7927 = vperm.xlu0 %14938, %v12291_v20   ;;  %v6862_v20 = vmul.f32 %v17953_v24, %v6413_v29  ;;  %v5277_v24 = vmul.f32 %v14955_v21, %v17461_v60  ;;  %v12299_v60 = vld [vmem:[%s20133_s4 + $0xdd0] sm:$0xff]  ;;  %v6419_v28 = vld [vmem:[#allocation2 + $0xfa] sm:$0xff] }
 0x2e9   :  { %13893 = vmatmul.mubr.msk.f32.gmra.mrb[166].mxu1 %vm732_vm2, %v5271_v17  ;;  %v12298_v17 = vld [vmem:[%s20133_s4 + $0xdc8] sm:$0xff]  ;;  %v6418_v7 = vld [vmem:[#allocation2 + $0xf2] sm:$0xff]  ;;  %v6868_v51 = vmul.f32 %v18013_v37, %v6419_v28 }
 0x2ea   :  { %v18240_v9 = vpop.permute.xlu1 %6786  ;;  %13895 = vmatprep.mubr.msk.f32.mxu1 %vm732_vm2, %v5272_v53  ;;  %14059 = vmatmul.mubr.msk.f32.gmra.mrb[18].mxu0 %vm732_vm2, %v6858_v26  ;;  %v6415_v53 = vld [vmem:[#allocation2 + $0xda] sm:$0xff]  ;;  %v6421_v21 = vld [vmem:[#allocation2 + $0x10a] sm:$0xff] }
 0x2eb   :  { %v18245_v12 = vpop.permute.xlu0 %6781  ;;  %7942 = vperm.xlu1 %14939, %v12294_v63   ;;  %14061 = vmatprep.mubr.msk.f32.mxu0 %vm732_vm2, %v6859_v1  ;;  %v6864_v63 = vmul.f32 %v17977_v41, %v6415_v53  ;;  %v6416_v1 = vld [vmem:[#allocation2 + $0xe2] sm:$0xff]  ;;  %v5279_v41 = vmul.f32 %v14957_v23, %v17483_v32  ;;  %v20599_v37 = vld [vmem:[#allocation29_spill] sm:$0xff]  ;;  %v14962_v53 = vld [vmem:[#allocation2 + $0x1b0] sm:$0xff] }
 0x2ec   :  { %7937 = vperm.xlu0 %14938, %v12293_v19   ;;  %v12300_v19 = vld [vmem:[%s20133_s4 + $0xdd8] sm:$0xff]  ;;  %v6865_v0 = vmul.f32 %v18001_v10, %v6416_v1  ;;  %v14958_v10 = vld [vmem:[#allocation2 + $0x190] sm:$0xff]  ;;  %v12301_v32 = vld [vmem:[%s20133_s4 + $0xde0] sm:$0xff] }
 0x2ed   :  { %13896 = vmatmul.mubr.msk.f32.gmra.mrb[168].mxu1 %vm732_vm2, %v5273_v36  ;;  %v20600_v4 = vld [vmem:[#allocation32_spill] sm:$0xff]  ;;  %v12370_v23 = vld [vmem:[%s20133_s4 + $0xe00] sm:$0xff]  ;;  %v12373_v28 = vld [vmem:[%s20133_s4 + $0xe18] sm:$0xff] }
 0x2ee   :  { %v18258_v22 = vpop.permute.xlu1 %6796  ;;  %13898 = vmatprep.mubr.msk.f32.mxu1 %vm732_vm2, %v5274_v62  ;;  %14062 = vmatmul.mubr.msk.f32.gmra.mrb[20].mxu0 %vm732_vm2, %v6860_v31  ;;  %v5280_v62 = vmul.f32 %v14958_v10, %v17515_v38  ;;  %v6866_v31 = vmul.f32 %v17995_v42, %v6417_v46  ;;  %v14959_v38 = vld [vmem:[#allocation2 + $0x198] sm:$0xff]  ;;  %v20602_v10 = vld [vmem:[#allocation30_spill] sm:$0xff] }
 0x2ef   :  { %v18263_v56 = vpop.permute.xlu0 %6791  ;;  %7952 = vperm.xlu1 %14939, %v12296_v13   ;;  %14064 = vmatprep.mubr.msk.f32.mxu0 %vm732_vm2, %v6861_v6  ;;  %v12302_v13 = vld [vmem:[%s20133_s4 + $0xde8] sm:$0xff]  ;;  %v6867_v6 = vmul.f32 %v18019_v43, %v6418_v7  ;;  %v5281_v42 = vmul.f32 %v14959_v38, %v17508_v16  ;;  %v14960_v43 = vld [vmem:[#allocation2 + $0x1a0] sm:$0xff]  ;;  %v12303_v16 = vld [vmem:[%s20133_s4 + $0xdf0] sm:$0xff] }
 0x2f0   :  { %7947 = vperm.xlu0 %14938, %v12295_v52   ;;  %v5282_v29 = vmul.f32 %v14960_v43, %v17537_v8  ;;  %v14961_v8 = vld [vmem:[#allocation2 + $0x1a8] sm:$0xff]  ;;  %v14963_v46 = vld [vmem:[#allocation2 + $0x1b8] sm:$0xff] }
 0x2f1   :  { %13899 = vmatmul.mubr.msk.f32.gmra.mrb[170].mxu1 %vm732_vm2, %v5275_v61 }
 0x2f2   :  { %v18276_v44 = vpop.permute.xlu1 %6806  ;;  %13901 = vmatprep.mubr.msk.f32.mxu1 %vm732_vm2, %v5276_v25  ;;  %14065 = vmatmul.mubr.msk.f32.gmra.mrb[22].mxu0 %vm732_vm2, %v6862_v20  ;;  %v6420_v25 = vld [vmem:[#allocation2 + $0x102] sm:$0xff]  ;;  %v12304_v20 = vld [vmem:[%s20133_s4 + $0xdf8] sm:$0xff] }
 0x2f3   :  { %v18281_v26 = vpop.permute.xlu0 %6801  ;;  %7962 = vperm.xlu1 %14939, %v12298_v17   ;;  %14067 = vmatprep.mubr.msk.f32.mxu0 %vm732_vm2, %v6863_v49  ;;  %v6869_v17 = vmul.f32 %v20598_v54, %v6420_v25  ;;  %v14965_v25 = vld [vmem:[#allocation2 + $0x1c8] sm:$0xff] }
 0x2f4   :  { %7957 = vperm.xlu0 %14938, %v12297_v50   ;;  %v5283_v50 = vmul.f32 %v14961_v8, %v20599_v37  ;;  %v20606_v8 = vld [vmem:[#allocation41_spill] sm:$0xff] }
 0x2f5   :  { %13902 = vmatmul.mubr.msk.f32.gmra.mrb[172].mxu1 %vm732_vm2, %v5277_v24 }
 0x2f6   :  { %v18294_v36 = vpop.permute.xlu1 %6816  ;;  %13904 = vmatprep.mubr.msk.f32.mxu1 %vm732_vm2, %v5278_v3  ;;  %14068 = vmatmul.mubr.msk.f32.gmra.mrb[24].mxu0 %vm732_vm2, %v6864_v63  ;;  %v5284_v3 = vmul.f32 %v14962_v53, %v20600_v4  ;;  %v20601_v63 = vld [vmem:[#allocation91_spill] sm:$0xff]  ;;  %v6426_v53 = vld [vmem:[#allocation2 + $0x132] sm:$0xff] }
 0x2f7   :  { %v18299_v15 = vpop.permute.xlu0 %6811  ;;  %7972 = vperm.xlu1 %14939, %v12300_v19   ;;  %14070 = vmatprep.mubr.msk.f32.mxu0 %vm732_vm2, %v6865_v0  ;;  %v6870_v1 = vmul.f32 %v20601_v63, %v6421_v21  ;;  %v6422_v19 = vld [vmem:[#allocation2 + $0x112] sm:$0xff]  ;;  %v12371_v0 = vld [vmem:[%s20133_s4 + $0xe08] sm:$0xff]  ;;  %v12374_v63 = vld [vmem:[%s20133_s4 + $0xe20] sm:$0xff] }
 0x2f8   :  { %7967 = vperm.xlu0 %14938, %v12299_v60   ;;  %v6871_v60 = vmul.f32 %v18056_v40, %v6422_v19  ;;  %v14964_v40 = vld [vmem:[#allocation2 + $0x1c0] sm:$0xff]  ;;  %v12375_v4 = vld [vmem:[%s20133_s4 + $0xe28] sm:$0xff]  ;;  %v14967_v19 = vld [vmem:[#allocation2 + $0x1d8] sm:$0xff] }
 0x2f9   :  { %13905 = vmatmul.mubr.msk.f32.gmra.mrb[174].mxu1 %vm732_vm2, %v5279_v41 }
 0x2fa   :  { %v18312_v52 = vpop.permute.xlu1 %6826  ;;  %13907 = vmatprep.mubr.msk.f32.mxu1 %vm732_vm2, %v5280_v62  ;;  %14071 = vmatmul.mubr.msk.f32.gmra.mrb[26].mxu0 %vm732_vm2, %v6866_v31  ;;  %v5285_v62 = vmul.f32 %v14963_v46, %v20602_v10  ;;  %v6423_v31 = vld [vmem:[#allocation2 + $0x11a] sm:$0xff] }
 0x2fb   :  { %v18317_v61 = vpop.permute.xlu0 %6821  ;;  %7982 = vperm.xlu1 %14939, %v12302_v13   ;;  %14073 = vmatprep.mubr.msk.f32.mxu0 %vm732_vm2, %v6867_v6  ;;  %v20603_v13 = vld [vmem:[#allocation36_spill] sm:$0xff]  ;;  %v20609_v10 = vld [vmem:[#allocation49_spill] sm:$0xff] }
 0x2fc   :  { %7977 = vperm.xlu0 %14938, %v12301_v32   ;;  %v5286_v6 = vmul.f32 %v14964_v40, %v20603_v13  ;;  %v20604_v32 = vld [vmem:[#allocation93_spill] sm:$0xff]  ;;  %v6428_v40 = vld [vmem:[#allocation2 + $0x142] sm:$0xff] }
 0x2fd   :  { %13908 = vmatmul.mubr.msk.f32.gmra.mrb[176].mxu1 %vm732_vm2, %v5281_v42  ;;  %v6872_v38 = vmul.f32 %v20604_v32, %v6423_v31  ;;  %v6424_v42 = vld [vmem:[#allocation2 + $0x122] sm:$0xff]  ;;  %v12377_v13 = vld [vmem:[%s20133_s4 + $0xe38] sm:$0xff]  ;;  %v12376_v32 = vld [vmem:[%s20133_s4 + $0xe30] sm:$0xff] }
 0x2fe   :  { %v18330_v49 = vpop.permute.xlu1 %6836  ;;  %13910 = vmatprep.mubr.msk.f32.mxu1 %vm732_vm2, %v5282_v29  ;;  %14074 = vmatmul.mubr.msk.f32.gmra.mrb[28].mxu0 %vm732_vm2, %v6868_v51  ;;  %v6873_v43 = vmul.f32 %v18079_v27, %v6424_v42  ;;  %v12372_v29 = vld [vmem:[%s20133_s4 + $0xe10] sm:$0xff]  ;;  %v20610_v42 = vld [vmem:[#allocation45_spill] sm:$0xff] }
 0x2ff   :  { %v18335_v24 = vpop.permute.xlu0 %6831  ;;  %7992 = vperm.xlu1 %14939, %v12304_v20   ;;  %14076 = vmatprep.mubr.msk.f32.mxu0 %vm732_vm2, %v6869_v17  ;;  %v20605_v20 = vld [vmem:[#allocation34_spill] sm:$0xff]  ;;  %v6425_v17 = vld [vmem:[#allocation2 + $0x12a] sm:$0xff] }
 0x300   :  { %7987 = vperm.xlu0 %14938, %v12303_v16   ;;  %v5287_v54 = vmul.f32 %v14965_v25, %v20605_v20  ;;  %v14966_v27 = vld [vmem:[#allocation2 + $0x1d0] sm:$0xff]  ;;  %v20611_v25 = vld [vmem:[#allocation42_spill] sm:$0xff] }
 0x301   :  { %13911 = vmatmul.mubr.msk.f32.gmra.mrb[178].mxu1 %vm732_vm2, %v5283_v50  ;;  %v5288_v37 = vmul.f32 %v14966_v27, %v20606_v8  ;;  %v20607_v50 = vld [vmem:[#allocation92_spill] sm:$0xff]  ;;  %v12379_v27 = vld [vmem:[%s20133_s4 + $0xe48] sm:$0xff]  ;;  %v4845_v8 = vld [vmem:[#allocation2 + $0x200] sm:$0xff] }
 0x302   :  { %v18348_v41 = vpop.permute.xlu1 %7682  ;;  %13913 = vmatprep.mubr.msk.f32.mxu1 %vm732_vm2, %v5284_v3  ;;  %14077 = vmatmul.mubr.msk.f32.gmra.mrb[30].mxu0 %vm732_vm2, %v6870_v1  ;;  %v6874_v21 = vmul.f32 %v20607_v50, %v6425_v17  ;;  %v6875_v3 = vmul.f32 %v18101_v58, %v6426_v53  ;;  %v14968_v58 = vld [vmem:[#allocation2 + $0x1e0] sm:$0xff]  ;;  %v6430_v17 = vld [vmem:[#allocation2 + $0x152] sm:$0xff] }
 0x303   :  { %v18353_v7 = vpop.permute.xlu0 %7677  ;;  %8838 = vperm.xlu1 %14939, %v12371_v0   ;;  %14079 = vmatprep.mubr.msk.f32.mxu0 %vm732_vm2, %v6871_v60  ;;  %v20608_v0 = vld [vmem:[#allocation38_spill] sm:$0xff]  ;;  %v20612_v53 = vld [vmem:[#allocation53_spill] sm:$0xff] }
 0x304   :  { %8833 = vperm.xlu0 %14938, %v12370_v23   ;;  %v5289_v60 = vmul.f32 %v14967_v19, %v20608_v0  ;;  %v6427_v23 = vld [vmem:[#allocation2 + $0x13a] sm:$0xff] }
 0x305   :  { %13914 = vmatmul.mubr.msk.f32.gmra.mrb[180].mxu1 %vm732_vm2, %v5285_v62  ;;  %v5290_v62 = vmul.f32 %v14968_v58, %v20609_v10  ;;  %v6876_v31 = vmul.f32 %v18096_v11, %v6427_v23  ;;  %v14969_v11 = vld [vmem:[#allocation2 + $0x1e8] sm:$0xff]  ;;  %v12378_v50 = vld [vmem:[%s20133_s4 + $0xe40] sm:$0xff]  ;;  %v20613_v19 = vld [vmem:[#allocation61_spill] sm:$0xff] }
 0x306   :  { %v18366_v51 = vpop.permute.xlu1 %7692  ;;  %13916 = vmatprep.mubr.msk.f32.mxu1 %vm732_vm2, %v5286_v6  ;;  %14080 = vmatmul.mubr.msk.f32.gmra.mrb[32].mxu0 %vm732_vm2, %v6872_v38  ;;  %v6877_v6 = vmul.f32 %v18119_v55, %v6428_v40  ;;  %v14970_v55 = vld [vmem:[#allocation2 + $0x1f0] sm:$0xff]  ;;  %v5294_v0 = vmul.f32 %v20613_v19, %v4845_v8  ;;  %v6432_v23 = vld [vmem:[#allocation2 + $0x162] sm:$0xff]  ;;  %v12381_v58 = vld [vmem:[%s20133_s4 + $0xe58] sm:$0xff] }
 0x307   :  { %v18371_v16 = vpop.permute.xlu0 %7687  ;;  %8848 = vperm.xlu1 %14939, %v12373_v28   ;;  %14082 = vmatprep.mubr.msk.f32.mxu0 %vm732_vm2, %v6873_v43  ;;  %v5291_v28 = vmul.f32 %v14969_v11, %v20610_v42  ;;  %v6429_v43 = vld [vmem:[#allocation2 + $0x14a] sm:$0xff]  ;;  %v5292_v20 = vmul.f32 %v14970_v55, %v20611_v25  ;;  %v6881_v10 = vmul.f32 %v18155_v45, %v6432_v23  ;;  %v6435_v55 = vld [vmem:[#allocation2 + $0x17a] sm:$0xff]  ;;  %v6440_v19 = vld [vmem:[#allocation2 + $0x1a2] sm:$0xff] }
 0x308   :  { %8843 = vperm.xlu0 %14938, %v12372_v29   ;;  %v12383_v11 = vld [vmem:[%s20133_s4 + $0xe68] sm:$0xff]  ;;  %v6884_v25 = vmul.f32 %v18168_v30, %v6435_v55 }
 0x309   :  { %13917 = vmatmul.mubr.msk.f32.gmra.mrb[182].mxu1 %vm732_vm2, %v5287_v54  ;;  %v6878_v54 = vmul.f32 %v18114_v5, %v6429_v43  ;;  %v14971_v5 = vld [vmem:[#allocation2 + $0x1f8] sm:$0xff]  ;;  %v6437_v8 = vld [vmem:[#allocation2 + $0x18a] sm:$0xff] }
 0x30a   :  { %v18384_v1 = vpop.permute.xlu1 %7702  ;;  %13919 = vmatprep.mubr.msk.f32.mxu1 %vm732_vm2, %v5288_v37  ;;  %14083 = vmatmul.mubr.msk.f32.gmra.mrb[34].mxu0 %vm732_vm2, %v6874_v21  ;;  %v6879_v37 = vmul.f32 %v18137_v18, %v6430_v17  ;;  %v4846_v18 = vld [vmem:[#allocation2 + $0x208] sm:$0xff]  ;;  %v12384_v17 = vld [vmem:[%s20133_s4 + $0xe70] sm:$0xff]  ;;  %v6886_v30 = vmul.f32 %v18186_v14, %v6437_v8 }
 0x30b   :  { %v18389_v46 = vpop.permute.xlu0 %7697  ;;  %8858 = vperm.xlu1 %14939, %v12375_v4   ;;  %14085 = vmatprep.mubr.msk.f32.mxu0 %vm732_vm2, %v6875_v3  ;;  %v5293_v4 = vmul.f32 %v14971_v5, %v20612_v53  ;;  %v6431_v3 = vld [vmem:[#allocation2 + $0x15a] sm:$0xff] }
 0x30c   :  { %8853 = vperm.xlu0 %14938, %v12374_v63   ;;  %v12386_v53 = vld [vmem:[%s20133_s4 + $0xe80] sm:$0xff] }
 0x30d   :  { %13920 = vmatmul.mubr.msk.f32.gmra.mrb[184].mxu1 %vm732_vm2, %v5289_v60  ;;  %v6880_v60 = vmul.f32 %v18132_v59, %v6431_v3  ;;  %v20614_v59 = vld [vmem:[#allocation63_spill] sm:$0xff]  ;;  %v6439_v3 = vld [vmem:[#allocation2 + $0x19a] sm:$0xff] }
 0x30e   :  { %v18402_v38 = vpop.permute.xlu1 %7712  ;;  %13922 = vmatprep.mubr.msk.f32.mxu1 %vm732_vm2, %v5290_v62  ;;  %14086 = vmatmul.mubr.msk.f32.gmra.mrb[36].mxu0 %vm732_vm2, %v6876_v31  ;;  %v12380_v62 = vld [vmem:[%s20133_s4 + $0xe50] sm:$0xff]  ;;  %v5295_v40 = vmul.f32 %v20614_v59, %v4846_v18  ;;  %v6888_v14 = vmul.f32 %v18204_v39, %v6439_v3  ;;  %v12397_v3 = vld [vmem:[%s20133_s4 + $0xed8] sm:$0xff] }
 0x30f   :  { %v18407_v29 = vpop.permute.xlu0 %7707  ;;  %8868 = vperm.xlu1 %14939, %v12377_v13   ;;  %14088 = vmatprep.mubr.msk.f32.mxu0 %vm732_vm2, %v6877_v6  ;;  %v6433_v13 = vld [vmem:[#allocation2 + $0x16a] sm:$0xff] }
 0x310   :  { %8863 = vperm.xlu0 %14938, %v12376_v32   ;;  %v6882_v45 = vmul.f32 %v18150_v33, %v6433_v13  ;;  %v6434_v32 = vld [vmem:[#allocation2 + $0x172] sm:$0xff] }
 0x311   :  { %13923 = vmatmul.mubr.msk.f32.gmra.mrb[186].mxu1 %vm732_vm2, %v5291_v28  ;;  %v6883_v42 = vmul.f32 %v18173_v35, %v6434_v32  ;;  %v12382_v28 = vld [vmem:[%s20133_s4 + $0xe60] sm:$0xff]  ;;  %v12385_v35 = vld [vmem:[%s20133_s4 + $0xe78] sm:$0xff] }
 0x312   :  { %v18420_v21 = vpop.permute.xlu1 %7722  ;;  %13925 = vmatprep.mubr.msk.f32.mxu1 %vm732_vm2, %v5292_v20  ;;  %14089 = vmatmul.mubr.msk.f32.gmra.mrb[38].mxu0 %vm732_vm2, %v6878_v54  ;;  %v6436_v20 = vld [vmem:[#allocation2 + $0x182] sm:$0xff] }
 0x313   :  { %v18425_v63 = vpop.permute.xlu0 %7717  ;;  %8878 = vperm.xlu1 %14939, %v12379_v27   ;;  %14091 = vmatprep.mubr.msk.f32.mxu0 %vm732_vm2, %v6879_v37  ;;  %v6885_v54 = vmul.f32 %v18191_v34, %v6436_v20  ;;  %v12387_v34 = vld [vmem:[%s20133_s4 + $0xe88] sm:$0xff] }
 0x314   :  { %8873 = vperm.xlu0 %14938, %v12378_v50   ;;  %v6438_v50 = vld [vmem:[#allocation2 + $0x192] sm:$0xff] }
 0x315   :  { %13926 = vmatmul.mubr.msk.f32.gmra.mrb[188].mxu1 %vm732_vm2, %v5293_v4  ;;  %v6887_v5 = vmul.f32 %v18209_v48, %v6438_v50  ;;  %v12389_v48 = vld [vmem:[%s20133_s4 + $0xe98] sm:$0xff] }
 0x316   :  { %v18438_v31 = vpop.permute.xlu1 %7732  ;;  %13928 = vmatprep.mubr.msk.f32.mxu1 %vm732_vm2, %v5294_v0  ;;  %14092 = vmatmul.mubr.msk.f32.gmra.mrb[40].mxu0 %vm732_vm2, %v6880_v60  ;;  %v6889_v0 = vmul.f32 %v18227_v2, %v6440_v19  ;;  %v12388_v60 = vld [vmem:[%s20133_s4 + $0xe90] sm:$0xff]  ;;  %v12391_v2 = vld [vmem:[%s20133_s4 + $0xea8] sm:$0xff] }
 0x317   :  { %v18443_v6 = vpop.permute.xlu0 %7727  ;;  %8888 = vperm.xlu1 %14939, %v12381_v58   ;;  %14094 = vmatprep.mubr.msk.f32.mxu0 %vm732_vm2, %v6881_v10  ;;  %v6441_v58 = vld [vmem:[#allocation2 + $0x1aa] sm:$0xff] }
 0x318   :  { %8883 = vperm.xlu0 %14938, %v12380_v62   ;;  %v6890_v39 = vmul.f32 %v18222_v57, %v6441_v58  ;;  %v6442_v62 = vld [vmem:[#allocation2 + $0x1b2] sm:$0xff] }
 0x319   :  { %13929 = vmatmul.mubr.msk.f32.gmra.mrb[190].mxu1 %vm732_vm2, %v5295_v40  ;;  %v6891_v59 = vmul.f32 %v18245_v12, %v6442_v62  ;;  %v12390_v40 = vld [vmem:[%s20133_s4 + $0xea0] sm:$0xff]  ;;  %v12393_v12 = vld [vmem:[%s20133_s4 + $0xeb8] sm:$0xff]  ;;  %v12399_v62 = vld [vmem:[%s20133_s4 + $0xee8] sm:$0xff] }
 0x31a   :  { %v18455_v43 = vpop.permute.xlu1 %7742  ;;  %14095 = vmatmul.mubr.msk.f32.gmra.mrb[42].mxu0 %vm732_vm2, %v6882_v45  ;;  %v6443_v45 = vld [vmem:[#allocation2 + $0x1ba] sm:$0xff] }
 0x31b   :  { %v18458_v33 = vpop.permute.xlu0 %7737  ;;  %8898 = vperm.xlu1 %14939, %v12383_v11   ;;  %14097 = vmatprep.mubr.msk.f32.mxu0 %vm732_vm2, %v6883_v42  ;;  %v6892_v57 = vmul.f32 %v18240_v9, %v6443_v45  ;;  %v6444_v11 = vld [vmem:[#allocation2 + $0x1c2] sm:$0xff] }
 0x31c   :  { %8893 = vperm.xlu0 %14938, %v12382_v28   ;;  %v6893_v42 = vmul.f32 %v18263_v56, %v6444_v11  ;;  %v12392_v28 = vld [vmem:[%s20133_s4 + $0xeb0] sm:$0xff]  ;;  %v12395_v56 = vld [vmem:[%s20133_s4 + $0xec8] sm:$0xff] }
 0x31e   :  { %v18469_v27 = vpop.permute.xlu1 %7752  ;;  %14098 = vmatmul.mubr.msk.f32.gmra.mrb[44].mxu0 %vm732_vm2, %v6884_v25  ;;  %v6445_v25 = vld [vmem:[#allocation2 + $0x1ca] sm:$0xff] }
 0x31f   :  { %v18472_v37 = vpop.permute.xlu0 %7747  ;;  %8908 = vperm.xlu1 %14939, %v12385_v35   ;;  %14100 = vmatprep.mubr.msk.f32.mxu0 %vm732_vm2, %v6885_v54  ;;  %v6894_v9 = vmul.f32 %v18258_v22, %v6445_v25  ;;  %v6446_v35 = vld [vmem:[#allocation2 + $0x1d2] sm:$0xff]  ;;  %v6447_v22 = vld [vmem:[#allocation2 + $0x1da] sm:$0xff] }
 0x320   :  { %8903 = vperm.xlu0 %14938, %v12384_v17   ;;  %v6895_v17 = vmul.f32 %v18281_v26, %v6446_v35 }
 0x322   :  { %v18483_v4 = vpop.permute.xlu1 %7762  ;;  %14101 = vmatmul.mubr.msk.f32.gmra.mrb[46].mxu0 %vm732_vm2, %v6886_v30  ;;  %v12394_v30 = vld [vmem:[%s20133_s4 + $0xec0] sm:$0xff] }
 0x323   :  { %v18486_v18 = vpop.permute.xlu0 %7757  ;;  %8918 = vperm.xlu1 %14939, %v12387_v34   ;;  %14103 = vmatprep.mubr.msk.f32.mxu0 %vm732_vm2, %v6887_v5  ;;  %v6896_v5 = vmul.f32 %v18276_v44, %v6447_v22  ;;  %v6449_v44 = vld [vmem:[#allocation2 + $0x1ea] sm:$0xff] }
 0x324   :  { %8913 = vperm.xlu0 %14938, %v12386_v53   ;;  %v6448_v53 = vld [vmem:[#allocation2 + $0x1e2] sm:$0xff]  ;;  %v6898_v58 = vmul.f32 %v18294_v36, %v6449_v44  ;;  %v6451_v36 = vld [vmem:[#allocation2 + $0x1fa] sm:$0xff] }
 0x325   :  { %v6900_v11 = vmul.f32 %v18312_v52, %v6451_v36  ;;  %v6453_v52 = vld [vmem:[#allocation2 + $0x20a] sm:$0xff] }
 0x326   :  { %v18497_v23 = vpop.permute.xlu1 %7772  ;;  %14104 = vmatmul.mubr.msk.f32.gmra.mrb[48].mxu0 %vm732_vm2, %v6888_v14  ;;  %v6897_v14 = vmul.f32 %v18299_v15, %v6448_v53  ;;  %v12403_v22 = vld [vmem:[%s20133_s4 + $0xf08] sm:$0xff] }
 0x327   :  { %v18500_v10 = vpop.permute.xlu0 %7767  ;;  %8928 = vperm.xlu1 %14939, %v12389_v48   ;;  %14106 = vmatprep.mubr.msk.f32.mxu0 %vm732_vm2, %v6889_v0  ;;  %v12396_v48 = vld [vmem:[%s20133_s4 + $0xed0] sm:$0xff] }
 0x328   :  { %8923 = vperm.xlu0 %14938, %v12388_v60  }
 0x32a   :  { %v18511_v13 = vpop.permute.xlu1 %7782  ;;  %14107 = vmatmul.mubr.msk.f32.gmra.mrb[50].mxu0 %vm732_vm2, %v6890_v39  ;;  %v6450_v39 = vld [vmem:[#allocation2 + $0x1f2] sm:$0xff] }
 0x32b   :  { %v18514_v32 = vpop.permute.xlu0 %7777  ;;  %8938 = vperm.xlu1 %14939, %v12391_v2   ;;  %14109 = vmatprep.mubr.msk.f32.mxu0 %vm732_vm2, %v6891_v59  ;;  %v6899_v2 = vmul.f32 %v18317_v61, %v6450_v39  ;;  %v7548_v39 = vld [vmem:[#allocation2 + $0x30] sm:$0xff] }
 0x32c   :  { %8933 = vperm.xlu0 %14938, %v12390_v40   ;;  %v12398_v40 = vld [vmem:[%s20133_s4 + $0xee0] sm:$0xff] }
 0x32e   :  { %v18525_v55 = vpop.permute.xlu1 %7792  ;;  %14110 = vmatmul.mubr.msk.f32.gmra.mrb[52].mxu0 %vm732_vm2, %v6892_v57 }
 0x32f   :  { %v18528_v20 = vpop.permute.xlu0 %7787  ;;  %8948 = vperm.xlu1 %14939, %v12393_v12   ;;  %14112 = vmatprep.mubr.msk.f32.mxu0 %vm732_vm2, %v6893_v42  ;;  %v6452_v12 = vld [vmem:[#allocation2 + $0x202] sm:$0xff]  ;;  %v12401_v42 = vld [vmem:[%s20133_s4 + $0xef8] sm:$0xff] }
 0x330   :  { %8943 = vperm.xlu0 %14938, %v12392_v28   ;;  %v18532_v54 = vpop.f32.mrb[128].mxu1  ;;  %v6901_v28 = vmul.f32 %v18335_v24, %v6452_v12 }
 0x331   :  { %v18538_v8 = vpop.f32.mrb[129].mxu1 }
 0x332   :  { %v18543_v50 = vpop.permute.xlu1 %7802  ;;  %14113 = vmatmul.mubr.msk.f32.gmra.mrb[54].mxu0 %vm732_vm2, %v6894_v9  ;;  %v12400_v9 = vld [vmem:[%s20133_s4 + $0xef0] sm:$0xff] }
 0x333   :  { %v18546_v34 = vpop.permute.xlu0 %7797  ;;  %8958 = vperm.xlu1 %14939, %v12395_v56   ;;  %14115 = vmatprep.mubr.msk.f32.mxu0 %vm732_vm2, %v6895_v17  ;;  %v6902_v17 = vmul.f32 %v18330_v49, %v6453_v52  ;;  %v7547_v49 = vld [vmem:[#allocation2 + $0x28] sm:$0xff] }
 0x334   :  { %8953 = vperm.xlu0 %14938, %v12394_v30   ;;  %v18550_v26 = vpop.f32.mrb[130].mxu1  ;;  %v7546_v30 = vld [vmem:[#allocation2 + $0x20] sm:$0xff]  ;;  %v7996_v44 = vmul.f32 %v18348_v41, %v7547_v49  ;;  %v12409_v49 = vld [vmem:[%s20133_s4 + $0xf38] sm:$0xff] }
 0x335   :  { %v18556_v19 = vpop.f32.mrb[131].mxu1  ;;  %v18639_v41 = vld [vmem:[%s20137_s3 + $0x40] sm:$0xff] }
 0x336   :  { %v18561_v0 = vpop.permute.xlu1 %7812  ;;  %14116 = vmatmul.mubr.msk.f32.gmra.mrb[56].mxu0 %vm732_vm2, %v6896_v5  ;;  %v7995_v5 = vmul.f32 %v18353_v7, %v7546_v30  ;;  %v7551_v30 = vld [vmem:[#allocation2 + $0x48] sm:$0xff] }
 0x337   :  { %v18564_v60 = vpop.permute.xlu0 %7807  ;;  %8968 = vperm.xlu1 %14939, %v12397_v3   ;;  %14118 = vmatprep.mubr.msk.f32.mxu0 %vm732_vm2, %v6897_v14  ;;  %v12402_v3 = vld [vmem:[%s20133_s4 + $0xf00] sm:$0xff] }
 0x338   :  { %8963 = vperm.xlu0 %14938, %v12396_v48   ;;  %v18568_v15 = vpop.f32.mrb[132].mxu1 }
 0x339   :  { %v18574_v59 = vpop.f32.mrb[133].mxu1 }
 0x33a   :  { %v18579_v45 = vpop.permute.xlu1 %7822  ;;  %14119 = vmatmul.mubr.msk.f32.gmra.mrb[58].mxu0 %vm732_vm2, %v6898_v58  ;;  %v12405_v58 = vld [vmem:[%s20133_s4 + $0xf18] sm:$0xff] }
 0x33b   :  { %v18582_v57 = vpop.permute.xlu0 %7817  ;;  %8978 = vperm.xlu1 %14939, %v12399_v62   ;;  %14121 = vmatprep.mubr.msk.f32.mxu0 %vm732_vm2, %v6899_v2  ;;  %v12404_v2 = vld [vmem:[%s20133_s4 + $0xf10] sm:$0xff] }
 0x33c   :  { %8973 = vperm.xlu0 %14938, %v12398_v40   ;;  %v18586_v61 = vpop.f32.mrb[134].mxu1  ;;  %v7997_v40 = vmul.f32 %v18371_v16, %v7548_v39  ;;  %v12408_v39 = vld [vmem:[%s20133_s4 + $0xf30] sm:$0xff] }
 0x33d   :  { %v18592_v25 = vpop.f32.mrb[135].mxu1 }
 0x33e   :  { %v18597_v35 = vpop.permute.xlu1 %7832  ;;  %14122 = vmatmul.mubr.msk.f32.gmra.mrb[60].mxu0 %vm732_vm2, %v6900_v11  ;;  %v7549_v11 = vld [vmem:[#allocation2 + $0x38] sm:$0xff] }
 0x33f   :  { %v18600_v56 = vpop.permute.xlu0 %7827  ;;  %8988 = vperm.xlu1 %14939, %v12401_v42   ;;  %14124 = vmatprep.mubr.msk.f32.mxu0 %vm732_vm2, %v6901_v28  ;;  %v7998_v42 = vmul.f32 %v18366_v51, %v7549_v11  ;;  %v7550_v28 = vld [vmem:[#allocation2 + $0x40] sm:$0xff] }
 0x340   :  { %8983 = vperm.xlu0 %14938, %v12400_v9   ;;  %v18604_v24 = vpop.f32.mrb[136].mxu1  ;;  %v12407_v9 = vld [vmem:[%s20133_s4 + $0xf28] sm:$0xff]  ;;  %v7999_v52 = vmul.f32 %v18389_v46, %v7550_v28  ;;  %v8000_v46 = vmul.f32 %v18384_v1, %v7551_v30  ;;  %v7553_v1 = vld [vmem:[#allocation2 + $0x58] sm:$0xff] }
 0x341   :  { %v18610_v53 = vpop.f32.mrb[137].mxu1  ;;  %v8002_v11 = vmul.f32 %v18402_v38, %v7553_v1  ;;  %v12411_v28 = vld [vmem:[%s20133_s4 + $0xf48] sm:$0xff] }
 0x342   :  { %v18615_v14 = vpop.permute.xlu1 %7842  ;;  %14125 = vmatmul.mubr.msk.f32.gmra.mrb[62].mxu0 %vm732_vm2, %v6902_v17  ;;  %v7555_v38 = vld [vmem:[#allocation2 + $0x68] sm:$0xff] }
 0x343   :  { %v18618_v48 = vpop.permute.xlu0 %7837  ;;  %8998 = vperm.xlu1 %14939, %v12403_v22   ;;  %14129 = vmatprep.mubr.msk.f32.mxu0 %vm732_vm2, %v7995_v5  ;;  %v7552_v5 = vld [vmem:[#allocation2 + $0x50] sm:$0xff] }
 0x344   :  { %8993 = vperm.xlu0 %14938, %v12402_v3   ;;  %v18622_v7 = vpop.f32.mrb[138].mxu1 }
 0x345   :  { %v18627_v62 = vpop.f32.mrb[139].mxu1 }
 0x346   :  { %v18633_v36 = vpop.permute.xlu1 %7852  ;;  %14130 = vmatmul.mubr.msk.f32.vlgmr.msra.gmra.mrb[0].mxu0 %vm732_vm2, %v7996_v44  ;;  %v8001_v44 = vmul.f32 %v18407_v29, %v7552_v5  ;;  %v8004_v5 = vmul.f32 %v18420_v21, %v7555_v38  ;;  %v7557_v21 = vld [vmem:[#allocation2 + $0x78] sm:$0xff]  ;;  %v12415_v38 = vld [vmem:[%s20133_s4 + $0xf68] sm:$0xff] }
 0x347   :  { %v18641_v12 = vpop.permute.xlu0 %7847  ;;  %14226 = vmatpush3.msra.mxu0 %v18076_v47  ;;  %9008 = vperm.xlu1 %14939, %v12405_v58   ;;  %v12406_v47 = vld [vmem:[%s20133_s4 + $0xf20] sm:$0xff] }
 0x348   :  { %9003 = vperm.xlu0 %14938, %v12404_v2   ;;  %14132 = vmatprep.mubr.msk.f32.mxu0 %vm732_vm2, %v7997_v40  ;;  %v18646_v16 = vpop.f32.mrb[140].mxu1 }
 0x349   :  { %v18652_v17 = vpop.f32.mrb[141].mxu1  ;;  %14323 = vmatprep.subr.mxu0 %v18639_v41 }
 0x34a   :  { %v18658_v51 = vpop.permute.xlu1 %7862  ;;  %14133 = vmatmul.mubr.msk.f32.gmra.mrb[2].mxu0 %vm732_vm2, %v7998_v42  ;;  %v7554_v42 = vld [vmem:[#allocation2 + $0x60] sm:$0xff] }
 0x34b   :  { %v18661_v22 = vpop.permute.xlu0 %7857  ;;  %9018 = vperm.xlu1 %14939, %v12407_v9   ;;  %14135 = vmatprep.mubr.msk.f32.mxu0 %vm732_vm2, %v7999_v52  ;;  %v8003_v9 = vmul.f32 %v18425_v63, %v7554_v42 }
 0x34c   :  { %9013 = vperm.xlu0 %14938, %v12406_v47   ;;  %v18665_v3 = vpop.f32.mrb[142].mxu1  ;;  %v12410_v47 = vld [vmem:[%s20133_s4 + $0xf40] sm:$0xff] }
 0x34d   :  { %v18671_v58 = vpop.f32.mrb[143].mxu1 }
 0x34e   :  { %v18676_v2 = vpop.permute.xlu1 %7872  ;;  %14136 = vmatmul.mubr.msk.f32.gmra.mrb[4].mxu0 %vm732_vm2, %v8000_v46 }
 0x34f   :  { %v18679_v40 = vpop.permute.xlu0 %7867  ;;  %9028 = vperm.xlu1 %14939, %v12409_v49   ;;  %14138 = vmatprep.mubr.msk.f32.mxu0 %vm732_vm2, %v8001_v44  ;;  %v7556_v49 = vld [vmem:[#allocation2 + $0x70] sm:$0xff]  ;;  %v12413_v44 = vld [vmem:[%s20133_s4 + $0xf58] sm:$0xff] }
 0x350   :  { %9023 = vperm.xlu0 %14938, %v12408_v39   ;;  %v18683_v29 = vpop.f32.mrb[144].mxu1  ;;  %v8005_v39 = vmul.f32 %v18443_v6, %v7556_v49 }
 0x351   :  { %v18689_v52 = vpop.f32.mrb[145].mxu1 }
 0x352   :  { %v18694_v30 = vpop.permute.xlu1 %7882  ;;  %14139 = vmatmul.mubr.msk.f32.gmra.mrb[6].mxu0 %vm732_vm2, %v8002_v11  ;;  %v12412_v11 = vld [vmem:[%s20133_s4 + $0xf50] sm:$0xff] }
 0x353   :  { %v18697_v46 = vpop.permute.xlu0 %7877  ;;  %9038 = vperm.xlu1 %14939, %v12411_v28   ;;  %14141 = vmatprep.mubr.msk.f32.mxu0 %vm732_vm2, %v8003_v9  ;;  %v8006_v9 = vmul.f32 %v18438_v31, %v7557_v21  ;;  %v7559_v31 = vld [vmem:[#allocation2 + $0x88] sm:$0xff]  ;;  %v7560_v21 = vld [vmem:[#allocation2 + $0x90] sm:$0xff] }
 0x354   :  { %9033 = vperm.xlu0 %14938, %v12410_v47   ;;  %v18701_v63 = vpop.f32.mrb[146].mxu1  ;;  %v7558_v47 = vld [vmem:[#allocation2 + $0x80] sm:$0xff] }
 0x355   :  { %v18707_v1 = vpop.f32.mrb[147].mxu1  ;;  %v8007_v49 = vmul.f32 %v18458_v33, %v7558_v47  ;;  %v12417_v47 = vld [vmem:[%s20133_s4 + $0xf78] sm:$0xff] }
 0x356   :  { %20615 = vst [vmem:[#allocation95_spill] sm:$0xff] %v18707_v1  ;;  %v18712_v42 = vpop.permute.xlu1 %7892  ;;  %14142 = vmatmul.mubr.msk.f32.gmra.mrb[8].mxu0 %vm732_vm2, %v8004_v5  ;;  %v12414_v5 = vld [vmem:[%s20133_s4 + $0xf60] sm:$0xff] }
 0x357   :  { %v18715_v28 = vpop.permute.xlu0 %7887  ;;  %9048 = vperm.xlu1 %14939, %v12413_v44   ;;  %14144 = vmatprep.mubr.msk.f32.mxu0 %vm732_vm2, %v8005_v39 }
 0x358   :  { %9043 = vperm.xlu0 %14938, %v12412_v11   ;;  %v18719_v6 = vpop.f32.mrb[148].mxu1  ;;  %v8008_v11 = vmul.f32 %v18455_v43, %v7559_v31  ;;  %v7561_v43 = vld [vmem:[#allocation2 + $0x98] sm:$0xff]  ;;  %v7562_v31 = vld [vmem:[#allocation2 + $0xa0] sm:$0xff] }
 0x359   :  { %20616 = vst [vmem:[#allocation94_spill] sm:$0xff] %v18719_v6  ;;  %v18725_v1 = vpop.f32.mrb[149].mxu1 }
 0x35a   :  { %20617 = vst [vmem:[#allocation97_spill] sm:$0xff] %v18725_v1  ;;  %v18730_v44 = vpop.permute.xlu1 %7902  ;;  %14145 = vmatmul.mubr.msk.f32.gmra.mrb[10].mxu0 %vm732_vm2, %v8006_v9  ;;  %v8009_v1 = vmul.f32 %v18472_v37, %v7560_v21  ;;  %v12416_v9 = vld [vmem:[%s20133_s4 + $0xf70] sm:$0xff]  ;;  %v12419_v21 = vld [vmem:[%s20133_s4 + $0xf88] sm:$0xff] }
 0x35b   :  { %v18733_v39 = vpop.permute.xlu0 %7897  ;;  %9058 = vperm.xlu1 %14939, %v12415_v38   ;;  %14147 = vmatprep.mubr.msk.f32.mxu0 %vm732_vm2, %v8007_v49 }
 0x35c   :  { %9053 = vperm.xlu0 %14938, %v12414_v5   ;;  %v18737_v33 = vpop.f32.mrb[150].mxu1  ;;  %v8010_v5 = vmul.f32 %v18469_v27, %v7561_v43  ;;  %v7563_v27 = vld [vmem:[#allocation2 + $0xa8] sm:$0xff]  ;;  %v7564_v43 = vld [vmem:[#allocation2 + $0xb0] sm:$0xff] }
 0x35d   :  { %20618 = vst [vmem:[#allocation96_spill] sm:$0xff] %v18737_v33  ;;  %v18743_v6 = vpop.f32.mrb[151].mxu1 }
 0x35e   :  { %20619 = vst [vmem:[#allocation99_spill] sm:$0xff] %v18743_v6  ;;  %v18748_v38 = vpop.permute.xlu1 %7912  ;;  %14148 = vmatmul.mubr.msk.f32.gmra.mrb[12].mxu0 %vm732_vm2, %v8008_v11  ;;  %v8011_v6 = vmul.f32 %v18486_v18, %v7562_v31  ;;  %v12418_v11 = vld [vmem:[%s20133_s4 + $0xf80] sm:$0xff]  ;;  %v12421_v31 = vld [vmem:[%s20133_s4 + $0xf98] sm:$0xff] }
 0x35f   :  { %v18751_v49 = vpop.permute.xlu0 %7907  ;;  %9068 = vperm.xlu1 %14939, %v12417_v47   ;;  %14150 = vmatprep.mubr.msk.f32.mxu0 %vm732_vm2, %v8009_v1 }
 0x360   :  { %9063 = vperm.xlu0 %14938, %v12416_v9   ;;  %v18755_v37 = vpop.f32.mrb[152].mxu1  ;;  %v8012_v9 = vmul.f32 %v18483_v4, %v7563_v27  ;;  %v7565_v4 = vld [vmem:[#allocation2 + $0xb8] sm:$0xff]  ;;  %v7566_v27 = vld [vmem:[#allocation2 + $0xc0] sm:$0xff] }
 0x361   :  { %20620 = vst [vmem:[#allocation98_spill] sm:$0xff] %v18755_v37  ;;  %v18761_v33 = vpop.f32.mrb[153].mxu1 }
 0x362   :  { %20621 = vst [vmem:[#allocation101_spill] sm:$0xff] %v18761_v33  ;;  %v18766_v47 = vpop.permute.xlu1 %7922  ;;  %14151 = vmatmul.mubr.msk.f32.gmra.mrb[14].mxu0 %vm732_vm2, %v8010_v5  ;;  %v8013_v33 = vmul.f32 %v18500_v10, %v7564_v43  ;;  %v12420_v5 = vld [vmem:[%s20133_s4 + $0xf90] sm:$0xff]  ;;  %v12423_v43 = vld [vmem:[%s20133_s4 + $0xfa8] sm:$0xff] }
 0x363   :  { %v18769_v1 = vpop.permute.xlu0 %7917  ;;  %9078 = vperm.xlu1 %14939, %v12419_v21   ;;  %14153 = vmatprep.mubr.msk.f32.mxu0 %vm732_vm2, %v8011_v6 }
 0x364   :  { %9073 = vperm.xlu0 %14938, %v12418_v11   ;;  %v18773_v18 = vpop.f32.mrb[154].mxu1  ;;  %v8014_v11 = vmul.f32 %v18497_v23, %v7565_v4  ;;  %v7567_v23 = vld [vmem:[#allocation2 + $0xc8] sm:$0xff]  ;;  %v7568_v4 = vld [vmem:[#allocation2 + $0xd0] sm:$0xff] }
 0x365   :  { %20622 = vst [vmem:[#allocation127_spill] sm:$0xff] %v18773_v18  ;;  %v18779_v37 = vpop.f32.mrb[155].mxu1 }
 0x366   :  { %20623 = vst [vmem:[#allocation100_spill] sm:$0xff] %v18779_v37  ;;  %v18784_v21 = vpop.permute.xlu1 %7932  ;;  %14154 = vmatmul.mubr.msk.f32.gmra.mrb[16].mxu0 %vm732_vm2, %v8012_v9  ;;  %v8015_v37 = vmul.f32 %v18514_v32, %v7566_v27  ;;  %v12422_v9 = vld [vmem:[%s20133_s4 + $0xfa0] sm:$0xff]  ;;  %v12425_v27 = vld [vmem:[%s20133_s4 + $0xfb8] sm:$0xff] }
 0x367   :  { %v18787_v6 = vpop.permute.xlu0 %7927  ;;  %9088 = vperm.xlu1 %14939, %v12421_v31   ;;  %14156 = vmatprep.mubr.msk.f32.mxu0 %vm732_vm2, %v8013_v33 }
 0x368   :  { %9083 = vperm.xlu0 %14938, %v12420_v5   ;;  %v18791_v10 = vpop.f32.mrb[156].mxu1  ;;  %v8016_v5 = vmul.f32 %v18511_v13, %v7567_v23  ;;  %v7569_v13 = vld [vmem:[#allocation2 + $0xd8] sm:$0xff]  ;;  %v7570_v23 = vld [vmem:[#allocation2 + $0xe0] sm:$0xff] }
 0x369   :  { %20624 = vst [vmem:[#allocation126_spill] sm:$0xff] %v18791_v10  ;;  %v18797_v18 = vpop.f32.mrb[157].mxu1 }
 0x36a   :  { %20625 = vst [vmem:[#allocation103_spill] sm:$0xff] %v18797_v18  ;;  %v18802_v31 = vpop.permute.xlu1 %7942  ;;  %14157 = vmatmul.mubr.msk.f32.gmra.mrb[18].mxu0 %vm732_vm2, %v8014_v11  ;;  %v8017_v18 = vmul.f32 %v18528_v20, %v7568_v4  ;;  %v12424_v11 = vld [vmem:[%s20133_s4 + $0xfb0] sm:$0xff]  ;;  %v12427_v20 = vld [vmem:[%s20133_s4 + $0xfc8] sm:$0xff]  ;;  %v8019_v4 = vmul.f32 %v18546_v34, %v7570_v23  ;;  %v12429_v34 = vld [vmem:[%s20133_s4 + $0xfd8] sm:$0xff] }
 0x36b   :  { %v18805_v33 = vpop.permute.xlu0 %7937  ;;  %9098 = vperm.xlu1 %14939, %v12423_v43   ;;  %14159 = vmatprep.mubr.msk.f32.mxu0 %vm732_vm2, %v8015_v37 }
 0x36c   :  { %9093 = vperm.xlu0 %14938, %v12422_v9   ;;  %v18809_v32 = vpop.f32.mrb[158].mxu1  ;;  %v8018_v9 = vmul.f32 %v18525_v55, %v7569_v13 }
 0x36d   :  { %20626 = vst [vmem:[#allocation129_spill] sm:$0xff] %v18809_v32  ;;  %v18815_v10 = vpop.f32.mrb[159].mxu1 }
 0x36e   :  { %20627 = vst [vmem:[#allocation102_spill] sm:$0xff] %v18815_v10  ;;  %v18820_v43 = vpop.permute.xlu1 %7952  ;;  %14160 = vmatmul.mubr.msk.f32.gmra.mrb[20].mxu0 %vm732_vm2, %v8016_v5  ;;  %v12426_v5 = vld [vmem:[%s20133_s4 + $0xfc0] sm:$0xff] }
 0x36f   :  { %v18823_v37 = vpop.permute.xlu0 %7947  ;;  %9108 = vperm.xlu1 %14939, %v12425_v27   ;;  %14162 = vmatprep.mubr.msk.f32.mxu0 %vm732_vm2, %v8017_v18  ;;  %v7571_v27 = vld [vmem:[#allocation2 + $0xe8] sm:$0xff] }
 0x370   :  { %9103 = vperm.xlu0 %14938, %v12424_v11   ;;  %v8020_v55 = vmul.f32 %v18543_v50, %v7571_v27  ;;  %v7572_v11 = vld [vmem:[#allocation2 + $0xf0] sm:$0xff] }
 0x371   :  { %v8021_v13 = vmul.f32 %v18564_v60, %v7572_v11  ;;  %v12431_v60 = vld [vmem:[%s20133_s4 + $0xfe8] sm:$0xff] }
 0x372   :  { %v18834_v10 = vpop.permute.xlu1 %7962  ;;  %14163 = vmatmul.mubr.msk.f32.gmra.mrb[22].mxu0 %vm732_vm2, %v8018_v9  ;;  %v12428_v9 = vld [vmem:[%s20133_s4 + $0xfd0] sm:$0xff] }
 0x373   :  { %v18837_v18 = vpop.permute.xlu0 %7957  ;;  %9118 = vperm.xlu1 %14939, %v12427_v20   ;;  %14165 = vmatprep.mubr.msk.f32.mxu0 %vm732_vm2, %v8019_v4  ;;  %v7573_v20 = vld [vmem:[#allocation2 + $0xf8] sm:$0xff] }
 0x374   :  { %9113 = vperm.xlu0 %14938, %v12426_v5   ;;  %v8022_v50 = vmul.f32 %v18561_v0, %v7573_v20  ;;  %v7574_v5 = vld [vmem:[#allocation2 + $0x100] sm:$0xff] }
 0x375   :  { %v8023_v27 = vmul.f32 %v18582_v57, %v7574_v5  ;;  %v12433_v57 = vld [vmem:[%s20133_s4 + $0xff8] sm:$0xff] }
 0x376   :  { %v18848_v23 = vpop.permute.xlu1 %7972  ;;  %14166 = vmatmul.mubr.msk.f32.gmra.mrb[24].mxu0 %vm732_vm2, %v8020_v55  ;;  %v12430_v55 = vld [vmem:[%s20133_s4 + $0xfe0] sm:$0xff] }
 0x377   :  { %v18851_v4 = vpop.permute.xlu0 %7967  ;;  %9128 = vperm.xlu1 %14939, %v12429_v34   ;;  %14168 = vmatprep.mubr.msk.f32.mxu0 %vm732_vm2, %v8021_v13  ;;  %v7575_v34 = vld [vmem:[#allocation2 + $0x108] sm:$0xff] }
 0x378   :  { %9123 = vperm.xlu0 %14938, %v12428_v9   ;;  %v8024_v0 = vmul.f32 %v18579_v45, %v7575_v34  ;;  %v7576_v9 = vld [vmem:[#allocation2 + $0x110] sm:$0xff] }
 0x379   :  { %v8025_v20 = vmul.f32 %v18600_v56, %v7576_v9  ;;  %v12500_v56 = vld [vmem:[%s20133_s4 + $0x1008] sm:$0xff] }
 0x37a   :  { %v18862_v11 = vpop.permute.xlu1 %7982  ;;  %14169 = vmatmul.mubr.msk.f32.gmra.mrb[26].mxu0 %vm732_vm2, %v8022_v50  ;;  %v12432_v50 = vld [vmem:[%s20133_s4 + $0xff0] sm:$0xff] }
 0x37b   :  { %v18865_v13 = vpop.permute.xlu0 %7977  ;;  %9138 = vperm.xlu1 %14939, %v12431_v60   ;;  %14171 = vmatprep.mubr.msk.f32.mxu0 %vm732_vm2, %v8023_v27  ;;  %v7577_v60 = vld [vmem:[#allocation2 + $0x118] sm:$0xff] }
 0x37c   :  { %9133 = vperm.xlu0 %14938, %v12430_v55   ;;  %v8026_v45 = vmul.f32 %v18597_v35, %v7577_v60  ;;  %v7578_v55 = vld [vmem:[#allocation2 + $0x120] sm:$0xff] }
 0x37d   :  { %v8027_v34 = vmul.f32 %v18618_v48, %v7578_v55  ;;  %v12502_v48 = vld [vmem:[%s20133_s4 + $0x1018] sm:$0xff] }
 0x37e   :  { %v18876_v5 = vpop.permute.xlu1 %7992  ;;  %14172 = vmatmul.mubr.msk.f32.gmra.mrb[28].mxu0 %vm732_vm2, %v8024_v0  ;;  %v12499_v0 = vld [vmem:[%s20133_s4 + $0x1000] sm:$0xff] }
 0x37f   :  { %v18879_v27 = vpop.permute.xlu0 %7987  ;;  %9148 = vperm.xlu1 %14939, %v12433_v57   ;;  %14174 = vmatprep.mubr.msk.f32.mxu0 %vm732_vm2, %v8025_v20  ;;  %v7579_v57 = vld [vmem:[#allocation2 + $0x128] sm:$0xff] }
 0x380   :  { %9143 = vperm.xlu0 %14938, %v12432_v50   ;;  %v8028_v35 = vmul.f32 %v18615_v14, %v7579_v57  ;;  %v7580_v50 = vld [vmem:[#allocation2 + $0x130] sm:$0xff] }
 0x381   :  { %v8029_v60 = vmul.f32 %v18641_v12, %v7580_v50  ;;  %v12504_v12 = vld [vmem:[%s20133_s4 + $0x1028] sm:$0xff] }
 0x382   :  { %v18890_v9 = vpop.permute.xlu1 %8838  ;;  %14175 = vmatmul.mubr.msk.f32.gmra.mrb[30].mxu0 %vm732_vm2, %v8026_v45  ;;  %v12501_v45 = vld [vmem:[%s20133_s4 + $0x1010] sm:$0xff] }
 0x383   :  { %v18893_v20 = vpop.permute.xlu0 %8833  ;;  %9994 = vperm.xlu1 %14939, %v12500_v56   ;;  %14177 = vmatprep.mubr.msk.f32.mxu0 %vm732_vm2, %v8027_v34  ;;  %v7581_v56 = vld [vmem:[#allocation2 + $0x138] sm:$0xff] }
 0x384   :  { %9989 = vperm.xlu0 %14938, %v12499_v0   ;;  %v8030_v14 = vmul.f32 %v18633_v36, %v7581_v56  ;;  %v7582_v0 = vld [vmem:[#allocation2 + $0x140] sm:$0xff] }
 0x385   :  { %v8031_v57 = vmul.f32 %v18661_v22, %v7582_v0  ;;  %v12506_v22 = vld [vmem:[%s20133_s4 + $0x1038] sm:$0xff] }
 0x386   :  { %v18904_v55 = vpop.permute.xlu1 %8848  ;;  %14178 = vmatmul.mubr.msk.f32.gmra.mrb[32].mxu0 %vm732_vm2, %v8028_v35  ;;  %v12503_v35 = vld [vmem:[%s20133_s4 + $0x1020] sm:$0xff] }
 0x387   :  { %v18907_v34 = vpop.permute.xlu0 %8843  ;;  %10004 = vperm.xlu1 %14939, %v12502_v48   ;;  %14180 = vmatprep.mubr.msk.f32.mxu0 %vm732_vm2, %v8029_v60  ;;  %v7583_v48 = vld [vmem:[#allocation2 + $0x148] sm:$0xff] }
 0x388   :  { %9999 = vperm.xlu0 %14938, %v12501_v45   ;;  %v8032_v36 = vmul.f32 %v18658_v51, %v7583_v48  ;;  %v7584_v45 = vld [vmem:[#allocation2 + $0x150] sm:$0xff] }
 0x389   :  { %v8033_v56 = vmul.f32 %v18679_v40, %v7584_v45  ;;  %v12508_v40 = vld [vmem:[%s20133_s4 + $0x1048] sm:$0xff] }
 0x38a   :  { %v18918_v50 = vpop.permute.xlu1 %8858  ;;  %14181 = vmatmul.mubr.msk.f32.gmra.mrb[34].mxu0 %vm732_vm2, %v8030_v14  ;;  %v12505_v14 = vld [vmem:[%s20133_s4 + $0x1030] sm:$0xff] }
 0x38b   :  { %v18921_v60 = vpop.permute.xlu0 %8853  ;;  %10014 = vperm.xlu1 %14939, %v12504_v12   ;;  %14183 = vmatprep.mubr.msk.f32.mxu0 %vm732_vm2, %v8031_v57  ;;  %v7585_v12 = vld [vmem:[#allocation2 + $0x158] sm:$0xff] }
 0x38c   :  { %10009 = vperm.xlu0 %14938, %v12503_v35   ;;  %v8034_v51 = vmul.f32 %v18676_v2, %v7585_v12  ;;  %v7586_v35 = vld [vmem:[#allocation2 + $0x160] sm:$0xff] }
 0x38d   :  { %v8035_v48 = vmul.f32 %v18697_v46, %v7586_v35  ;;  %v12510_v46 = vld [vmem:[%s20133_s4 + $0x1058] sm:$0xff] }
 0x38e   :  { %v18932_v0 = vpop.permute.xlu1 %8868  ;;  %14184 = vmatmul.mubr.msk.f32.gmra.mrb[36].mxu0 %vm732_vm2, %v8032_v36  ;;  %v12507_v36 = vld [vmem:[%s20133_s4 + $0x1040] sm:$0xff] }
 0x38f   :  { %v18935_v57 = vpop.permute.xlu0 %8863  ;;  %10024 = vperm.xlu1 %14939, %v12506_v22   ;;  %14186 = vmatprep.mubr.msk.f32.mxu0 %vm732_vm2, %v8033_v56  ;;  %v7587_v22 = vld [vmem:[#allocation2 + $0x168] sm:$0xff] }
 0x390   :  { %10019 = vperm.xlu0 %14938, %v12505_v14   ;;  %v8036_v2 = vmul.f32 %v18694_v30, %v7587_v22  ;;  %v7588_v14 = vld [vmem:[#allocation2 + $0x170] sm:$0xff] }
 0x391   :  { %v8037_v12 = vmul.f32 %v18715_v28, %v7588_v14  ;;  %v12512_v28 = vld [vmem:[%s20133_s4 + $0x1068] sm:$0xff] }
 0x392   :  { %v18946_v45 = vpop.permute.xlu1 %8878  ;;  %14187 = vmatmul.mubr.msk.f32.gmra.mrb[38].mxu0 %vm732_vm2, %v8034_v51  ;;  %v12509_v51 = vld [vmem:[%s20133_s4 + $0x1050] sm:$0xff] }
 0x393   :  { %v18949_v56 = vpop.permute.xlu0 %8873  ;;  %10034 = vperm.xlu1 %14939, %v12508_v40   ;;  %14189 = vmatprep.mubr.msk.f32.mxu0 %vm732_vm2, %v8035_v48  ;;  %v7589_v40 = vld [vmem:[#allocation2 + $0x178] sm:$0xff] }
 0x394   :  { %10029 = vperm.xlu0 %14938, %v12507_v36   ;;  %v8038_v30 = vmul.f32 %v18712_v42, %v7589_v40  ;;  %v7590_v36 = vld [vmem:[#allocation2 + $0x180] sm:$0xff] }
 0x395   :  { %v8039_v22 = vmul.f32 %v18733_v39, %v7590_v36  ;;  %v12514_v39 = vld [vmem:[%s20133_s4 + $0x1078] sm:$0xff] }
 0x396   :  { %v18960_v35 = vpop.permute.xlu1 %8888  ;;  %14190 = vmatmul.mubr.msk.f32.gmra.mrb[40].mxu0 %vm732_vm2, %v8036_v2  ;;  %v12511_v2 = vld [vmem:[%s20133_s4 + $0x1060] sm:$0xff] }
 0x397   :  { %v18963_v48 = vpop.permute.xlu0 %8883  ;;  %10044 = vperm.xlu1 %14939, %v12510_v46   ;;  %14192 = vmatprep.mubr.msk.f32.mxu0 %vm732_vm2, %v8037_v12  ;;  %v7591_v46 = vld [vmem:[#allocation2 + $0x188] sm:$0xff] }
 0x398   :  { %10039 = vperm.xlu0 %14938, %v12509_v51   ;;  %v8040_v42 = vmul.f32 %v18730_v44, %v7591_v46  ;;  %v7592_v51 = vld [vmem:[#allocation2 + $0x190] sm:$0xff] }
 0x399   :  { %v8041_v40 = vmul.f32 %v18751_v49, %v7592_v51  ;;  %v12516_v49 = vld [vmem:[%s20133_s4 + $0x1088] sm:$0xff] }
 0x39a   :  { %v18974_v14 = vpop.permute.xlu1 %8898  ;;  %14193 = vmatmul.mubr.msk.f32.gmra.mrb[42].mxu0 %vm732_vm2, %v8038_v30  ;;  %v12513_v30 = vld [vmem:[%s20133_s4 + $0x1070] sm:$0xff] }
 0x39b   :  { %v18977_v12 = vpop.permute.xlu0 %8893  ;;  %10054 = vperm.xlu1 %14939, %v12512_v28   ;;  %14195 = vmatprep.mubr.msk.f32.mxu0 %vm732_vm2, %v8039_v22  ;;  %v7593_v28 = vld [vmem:[#allocation2 + $0x198] sm:$0xff] }
 0x39c   :  { %10049 = vperm.xlu0 %14938, %v12511_v2   ;;  %v8042_v44 = vmul.f32 %v18748_v38, %v7593_v28  ;;  %v7594_v2 = vld [vmem:[#allocation2 + $0x1a0] sm:$0xff] }
 0x39d   :  { %v8043_v46 = vmul.f32 %v18769_v1, %v7594_v2  ;;  %v12518_v1 = vld [vmem:[%s20133_s4 + $0x1098] sm:$0xff] }
 0x39e   :  { %v18988_v36 = vpop.permute.xlu1 %8908  ;;  %14196 = vmatmul.mubr.msk.f32.gmra.mrb[44].mxu0 %vm732_vm2, %v8040_v42  ;;  %v12515_v42 = vld [vmem:[%s20133_s4 + $0x1080] sm:$0xff] }
 0x39f   :  { %v18991_v22 = vpop.permute.xlu0 %8903  ;;  %10064 = vperm.xlu1 %14939, %v12514_v39   ;;  %14198 = vmatprep.mubr.msk.f32.mxu0 %vm732_vm2, %v8041_v40  ;;  %v7595_v39 = vld [vmem:[#allocation2 + $0x1a8] sm:$0xff] }
 0x3a0   :  { %10059 = vperm.xlu0 %14938, %v12513_v30   ;;  %v8044_v38 = vmul.f32 %v18766_v47, %v7595_v39  ;;  %v7596_v30 = vld [vmem:[#allocation2 + $0x1b0] sm:$0xff] }
 0x3a1   :  { %v8045_v28 = vmul.f32 %v18787_v6, %v7596_v30  ;;  %v12520_v6 = vld [vmem:[%s20133_s4 + $0x10a8] sm:$0xff] }
 0x3a2   :  { %v19002_v51 = vpop.permute.xlu1 %8918  ;;  %14199 = vmatmul.mubr.msk.f32.gmra.mrb[46].mxu0 %vm732_vm2, %v8042_v44  ;;  %v12517_v44 = vld [vmem:[%s20133_s4 + $0x1090] sm:$0xff] }
 0x3a3   :  { %v19005_v40 = vpop.permute.xlu0 %8913  ;;  %10074 = vperm.xlu1 %14939, %v12516_v49   ;;  %14201 = vmatprep.mubr.msk.f32.mxu0 %vm732_vm2, %v8043_v46  ;;  %v7597_v49 = vld [vmem:[#allocation2 + $0x1b8] sm:$0xff] }
 0x3a4   :  { %10069 = vperm.xlu0 %14938, %v12515_v42   ;;  %v8046_v47 = vmul.f32 %v18784_v21, %v7597_v49  ;;  %v7598_v42 = vld [vmem:[#allocation2 + $0x1c0] sm:$0xff] }
 0x3a5   :  { %v8047_v39 = vmul.f32 %v18805_v33, %v7598_v42  ;;  %v12522_v33 = vld [vmem:[%s20133_s4 + $0x10b8] sm:$0xff] }
 0x3a6   :  { %v19016_v2 = vpop.permute.xlu1 %8928  ;;  %14202 = vmatmul.mubr.msk.f32.gmra.mrb[48].mxu0 %vm732_vm2, %v8044_v38  ;;  %v12519_v38 = vld [vmem:[%s20133_s4 + $0x10a0] sm:$0xff] }
 0x3a7   :  { %v19019_v46 = vpop.permute.xlu0 %8923  ;;  %10084 = vperm.xlu1 %14939, %v12518_v1   ;;  %14204 = vmatprep.mubr.msk.f32.mxu0 %vm732_vm2, %v8045_v28  ;;  %v7599_v1 = vld [vmem:[#allocation2 + $0x1c8] sm:$0xff] }
 0x3a8   :  { %10079 = vperm.xlu0 %14938, %v12517_v44   ;;  %v8048_v21 = vmul.f32 %v18802_v31, %v7599_v1  ;;  %v7600_v44 = vld [vmem:[#allocation2 + $0x1d0] sm:$0xff] }
 0x3a9   :  { %v8049_v49 = vmul.f32 %v18823_v37, %v7600_v44  ;;  %v12524_v37 = vld [vmem:[%s20133_s4 + $0x10c8] sm:$0xff] }
 0x3aa   :  { %v19030_v30 = vpop.permute.xlu1 %8938  ;;  %14205 = vmatmul.mubr.msk.f32.gmra.mrb[50].mxu0 %vm732_vm2, %v8046_v47  ;;  %v12521_v47 = vld [vmem:[%s20133_s4 + $0x10b0] sm:$0xff] }
 0x3ab   :  { %v19033_v28 = vpop.permute.xlu0 %8933  ;;  %10094 = vperm.xlu1 %14939, %v12520_v6   ;;  %14207 = vmatprep.mubr.msk.f32.mxu0 %vm732_vm2, %v8047_v39  ;;  %v7601_v6 = vld [vmem:[#allocation2 + $0x1d8] sm:$0xff] }
 0x3ac   :  { %10089 = vperm.xlu0 %14938, %v12519_v38   ;;  %v8050_v31 = vmul.f32 %v18820_v43, %v7601_v6  ;;  %v7602_v38 = vld [vmem:[#allocation2 + $0x1e0] sm:$0xff]  ;;  %v7603_v43 = vld [vmem:[#allocation2 + $0x1e8] sm:$0xff]  ;;  %v7604_v6 = vld [vmem:[#allocation2 + $0x1f0] sm:$0xff] }
 0x3ad   :  { %v8051_v44 = vmul.f32 %v18837_v18, %v7602_v38  ;;  %v12526_v38 = vld [vmem:[%s20133_s4 + $0x10d8] sm:$0xff] }
 0x3ae   :  { %v19044_v42 = vpop.permute.xlu1 %8948  ;;  %14208 = vmatmul.mubr.msk.f32.gmra.mrb[52].mxu0 %vm732_vm2, %v8048_v21  ;;  %v12523_v21 = vld [vmem:[%s20133_s4 + $0x10c0] sm:$0xff] }
 0x3af   :  { %v19047_v39 = vpop.permute.xlu0 %8943  ;;  %10104 = vperm.xlu1 %14939, %v12522_v33   ;;  %14210 = vmatprep.mubr.msk.f32.mxu0 %vm732_vm2, %v8049_v49 }
 0x3b0   :  { %10099 = vperm.xlu0 %14938, %v12521_v47   ;;  %v19051_v1 = vpop.f32.mrb[160].mxu1  ;;  %v8052_v47 = vmul.f32 %v18834_v10, %v7603_v43  ;;  %v7605_v10 = vld [vmem:[#allocation2 + $0x1f8] sm:$0xff]  ;;  %v7606_v43 = vld [vmem:[#allocation2 + $0x200] sm:$0xff] }
 0x3b1   :  { %20628 = vst [vmem:[#allocation128_spill] sm:$0xff] %v19051_v1  ;;  %v19057_v32 = vpop.f32.mrb[161].mxu1 }
 0x3b2   :  { %20629 = vst [vmem:[#allocation105_spill] sm:$0xff] %v19057_v32  ;;  %v19062_v33 = vpop.permute.xlu1 %8958  ;;  %14211 = vmatmul.mubr.msk.f32.gmra.mrb[54].mxu0 %vm732_vm2, %v8050_v31  ;;  %v8053_v32 = vmul.f32 %v18851_v4, %v7604_v6  ;;  %v12525_v31 = vld [vmem:[%s20133_s4 + $0x10d0] sm:$0xff]  ;;  %v12528_v6 = vld [vmem:[%s20133_s4 + $0x10e8] sm:$0xff] }
 0x3b3   :  { %v19065_v49 = vpop.permute.xlu0 %8953  ;;  %10114 = vperm.xlu1 %14939, %v12524_v37   ;;  %14213 = vmatprep.mubr.msk.f32.mxu0 %vm732_vm2, %v8051_v44 }
 0x3b4   :  { %10109 = vperm.xlu0 %14938, %v12523_v21   ;;  %v19069_v18 = vpop.f32.mrb[162].mxu1  ;;  %v8054_v21 = vmul.f32 %v18848_v23, %v7605_v10  ;;  %v7608_v10 = vld [vmem:[#allocation2 + $0x210] sm:$0xff] }
 0x3b5   :  { %20630 = vst [vmem:[#allocation131_spill] sm:$0xff] %v19069_v18  ;;  %v19075_v1 = vpop.f32.mrb[163].mxu1 }
 0x3b6   :  { %20631 = vst [vmem:[#allocation104_spill] sm:$0xff] %v19075_v1  ;;  %v19080_v37 = vpop.permute.xlu1 %8968  ;;  %14214 = vmatmul.mubr.msk.f32.gmra.mrb[56].mxu0 %vm732_vm2, %v8052_v47  ;;  %v8055_v1 = vmul.f32 %v18865_v13, %v7606_v43  ;;  %v12527_v47 = vld [vmem:[%s20133_s4 + $0x10e0] sm:$0xff]  ;;  %v12530_v43 = vld [vmem:[%s20133_s4 + $0x10f8] sm:$0xff] }
 0x3b7   :  { %v19083_v44 = vpop.permute.xlu0 %8963  ;;  %10124 = vperm.xlu1 %14939, %v12526_v38   ;;  %14216 = vmatprep.mubr.msk.f32.mxu0 %vm732_vm2, %v8053_v32  ;;  %v7607_v32 = vld [vmem:[#allocation2 + $0x208] sm:$0xff] }
 0x3b8   :  { %10119 = vperm.xlu0 %14938, %v12525_v31   ;;  %v19087_v4 = vpop.f32.mrb[164].mxu1  ;;  %v8056_v31 = vmul.f32 %v18862_v11, %v7607_v32  ;;  %v8702_v32 = vld [vmem:[#allocation2 + $0x21] sm:$0xff] }
 0x3b9   :  { %20632 = vst [vmem:[#allocation130_spill] sm:$0xff] %v19087_v4  ;;  %v19093_v18 = vpop.f32.mrb[165].mxu1  ;;  %v8057_v4 = vmul.f32 %v18879_v27, %v7608_v10  ;;  %v12532_v10 = vld [vmem:[%s20133_s4 + $0x1108] sm:$0xff] }
 0x3ba   :  { %20633 = vst [vmem:[#allocation107_spill] sm:$0xff] %v19093_v18  ;;  %v19098_v38 = vpop.permute.xlu1 %8978  ;;  %14217 = vmatmul.mubr.msk.f32.gmra.mrb[58].mxu0 %vm732_vm2, %v8054_v21  ;;  %v7609_v18 = vld [vmem:[#allocation2 + $0x218] sm:$0xff] }
 0x3bb   :  { %v19101_v23 = vpop.permute.xlu0 %8973  ;;  %10134 = vperm.xlu1 %14939, %v12528_v6   ;;  %14219 = vmatprep.mubr.msk.f32.mxu0 %vm732_vm2, %v8055_v1  ;;  %v12529_v6 = vld [vmem:[%s20133_s4 + $0x10f0] sm:$0xff] }
 0x3bc   :  { %10129 = vperm.xlu0 %14938, %v12527_v47   ;;  %v19105_v13 = vpop.f32.mrb[166].mxu1  ;;  %v8058_v47 = vmul.f32 %v18876_v5, %v7609_v18  ;;  %v8703_v5 = vld [vmem:[#allocation2 + $0x29] sm:$0xff] }
 0x3bd   :  { %20634 = vst [vmem:[#allocation133_spill] sm:$0xff] %v19105_v13  ;;  %v19111_v21 = vpop.f32.mrb[167].mxu1 }
 0x3be   :  { %20635 = vst [vmem:[#allocation106_spill] sm:$0xff] %v19111_v21  ;;  %v19116_v1 = vpop.permute.xlu1 %8988  ;;  %14220 = vmatmul.mubr.msk.f32.gmra.mrb[60].mxu0 %vm732_vm2, %v8056_v31  ;;  %v9151_v21 = vmul.f32 %v18893_v20, %v8702_v32  ;;  %v12531_v31 = vld [vmem:[%s20133_s4 + $0x1100] sm:$0xff]  ;;  %v8704_v32 = vld [vmem:[#allocation2 + $0x31] sm:$0xff] }
 0x3bf   :  { %v19119_v11 = vpop.permute.xlu0 %8983  ;;  %10144 = vperm.xlu1 %14939, %v12530_v43   ;;  %14222 = vmatprep.mubr.msk.f32.mxu0 %vm732_vm2, %v8057_v4  ;;  %v9152_v4 = vmul.f32 %v18890_v9, %v8703_v5  ;;  %v8705_v9 = vld [vmem:[#allocation2 + $0x39] sm:$0xff]  ;;  %v8706_v5 = vld [vmem:[#allocation2 + $0x41] sm:$0xff] }
 0x3c0   :  { %10139 = vperm.xlu0 %14938, %v12529_v6   ;;  %v19123_v27 = vpop.f32.mrb[168].mxu1  ;;  %v12534_v6 = vld [vmem:[%s20133_s4 + $0x1118] sm:$0xff] }
 0x3c1   :  { %20636 = vst [vmem:[#allocation132_spill] sm:$0xff] %v19123_v27  ;;  %v19129_v13 = vpop.f32.mrb[169].mxu1 }
 0x3c2   :  { %20637 = vst [vmem:[#allocation109_spill] sm:$0xff] %v19129_v13  ;;  %v19134_v43 = vpop.permute.xlu1 %8998  ;;  %14223 = vmatmul.mubr.msk.f32.gmra.mrb[62].mxu0 %vm732_vm2, %v8058_v47  ;;  %v12533_v47 = vld [vmem:[%s20133_s4 + $0x1110] sm:$0xff] }
 0x3c3   :  { %v19137_v18 = vpop.permute.xlu0 %8993  ;;  %10154 = vperm.xlu1 %14939, %v12532_v10   ;;  %14227 = vmatprep.mubr.msk.f32.mxu0 %vm732_vm2, %v9151_v21  ;;  %v9153_v10 = vmul.f32 %v18907_v34, %v8704_v32  ;;  %v12536_v34 = vld [vmem:[%s20133_s4 + $0x1128] sm:$0xff] }
 0x3c4   :  { %10149 = vperm.xlu0 %14938, %v12531_v31   ;;  %v19141_v20 = vpop.f32.mrb[170].mxu1  ;;  %v9154_v31 = vmul.f32 %v18904_v55, %v8705_v9  ;;  %v8707_v55 = vld [vmem:[#allocation2 + $0x49] sm:$0xff]  ;;  %v8708_v9 = vld [vmem:[#allocation2 + $0x51] sm:$0xff] }
 0x3c5   :  { %v19146_v13 = vpop.f32.mrb[171].mxu1 }
 0x3c6   :  { %20638 = vst [vmem:[#allocation135_spill] sm:$0xff] %v19146_v13  ;;  %v19152_v27 = vpop.permute.xlu1 %9008  ;;  %14228 = vmatmul.mubr.msk.f32.vlgmr.msra.gmra.mrb[0].mxu0 %vm732_vm2, %v9152_v4  ;;  %v9155_v4 = vmul.f32 %v18921_v60, %v8706_v5  ;;  %v12538_v5 = vld [vmem:[%s20133_s4 + $0x1138] sm:$0xff] }
 0x3c7   :  { %v19155_v21 = vpop.permute.xlu0 %9003  ;;  %14324 = vmatpush3.msra.mxu0 %v18639_v41  ;;  %10164 = vperm.xlu1 %14939, %v12534_v6   ;;  %v12535_v41 = vld [vmem:[%s20133_s4 + $0x1120] sm:$0xff] }
 0x3c8   :  { %10159 = vperm.xlu0 %14938, %v12533_v47   ;;  %14230 = vmatprep.mubr.msk.f32.mxu0 %vm732_vm2, %v9153_v10  ;;  %v19160_v13 = vpop.f32.mrb[172].mxu1  ;;  %v9156_v10 = vmul.f32 %v18918_v50, %v8707_v55  ;;  %v8709_v50 = vld [vmem:[#allocation2 + $0x59] sm:$0xff]  ;;  %v8710_v55 = vld [vmem:[#allocation2 + $0x61] sm:$0xff] }
 0x3c9   :  { %20639 = vst [vmem:[#allocation108_spill] sm:$0xff] %v19160_v13  ;;  %v19166_v32 = vpop.f32.mrb[173].mxu1 }
 0x3ca   :  { %20640 = vst [vmem:[#allocation134_spill] sm:$0xff] %v19166_v32  ;;  %v19171_v6 = vpop.permute.xlu1 %9018  ;;  %14231 = vmatmul.mubr.msk.f32.gmra.mrb[2].mxu0 %vm732_vm2, %v9154_v31  ;;  %v9157_v32 = vmul.f32 %v18935_v57, %v8708_v9  ;;  %v12537_v31 = vld [vmem:[%s20133_s4 + $0x1130] sm:$0xff]  ;;  %v12540_v9 = vld [vmem:[%s20133_s4 + $0x1148] sm:$0xff] }
 0x3cb   :  { %v19174_v47 = vpop.permute.xlu0 %9013  ;;  %10174 = vperm.xlu1 %14939, %v12536_v34   ;;  %14233 = vmatprep.mubr.msk.f32.mxu0 %vm732_vm2, %v9155_v4 }
 0x3cc   :  { %10169 = vperm.xlu0 %14938, %v12535_v41   ;;  %v19178_v60 = vpop.f32.mrb[174].mxu1  ;;  %v9158_v41 = vmul.f32 %v18932_v0, %v8709_v50  ;;  %v8711_v0 = vld [vmem:[#allocation2 + $0x69] sm:$0xff]  ;;  %v8712_v50 = vld [vmem:[#allocation2 + $0x71] sm:$0xff] }
 0x3cd   :  { %20641 = vst [vmem:[#allocation111_spill] sm:$0xff] %v19178_v60  ;;  %v19184_v13 = vpop.f32.mrb[175].mxu1 }
 0x3ce   :  { %20642 = vst [vmem:[#allocation137_spill] sm:$0xff] %v19184_v13  ;;  %v19189_v34 = vpop.permute.xlu1 %9028  ;;  %14234 = vmatmul.mubr.msk.f32.gmra.mrb[4].mxu0 %vm732_vm2, %v9156_v10  ;;  %v9159_v13 = vmul.f32 %v18949_v56, %v8710_v55  ;;  %v12539_v10 = vld [vmem:[%s20133_s4 + $0x1140] sm:$0xff]  ;;  %v12542_v55 = vld [vmem:[%s20133_s4 + $0x1158] sm:$0xff] }
 0x3cf   :  { %v19192_v4 = vpop.permute.xlu0 %9023  ;;  %10184 = vperm.xlu1 %14939, %v12538_v5   ;;  %14236 = vmatprep.mubr.msk.f32.mxu0 %vm732_vm2, %v9157_v32 }
 0x3d0   :  { %10179 = vperm.xlu0 %14938, %v12537_v31   ;;  %v19196_v57 = vpop.f32.mrb[176].mxu1  ;;  %v9160_v31 = vmul.f32 %v18946_v45, %v8711_v0  ;;  %v8713_v45 = vld [vmem:[#allocation2 + $0x79] sm:$0xff]  ;;  %v8714_v0 = vld [vmem:[#allocation2 + $0x81] sm:$0xff] }
 0x3d1   :  { %20643 = vst [vmem:[#allocation110_spill] sm:$0xff] %v19196_v57  ;;  %v19202_v60 = vpop.f32.mrb[177].mxu1 }
 0x3d2   :  { %20644 = vst [vmem:[#allocation136_spill] sm:$0xff] %v19202_v60  ;;  %v19207_v5 = vpop.permute.xlu1 %9038  ;;  %14237 = vmatmul.mubr.msk.f32.gmra.mrb[6].mxu0 %vm732_vm2, %v9158_v41  ;;  %v9161_v60 = vmul.f32 %v18963_v48, %v8712_v50  ;;  %v12541_v41 = vld [vmem:[%s20133_s4 + $0x1150] sm:$0xff]  ;;  %v12544_v50 = vld [vmem:[%s20133_s4 + $0x1168] sm:$0xff] }
 0x3d3   :  { %v19210_v32 = vpop.permute.xlu0 %9033  ;;  %10194 = vperm.xlu1 %14939, %v12540_v9   ;;  %14239 = vmatprep.mubr.msk.f32.mxu0 %vm732_vm2, %v9159_v13 }
 0x3d4   :  { %10189 = vperm.xlu0 %14938, %v12539_v10   ;;  %v19214_v56 = vpop.f32.mrb[178].mxu1  ;;  %v9162_v10 = vmul.f32 %v18960_v35, %v8713_v45  ;;  %v8715_v35 = vld [vmem:[#allocation2 + $0x89] sm:$0xff]  ;;  %v8716_v45 = vld [vmem:[#allocation2 + $0x91] sm:$0xff] }
 0x3d5   :  { %20645 = vst [vmem:[#allocation113_spill] sm:$0xff] %v19214_v56  ;;  %v19220_v57 = vpop.f32.mrb[179].mxu1 }
 0x3d6   :  { %20646 = vst [vmem:[#allocation139_spill] sm:$0xff] %v19220_v57  ;;  %v19225_v9 = vpop.permute.xlu1 %9048  ;;  %14240 = vmatmul.mubr.msk.f32.gmra.mrb[8].mxu0 %vm732_vm2, %v9160_v31  ;;  %v9163_v57 = vmul.f32 %v18977_v12, %v8714_v0  ;;  %v12543_v31 = vld [vmem:[%s20133_s4 + $0x1160] sm:$0xff]  ;;  %v12546_v0 = vld [vmem:[%s20133_s4 + $0x1178] sm:$0xff] }
 0x3d7   :  { %v19228_v13 = vpop.permute.xlu0 %9043  ;;  %10204 = vperm.xlu1 %14939, %v12542_v55   ;;  %14242 = vmatprep.mubr.msk.f32.mxu0 %vm732_vm2, %v9161_v60 }
 0x3d8   :  { %10199 = vperm.xlu0 %14938, %v12541_v41   ;;  %v19232_v48 = vpop.f32.mrb[180].mxu1  ;;  %v9164_v41 = vmul.f32 %v18974_v14, %v8715_v35  ;;  %v8717_v14 = vld [vmem:[#allocation2 + $0x99] sm:$0xff]  ;;  %v8718_v35 = vld [vmem:[#allocation2 + $0xa1] sm:$0xff] }
 0x3d9   :  { %20647 = vst [vmem:[#allocation112_spill] sm:$0xff] %v19232_v48  ;;  %v19238_v56 = vpop.f32.mrb[181].mxu1 }
 0x3da   :  { %20648 = vst [vmem:[#allocation138_spill] sm:$0xff] %v19238_v56  ;;  %v19243_v55 = vpop.permute.xlu1 %9058  ;;  %14243 = vmatmul.mubr.msk.f32.gmra.mrb[10].mxu0 %vm732_vm2, %v9162_v10  ;;  %v9165_v56 = vmul.f32 %v18991_v22, %v8716_v45  ;;  %v12545_v10 = vld [vmem:[%s20133_s4 + $0x1170] sm:$0xff]  ;;  %v12548_v45 = vld [vmem:[%s20133_s4 + $0x1188] sm:$0xff] }
 0x3db   :  { %v19246_v60 = vpop.permute.xlu0 %9053  ;;  %10214 = vperm.xlu1 %14939, %v12544_v50   ;;  %14245 = vmatprep.mubr.msk.f32.mxu0 %vm732_vm2, %v9163_v57 }
 0x3dc   :  { %10209 = vperm.xlu0 %14938, %v12543_v31   ;;  %v19250_v12 = vpop.f32.mrb[182].mxu1  ;;  %v9166_v31 = vmul.f32 %v18988_v36, %v8717_v14  ;;  %v8719_v36 = vld [vmem:[#allocation2 + $0xa9] sm:$0xff]  ;;  %v8720_v14 = vld [vmem:[#allocation2 + $0xb1] sm:$0xff] }
 0x3dd   :  { %20649 = vst [vmem:[#allocation115_spill] sm:$0xff] %v19250_v12  ;;  %v19256_v48 = vpop.f32.mrb[183].mxu1 }
 0x3de   :  { %20650 = vst [vmem:[#allocation141_spill] sm:$0xff] %v19256_v48  ;;  %v19261_v50 = vpop.permute.xlu1 %9068  ;;  %14246 = vmatmul.mubr.msk.f32.gmra.mrb[12].mxu0 %vm732_vm2, %v9164_v41  ;;  %v9167_v48 = vmul.f32 %v19005_v40, %v8718_v35  ;;  %v12547_v41 = vld [vmem:[%s20133_s4 + $0x1180] sm:$0xff]  ;;  %v12550_v35 = vld [vmem:[%s20133_s4 + $0x1198] sm:$0xff] }
 0x3df   :  { %v19264_v57 = vpop.permute.xlu0 %9063  ;;  %10224 = vperm.xlu1 %14939, %v12546_v0   ;;  %14248 = vmatprep.mubr.msk.f32.mxu0 %vm732_vm2, %v9165_v56 }
 0x3e0   :  { %10219 = vperm.xlu0 %14938, %v12545_v10   ;;  %v19268_v22 = vpop.f32.mrb[184].mxu1  ;;  %v9168_v10 = vmul.f32 %v19002_v51, %v8719_v36  ;;  %v8721_v51 = vld [vmem:[#allocation2 + $0xb9] sm:$0xff]  ;;  %v8722_v36 = vld [vmem:[#allocation2 + $0xc1] sm:$0xff] }
 0x3e1   :  { %20651 = vst [vmem:[#allocation114_spill] sm:$0xff] %v19268_v22  ;;  %v19274_v12 = vpop.f32.mrb[185].mxu1 }
 0x3e2   :  { %20652 = vst [vmem:[#allocation140_spill] sm:$0xff] %v19274_v12  ;;  %v19279_v0 = vpop.permute.xlu1 %9078  ;;  %14249 = vmatmul.mubr.msk.f32.gmra.mrb[14].mxu0 %vm732_vm2, %v9166_v31  ;;  %v9169_v12 = vmul.f32 %v19019_v46, %v8720_v14  ;;  %v12549_v31 = vld [vmem:[%s20133_s4 + $0x1190] sm:$0xff]  ;;  %v12552_v14 = vld [vmem:[%s20133_s4 + $0x11a8] sm:$0xff] }
 0x3e3   :  { %v19282_v56 = vpop.permute.xlu0 %9073  ;;  %10234 = vperm.xlu1 %14939, %v12548_v45   ;;  %14251 = vmatprep.mubr.msk.f32.mxu0 %vm732_vm2, %v9167_v48 }
 0x3e4   :  { %10229 = vperm.xlu0 %14938, %v12547_v41   ;;  %v19286_v40 = vpop.f32.mrb[186].mxu1  ;;  %v9170_v41 = vmul.f32 %v19016_v2, %v8721_v51  ;;  %v8723_v2 = vld [vmem:[#allocation2 + $0xc9] sm:$0xff]  ;;  %v8724_v51 = vld [vmem:[#allocation2 + $0xd1] sm:$0xff] }
 0x3e5   :  { %20653 = vst [vmem:[#allocation117_spill] sm:$0xff] %v19286_v40  ;;  %v19292_v22 = vpop.f32.mrb[187].mxu1 }
 0x3e6   :  { %20654 = vst [vmem:[#allocation143_spill] sm:$0xff] %v19292_v22  ;;  %v19297_v45 = vpop.permute.xlu1 %9088  ;;  %14252 = vmatmul.mubr.msk.f32.gmra.mrb[16].mxu0 %vm732_vm2, %v9168_v10  ;;  %v9171_v22 = vmul.f32 %v19033_v28, %v8722_v36  ;;  %v12551_v10 = vld [vmem:[%s20133_s4 + $0x11a0] sm:$0xff]  ;;  %v12554_v36 = vld [vmem:[%s20133_s4 + $0x11b8] sm:$0xff] }
 0x3e7   :  { %v19300_v48 = vpop.permute.xlu0 %9083  ;;  %10244 = vperm.xlu1 %14939, %v12550_v35   ;;  %14254 = vmatprep.mubr.msk.f32.mxu0 %vm732_vm2, %v9169_v12 }
 0x3e8   :  { %10239 = vperm.xlu0 %14938, %v12549_v31   ;;  %v19304_v46 = vpop.f32.mrb[188].mxu1  ;;  %v9172_v31 = vmul.f32 %v19030_v30, %v8723_v2  ;;  %v8725_v30 = vld [vmem:[#allocation2 + $0xd9] sm:$0xff]  ;;  %v8726_v2 = vld [vmem:[#allocation2 + $0xe1] sm:$0xff] }
 0x3e9   :  { %20655 = vst [vmem:[#allocation116_spill] sm:$0xff] %v19304_v46  ;;  %v19310_v40 = vpop.f32.mrb[189].mxu1 }
 0x3ea   :  { %20656 = vst [vmem:[#allocation142_spill] sm:$0xff] %v19310_v40  ;;  %v19315_v35 = vpop.permute.xlu1 %9098  ;;  %14255 = vmatmul.mubr.msk.f32.gmra.mrb[18].mxu0 %vm732_vm2, %v9170_v41  ;;  %v9173_v40 = vmul.f32 %v19047_v39, %v8724_v51  ;;  %v12553_v41 = vld [vmem:[%s20133_s4 + $0x11b0] sm:$0xff]  ;;  %v12556_v39 = vld [vmem:[%s20133_s4 + $0x11c8] sm:$0xff]  ;;  %v9175_v51 = vmul.f32 %v19065_v49, %v8726_v2  ;;  %v12558_v49 = vld [vmem:[%s20133_s4 + $0x11d8] sm:$0xff] }
 0x3eb   :  { %v19318_v12 = vpop.permute.xlu0 %9093  ;;  %10254 = vperm.xlu1 %14939, %v12552_v14   ;;  %14257 = vmatprep.mubr.msk.f32.mxu0 %vm732_vm2, %v9171_v22 }
 0x3ec   :  { %10249 = vperm.xlu0 %14938, %v12551_v10   ;;  %v19322_v28 = vpop.f32.mrb[190].mxu1  ;;  %v9174_v10 = vmul.f32 %v19044_v42, %v8725_v30 }
 0x3ed   :  { %20657 = vst [vmem:[#allocation119_spill] sm:$0xff] %v19322_v28  ;;  %v19328_v46 = vpop.f32.mrb[191].mxu1 }
 0x3ee   :  { %20658 = vst [vmem:[#allocation145_spill] sm:$0xff] %v19328_v46  ;;  %v19333_v14 = vpop.permute.xlu1 %9108  ;;  %14258 = vmatmul.mubr.msk.f32.gmra.mrb[20].mxu0 %vm732_vm2, %v9172_v31  ;;  %v12555_v31 = vld [vmem:[%s20133_s4 + $0x11c0] sm:$0xff] }
 0x3ef   :  { %v19336_v22 = vpop.permute.xlu0 %9103  ;;  %10264 = vperm.xlu1 %14939, %v12554_v36   ;;  %14260 = vmatprep.mubr.msk.f32.mxu0 %vm732_vm2, %v9173_v40  ;;  %v8727_v36 = vld [vmem:[#allocation2 + $0xe9] sm:$0xff] }
 0x3f0   :  { %10259 = vperm.xlu0 %14938, %v12553_v41   ;;  %v9176_v42 = vmul.f32 %v19062_v33, %v8727_v36  ;;  %v8728_v41 = vld [vmem:[#allocation2 + $0xf1] sm:$0xff] }
 0x3f1   :  { %v9177_v30 = vmul.f32 %v19083_v44, %v8728_v41  ;;  %v12560_v44 = vld [vmem:[%s20133_s4 + $0x11e8] sm:$0xff] }
 0x3f2   :  { %v19347_v46 = vpop.permute.xlu1 %9118  ;;  %14261 = vmatmul.mubr.msk.f32.gmra.mrb[22].mxu0 %vm732_vm2, %v9174_v10  ;;  %v12557_v10 = vld [vmem:[%s20133_s4 + $0x11d0] sm:$0xff] }
 0x3f3   :  { %v19350_v40 = vpop.permute.xlu0 %9113  ;;  %10274 = vperm.xlu1 %14939, %v12556_v39   ;;  %14263 = vmatprep.mubr.msk.f32.mxu0 %vm732_vm2, %v9175_v51  ;;  %v8729_v39 = vld [vmem:[#allocation2 + $0xf9] sm:$0xff] }
 0x3f4   :  { %10269 = vperm.xlu0 %14938, %v12555_v31   ;;  %v9178_v33 = vmul.f32 %v19080_v37, %v8729_v39  ;;  %v8730_v31 = vld [vmem:[#allocation2 + $0x101] sm:$0xff] }
 0x3f5   :  { %v9179_v36 = vmul.f32 %v19101_v23, %v8730_v31  ;;  %v12562_v23 = vld [vmem:[%s20133_s4 + $0x11f8] sm:$0xff] }
 0x3f6   :  { %v19361_v2 = vpop.permute.xlu1 %9128  ;;  %14264 = vmatmul.mubr.msk.f32.gmra.mrb[24].mxu0 %vm732_vm2, %v9176_v42  ;;  %v12559_v42 = vld [vmem:[%s20133_s4 + $0x11e0] sm:$0xff] }
 0x3f7   :  { %v19364_v51 = vpop.permute.xlu0 %9123  ;;  %10284 = vperm.xlu1 %14939, %v12558_v49   ;;  %14266 = vmatprep.mubr.msk.f32.mxu0 %vm732_vm2, %v9177_v30  ;;  %v8731_v49 = vld [vmem:[#allocation2 + $0x109] sm:$0xff] }
 0x3f8   :  { %10279 = vperm.xlu0 %14938, %v12557_v10   ;;  %v9180_v37 = vmul.f32 %v19098_v38, %v8731_v49  ;;  %v8732_v10 = vld [vmem:[#allocation2 + $0x111] sm:$0xff]  ;;  %v8735_v49 = vld [vmem:[#allocation2 + $0x129] sm:$0xff] }
 0x3f9   :  { %v9181_v39 = vmul.f32 %v19119_v11, %v8732_v10 }
 0x3fa   :  { %v19375_v41 = vpop.permute.xlu1 %9138  ;;  %14267 = vmatmul.mubr.msk.f32.gmra.mrb[26].mxu0 %vm732_vm2, %v9178_v33  ;;  %v12561_v33 = vld [vmem:[%s20133_s4 + $0x11f0] sm:$0xff]  ;;  %s14974_s4 = smov 8  }
 0x3fb   :  { %v19378_v30 = vpop.permute.xlu0 %9133  ;;  %10294 = vperm.xlu1 %14939, %v12560_v44   ;;  %14269 = vmatprep.mubr.msk.f32.mxu0 %vm732_vm2, %v9179_v36  ;;  %v8733_v44 = vld [vmem:[#allocation2 + $0x119] sm:$0xff] }
 0x3fc   :  { %10289 = vperm.xlu0 %14938, %v12559_v42   ;;  %v9182_v38 = vmul.f32 %v19116_v1, %v8733_v44  ;;  %v8734_v42 = vld [vmem:[#allocation2 + $0x121] sm:$0xff]  ;;  %v8737_v1 = vld [vmem:[#allocation2 + $0x139] sm:$0xff] }
 0x3fd   :  { %v9183_v11 = vmul.f32 %v19137_v18, %v8734_v42  ;;  %v9186_v18 = vmul.f32 %v19152_v27, %v8737_v1  ;;  %v8738_v44 = vld [vmem:[#allocation2 + $0x141] sm:$0xff]  ;;  %v8741_v27 = vld [vmem:[#allocation2 + $0x159] sm:$0xff] }
 0x3fe   :  { %v19389_v31 = vpop.permute.xlu1 %9148  ;;  %14270 = vmatmul.mubr.msk.f32.gmra.mrb[28].mxu0 %vm732_vm2, %v9180_v37  ;;  %v9184_v37 = vmul.f32 %v19134_v43, %v8735_v49  ;;  %v8739_v43 = vld [vmem:[#allocation2 + $0x149] sm:$0xff] }
 0x3ff   :  { %v19392_v36 = vpop.permute.xlu0 %9143  ;;  %10304 = vperm.xlu1 %14939, %v12562_v23   ;;  %14272 = vmatprep.mubr.msk.f32.mxu0 %vm732_vm2, %v9181_v39  ;;  %v8736_v23 = vld [vmem:[#allocation2 + $0x131] sm:$0xff] }
 0x400   :  { %10299 = vperm.xlu0 %14938, %v12561_v33   ;;  %v9185_v39 = vmul.f32 %v19155_v21, %v8736_v23  ;;  %v9188_v21 = vmul.f32 %v19171_v6, %v8739_v43  ;;  %v8743_v6 = vld [vmem:[#allocation2 + $0x169] sm:$0xff] }
 0x402   :  { %14273 = vmatmul.mubr.msk.f32.gmra.mrb[30].mxu0 %vm732_vm2, %v9182_v38  ;;  %v19398_v10 = vpop.permute.xlu1 %9994  ;;  %v9187_v38 = vmul.f32 %v19174_v47, %v8738_v44  ;;  %v9190_v47 = vmul.f32 %v19189_v34, %v8741_v27  ;;  %v8744_v44 = vld [vmem:[#allocation2 + $0x171] sm:$0xff]  ;;  %v8745_v34 = vld [vmem:[#allocation2 + $0x179] sm:$0xff] }
 0x403   :  { %v19400_v28 = vpop.permute.xlu0 %9989  ;;  %14275 = vmatprep.mubr.msk.f32.mxu0 %vm732_vm2, %v9183_v11  ;;  %v8740_v11 = vld [vmem:[#allocation2 + $0x151] sm:$0xff] }
 0x406   :  { %14276 = vmatmul.mubr.msk.f32.gmra.mrb[32].mxu0 %vm732_vm2, %v9184_v37  ;;  %v19411_v42 = vpop.permute.xlu1 %10004  ;;  %v9189_v37 = vmul.f32 %v19192_v4, %v8740_v11  ;;  %v9192_v4 = vmul.f32 %v19207_v5, %v8743_v6  ;;  %v8747_v5 = vld [vmem:[#allocation2 + $0x189] sm:$0xff]  ;;  %v8750_v6 = vld [vmem:[#allocation2 + $0x1a1] sm:$0xff] }
 0x407   :  { %v19406_v33 = vpop.permute.xlu0 %9999  ;;  %14278 = vmatprep.mubr.msk.f32.mxu0 %vm732_vm2, %v9185_v39  ;;  %v8742_v39 = vld [vmem:[#allocation2 + $0x161] sm:$0xff] }
 0x408   :  { %v9191_v1 = vmul.f32 %v19210_v32, %v8742_v39  ;;  %v9194_v32 = vmul.f32 %v19225_v9, %v8745_v34  ;;  %v8749_v9 = vld [vmem:[#allocation2 + $0x199] sm:$0xff] }
 0x40a   :  { %14279 = vmatmul.mubr.msk.f32.gmra.mrb[34].mxu0 %vm732_vm2, %v9186_v18  ;;  %v19420_v23 = vpop.permute.xlu1 %10014 }
 0x40b   :  { %14281 = vmatprep.mubr.msk.f32.mxu0 %vm732_vm2, %v9187_v38  ;;  %v19416_v49 = vpop.permute.xlu0 %10009  ;;  %v9193_v38 = vmul.f32 %v19228_v13, %v8744_v44  ;;  %v9196_v13 = vmul.f32 %v19243_v55, %v8747_v5  ;;  %v8751_v55 = vld [vmem:[#allocation2 + $0x1a9] sm:$0xff] }
 0x40e   :  { %14282 = vmatmul.mubr.msk.f32.gmra.mrb[36].mxu0 %vm732_vm2, %v9188_v21  ;;  %v19431_v43 = vpop.permute.xlu1 %10024  ;;  %v8746_v21 = vld [vmem:[#allocation2 + $0x181] sm:$0xff] }
 0x40f   :  { %14284 = vmatprep.mubr.msk.f32.mxu0 %vm732_vm2, %v9189_v37  ;;  %v19425_v18 = vpop.permute.xlu0 %10019  ;;  %v9195_v37 = vmul.f32 %v19246_v60, %v8746_v21  ;;  %v9198_v60 = vmul.f32 %v19261_v50, %v8749_v9  ;;  %v8753_v50 = vld [vmem:[#allocation2 + $0x1b9] sm:$0xff] }
 0x412   :  { %14285 = vmatmul.mubr.msk.f32.gmra.mrb[38].mxu0 %vm732_vm2, %v9190_v47  ;;  %v19440_v27 = vpop.permute.xlu1 %10034  ;;  %v8748_v47 = vld [vmem:[#allocation2 + $0x191] sm:$0xff] }
 0x413   :  { %14287 = vmatprep.mubr.msk.f32.mxu0 %vm732_vm2, %v9191_v1  ;;  %v19436_v11 = vpop.permute.xlu0 %10029  ;;  %v9197_v39 = vmul.f32 %v19264_v57, %v8748_v47  ;;  %v9200_v57 = vmul.f32 %v19279_v0, %v8751_v55  ;;  %v8755_v0 = vld [vmem:[#allocation2 + $0x1c9] sm:$0xff]  ;;  %v8756_v47 = vld [vmem:[#allocation2 + $0x1d1] sm:$0xff] }
 0x416   :  { %14288 = vmatmul.mubr.msk.f32.gmra.mrb[40].mxu0 %vm732_vm2, %v9192_v4  ;;  %v9199_v4 = vmul.f32 %v19282_v56, %v8750_v6  ;;  %v19451_v44 = vpop.permute.xlu1 %10044  ;;  %v9202_v56 = vmul.f32 %v19297_v45, %v8753_v50  ;;  %v8757_v45 = vld [vmem:[#allocation2 + $0x1d9] sm:$0xff]  ;;  %v8762_v50 = vld [vmem:[#allocation2 + $0x201] sm:$0xff] }
 0x417   :  { %14290 = vmatprep.mubr.msk.f32.mxu0 %vm732_vm2, %v9193_v38  ;;  %v19445_v1 = vpop.permute.xlu0 %10039  ;;  %v8752_v38 = vld [vmem:[#allocation2 + $0x1b1] sm:$0xff] }
 0x41a   :  { %14291 = vmatmul.mubr.msk.f32.gmra.mrb[42].mxu0 %vm732_vm2, %v9194_v32  ;;  %v9201_v32 = vmul.f32 %v19300_v48, %v8752_v38  ;;  %v19460_v21 = vpop.permute.xlu1 %10054  ;;  %v9204_v48 = vmul.f32 %v19315_v35, %v8755_v0  ;;  %v8759_v35 = vld [vmem:[#allocation2 + $0x1e9] sm:$0xff] }
 0x41b   :  { %14293 = vmatprep.mubr.msk.f32.mxu0 %vm732_vm2, %v9195_v37  ;;  %v19456_v34 = vpop.permute.xlu0 %10049  ;;  %v8754_v37 = vld [vmem:[#allocation2 + $0x1c1] sm:$0xff] }
 0x41c   :  { %v9203_v5 = vmul.f32 %v19318_v12, %v8754_v37  ;;  %v9206_v12 = vmul.f32 %v19333_v14, %v8757_v45  ;;  %v8761_v14 = vld [vmem:[#allocation2 + $0x1f9] sm:$0xff] }
 0x41e   :  { %14294 = vmatmul.mubr.msk.f32.gmra.mrb[44].mxu0 %vm732_vm2, %v9196_v13  ;;  %v19471_v9 = vpop.permute.xlu1 %10064 }
 0x41f   :  { %14296 = vmatprep.mubr.msk.f32.mxu0 %vm732_vm2, %v9197_v39  ;;  %v19465_v13 = vpop.permute.xlu0 %10059  ;;  %v9205_v39 = vmul.f32 %v19336_v22, %v8756_v47  ;;  %v9208_v22 = vmul.f32 %v19347_v46, %v8759_v35  ;;  %v8763_v46 = vld [vmem:[#allocation2 + $0x209] sm:$0xff] }
 0x422   :  { %14297 = vmatmul.mubr.msk.f32.gmra.mrb[46].mxu0 %vm732_vm2, %v9198_v60  ;;  %v8758_v60 = vld [vmem:[#allocation2 + $0x1e1] sm:$0xff]  ;;  %v19480_v55 = vpop.permute.xlu1 %10074 }
 0x423   :  { %14299 = vmatprep.mubr.msk.f32.mxu0 %vm732_vm2, %v9199_v4  ;;  %v19476_v6 = vpop.permute.xlu0 %10069  ;;  %v9207_v4 = vmul.f32 %v19350_v40, %v8758_v60  ;;  %v9210_v40 = vmul.f32 %v19361_v2, %v8761_v14  ;;  %v9860_v60 = vld [vmem:[#allocation2 + $0x32] sm:$0xff] }
 0x426   :  { %14300 = vmatmul.mubr.msk.f32.gmra.mrb[48].mxu0 %vm732_vm2, %v9200_v57  ;;  %v8760_v57 = vld [vmem:[#allocation2 + $0x1f1] sm:$0xff]  ;;  %v19491_v37 = vpop.permute.xlu1 %10084 }
 0x427   :  { %14302 = vmatprep.mubr.msk.f32.mxu0 %vm732_vm2, %v9201_v32  ;;  %v9209_v38 = vmul.f32 %v19364_v51, %v8760_v57  ;;  %v19485_v32 = vpop.permute.xlu0 %10079  ;;  %v9212_v51 = vmul.f32 %v19375_v41, %v8763_v46  ;;  %v9859_v41 = vld [vmem:[#allocation2 + $0x2a] sm:$0xff] }
 0x42a   :  { %14303 = vmatmul.mubr.msk.f32.gmra.mrb[50].mxu0 %vm732_vm2, %v9202_v56  ;;  %v9211_v56 = vmul.f32 %v19378_v30, %v8762_v50  ;;  %v19500_v2 = vpop.permute.xlu1 %10094 }
 0x42b   :  { %14305 = vmatprep.mubr.msk.f32.mxu0 %vm732_vm2, %v9203_v5  ;;  %v8764_v5 = vld [vmem:[#allocation2 + $0x211] sm:$0xff]  ;;  %v19496_v0 = vpop.permute.xlu0 %10089 }
 0x42c   :  { %v9213_v47 = vmul.f32 %v19392_v36, %v8764_v5  ;;  %v10308_v36 = vmul.f32 %v19398_v10, %v9859_v41  ;;  %v9863_v10 = vld [vmem:[#allocation2 + $0x4a] sm:$0xff]  ;;  %v9866_v5 = vld [vmem:[#allocation2 + $0x62] sm:$0xff] }
 0x42d   :  { %v10315_v46 = vmul.f32 %v19436_v11, %v9866_v5 }
 0x42e   :  { %14306 = vmatmul.mubr.msk.f32.gmra.mrb[52].mxu0 %vm732_vm2, %v9204_v48  ;;  %v8765_v48 = vld [vmem:[#allocation2 + $0x219] sm:$0xff]  ;;  %v19511_v35 = vpop.permute.xlu1 %10104 }
 0x42f   :  { %14308 = vmatprep.mubr.msk.f32.mxu0 %vm732_vm2, %v9205_v39  ;;  %v9214_v30 = vmul.f32 %v19389_v31, %v8765_v48  ;;  %v9858_v39 = vld [vmem:[#allocation2 + $0x22] sm:$0xff]  ;;  %v9861_v31 = vld [vmem:[#allocation2 + $0x3a] sm:$0xff]  ;;  %v9868_v48 = vld [vmem:[#allocation2 + $0x72] sm:$0xff] }
 0x430   :  { %v10307_v45 = vmul.f32 %v19400_v28, %v9858_v39  ;;  %v10310_v28 = vmul.f32 %v19411_v42, %v9861_v31  ;;  %v9865_v42 = vld [vmem:[#allocation2 + $0x5a] sm:$0xff] }
 0x432   :  { %14309 = vmatmul.mubr.msk.f32.gmra.mrb[54].mxu0 %vm732_vm2, %v9206_v12  ;;  %v19505_v12 = vpop.permute.xlu0 %10099  ;;  %v19520_v14 = vpop.permute.xlu1 %10114 }
 0x433   :  { %14311 = vmatprep.mubr.msk.f32.mxu0 %vm732_vm2, %v9207_v4  ;;  %v10309_v4 = vmul.f32 %v19406_v33, %v9860_v60  ;;  %v10312_v33 = vmul.f32 %v19420_v23, %v9863_v10  ;;  %v9867_v23 = vld [vmem:[#allocation2 + $0x6a] sm:$0xff]  ;;  %v9872_v60 = vld [vmem:[#allocation2 + $0x92] sm:$0xff] }
 0x434   :  { %v9875_v10 = vld [vmem:[#allocation2 + $0xaa] sm:$0xff] }
 0x436   :  { %14312 = vmatmul.mubr.msk.f32.gmra.mrb[56].mxu0 %vm732_vm2, %v9208_v22  ;;  %v9862_v22 = vld [vmem:[#allocation2 + $0x42] sm:$0xff]  ;;  %v19516_v57 = vpop.permute.xlu0 %10109 }
 0x437   :  { %14314 = vmatprep.mubr.msk.f32.mxu0 %vm732_vm2, %v9209_v38  ;;  %v10311_v38 = vmul.f32 %v19416_v49, %v9862_v22  ;;  %v10314_v49 = vmul.f32 %v19431_v43, %v9865_v42  ;;  %v9869_v43 = vld [vmem:[#allocation2 + $0x7a] sm:$0xff] }
 0x438   :  { %v10318_v11 = vmul.f32 %v19451_v44, %v9869_v43  ;;  %v9873_v44 = vld [vmem:[#allocation2 + $0x9a] sm:$0xff] }
 0x439   :  { %v9877_v42 = vld [vmem:[#allocation2 + $0xba] sm:$0xff] }
 0x43a   :  { %14315 = vmatmul.mubr.msk.f32.gmra.mrb[58].mxu0 %vm732_vm2, %v9210_v40  ;;  %v9864_v40 = vld [vmem:[#allocation2 + $0x52] sm:$0xff] }
 0x43b   :  { %14317 = vmatprep.mubr.msk.f32.mxu0 %vm732_vm2, %v9211_v56  ;;  %v10313_v50 = vmul.f32 %v19425_v18, %v9864_v40  ;;  %v19525_v56 = vpop.permute.xlu0 %10119  ;;  %v10316_v18 = vmul.f32 %v19440_v27, %v9867_v23  ;;  %v9871_v27 = vld [vmem:[#allocation2 + $0x8a] sm:$0xff] }
 0x43e   :  { %14318 = vmatmul.mubr.msk.f32.gmra.mrb[60].mxu0 %vm732_vm2, %v9212_v51  ;;  %v19531_v51 = vpop.permute.xlu1 %10124 }
 0x43f   :  { %14320 = vmatprep.mubr.msk.f32.mxu0 %vm732_vm2, %v9213_v47  ;;  %v19536_v47 = vpop.permute.xlu0 %10129 }
 0x442   :  { %14321 = vmatmul.mubr.msk.f32.gmra.mrb[62].mxu0 %vm732_vm2, %v9214_v30  ;;  %v10317_v30 = vmul.f32 %v19445_v1, %v9868_v48  ;;  %v19540_v39 = vpop.permute.xlu1 %10134  ;;  %v10320_v1 = vmul.f32 %v19460_v21, %v9871_v27  ;;  %v9881_v48 = vld [vmem:[#allocation2 + $0xda] sm:$0xff] }
 0x443   :  { %14325 = vmatprep.mubr.msk.f32.mxu0 %vm732_vm2, %v10307_v45  ;;  %v9870_v45 = vld [vmem:[#allocation2 + $0x82] sm:$0xff] }
 0x444   :  { %v10319_v41 = vmul.f32 %v19456_v34, %v9870_v45  ;;  %v10322_v34 = vmul.f32 %v19471_v9, %v9873_v44  ;;  %v10326_v9 = vmul.f32 %v19491_v37, %v9877_v42  ;;  %v10330_v37 = vmul.f32 %v19511_v35, %v9881_v48  ;;  %v9883_v45 = vld [vmem:[#allocation2 + $0xea] sm:$0xff]  ;;  %v9892_v42 = vld [vmem:[#allocation2 + $0x132] sm:$0xff] }
 0x445   :  { %v9887_v44 = vld [vmem:[#allocation2 + $0x10a] sm:$0xff] }
 0x446   :  { %14326 = vmatmul.mubr.msk.f32.vlgmr.msra.gmra.mrb[0].mxu0 %vm732_vm2, %v10308_v36  ;;  %v19545_v36 = vpop.permute.xlu0 %10139  ;;  %v19551_v31 = vpop.permute.xlu1 %10144 }
 0x447   :  { %14328 = vmatprep.mubr.msk.f32.mxu0 %vm732_vm2, %v10309_v4  ;;  %v10321_v4 = vmul.f32 %v19465_v13, %v9872_v60  ;;  %v10324_v13 = vmul.f32 %v19480_v55, %v9875_v10  ;;  %v9889_v10 = vld [vmem:[#allocation2 + $0x11a] sm:$0xff] }
 0x44a   :  { %14329 = vmatmul.mubr.msk.f32.gmra.mrb[2].mxu0 %vm732_vm2, %v10310_v28  ;;  %v9874_v28 = vld [vmem:[#allocation2 + $0xa2] sm:$0xff]  ;;  %v10150_v22 = vpop.permute.xlu0 %10149  ;;  %v10155_v21 = vpop.permute.xlu1 %10154 }
 0x44b   :  { %14331 = vmatprep.mubr.msk.f32.mxu0 %vm732_vm2, %v10311_v38  ;;  %v10323_v38 = vmul.f32 %v19476_v6, %v9874_v28  ;;  %v9878_v6 = vld [vmem:[#allocation2 + $0xc2] sm:$0xff] }
 0x44e   :  { %14332 = vmatmul.mubr.msk.f32.gmra.mrb[4].mxu0 %vm732_vm2, %v10312_v33  ;;  %v9876_v33 = vld [vmem:[#allocation2 + $0xb2] sm:$0xff]  ;;  %v10165_v5 = vpop.permute.xlu1 %10164 }
 0x44f   :  { %14334 = vmatprep.mubr.msk.f32.mxu0 %vm732_vm2, %v10313_v50  ;;  %v10325_v40 = vmul.f32 %v19485_v32, %v9876_v33  ;;  %v10160_v50 = vpop.permute.xlu0 %10159  ;;  %v9880_v32 = vld [vmem:[#allocation2 + $0xd2] sm:$0xff] }
 0x452   :  { %14335 = vmatmul.mubr.msk.f32.gmra.mrb[6].mxu0 %vm732_vm2, %v10314_v49  ;;  %v10327_v49 = vmul.f32 %v19496_v0, %v9878_v6  ;;  %v9882_v0 = vld [vmem:[#allocation2 + $0xe2] sm:$0xff]  ;;  %v9893_v6 = vld [vmem:[#allocation2 + $0x13a] sm:$0xff] }
 0x453   :  { %14337 = vmatprep.mubr.msk.f32.mxu0 %vm732_vm2, %v10315_v46  ;;  %v9879_v46 = vld [vmem:[#allocation2 + $0xca] sm:$0xff]  ;;  %v10170_v23 = vpop.permute.xlu0 %10169  ;;  %v10331_v43 = vmul.f32 %v19516_v57, %v9882_v0  ;;  %v9886_v57 = vld [vmem:[#allocation2 + $0x102] sm:$0xff] }
 0x454   :  { %v10328_v55 = vmul.f32 %v19500_v2, %v9879_v46  ;;  %v10332_v2 = vmul.f32 %v19520_v14, %v9883_v45  ;;  %v10336_v14 = vmul.f32 %v19540_v39, %v9887_v44  ;;  %v10342_v46 = vmul.f32 %v10165_v5, %v9893_v6 }
 0x456   :  { %14338 = vmatmul.mubr.msk.f32.gmra.mrb[8].mxu0 %vm732_vm2, %v10316_v18  ;;  %v10329_v18 = vmul.f32 %v19505_v12, %v9880_v32  ;;  %v9884_v12 = vld [vmem:[#allocation2 + $0xf2] sm:$0xff]  ;;  %v9895_v32 = vld [vmem:[#allocation2 + $0x14a] sm:$0xff] }
 0x457   :  { %14340 = vmatprep.mubr.msk.f32.mxu0 %vm732_vm2, %v10317_v30  ;;  %v10175_v30 = vpop.permute.xlu1 %10174 }
 0x45a   :  { %14341 = vmatmul.mubr.msk.f32.gmra.mrb[10].mxu0 %vm732_vm2, %v10318_v11  ;;  %v10180_v11 = vpop.permute.xlu0 %10179 }
 0x45b   :  { %14343 = vmatprep.mubr.msk.f32.mxu0 %vm732_vm2, %v10319_v41  ;;  %v10333_v41 = vmul.f32 %v19525_v56, %v9884_v12  ;;  %v10185_v27 = vpop.permute.xlu1 %10184  ;;  %v9888_v56 = vld [vmem:[#allocation2 + $0x112] sm:$0xff] }
 0x45c   :  { %v10337_v28 = vmul.f32 %v19545_v36, %v9888_v56  ;;  %v10341_v36 = vmul.f32 %v10160_v50, %v9892_v42  ;;  %v9897_v50 = vld [vmem:[#allocation2 + $0x15a] sm:$0xff] }
 0x45d   :  { %v10346_v0 = vmul.f32 %v10185_v27, %v9897_v50  ;;  %v9902_v27 = vld [vmem:[#allocation2 + $0x182] sm:$0xff] }
 0x45e   :  { %14344 = vmatmul.mubr.msk.f32.gmra.mrb[12].mxu0 %vm732_vm2, %v10320_v1  ;;  %v9885_v1 = vld [vmem:[#allocation2 + $0xfa] sm:$0xff]  ;;  %v10190_v60 = vpop.permute.xlu0 %10189 }
 0x45f   :  { %14346 = vmatprep.mubr.msk.f32.mxu0 %vm732_vm2, %v10321_v4  ;;  %v10334_v35 = vmul.f32 %v19531_v51, %v9885_v1  ;;  %v10335_v4 = vmul.f32 %v19536_v47, %v9886_v57  ;;  %v10338_v51 = vmul.f32 %v19551_v31, %v9889_v10  ;;  %v9890_v47 = vld [vmem:[#allocation2 + $0x122] sm:$0xff]  ;;  %v9901_v1 = vld [vmem:[#allocation2 + $0x17a] sm:$0xff] }
 0x460   :  { %v9894_v31 = vld [vmem:[#allocation2 + $0x142] sm:$0xff] }
 0x462   :  { %14347 = vmatmul.mubr.msk.f32.gmra.mrb[14].mxu0 %vm732_vm2, %v10322_v34  ;;  %v10195_v34 = vpop.permute.xlu1 %10194 }
 0x463   :  { %14349 = vmatprep.mubr.msk.f32.mxu0 %vm732_vm2, %v10323_v38  ;;  %v10200_v38 = vpop.permute.xlu0 %10199 }
 0x466   :  { %14350 = vmatmul.mubr.msk.f32.gmra.mrb[16].mxu0 %vm732_vm2, %v10324_v13  ;;  %v10339_v13 = vmul.f32 %v10150_v22, %v9890_v47  ;;  %v10205_v33 = vpop.permute.xlu1 %10204 }
 0x467   :  { %14352 = vmatprep.mubr.msk.f32.mxu0 %vm732_vm2, %v10325_v40  ;;  %v9891_v40 = vld [vmem:[#allocation2 + $0x12a] sm:$0xff] }
 0x468   :  { %v10340_v39 = vmul.f32 %v10155_v21, %v9891_v40  ;;  %v9896_v21 = vld [vmem:[#allocation2 + $0x152] sm:$0xff] }
 0x469   :  { %v10345_v48 = vmul.f32 %v10180_v11, %v9896_v21 }
 0x46a   :  { %14353 = vmatmul.mubr.msk.f32.gmra.mrb[18].mxu0 %vm732_vm2, %v10326_v9  ;;  %v10210_v9 = vpop.permute.xlu0 %10209 }
 0x46b   :  { %14355 = vmatprep.mubr.msk.f32.mxu0 %vm732_vm2, %v10327_v49  ;;  %v10215_v49 = vpop.permute.xlu1 %10214  ;;  %v10351_v57 = vmul.f32 %v10210_v9, %v9902_v27 }
 0x46e   :  { %14356 = vmatmul.mubr.msk.f32.gmra.mrb[20].mxu0 %vm732_vm2, %v10328_v55  ;;  %v10343_v55 = vmul.f32 %v10170_v23, %v9894_v31  ;;  %v10220_v22 = vpop.permute.xlu0 %10219  ;;  %v9899_v23 = vld [vmem:[#allocation2 + $0x16a] sm:$0xff] }
 0x46f   :  { %14358 = vmatprep.mubr.msk.f32.mxu0 %vm732_vm2, %v10329_v18  ;;  %v10344_v18 = vmul.f32 %v10175_v30, %v9895_v32  ;;  %v10348_v12 = vmul.f32 %v10195_v34, %v9899_v23  ;;  %v9900_v30 = vld [vmem:[#allocation2 + $0x172] sm:$0xff] }
 0x472   :  { %14359 = vmatmul.mubr.msk.f32.gmra.mrb[22].mxu0 %vm732_vm2, %v10330_v37  ;;  %v10225_v37 = vpop.permute.xlu1 %10224  ;;  %v10230_v5 = vpop.permute.xlu0 %10229 }
 0x473   :  { %14361 = vmatprep.mubr.msk.f32.mxu0 %vm732_vm2, %v10331_v43  ;;  %v9898_v43 = vld [vmem:[#allocation2 + $0x162] sm:$0xff] }
 0x474   :  { %v10347_v45 = vmul.f32 %v10190_v60, %v9898_v43  ;;  %v9903_v60 = vld [vmem:[#allocation2 + $0x18a] sm:$0xff] }
 0x475   :  { %v10352_v44 = vmul.f32 %v10215_v49, %v9903_v60  ;;  %v9910_v49 = vld [vmem:[#allocation2 + $0x1c2] sm:$0xff]  ;;  %v9919_v60 = vld [vmem:[#allocation2 + $0x20a] sm:$0xff] }
 0x476   :  { %14362 = vmatmul.mubr.msk.f32.gmra.mrb[24].mxu0 %vm732_vm2, %v10332_v2  ;;  %v10235_v2 = vpop.permute.xlu1 %10234  ;;  %v10240_v11 = vpop.permute.xlu0 %10239 }
 0x477   :  { %14364 = vmatprep.mubr.msk.f32.mxu0 %vm732_vm2, %v10333_v41  ;;  %v10349_v41 = vmul.f32 %v10200_v38, %v9900_v30 }
 0x47a   :  { %14365 = vmatmul.mubr.msk.f32.gmra.mrb[26].mxu0 %vm732_vm2, %v10334_v35  ;;  %v10350_v35 = vmul.f32 %v10205_v33, %v9901_v1  ;;  %v10250_v34 = vpop.permute.xlu0 %10249  ;;  %v9907_v33 = vld [vmem:[#allocation2 + $0x1aa] sm:$0xff] }
 0x47b   :  { %14367 = vmatprep.mubr.msk.f32.mxu0 %vm732_vm2, %v10335_v4  ;;  %v10245_v4 = vpop.permute.xlu1 %10244  ;;  %v10356_v40 = vmul.f32 %v10235_v2, %v9907_v33  ;;  %v10359_v31 = vmul.f32 %v10250_v34, %v9910_v49  ;;  %v9916_v2 = vld [vmem:[#allocation2 + $0x1f2] sm:$0xff] }
 0x47e   :  { %14368 = vmatmul.mubr.msk.f32.gmra.mrb[28].mxu0 %vm732_vm2, %v10336_v14  ;;  %v9904_v14 = vld [vmem:[#allocation2 + $0x192] sm:$0xff] }
 0x47f   :  { %14370 = vmatprep.mubr.msk.f32.mxu0 %vm732_vm2, %v10337_v28  ;;  %v10353_v56 = vmul.f32 %v10220_v22, %v9904_v14  ;;  %v9905_v28 = vld [vmem:[#allocation2 + $0x19a] sm:$0xff]  ;;  %v10255_v38 = vpop.permute.xlu1 %10254 }
 0x480   :  { %v10354_v10 = vmul.f32 %v10225_v37, %v9905_v28  ;;  %v9913_v37 = vld [vmem:[#allocation2 + $0x1da] sm:$0xff] }
 0x481   :  { %v9921_v14 = vld [vmem:[#allocation2 + $0x21a] sm:$0xff] }
 0x482   :  { %14371 = vmatmul.mubr.msk.f32.gmra.mrb[30].mxu0 %vm732_vm2, %v10338_v51  ;;  %v9906_v51 = vld [vmem:[#allocation2 + $0x1a2] sm:$0xff] }
 0x483   :  { %14373 = vmatprep.mubr.msk.f32.mxu0 %vm732_vm2, %v10339_v13  ;;  %v10355_v47 = vmul.f32 %v10230_v5, %v9906_v51  ;;  %v10260_v13 = vpop.permute.xlu0 %10259  ;;  %v10265_v9 = vpop.permute.xlu1 %10264 }
 0x484   :  { %v10362_v50 = vmul.f32 %v10265_v9, %v9913_v37 }
 0x486   :  { %14374 = vmatmul.mubr.msk.f32.gmra.mrb[32].mxu0 %vm732_vm2, %v10340_v39  ;;  %v9908_v39 = vld [vmem:[#allocation2 + $0x1b2] sm:$0xff] }
 0x487   :  { %14376 = vmatprep.mubr.msk.f32.mxu0 %vm732_vm2, %v10341_v36  ;;  %v10357_v42 = vmul.f32 %v10240_v11, %v9908_v39  ;;  %v9909_v36 = vld [vmem:[#allocation2 + $0x1ba] sm:$0xff]  ;;  %v10275_v22 = vpop.permute.xlu1 %10274 }
 0x488   :  { %v10358_v6 = vmul.f32 %v10245_v4, %v9909_v36 }
 0x48a   :  { %14377 = vmatmul.mubr.msk.f32.gmra.mrb[34].mxu0 %vm732_vm2, %v10342_v46  ;;  %v10270_v46 = vpop.permute.xlu0 %10269 }
 0x48b   :  { %14379 = vmatprep.mubr.msk.f32.mxu0 %vm732_vm2, %v10343_v55  ;;  %v9911_v55 = vld [vmem:[#allocation2 + $0x1ca] sm:$0xff]  ;;  %v10285_v5 = vpop.permute.xlu1 %10284 }
 0x48c   :  { %v10360_v32 = vmul.f32 %v10255_v38, %v9911_v55 }
 0x48e   :  { %14380 = vmatmul.mubr.msk.f32.gmra.mrb[36].mxu0 %vm732_vm2, %v10344_v18  ;;  %v9912_v18 = vld [vmem:[#allocation2 + $0x1d2] sm:$0xff] }
 0x48f   :  { %14382 = vmatprep.mubr.msk.f32.mxu0 %vm732_vm2, %v10345_v48  ;;  %v10361_v21 = vmul.f32 %v10260_v13, %v9912_v18  ;;  %v10280_v48 = vpop.permute.xlu0 %10279  ;;  %v10295_v11 = vpop.permute.xlu1 %10294 }
 0x490   :  { %v10365_v30 = vmul.f32 %v10280_v48, %v9916_v2 }
 0x492   :  { %14383 = vmatmul.mubr.msk.f32.gmra.mrb[38].mxu0 %vm732_vm2, %v10346_v0  ;;  %v9914_v0 = vld [vmem:[#allocation2 + $0x1e2] sm:$0xff] }
 0x493   :  { %14385 = vmatprep.mubr.msk.f32.mxu0 %vm732_vm2, %v10347_v45  ;;  %v10363_v43 = vmul.f32 %v10270_v46, %v9914_v0  ;;  %v9915_v45 = vld [vmem:[#allocation2 + $0x1ea] sm:$0xff]  ;;  %v10305_v34 = vpop.permute.xlu1 %10304 }
 0x494   :  { %v10364_v23 = vmul.f32 %v10275_v22, %v9915_v45  ;;  %v10370_v28 = vmul.f32 %v10305_v34, %v9921_v14  ;;  %v20659_v34 = vld [vmem:[#allocation95_spill] sm:$0xff] }
 0x496   :  { %14386 = vmatmul.mubr.msk.f32.gmra.mrb[40].mxu0 %vm732_vm2, %v10348_v12  ;;  %v10290_v12 = vpop.permute.xlu0 %10289 }
 0x497   :  { %14388 = vmatprep.mubr.msk.f32.mxu0 %vm732_vm2, %v10349_v41  ;;  %v9917_v41 = vld [vmem:[#allocation2 + $0x1fa] sm:$0xff] }
 0x498   :  { %v10366_v1 = vmul.f32 %v10285_v5, %v9917_v41 }
 0x49a   :  { %14389 = vmatmul.mubr.msk.f32.gmra.mrb[42].mxu0 %vm732_vm2, %v10350_v35  ;;  %v9918_v35 = vld [vmem:[#allocation2 + $0x202] sm:$0xff]  ;;  %v10300_v4 = vpop.permute.xlu0 %10299 }
 0x49b   :  { %14391 = vmatprep.mubr.msk.f32.mxu0 %vm732_vm2, %v10351_v57  ;;  %v10367_v27 = vmul.f32 %v10290_v12, %v9918_v35  ;;  %v9920_v57 = vld [vmem:[#allocation2 + $0x212] sm:$0xff] }
 0x49e   :  { %14392 = vmatmul.mubr.msk.f32.gmra.mrb[44].mxu0 %vm732_vm2, %v10352_v44  ;;  %v10368_v44 = vmul.f32 %v10295_v11, %v9919_v60 }
 0x49f   :  { %14394 = vmatprep.mubr.msk.f32.mxu0 %vm732_vm2, %v10353_v56  ;;  %v10369_v56 = vmul.f32 %v10300_v4, %v9920_v57 }
 0x4a2   :  { %14395 = vmatmul.mubr.msk.f32.gmra.mrb[46].mxu0 %vm732_vm2, %v10354_v10 }
 0x4a3   :  { %14397 = vmatprep.mubr.msk.f32.mxu0 %vm732_vm2, %v10355_v47 }
 0x4a6   :  { %14398 = vmatmul.mubr.msk.f32.gmra.mrb[48].mxu0 %vm732_vm2, %v10356_v40 }
 0x4a7   :  { %14400 = vmatprep.mubr.msk.f32.mxu0 %vm732_vm2, %v10357_v42 }
 0x4aa   :  { %14401 = vmatmul.mubr.msk.f32.gmra.mrb[50].mxu0 %vm732_vm2, %v10358_v6 }
 0x4ab   :  { %14403 = vmatprep.mubr.msk.f32.mxu0 %vm732_vm2, %v10359_v31 }
 0x4ae   :  { %14404 = vmatmul.mubr.msk.f32.gmra.mrb[52].mxu0 %vm732_vm2, %v10360_v32 }
 0x4af   :  { %14406 = vmatprep.mubr.msk.f32.mxu0 %vm732_vm2, %v10361_v21 }
 0x4b2   :  { %14407 = vmatmul.mubr.msk.f32.gmra.mrb[54].mxu0 %vm732_vm2, %v10362_v50 }
 0x4b3   :  { %14409 = vmatprep.mubr.msk.f32.mxu0 %vm732_vm2, %v10363_v43 }
 0x4b6   :  { %14410 = vmatmul.mubr.msk.f32.gmra.mrb[56].mxu0 %vm732_vm2, %v10364_v23 }
 0x4b7   :  { %14412 = vmatprep.mubr.msk.f32.mxu0 %vm732_vm2, %v10365_v30 }
 0x4ba   :  { %14413 = vmatmul.mubr.msk.f32.gmra.mrb[58].mxu0 %vm732_vm2, %v10366_v1 }
 0x4bb   :  { %14415 = vmatprep.mubr.msk.f32.mxu0 %vm732_vm2, %v10367_v27 }
 0x4be   :  { %14416 = vmatmul.mubr.msk.f32.gmra.mrb[60].mxu0 %vm732_vm2, %v10368_v44 }
 0x4bf   :  { %14418 = vmatprep.mubr.msk.f32.mxu0 %vm732_vm2, %v10369_v56 }
 0x4c2   :  { %14419 = vmatmul.mubr.msk.f32.gmra.mrb[62].mxu0 %vm732_vm2, %v10370_v28 }
 0x519   :  { %v14327_v38 = vpop.f32.mrb[0].mxu0 }
 0x51a   :  { %v14423_v10 = vadd.f32 %v14327_v38, %v18532_v54  ;;  %v10631_v51 = vpop.f32.mrb[1].mxu0 }
 0x51b   :  { %v14424_v47 = vadd.f32 %v10631_v51, %v18538_v8 }
 0x51c   :  { %v11015_v13 = vmax.f32 %v14423_v10, 0.0  ;;  %v20660_v10 = vld [vmem:[#allocation94_spill] sm:$0xff] }
 0x51d   :  { %v11014_v33 = vmax.f32 %v14424_v47, 0.0  ;;  %v14330_v40 = vpop.f32.mrb[2].mxu0  ;;  %v20661_v47 = vld [vmem:[#allocation97_spill] sm:$0xff] }
 0x51e   :  { %v14425_v39 = vadd.f32 %v14330_v40, %v18550_v26  ;;  %v10641_v42 = vpop.f32.mrb[3].mxu0  ;;  %11144 = vrot.lane.b32.xlu1 %v11015_v13, %s14974_s4 }
 0x51f   :  { %v14426_v9 = vadd.f32 %v10641_v42, %v18556_v19  ;;  %11142 = vrot.lane.b32.xlu0 %v11014_v33, %s14974_s4 }
 0x520   :  { %v11017_v36 = vmax.f32 %v14425_v39, 0.0  ;;  %v20662_v39 = vld [vmem:[#allocation96_spill] sm:$0xff] }
 0x521   :  { %v11016_v6 = vmax.f32 %v14426_v9, 0.0  ;;  %v14333_v49 = vpop.f32.mrb[4].mxu0 }
 0x522   :  { %v14427_v54 = vadd.f32 %v14333_v49, %v18568_v15  ;;  %v10651_v46 = vpop.f32.mrb[5].mxu0  ;;  %11148 = vrot.lane.b32.xlu1 %v11017_v36, %s14974_s4  ;;  %v20663_v36 = vld [vmem:[#allocation99_spill] sm:$0xff] }
 0x523   :  { %v14428_v8 = vadd.f32 %v10651_v46, %v18574_v59  ;;  %11146 = vrot.lane.b32.xlu0 %v11016_v6, %s14974_s4 }
 0x524   :  { %v11019_v26 = vmax.f32 %v14427_v54, 0.0 }
 0x525   :  { %v11018_v31 = vmax.f32 %v14428_v8, 0.0  ;;  %v14336_v55 = vpop.f32.mrb[6].mxu0  ;;  %v20664_v8 = vld [vmem:[#allocation98_spill] sm:$0xff] }
 0x526   :  { %v14429_v22 = vadd.f32 %v14336_v55, %v18586_v61  ;;  %v10661_v19 = vpop.f32.mrb[7].mxu0  ;;  %11152 = vrot.lane.b32.xlu1 %v11019_v26, %s14974_s4  ;;  %v20665_v55 = vld [vmem:[#allocation101_spill] sm:$0xff] }
 0x527   :  { %v14430_v32 = vadd.f32 %v10661_v19, %v18592_v25  ;;  %11150 = vrot.lane.b32.xlu0 %v11018_v31, %s14974_s4 }
 0x528   :  { %v11021_v15 = vmax.f32 %v14429_v22, 0.0 }
 0x529   :  { %v11020_v18 = vmax.f32 %v14430_v32, 0.0  ;;  %v14339_v21 = vpop.f32.mrb[8].mxu0 }
 0x52a   :  { %v14431_v48 = vadd.f32 %v14339_v21, %v18604_v24  ;;  %v10671_v59 = vpop.f32.mrb[9].mxu0  ;;  %11156 = vrot.lane.b32.xlu1 %v11021_v15, %s14974_s4 }
 0x52b   :  { %v14432_v37 = vadd.f32 %v10671_v59, %v18610_v53  ;;  %11154 = vrot.lane.b32.xlu0 %v11020_v18, %s14974_s4  ;;  %v20666_v18 = vld [vmem:[#allocation127_spill] sm:$0xff]  ;;  %v20667_v59 = vld [vmem:[#allocation100_spill] sm:$0xff] }
 0x52c   :  { %v11023_v61 = vmax.f32 %v14431_v48, 0.0 }
 0x52d   :  { %v11022_v50 = vmax.f32 %v14432_v37, 0.0  ;;  %v14342_v0 = vpop.f32.mrb[10].mxu0 }
 0x52e   :  { %v14433_v43 = vadd.f32 %v14342_v0, %v18622_v7  ;;  %v10681_v25 = vpop.f32.mrb[11].mxu0  ;;  %11160 = vrot.lane.b32.xlu1 %v11023_v61, %s14974_s4 }
 0x52f   :  { %v14434_v5 = vadd.f32 %v10681_v25, %v18627_v62  ;;  %11158 = vrot.lane.b32.xlu0 %v11022_v50, %s14974_s4 }
 0x530   :  { %v11025_v24 = vmax.f32 %v14433_v43, 0.0  ;;  %v20668_v43 = vld [vmem:[#allocation126_spill] sm:$0xff] }
 0x531   :  { %v11024_v45 = vmax.f32 %v14434_v5, 0.0  ;;  %v14345_v23 = vpop.f32.mrb[12].mxu0 }
 0x532   :  { %v14435_v2 = vadd.f32 %v14345_v23, %v18646_v16  ;;  %v10691_v53 = vpop.f32.mrb[13].mxu0  ;;  %11164 = vrot.lane.b32.xlu1 %v11025_v24, %s14974_s4  ;;  %v20669_v24 = vld [vmem:[#allocation103_spill] sm:$0xff] }
 0x533   :  { %v14436_v12 = vadd.f32 %v10691_v53, %v18652_v17  ;;  %11162 = vrot.lane.b32.xlu0 %v11024_v45, %s14974_s4 }
 0x534   :  { %v11027_v7 = vmax.f32 %v14435_v2, 0.0 }
 0x535   :  { %v11026_v30 = vmax.f32 %v14436_v12, 0.0  ;;  %v14348_v41 = vpop.f32.mrb[14].mxu0  ;;  %v20670_v12 = vld [vmem:[#allocation129_spill] sm:$0xff] }
 0x536   :  { %v14437_v11 = vadd.f32 %v14348_v41, %v18665_v3  ;;  %v10701_v62 = vpop.f32.mrb[15].mxu0  ;;  %11168 = vrot.lane.b32.xlu1 %v11027_v7, %s14974_s4  ;;  %v20671_v41 = vld [vmem:[#allocation102_spill] sm:$0xff] }
 0x537   :  { %v14438_v1 = vadd.f32 %v10701_v62, %v18671_v58  ;;  %11166 = vrot.lane.b32.xlu0 %v11026_v30, %s14974_s4 }
 0x538   :  { %v11029_v16 = vmax.f32 %v14437_v11, 0.0 }
 0x539   :  { %v11028_v35 = vmax.f32 %v14438_v1, 0.0  ;;  %v14351_v27 = vpop.f32.mrb[16].mxu0 }
 0x53a   :  { %v14439_v57 = vadd.f32 %v14351_v27, %v18683_v29  ;;  %v10711_v17 = vpop.f32.mrb[17].mxu0  ;;  %11172 = vrot.lane.b32.xlu1 %v11029_v16, %s14974_s4 }
 0x53b   :  { %v14440_v4 = vadd.f32 %v10711_v17, %v18689_v52  ;;  %11170 = vrot.lane.b32.xlu0 %v11028_v35, %s14974_s4  ;;  %v20672_v35 = vld [vmem:[#allocation128_spill] sm:$0xff]  ;;  %v20673_v17 = vld [vmem:[#allocation105_spill] sm:$0xff] }
 0x53c   :  { %v11031_v3 = vmax.f32 %v14439_v57, 0.0 }
 0x53d   :  { %v11030_v60 = vmax.f32 %v14440_v4, 0.0  ;;  %v14354_v44 = vpop.f32.mrb[18].mxu0 }
 0x53e   :  { %v14441_v14 = vadd.f32 %v14354_v44, %v18701_v63  ;;  %v10721_v58 = vpop.f32.mrb[19].mxu0  ;;  %11176 = vrot.lane.b32.xlu1 %v11031_v3, %s14974_s4 }
 0x53f   :  { %v14442_v56 = vadd.f32 %v10721_v58, %v20659_v34  ;;  %11174 = vrot.lane.b32.xlu0 %v11030_v60, %s14974_s4 }
 0x540   :  { %v11033_v29 = vmax.f32 %v14441_v14, 0.0  ;;  %v20674_v14 = vld [vmem:[#allocation131_spill] sm:$0xff] }
 0x541   :  { %v11032_v28 = vmax.f32 %v14442_v56, 0.0  ;;  %v14357_v38 = vpop.f32.mrb[20].mxu0  ;;  %v20675_v56 = vld [vmem:[#allocation104_spill] sm:$0xff] }
 0x542   :  { %v14443_v51 = vadd.f32 %v14357_v38, %v20660_v10  ;;  %v10731_v52 = vpop.f32.mrb[21].mxu0  ;;  %11180 = vrot.lane.b32.xlu1 %v11033_v29, %s14974_s4 }
 0x543   :  { %v14444_v13 = vadd.f32 %v10731_v52, %v20661_v47  ;;  %11178 = vrot.lane.b32.xlu0 %v11032_v28, %s14974_s4 }
 0x544   :  { %v11035_v63 = vmax.f32 %v14443_v51, 0.0  ;;  %v20676_v51 = vld [vmem:[#allocation130_spill] sm:$0xff] }
 0x545   :  { %v11034_v33 = vmax.f32 %v14444_v13, 0.0  ;;  %v14360_v40 = vpop.f32.mrb[22].mxu0  ;;  %v20677_v13 = vld [vmem:[#allocation107_spill] sm:$0xff] }
 0x546   :  { %v14445_v42 = vadd.f32 %v14360_v40, %v20662_v39  ;;  %v10741_v9 = vpop.f32.mrb[23].mxu0  ;;  %11184 = vrot.lane.b32.xlu1 %v11035_v63, %s14974_s4 }
 0x547   :  { %v14446_v6 = vadd.f32 %v10741_v9, %v20663_v36  ;;  %11182 = vrot.lane.b32.xlu0 %v11034_v33, %s14974_s4 }
 0x548   :  { %v11037_v49 = vmax.f32 %v14445_v42, 0.0  ;;  %v20678_v42 = vld [vmem:[#allocation133_spill] sm:$0xff] }
 0x549   :  { %v11036_v54 = vmax.f32 %v14446_v6, 0.0  ;;  %v14363_v46 = vpop.f32.mrb[24].mxu0  ;;  %v20679_v6 = vld [vmem:[#allocation106_spill] sm:$0xff] }
 0x54a   :  { %v14447_v26 = vadd.f32 %v14363_v46, %v20664_v8  ;;  %v10751_v31 = vpop.f32.mrb[25].mxu0  ;;  %11188 = vrot.lane.b32.xlu1 %v11037_v49, %s14974_s4 }
 0x54b   :  { %v14448_v22 = vadd.f32 %v10751_v31, %v20665_v55  ;;  %11186 = vrot.lane.b32.xlu0 %v11036_v54, %s14974_s4 }
 0x54c   :  { %v11039_v19 = vmax.f32 %v14447_v26, 0.0  ;;  %v20680_v26 = vld [vmem:[#allocation132_spill] sm:$0xff] }
 0x54d   :  { %v11038_v32 = vmax.f32 %v14448_v22, 0.0  ;;  %v14366_v15 = vpop.f32.mrb[26].mxu0  ;;  %v20681_v22 = vld [vmem:[#allocation109_spill] sm:$0xff] }
 0x54e   :  { %v14449_v21 = vadd.f32 %v14366_v15, %v20666_v18  ;;  %v10761_v48 = vpop.f32.mrb[27].mxu0  ;;  %11192 = vrot.lane.b32.xlu1 %v11039_v19, %s14974_s4 }
 0x54f   :  { %v14450_v37 = vadd.f32 %v10761_v48, %v20667_v59  ;;  %11190 = vrot.lane.b32.xlu0 %v11038_v32, %s14974_s4  ;;  %v20682_v59 = vld [vmem:[#allocation135_spill] sm:$0xff] }
 0x550   :  { %v11041_v61 = vmax.f32 %v14449_v21, 0.0 }
 0x551   :  { %v11040_v50 = vmax.f32 %v14450_v37, 0.0  ;;  %v14369_v0 = vpop.f32.mrb[28].mxu0 }
 0x552   :  { %v14451_v25 = vadd.f32 %v14369_v0, %v20668_v43  ;;  %v10771_v5 = vpop.f32.mrb[29].mxu0  ;;  %11196 = vrot.lane.b32.xlu1 %v11041_v61, %s14974_s4  ;;  %v20683_v43 = vld [vmem:[#allocation108_spill] sm:$0xff] }
 0x553   :  { %v14452_v45 = vadd.f32 %v10771_v5, %v20669_v24  ;;  %11194 = vrot.lane.b32.xlu0 %v11040_v50, %s14974_s4  ;;  %v20684_v24 = vld [vmem:[#allocation134_spill] sm:$0xff] }
 0x554   :  { %v11043_v23 = vmax.f32 %v14451_v25, 0.0 }
 0x555   :  { %v11042_v2 = vmax.f32 %v14452_v45, 0.0  ;;  %v14372_v53 = vpop.f32.mrb[30].mxu0 }
 0x556   :  { %v14453_v7 = vadd.f32 %v14372_v53, %v20670_v12  ;;  %v10781_v30 = vpop.f32.mrb[31].mxu0  ;;  %11200 = vrot.lane.b32.xlu1 %v11043_v23, %s14974_s4  ;;  %v20685_v53 = vld [vmem:[#allocation111_spill] sm:$0xff] }
 0x557   :  { %v14454_v11 = vadd.f32 %v10781_v30, %v20671_v41  ;;  %11198 = vrot.lane.b32.xlu0 %v11042_v2, %s14974_s4  ;;  %v20686_v30 = vld [vmem:[#allocation137_spill] sm:$0xff] }
 0x558   :  { %v11045_v62 = vmax.f32 %v14453_v7, 0.0 }
 0x559   :  { %v11044_v1 = vmax.f32 %v14454_v11, 0.0  ;;  %v14375_v16 = vpop.f32.mrb[32].mxu0 }
 0x55a   :  { %v14455_v27 = vadd.f32 %v14375_v16, %v20672_v35  ;;  %v10791_v57 = vpop.f32.mrb[33].mxu0  ;;  %11204 = vrot.lane.b32.xlu1 %v11045_v62, %s14974_s4  ;;  %v20687_v16 = vld [vmem:[#allocation110_spill] sm:$0xff] }
 0x55b   :  { %v14456_v4 = vadd.f32 %v10791_v57, %v20673_v17  ;;  %11202 = vrot.lane.b32.xlu0 %v11044_v1, %s14974_s4  ;;  %v20688_v57 = vld [vmem:[#allocation136_spill] sm:$0xff] }
 0x55c   :  { %v11047_v3 = vmax.f32 %v14455_v27, 0.0 }
 0x55d   :  { %v11046_v60 = vmax.f32 %v14456_v4, 0.0  ;;  %v14378_v44 = vpop.f32.mrb[34].mxu0 }
 0x55e   :  { %v14457_v58 = vadd.f32 %v14378_v44, %v20674_v14  ;;  %v10801_v34 = vpop.f32.mrb[35].mxu0  ;;  %11208 = vrot.lane.b32.xlu1 %v11047_v3, %s14974_s4  ;;  %v20689_v44 = vld [vmem:[#allocation113_spill] sm:$0xff] }
 0x55f   :  { %v14458_v29 = vadd.f32 %v10801_v34, %v20675_v56  ;;  %11206 = vrot.lane.b32.xlu0 %v11046_v60, %s14974_s4  ;;  %v20690_v34 = vld [vmem:[#allocation139_spill] sm:$0xff] }
 0x560   :  { %v11049_v28 = vmax.f32 %v14457_v58, 0.0 }
 0x561   :  { %v11048_v38 = vmax.f32 %v14458_v29, 0.0  ;;  %v14381_v10 = vpop.f32.mrb[36].mxu0 }
 0x562   :  { %v14459_v52 = vadd.f32 %v14381_v10, %v20676_v51  ;;  %v10811_v47 = vpop.f32.mrb[37].mxu0  ;;  %11212 = vrot.lane.b32.xlu1 %v11049_v28, %s14974_s4  ;;  %v20691_v10 = vld [vmem:[#allocation112_spill] sm:$0xff] }
 0x563   :  { %v14460_v63 = vadd.f32 %v10811_v47, %v20677_v13  ;;  %11210 = vrot.lane.b32.xlu0 %v11048_v38, %s14974_s4  ;;  %v20692_v47 = vld [vmem:[#allocation138_spill] sm:$0xff] }
 0x564   :  { %v11051_v33 = vmax.f32 %v14459_v52, 0.0 }
 0x565   :  { %v11050_v40 = vmax.f32 %v14460_v63, 0.0  ;;  %v14384_v39 = vpop.f32.mrb[38].mxu0 }
 0x566   :  { %v14461_v9 = vadd.f32 %v14384_v39, %v20678_v42  ;;  %v10821_v36 = vpop.f32.mrb[39].mxu0  ;;  %11216 = vrot.lane.b32.xlu1 %v11051_v33, %s14974_s4  ;;  %v20693_v39 = vld [vmem:[#allocation115_spill] sm:$0xff] }
 0x567   :  { %v14462_v49 = vadd.f32 %v10821_v36, %v20679_v6  ;;  %11214 = vrot.lane.b32.xlu0 %v11050_v40, %s14974_s4  ;;  %v20694_v36 = vld [vmem:[#allocation141_spill] sm:$0xff] }
 0x568   :  { %v11053_v54 = vmax.f32 %v14461_v9, 0.0 }
 0x569   :  { %v11052_v46 = vmax.f32 %v14462_v49, 0.0  ;;  %v14387_v8 = vpop.f32.mrb[40].mxu0 }
 0x56a   :  { %v14463_v31 = vadd.f32 %v14387_v8, %v20680_v26  ;;  %v10831_v55 = vpop.f32.mrb[41].mxu0  ;;  %11220 = vrot.lane.b32.xlu1 %v11053_v54, %s14974_s4  ;;  %v20695_v8 = vld [vmem:[#allocation114_spill] sm:$0xff] }
 0x56b   :  { %v14464_v19 = vadd.f32 %v10831_v55, %v20681_v22  ;;  %11218 = vrot.lane.b32.xlu0 %v11052_v46, %s14974_s4  ;;  %v20696_v55 = vld [vmem:[#allocation140_spill] sm:$0xff] }
 0x56c   :  { %v11055_v32 = vmax.f32 %v14463_v31, 0.0 }
 0x56d   :  { %v11054_v15 = vmax.f32 %v14464_v19, 0.0  ;;  %v14390_v18 = vpop.f32.mrb[42].mxu0 }
 0x56e   :  { %v14465_v21 = vadd.f32 %v14390_v18, %v19141_v20  ;;  %v10841_v48 = vpop.f32.mrb[43].mxu0  ;;  %11224 = vrot.lane.b32.xlu1 %v11055_v32, %s14974_s4  ;;  %v20697_v18 = vld [vmem:[#allocation117_spill] sm:$0xff] }
 0x56f   :  { %v14466_v37 = vadd.f32 %v10841_v48, %v20682_v59  ;;  %11222 = vrot.lane.b32.xlu0 %v11054_v15, %s14974_s4  ;;  %v20698_v59 = vld [vmem:[#allocation14_spill] sm:$0xff] }
 0x570   :  { %v11057_v61 = vmax.f32 %v14465_v21, 0.0 }
 0x571   :  { %v11056_v50 = vmax.f32 %v14466_v37, 0.0  ;;  %v14393_v0 = vpop.f32.mrb[44].mxu0  ;;  %v1311_v37 = vmax.f32 %v20698_v59, 0.0 }
 0x572   :  { %v14467_v25 = vadd.f32 %v14393_v0, %v20683_v43  ;;  %v10851_v5 = vpop.f32.mrb[45].mxu0  ;;  %11228 = vrot.lane.b32.xlu1 %v11057_v61, %s14974_s4  ;;  %v20699_v61 = vld [vmem:[#allocation143_spill] sm:$0xff]  ;;  %v20700_v0 = vld [vmem:[#allocation17_spill] sm:$0xff] }
 0x573   :  { %v14468_v45 = vadd.f32 %v10851_v5, %v20684_v24  ;;  %11226 = vrot.lane.b32.xlu0 %v11056_v50, %s14974_s4  ;;  %v1310_v43 = vmax.f32 %v20700_v0, 0.0  ;;  %v20715_v0 = vld [vmem:[#allocation26_spill] sm:$0xff] }
 0x574   :  { %v11059_v20 = vmax.f32 %v14467_v25, 0.0 }
 0x575   :  { %v11058_v23 = vmax.f32 %v14468_v45, 0.0  ;;  %v14396_v2 = vpop.f32.mrb[46].mxu0 }
 0x576   :  { %v14469_v12 = vadd.f32 %v14396_v2, %v20685_v53  ;;  %v10861_v7 = vpop.f32.mrb[47].mxu0  ;;  %11232 = vrot.lane.b32.xlu1 %v11059_v20, %s14974_s4  ;;  %v20701_v2 = vld [vmem:[#allocation116_spill] sm:$0xff] }
 0x577   :  { %v14470_v41 = vadd.f32 %v10861_v7, %v20686_v30  ;;  %11230 = vrot.lane.b32.xlu0 %v11058_v23, %s14974_s4  ;;  %v20702_v30 = vld [vmem:[#allocation16_spill] sm:$0xff] }
 0x578   :  { %v11061_v11 = vmax.f32 %v14469_v12, 0.0 }
 0x579   :  { %v11060_v62 = vmax.f32 %v14470_v41, 0.0  ;;  %v14399_v1 = vpop.f32.mrb[48].mxu0  ;;  %v1313_v41 = vmax.f32 %v20702_v30, 0.0 }
 0x57a   :  { %v14471_v35 = vadd.f32 %v14399_v1, %v20687_v16  ;;  %v10871_v27 = vpop.f32.mrb[49].mxu0  ;;  %11236 = vrot.lane.b32.xlu1 %v11061_v11, %s14974_s4  ;;  %v20703_v11 = vld [vmem:[#allocation142_spill] sm:$0xff]  ;;  %v20704_v1 = vld [vmem:[#allocation19_spill] sm:$0xff] }
 0x57b   :  { %v14472_v17 = vadd.f32 %v10871_v27, %v20688_v57  ;;  %11234 = vrot.lane.b32.xlu0 %v11060_v62, %s14974_s4  ;;  %v1312_v16 = vmax.f32 %v20704_v1, 0.0  ;;  %v20719_v1 = vld [vmem:[#allocation35_spill] sm:$0xff] }
 0x57c   :  { %v11063_v4 = vmax.f32 %v14471_v35, 0.0 }
 0x57d   :  { %v11062_v3 = vmax.f32 %v14472_v17, 0.0  ;;  %v14402_v60 = vpop.f32.mrb[50].mxu0 }
 0x57e   :  { %v14473_v14 = vadd.f32 %v14402_v60, %v20689_v44  ;;  %v10881_v58 = vpop.f32.mrb[51].mxu0  ;;  %11240 = vrot.lane.b32.xlu1 %v11063_v4, %s14974_s4  ;;  %v20705_v60 = vld [vmem:[#allocation119_spill] sm:$0xff] }
 0x57f   :  { %v14474_v56 = vadd.f32 %v10881_v58, %v20690_v34  ;;  %11238 = vrot.lane.b32.xlu0 %v11062_v3, %s14974_s4  ;;  %v20706_v34 = vld [vmem:[#allocation18_spill] sm:$0xff] }
 0x580   :  { %v11065_v29 = vmax.f32 %v14473_v14, 0.0 }
 0x581   :  { %v11064_v28 = vmax.f32 %v14474_v56, 0.0  ;;  %v14405_v38 = vpop.f32.mrb[52].mxu0  ;;  %v1315_v56 = vmax.f32 %v20706_v34, 0.0 }
 0x582   :  { %v14475_v51 = vadd.f32 %v14405_v38, %v20691_v10  ;;  %v10891_v52 = vpop.f32.mrb[53].mxu0  ;;  %11244 = vrot.lane.b32.xlu1 %v11065_v29, %s14974_s4  ;;  %v20707_v29 = vld [vmem:[#allocation145_spill] sm:$0xff] }
 0x583   :  { %v14476_v13 = vadd.f32 %v10891_v52, %v20692_v47  ;;  %11242 = vrot.lane.b32.xlu0 %v11064_v28, %s14974_s4  ;;  %v20708_v38 = vld [vmem:[#allocation21_spill] sm:$0xff] }
 0x584   :  { %v11067_v63 = vmax.f32 %v14475_v51, 0.0  ;;  %v1314_v10 = vmax.f32 %v20708_v38, 0.0  ;;  %v20723_v38 = vld [vmem:[#allocation47_spill] sm:$0xff] }
 0x585   :  { %v11066_v33 = vmax.f32 %v14476_v13, 0.0  ;;  %v14408_v40 = vpop.f32.mrb[54].mxu0 }
 0x586   :  { %v14477_v42 = vadd.f32 %v14408_v40, %v20693_v39  ;;  %v10901_v9 = vpop.f32.mrb[55].mxu0  ;;  %11248 = vrot.lane.b32.xlu1 %v11067_v63, %s14974_s4  ;;  %v20709_v40 = vld [vmem:[#allocation20_spill] sm:$0xff] }
 0x587   :  { %v14478_v6 = vadd.f32 %v10901_v9, %v20694_v36  ;;  %11246 = vrot.lane.b32.xlu0 %v11066_v33, %s14974_s4  ;;  %v1317_v39 = vmax.f32 %v20709_v40, 0.0  ;;  %v20725_v40 = vld [vmem:[#allocation55_spill] sm:$0xff] }
 0x588   :  { %v11069_v49 = vmax.f32 %v14477_v42, 0.0  ;;  %v20710_v42 = vld [vmem:[#allocation23_spill] sm:$0xff] }
 0x589   :  { %v11068_v54 = vmax.f32 %v14478_v6, 0.0  ;;  %v14411_v46 = vpop.f32.mrb[56].mxu0  ;;  %v1316_v9 = vmax.f32 %v20710_v42, 0.0  ;;  %v20726_v42 = vld [vmem:[#allocation59_spill] sm:$0xff] }
 0x58a   :  { %v14479_v26 = vadd.f32 %v14411_v46, %v20695_v8  ;;  %v10911_v31 = vpop.f32.mrb[57].mxu0  ;;  %11252 = vrot.lane.b32.xlu1 %v11069_v49, %s14974_s4  ;;  %v20711_v46 = vld [vmem:[#allocation22_spill] sm:$0xff] }
 0x58b   :  { %v14480_v22 = vadd.f32 %v10911_v31, %v20696_v55  ;;  %11250 = vrot.lane.b32.xlu0 %v11068_v54, %s14974_s4  ;;  %v1319_v8 = vmax.f32 %v20711_v46, 0.0  ;;  %v20727_v46 = vld [vmem:[#allocation57_spill] sm:$0xff] }
 0x58c   :  { %v11071_v19 = vmax.f32 %v14479_v26, 0.0  ;;  %v20712_v26 = vld [vmem:[#allocation25_spill] sm:$0xff] }
 0x58d   :  { %v11070_v32 = vmax.f32 %v14480_v22, 0.0  ;;  %v14414_v15 = vpop.f32.mrb[58].mxu0  ;;  %v1318_v31 = vmax.f32 %v20712_v26, 0.0  ;;  %v20728_v26 = vld [vmem:[#allocation40_spill] sm:$0xff] }
 0x58e   :  { %v14481_v21 = vadd.f32 %v14414_v15, %v20697_v18  ;;  %v10921_v48 = vpop.f32.mrb[59].mxu0  ;;  %11256 = vrot.lane.b32.xlu1 %v11071_v19, %s14974_s4  ;;  %v20713_v15 = vld [vmem:[#allocation24_spill] sm:$0xff] }
 0x58f   :  { %v14482_v50 = vadd.f32 %v10921_v48, %v20699_v61  ;;  %11254 = vrot.lane.b32.xlu0 %v11070_v32, %s14974_s4  ;;  %v1321_v18 = vmax.f32 %v20713_v15, 0.0  ;;  %v20729_v15 = vld [vmem:[#allocation46_spill] sm:$0xff] }
 0x590   :  { %v11073_v25 = vmax.f32 %v14481_v21, 0.0  ;;  %v11145_v5 = vpop.permute.xlu1 %11144  ;;  %v20714_v21 = vld [vmem:[#allocation27_spill] sm:$0xff] }
 0x591   :  { %v11072_v24 = vmax.f32 %v14482_v50, 0.0  ;;  %v11335_v45 = vsel %vm732_vm2, %v1311_v37, %v11145_v5  ;;  %v14417_v20 = vpop.f32.mrb[60].mxu0  ;;  %v11143_v23 = vpop.permute.xlu0 %11142  ;;  %v1320_v48 = vmax.f32 %v20714_v21, 0.0  ;;  %v20730_v21 = vld [vmem:[#allocation67_spill] sm:$0xff] }
 0x592   :  { %11400 = vst.msk [vmem:[%s20138_s5 + $0x8] sm:$0xff] %vm11398_vm4, %v11335_v45  ;;  %v14483_v53 = vadd.f32 %v14417_v20, %v20701_v2  ;;  %v11334_v12 = vsel %vm732_vm2, %v1310_v43, %v11143_v23  ;;  %v10931_v7 = vpop.f32.mrb[61].mxu0  ;;  %11260 = vrot.lane.b32.xlu1 %v11073_v25, %s14974_s4  ;;  %v1323_v43 = vmax.f32 %v20715_v0, 0.0  ;;  %v20716_v25 = vld [vmem:[#allocation28_spill] sm:$0xff]  ;;  %v20717_v2 = vld [vmem:[#allocation31_spill] sm:$0xff] }
 0x593   :  { %11399 = vst.msk [vmem:[%s20138_s5] sm:$0xff] %vm11398_vm4, %v11334_v12  ;;  %v14484_v62 = vadd.f32 %v10931_v7, %v20703_v11  ;;  %11258 = vrot.lane.b32.xlu0 %v11072_v24, %s14974_s4  ;;  %v1322_v5 = vmax.f32 %v20716_v25, 0.0  ;;  %v20718_v12 = vld [vmem:[#allocation33_spill] sm:$0xff]  ;;  %v20731_v0 = vld [vmem:[#allocation44_spill] sm:$0xff]  ;;  %v20732_v25 = vld [vmem:[#allocation50_spill] sm:$0xff] }
 0x594   :  { %v11075_v35 = vmax.f32 %v14483_v53, 0.0  ;;  %v11149_v27 = vpop.permute.xlu1 %11148  ;;  %v1325_v53 = vmax.f32 %v20717_v2, 0.0  ;;  %v1324_v7 = vmax.f32 %v20718_v12, 0.0  ;;  %v20733_v2 = vld [vmem:[#allocation65_spill] sm:$0xff]  ;;  %v20734_v12 = vld [vmem:[#allocation71_spill] sm:$0xff] }
 0x595   :  { %v11074_v57 = vmax.f32 %v14484_v62, 0.0  ;;  %v11337_v17 = vsel %vm732_vm2, %v1313_v41, %v11149_v27  ;;  %v14420_v4 = vpop.f32.mrb[62].mxu0  ;;  %v11147_v3 = vpop.permute.xlu0 %11146 }
 0x596   :  { %11402 = vst.msk [vmem:[%s20138_s5 + $0x18] sm:$0xff] %vm11398_vm4, %v11337_v17  ;;  %v14485_v44 = vadd.f32 %v14420_v4, %v20705_v60  ;;  %v11336_v14 = vsel %vm732_vm2, %v1312_v16, %v11147_v3  ;;  %v10941_v58 = vpop.f32.mrb[63].mxu0  ;;  %11264 = vrot.lane.b32.xlu1 %v11075_v35, %s14974_s4  ;;  %v1327_v16 = vmax.f32 %v20719_v1, 0.0  ;;  %v20720_v35 = vld [vmem:[#allocation37_spill] sm:$0xff]  ;;  %v20721_v60 = vld [vmem:[#allocation39_spill] sm:$0xff]  ;;  %v20735_v1 = vld [vmem:[#allocation48_spill] sm:$0xff] }
 0x597   :  { %11401 = vst.msk [vmem:[%s20138_s5 + $0x10] sm:$0xff] %vm11398_vm4, %v11336_v14  ;;  %v14486_v28 = vadd.f32 %v10941_v58, %v20707_v29  ;;  %11262 = vrot.lane.b32.xlu0 %v11074_v57, %s14974_s4  ;;  %v1326_v27 = vmax.f32 %v20720_v35, 0.0  ;;  %v20722_v14 = vld [vmem:[#allocation43_spill] sm:$0xff]  ;;  %v20736_v35 = vld [vmem:[#allocation54_spill] sm:$0xff] }
 0x598   :  { %v11077_v51 = vmax.f32 %v14485_v44, 0.0  ;;  %v11153_v52 = vpop.permute.xlu1 %11152  ;;  %v1329_v44 = vmax.f32 %v20721_v60, 0.0  ;;  %v1328_v58 = vmax.f32 %v20722_v14, 0.0  ;;  %v20737_v60 = vld [vmem:[#allocation69_spill] sm:$0xff]  ;;  %v20738_v14 = vld [vmem:[#allocation75_spill] sm:$0xff] }
 0x599   :  { %v11076_v47 = vmax.f32 %v14486_v28, 0.0  ;;  %v11339_v13 = vsel %vm732_vm2, %v1315_v56, %v11153_v52  ;;  %v11151_v63 = vpop.permute.xlu0 %11150 }
 0x59a   :  { %11404 = vst.msk [vmem:[%s20138_s5 + $0x28] sm:$0xff] %vm11398_vm4, %v11339_v13  ;;  %v11338_v33 = vsel %vm732_vm2, %v1314_v10, %v11151_v63  ;;  %11268 = vrot.lane.b32.xlu1 %v11077_v51, %s14974_s4  ;;  %v1331_v10 = vmax.f32 %v20723_v38, 0.0  ;;  %v20724_v51 = vld [vmem:[#allocation51_spill] sm:$0xff]  ;;  %v20739_v38 = vld [vmem:[#allocation52_spill] sm:$0xff] }
 0x59b   :  { %11403 = vst.msk [vmem:[%s20138_s5 + $0x20] sm:$0xff] %vm11398_vm4, %v11338_v33  ;;  %11266 = vrot.lane.b32.xlu0 %v11076_v47, %s14974_s4  ;;  %v1330_v52 = vmax.f32 %v20724_v51, 0.0  ;;  %v20740_v51 = vld [vmem:[#allocation58_spill] sm:$0xff] }
 0x59c   :  { %v11157_v36 = vpop.permute.xlu1 %11156 }
 0x59d   :  { %v11341_v6 = vsel %vm732_vm2, %v1317_v39, %v11157_v36  ;;  %v11155_v49 = vpop.permute.xlu0 %11154  ;;  %v1333_v39 = vmax.f32 %v20725_v40, 0.0  ;;  %v20741_v40 = vld [vmem:[#allocation73_spill] sm:$0xff] }
 0x59e   :  { %11406 = vst.msk [vmem:[%s20138_s5 + $0x38] sm:$0xff] %vm11398_vm4, %v11341_v6  ;;  %v11340_v54 = vsel %vm732_vm2, %v1316_v9, %v11155_v49  ;;  %v1332_v9 = vmax.f32 %v20726_v42, 0.0  ;;  %v20742_v42 = vld [vmem:[#allocation79_spill] sm:$0xff] }
 0x59f   :  { %11405 = vst.msk [vmem:[%s20138_s5 + $0x30] sm:$0xff] %vm11398_vm4, %v11340_v54 }
 0x5a0   :  { %v11161_v55 = vpop.permute.xlu1 %11160 }
 0x5a1   :  { %v11343_v22 = vsel %vm732_vm2, %v1319_v8, %v11161_v55  ;;  %v11159_v19 = vpop.permute.xlu0 %11158  ;;  %v1335_v8 = vmax.f32 %v20727_v46, 0.0  ;;  %v20743_v46 = vld [vmem:[#allocation56_spill] sm:$0xff] }
 0x5a2   :  { %11408 = vst.msk [vmem:[%s20138_s5 + $0x48] sm:$0xff] %vm11398_vm4, %v11343_v22  ;;  %v11342_v32 = vsel %vm732_vm2, %v1318_v31, %v11159_v19  ;;  %v1334_v31 = vmax.f32 %v20728_v26, 0.0  ;;  %v20744_v26 = vld [vmem:[#allocation62_spill] sm:$0xff] }
 0x5a3   :  { %11407 = vst.msk [vmem:[%s20138_s5 + $0x40] sm:$0xff] %vm11398_vm4, %v11342_v32 }
 0x5a4   :  { %v11165_v59 = vpop.permute.xlu1 %11164 }
 0x5a5   :  { %v11345_v37 = vsel %vm732_vm2, %v1321_v18, %v11165_v59  ;;  %v11163_v61 = vpop.permute.xlu0 %11162  ;;  %v1337_v18 = vmax.f32 %v20729_v15, 0.0  ;;  %v20745_v15 = vld [vmem:[#allocation77_spill] sm:$0xff] }
 0x5a6   :  { %11410 = vst.msk [vmem:[%s20138_s5 + $0x58] sm:$0xff] %vm11398_vm4, %v11345_v37  ;;  %v11344_v50 = vsel %vm732_vm2, %v1320_v48, %v11163_v61  ;;  %v1336_v48 = vmax.f32 %v20730_v21, 0.0  ;;  %v20746_v21 = vld [vmem:[#allocation60_spill] sm:$0xff] }
 0x5a7   :  { %11409 = vst.msk [vmem:[%s20138_s5 + $0x50] sm:$0xff] %vm11398_vm4, %v11344_v50 }
 0x5a8   :  { %v11169_v24 = vpop.permute.xlu1 %11168 }
 0x5a9   :  { %v11347_v45 = vsel %vm732_vm2, %v1323_v43, %v11169_v24  ;;  %v11167_v20 = vpop.permute.xlu0 %11166  ;;  %v1339_v43 = vmax.f32 %v20731_v0, 0.0  ;;  %v20747_v0 = vld [vmem:[#allocation66_spill] sm:$0xff] }
 0x5aa   :  { %11412 = vst.msk [vmem:[%s20138_s5 + $0x68] sm:$0xff] %vm11398_vm4, %v11347_v45  ;;  %v11346_v23 = vsel %vm732_vm2, %v1322_v5, %v11167_v20  ;;  %v1338_v5 = vmax.f32 %v20732_v25, 0.0  ;;  %v20748_v25 = vld [vmem:[#allocation64_spill] sm:$0xff] }
 0x5ab   :  { %11411 = vst.msk [vmem:[%s20138_s5 + $0x60] sm:$0xff] %vm11398_vm4, %v11346_v23 }
 0x5ac   :  { %v11173_v30 = vpop.permute.xlu1 %11172 }
 0x5ad   :  { %v11349_v41 = vsel %vm732_vm2, %v1325_v53, %v11173_v30  ;;  %v11171_v11 = vpop.permute.xlu0 %11170  ;;  %v1341_v53 = vmax.f32 %v20733_v2, 0.0  ;;  %v20749_v2 = vld [vmem:[#allocation124_spill] sm:$0xff] }
 0x5ae   :  { %11414 = vst.msk [vmem:[%s20138_s5 + $0x78] sm:$0xff] %vm11398_vm4, %v11349_v41  ;;  %v11348_v62 = vsel %vm732_vm2, %v1324_v7, %v11171_v11  ;;  %v1340_v7 = vmax.f32 %v20734_v12, 0.0  ;;  %v20750_v12 = vld [vmem:[#allocation70_spill] sm:$0xff] }
 0x5af   :  { %11413 = vst.msk [vmem:[%s20138_s5 + $0x70] sm:$0xff] %vm11398_vm4, %v11348_v62 }
 0x5b0   :  { %v11177_v57 = vpop.permute.xlu1 %11176 }
 0x5b1   :  { %v11351_v17 = vsel %vm732_vm2, %v1327_v16, %v11177_v57  ;;  %v11175_v4 = vpop.permute.xlu0 %11174  ;;  %v1343_v16 = vmax.f32 %v20735_v1, 0.0  ;;  %v20751_v1 = vld [vmem:[#allocation68_spill] sm:$0xff] }
 0x5b2   :  { %11416 = vst.msk [vmem:[%s20138_s5 + $0x88] sm:$0xff] %vm11398_vm4, %v11351_v17  ;;  %v11350_v3 = vsel %vm732_vm2, %v1326_v27, %v11175_v4  ;;  %v1342_v27 = vmax.f32 %v20736_v35, 0.0  ;;  %v20752_v35 = vld [vmem:[#allocation125_spill] sm:$0xff] }
 0x5b3   :  { %11415 = vst.msk [vmem:[%s20138_s5 + $0x80] sm:$0xff] %vm11398_vm4, %v11350_v3 }
 0x5b4   :  { %v11181_v34 = vpop.permute.xlu1 %11180 }
 0x5b5   :  { %v11353_v56 = vsel %vm732_vm2, %v1329_v44, %v11181_v34  ;;  %v11179_v29 = vpop.permute.xlu0 %11178  ;;  %v1345_v44 = vmax.f32 %v20737_v60, 0.0  ;;  %v20753_v60 = vld [vmem:[#allocation74_spill] sm:$0xff] }
 0x5b6   :  { %11418 = vst.msk [vmem:[%s20138_s5 + $0x98] sm:$0xff] %vm11398_vm4, %v11353_v56  ;;  %v11352_v28 = vsel %vm732_vm2, %v1328_v58, %v11179_v29  ;;  %v1344_v58 = vmax.f32 %v20738_v14, 0.0  ;;  %v20754_v14 = vld [vmem:[#allocation72_spill] sm:$0xff] }
 0x5b7   :  { %11417 = vst.msk [vmem:[%s20138_s5 + $0x90] sm:$0xff] %vm11398_vm4, %v11352_v28 }
 0x5b8   :  { %v11185_v47 = vpop.permute.xlu1 %11184 }
 0x5b9   :  { %v11355_v13 = vsel %vm732_vm2, %v1331_v10, %v11185_v47  ;;  %v11183_v63 = vpop.permute.xlu0 %11182  ;;  %v1347_v10 = vmax.f32 %v20739_v38, 0.0  ;;  %v20755_v38 = vld [vmem:[#allocation78_spill] sm:$0xff] }
 0x5ba   :  { %11420 = vst.msk [vmem:[%s20138_s5 + $0xa8] sm:$0xff] %vm11398_vm4, %v11355_v13  ;;  %v11354_v33 = vsel %vm732_vm2, %v1330_v52, %v11183_v63  ;;  %v1346_v52 = vmax.f32 %v20740_v51, 0.0  ;;  %v20756_v51 = vld [vmem:[#allocation76_spill] sm:$0xff] }
 0x5bb   :  { %11419 = vst.msk [vmem:[%s20138_s5 + $0xa0] sm:$0xff] %vm11398_vm4, %v11354_v33 }
 0x5bc   :  { %v11189_v36 = vpop.permute.xlu1 %11188 }
 0x5bd   :  { %v11357_v6 = vsel %vm732_vm2, %v1333_v39, %v11189_v36  ;;  %v11187_v49 = vpop.permute.xlu0 %11186  ;;  %v1349_v39 = vmax.f32 %v20741_v40, 0.0  ;;  %v20757_v40 = vld [vmem:[#allocation81_spill] sm:$0xff] }
 0x5be   :  { %11422 = vst.msk [vmem:[%s20138_s5 + $0xb8] sm:$0xff] %vm11398_vm4, %v11357_v6  ;;  %v11356_v54 = vsel %vm732_vm2, %v1332_v9, %v11187_v49  ;;  %v1348_v9 = vmax.f32 %v20742_v42, 0.0  ;;  %v20758_v42 = vld [vmem:[#allocation80_spill] sm:$0xff] }
 0x5bf   :  { %11421 = vst.msk [vmem:[%s20138_s5 + $0xb0] sm:$0xff] %vm11398_vm4, %v11356_v54 }
 0x5c0   :  { %v11193_v55 = vpop.permute.xlu1 %11192 }
 0x5c1   :  { %v11359_v22 = vsel %vm732_vm2, %v1335_v8, %v11193_v55  ;;  %v11191_v19 = vpop.permute.xlu0 %11190  ;;  %v1351_v8 = vmax.f32 %v20743_v46, 0.0  ;;  %v20759_v46 = vld [vmem:[#allocation83_spill] sm:$0xff] }
 0x5c2   :  { %11424 = vst.msk [vmem:[%s20138_s5 + $0xc8] sm:$0xff] %vm11398_vm4, %v11359_v22  ;;  %v11358_v32 = vsel %vm732_vm2, %v1334_v31, %v11191_v19  ;;  %v1350_v31 = vmax.f32 %v20744_v26, 0.0  ;;  %v20760_v26 = vld [vmem:[#allocation82_spill] sm:$0xff] }
 0x5c3   :  { %11423 = vst.msk [vmem:[%s20138_s5 + $0xc0] sm:$0xff] %vm11398_vm4, %v11358_v32 }
 0x5c4   :  { %v11197_v59 = vpop.permute.xlu1 %11196 }
 0x5c5   :  { %v11361_v37 = vsel %vm732_vm2, %v1337_v18, %v11197_v59  ;;  %v11195_v61 = vpop.permute.xlu0 %11194  ;;  %v1353_v18 = vmax.f32 %v20745_v15, 0.0  ;;  %v20761_v15 = vld [vmem:[#allocation85_spill] sm:$0xff] }
 0x5c6   :  { %11426 = vst.msk [vmem:[%s20138_s5 + $0xd8] sm:$0xff] %vm11398_vm4, %v11361_v37  ;;  %v11360_v50 = vsel %vm732_vm2, %v1336_v48, %v11195_v61  ;;  %v1352_v48 = vmax.f32 %v20746_v21, 0.0  ;;  %v20762_v21 = vld [vmem:[#allocation84_spill] sm:$0xff] }
 0x5c7   :  { %11425 = vst.msk [vmem:[%s20138_s5 + $0xd0] sm:$0xff] %vm11398_vm4, %v11360_v50 }
 0x5c8   :  { %v11201_v24 = vpop.permute.xlu1 %11200 }
 0x5c9   :  { %v11363_v45 = vsel %vm732_vm2, %v1339_v43, %v11201_v24  ;;  %v11199_v20 = vpop.permute.xlu0 %11198  ;;  %v1355_v43 = vmax.f32 %v20747_v0, 0.0  ;;  %v20763_v0 = vld [vmem:[#allocation87_spill] sm:$0xff] }
 0x5ca   :  { %11428 = vst.msk [vmem:[%s20138_s5 + $0xe8] sm:$0xff] %vm11398_vm4, %v11363_v45  ;;  %v11362_v23 = vsel %vm732_vm2, %v1338_v5, %v11199_v20  ;;  %v1354_v5 = vmax.f32 %v20748_v25, 0.0  ;;  %v20764_v25 = vld [vmem:[#allocation86_spill] sm:$0xff] }
 0x5cb   :  { %11427 = vst.msk [vmem:[%s20138_s5 + $0xe0] sm:$0xff] %vm11398_vm4, %v11362_v23 }
 0x5cc   :  { %v11205_v30 = vpop.permute.xlu1 %11204 }
 0x5cd   :  { %v11365_v41 = vsel %vm732_vm2, %v1341_v53, %v11205_v30  ;;  %v11203_v11 = vpop.permute.xlu0 %11202  ;;  %v1357_v53 = vmax.f32 %v20749_v2, 0.0  ;;  %v20765_v2 = vld [vmem:[#allocation89_spill] sm:$0xff] }
 0x5ce   :  { %11430 = vst.msk [vmem:[%s20138_s5 + $0xf8] sm:$0xff] %vm11398_vm4, %v11365_v41  ;;  %v11364_v62 = vsel %vm732_vm2, %v1340_v7, %v11203_v11  ;;  %v1356_v7 = vmax.f32 %v20750_v12, 0.0  ;;  %v20766_v12 = vld [vmem:[#allocation88_spill] sm:$0xff] }
 0x5cf   :  { %11429 = vst.msk [vmem:[%s20138_s5 + $0xf0] sm:$0xff] %vm11398_vm4, %v11364_v62 }
 0x5d0   :  { %v11209_v57 = vpop.permute.xlu1 %11208 }
 0x5d1   :  { %v11367_v17 = vsel %vm732_vm2, %v1343_v16, %v11209_v57  ;;  %v11207_v4 = vpop.permute.xlu0 %11206  ;;  %v1359_v16 = vmax.f32 %v20751_v1, 0.0 }
 0x5d2   :  { %11432 = vst.msk [vmem:[%s20138_s5 + $0x108] sm:$0xff] %vm11398_vm4, %v11367_v17  ;;  %v11366_v3 = vsel %vm732_vm2, %v1342_v27, %v11207_v4  ;;  %v1358_v27 = vmax.f32 %v20752_v35, 0.0 }
 0x5d3   :  { %11431 = vst.msk [vmem:[%s20138_s5 + $0x100] sm:$0xff] %vm11398_vm4, %v11366_v3 }
 0x5d4   :  { %v11213_v34 = vpop.permute.xlu1 %11212 }
 0x5d5   :  { %v11369_v56 = vsel %vm732_vm2, %v1345_v44, %v11213_v34  ;;  %v11211_v29 = vpop.permute.xlu0 %11210  ;;  %v1361_v44 = vmax.f32 %v20753_v60, 0.0 }
 0x5d6   :  { %11434 = vst.msk [vmem:[%s20138_s5 + $0x118] sm:$0xff] %vm11398_vm4, %v11369_v56  ;;  %v11368_v28 = vsel %vm732_vm2, %v1344_v58, %v11211_v29  ;;  %v1360_v58 = vmax.f32 %v20754_v14, 0.0 }
 0x5d7   :  { %11433 = vst.msk [vmem:[%s20138_s5 + $0x110] sm:$0xff] %vm11398_vm4, %v11368_v28 }
 0x5d8   :  { %v11217_v47 = vpop.permute.xlu1 %11216 }
 0x5d9   :  { %v11371_v13 = vsel %vm732_vm2, %v1347_v10, %v11217_v47  ;;  %v11215_v63 = vpop.permute.xlu0 %11214  ;;  %v1363_v10 = vmax.f32 %v20755_v38, 0.0 }
 0x5da   :  { %11436 = vst.msk [vmem:[%s20138_s5 + $0x128] sm:$0xff] %vm11398_vm4, %v11371_v13  ;;  %v11370_v33 = vsel %vm732_vm2, %v1346_v52, %v11215_v63  ;;  %v1362_v52 = vmax.f32 %v20756_v51, 0.0 }
 0x5db   :  { %11435 = vst.msk [vmem:[%s20138_s5 + $0x120] sm:$0xff] %vm11398_vm4, %v11370_v33 }
 0x5dc   :  { %v11221_v36 = vpop.permute.xlu1 %11220 }
 0x5dd   :  { %v11373_v6 = vsel %vm732_vm2, %v1349_v39, %v11221_v36  ;;  %v11219_v49 = vpop.permute.xlu0 %11218  ;;  %v1365_v39 = vmax.f32 %v20757_v40, 0.0 }
 0x5de   :  { %11438 = vst.msk [vmem:[%s20138_s5 + $0x138] sm:$0xff] %vm11398_vm4, %v11373_v6  ;;  %v11372_v54 = vsel %vm732_vm2, %v1348_v9, %v11219_v49  ;;  %v1364_v9 = vmax.f32 %v20758_v42, 0.0 }
 0x5df   :  { %11437 = vst.msk [vmem:[%s20138_s5 + $0x130] sm:$0xff] %vm11398_vm4, %v11372_v54 }
 0x5e0   :  { %v11225_v55 = vpop.permute.xlu1 %11224 }
 0x5e1   :  { %v11375_v22 = vsel %vm732_vm2, %v1351_v8, %v11225_v55  ;;  %v11223_v19 = vpop.permute.xlu0 %11222  ;;  %v1367_v8 = vmax.f32 %v20759_v46, 0.0 }
 0x5e2   :  { %11440 = vst.msk [vmem:[%s20138_s5 + $0x148] sm:$0xff] %vm11398_vm4, %v11375_v22  ;;  %v11374_v32 = vsel %vm732_vm2, %v1350_v31, %v11223_v19  ;;  %v1366_v31 = vmax.f32 %v20760_v26, 0.0 }
 0x5e3   :  { %11439 = vst.msk [vmem:[%s20138_s5 + $0x140] sm:$0xff] %vm11398_vm4, %v11374_v32 }
 0x5e4   :  { %v11229_v59 = vpop.permute.xlu1 %11228 }
 0x5e5   :  { %v11377_v37 = vsel %vm732_vm2, %v1353_v18, %v11229_v59  ;;  %v11227_v61 = vpop.permute.xlu0 %11226  ;;  %v1369_v18 = vmax.f32 %v20761_v15, 0.0 }
 0x5e6   :  { %11442 = vst.msk [vmem:[%s20138_s5 + $0x158] sm:$0xff] %vm11398_vm4, %v11377_v37  ;;  %v11376_v50 = vsel %vm732_vm2, %v1352_v48, %v11227_v61  ;;  %v1368_v48 = vmax.f32 %v20762_v21, 0.0 }
 0x5e7   :  { %11441 = vst.msk [vmem:[%s20138_s5 + $0x150] sm:$0xff] %vm11398_vm4, %v11376_v50 }
 0x5e8   :  { %v11233_v24 = vpop.permute.xlu1 %11232 }
 0x5e9   :  { %v11379_v45 = vsel %vm732_vm2, %v1355_v43, %v11233_v24  ;;  %v11231_v20 = vpop.permute.xlu0 %11230  ;;  %v1371_v43 = vmax.f32 %v20763_v0, 0.0 }
 0x5ea   :  { %11444 = vst.msk [vmem:[%s20138_s5 + $0x168] sm:$0xff] %vm11398_vm4, %v11379_v45  ;;  %v11378_v23 = vsel %vm732_vm2, %v1354_v5, %v11231_v20  ;;  %v1370_v5 = vmax.f32 %v20764_v25, 0.0 }
 0x5eb   :  { %11443 = vst.msk [vmem:[%s20138_s5 + $0x160] sm:$0xff] %vm11398_vm4, %v11378_v23 }
 0x5ec   :  { %v11237_v30 = vpop.permute.xlu1 %11236 }
 0x5ed   :  { %v11381_v41 = vsel %vm732_vm2, %v1357_v53, %v11237_v30  ;;  %v11235_v11 = vpop.permute.xlu0 %11234  ;;  %v1373_v53 = vmax.f32 %v20765_v2, 0.0 }
 0x5ee   :  { %11446 = vst.msk [vmem:[%s20138_s5 + $0x178] sm:$0xff] %vm11398_vm4, %v11381_v41  ;;  %v11380_v62 = vsel %vm732_vm2, %v1356_v7, %v11235_v11  ;;  %v1372_v7 = vmax.f32 %v20766_v12, 0.0 }
 0x5ef   :  { %11445 = vst.msk [vmem:[%s20138_s5 + $0x170] sm:$0xff] %vm11398_vm4, %v11380_v62 }
 0x5f0   :  { %v11241_v57 = vpop.permute.xlu1 %11240 }
 0x5f1   :  { %v11383_v17 = vsel %vm732_vm2, %v1359_v16, %v11241_v57  ;;  %v11239_v4 = vpop.permute.xlu0 %11238 }
 0x5f2   :  { %11448 = vst.msk [vmem:[%s20138_s5 + $0x188] sm:$0xff] %vm11398_vm4, %v11383_v17  ;;  %v11382_v3 = vsel %vm732_vm2, %v1358_v27, %v11239_v4 }
 0x5f3   :  { %11447 = vst.msk [vmem:[%s20138_s5 + $0x180] sm:$0xff] %vm11398_vm4, %v11382_v3 }
 0x5f4   :  { %v11245_v34 = vpop.permute.xlu1 %11244 }
 0x5f5   :  { %v11385_v56 = vsel %vm732_vm2, %v1361_v44, %v11245_v34  ;;  %v11243_v29 = vpop.permute.xlu0 %11242 }
 0x5f6   :  { %11450 = vst.msk [vmem:[%s20138_s5 + $0x198] sm:$0xff] %vm11398_vm4, %v11385_v56  ;;  %v11384_v28 = vsel %vm732_vm2, %v1360_v58, %v11243_v29 }
 0x5f7   :  { %11449 = vst.msk [vmem:[%s20138_s5 + $0x190] sm:$0xff] %vm11398_vm4, %v11384_v28 }
 0x5f8   :  { %v11249_v47 = vpop.permute.xlu1 %11248 }
 0x5f9   :  { %v11387_v13 = vsel %vm732_vm2, %v1363_v10, %v11249_v47  ;;  %v11247_v63 = vpop.permute.xlu0 %11246 }
 0x5fa   :  { %11452 = vst.msk [vmem:[%s20138_s5 + $0x1a8] sm:$0xff] %vm11398_vm4, %v11387_v13  ;;  %v11386_v33 = vsel %vm732_vm2, %v1362_v52, %v11247_v63 }
 0x5fb   :  { %11451 = vst.msk [vmem:[%s20138_s5 + $0x1a0] sm:$0xff] %vm11398_vm4, %v11386_v33 }
 0x5fc   :  { %v11253_v36 = vpop.permute.xlu1 %11252 }
 0x5fd   :  { %v11389_v6 = vsel %vm732_vm2, %v1365_v39, %v11253_v36  ;;  %v11251_v49 = vpop.permute.xlu0 %11250 }
 0x5fe   :  { %11454 = vst.msk [vmem:[%s20138_s5 + $0x1b8] sm:$0xff] %vm11398_vm4, %v11389_v6  ;;  %v11388_v54 = vsel %vm732_vm2, %v1364_v9, %v11251_v49 }
 0x5ff   :  { %11453 = vst.msk [vmem:[%s20138_s5 + $0x1b0] sm:$0xff] %vm11398_vm4, %v11388_v54 }
 0x600   :  { %v11257_v55 = vpop.permute.xlu1 %11256 }
 0x601   :  { %v11391_v22 = vsel %vm732_vm2, %v1367_v8, %v11257_v55  ;;  %v11255_v19 = vpop.permute.xlu0 %11254 }
 0x602   :  { %11456 = vst.msk [vmem:[%s20138_s5 + $0x1c8] sm:$0xff] %vm11398_vm4, %v11391_v22  ;;  %v11390_v32 = vsel %vm732_vm2, %v1366_v31, %v11255_v19 }
 0x603   :  { %11455 = vst.msk [vmem:[%s20138_s5 + $0x1c0] sm:$0xff] %vm11398_vm4, %v11390_v32 }
 0x604   :  { %v11261_v59 = vpop.permute.xlu1 %11260 }
 0x605   :  { %v11393_v37 = vsel %vm732_vm2, %v1369_v18, %v11261_v59  ;;  %v11259_v61 = vpop.permute.xlu0 %11258 }
 0x606   :  { %11458 = vst.msk [vmem:[%s20138_s5 + $0x1d8] sm:$0xff] %vm11398_vm4, %v11393_v37  ;;  %v11392_v50 = vsel %vm732_vm2, %v1368_v48, %v11259_v61 }
 0x607   :  { %11457 = vst.msk [vmem:[%s20138_s5 + $0x1d0] sm:$0xff] %vm11398_vm4, %v11392_v50 }
 0x608   :  { %v11265_v24 = vpop.permute.xlu1 %11264 }
 0x609   :  { %v11395_v45 = vsel %vm732_vm2, %v1371_v43, %v11265_v24  ;;  %v11263_v20 = vpop.permute.xlu0 %11262 }
 0x60a   :  { %11460 = vst.msk [vmem:[%s20138_s5 + $0x1e8] sm:$0xff] %vm11398_vm4, %v11395_v45  ;;  %v11394_v23 = vsel %vm732_vm2, %v1370_v5, %v11263_v20 }
 0x60b   :  { %11459 = vst.msk [vmem:[%s20138_s5 + $0x1e0] sm:$0xff] %vm11398_vm4, %v11394_v23 }
 0x60c   :  { %v11269_v30 = vpop.permute.xlu1 %11268 }
 0x60d   :  { %v11397_v41 = vsel %vm732_vm2, %v1373_v53, %v11269_v30  ;;  %v11267_v11 = vpop.permute.xlu0 %11266 }
 0x60e   :  { %11462 = vst.msk [vmem:[%s20138_s5 + $0x1f8] sm:$0xff] %vm11398_vm4, %v11397_v41  ;;  %v11396_v62 = vsel %vm732_vm2, %v1372_v7, %v11267_v11 }
 0x60f   :  { %11461 = vst.msk [vmem:[%s20138_s5 + $0x1f0] sm:$0xff] %vm11398_vm4, %v11396_v62 }

</bundles_post_ra>
